<compile_context>
chip_gen: v5e
topology: v5e:2x2
jax: 0.10.0
libtpu: 0.0.40
codegen_flags: <defaults>
</compile_context>

<pallas_src>
import math
from functools import partial

import jax
import jax.numpy as jnp
from jax.experimental import pallas as pl
from jax.experimental.pallas import tpu as pltpu


def _round_up(a, b):
    return ((a + b - 1) // b) * b


def _periodic_embeddings_kernel(x_ref, pw_ref, wc_ref, ws_ref, lb_ref, o_ref, *, mm_dtype):
    # x_ref : (F, 1, TB)   batch tile of raw features (feature-major, batch on lanes)
    # pw_ref: (F, K, 1)    2*pi*W_p, ready to broadcast over the batch lanes
    # wc_ref: (F, D, K)    cos-half of the per-feature linear weight (pre-transposed)
    # ws_ref: (F, D, K)    sin-half of the per-feature linear weight (pre-transposed)
    # lb_ref: (F, D, 1)    per-feature bias
    # o_ref : (F, D, TB)   output tile; batch on lanes -> unmasked, lane-dense stores
    x = x_ref[...]                       # (F, 1, TB) f32
    pw = pw_ref[...]                     # (F, K, 1)  f32 (2*pi already folded in)

    # Outer product of frequencies and inputs. Transcendentals stay in f32
    # (v5e has no bf16 EUP; keeps numerics close to the reference).
    angles = pw * x                      # (F, K, TB)
    cos_f = jnp.cos(angles)
    sin_f = jnp.sin(angles)

    # Per-feature linear as two accumulating, feature-leading batched matmuls
    # (no concat -> no (F, 2K, TB) relayout/copy; f32 accumulation on the MXU).
    y = jnp.einsum("fdk,fkt->fdt", wc_ref[...], cos_f.astype(mm_dtype),
                   preferred_element_type=jnp.float32)
    y = y + jnp.einsum("fdk,fkt->fdt", ws_ref[...], sin_f.astype(mm_dtype),
                       preferred_element_type=jnp.float32)
    y = y + lb_ref[...]                  # (F, D, 1) broadcast over batch lanes

    # ReLU (activation=True -> PLR embeddings)
    o_ref[...] = jnp.maximum(y, 0.0).astype(o_ref.dtype)


def periodic_embeddings(x, p_weight, l_weight, l_bias, *,
                        batch_tile=256,
                        matmul_dtype=jnp.bfloat16,
                        vmem_budget_bytes=40 * 1024 * 1024):
    """PLR embeddings: x (B, F) -> (B, F, D).

    p_weight: (F, K); l_weight: (F, 2K, D); l_bias: (F, D).
    `batch_tile` is a hint; it is rounded to a multiple of 128 and capped so the
    per-step VMEM footprint stays within `vmem_budget_bytes` (v7x-safe).
    """
    B, F = x.shape
    F2, two_k, D = l_weight.shape
    K = two_k // 2
    assert F2 == F and p_weight.shape == (F, K) and l_bias.shape == (F, D)

    # ---- one-time weight transforms (outside the kernel, done once per call) ----
    # Fold 2*pi into the frequencies; shape (F, K, 1) so the kernel only broadcasts
    # along the batch lanes (no cross-lane relayout).
    pw = ((2.0 * math.pi) * p_weight.astype(jnp.float32)).reshape(F, K, 1)
    # Split the NLinear weight into cos / sin halves and pre-transpose to (F, D, K)
    # so the in-kernel batched matmul is feature-leading with a lane-dense output.
    wc = jnp.transpose(l_weight[:, :K, :], (0, 2, 1)).astype(matmul_dtype)
    ws = jnp.transpose(l_weight[:, K:, :], (0, 2, 1)).astype(matmul_dtype)
    lb = l_bias.astype(jnp.float32).reshape(F, D, 1)

    # ---- batch tiling: batch is the lane (last) dim of the x / out blocks ----
    B_pad = _round_up(max(B, 1), 128)
    mm_itemsize = jnp.dtype(matmul_dtype).itemsize

    def vmem_bytes(bt):
        f32 = 4
        x_tiles = 2 * F * bt * f32                                   # double-buffered input tile
        o_tiles = 2 * F * D * bt * f32                               # double-buffered output tile
        weights = 2 * (F * K * f32 + 2 * F * D * K * mm_itemsize + F * D * f32)
        interm = F * K * bt * (3 * f32 + 2 * mm_itemsize) + 2 * F * D * bt * f32
        return x_tiles + o_tiles + weights + interm

    hi = max(128, (min(batch_tile, B_pad) // 128) * 128)

    def pick(min_steps):
        for cand in range(hi, 127, -128):
            if B_pad % cand:
                continue
            if B_pad // cand < min_steps:
                continue
            if vmem_bytes(cand) > vmem_budget_bytes:
                continue
            return cand
        return None

    # Prefer >=2 grid steps so the "parallel" batch axis can shard across v7x's
    # two TensorCores; fall back to a single step for small batches.
    bt = pick(2) or pick(1) or 128
    n_steps = B_pad // bt

    x_pad = x.astype(jnp.float32)
    if B_pad != B:
        x_pad = jnp.pad(x_pad, ((0, B_pad - B), (0, 0)))
    xt = jnp.transpose(x_pad, (1, 0)).reshape(F, 1, B_pad)

    vmem_limit = int(min(62 * 1024 * 1024, max(32 * 1024 * 1024, 2 * vmem_bytes(bt))))

    kernel = partial(_periodic_embeddings_kernel, mm_dtype=matmul_dtype)
    out_fdb = pl.pallas_call(
        kernel,
        out_shape=jax.ShapeDtypeStruct((F, D, B_pad), x.dtype),
        grid_spec=pltpu.PrefetchScalarGridSpec(
            num_scalar_prefetch=0,
            grid=(n_steps,),
            in_specs=[
                pl.BlockSpec((F, 1, bt), lambda i: (0, 0, i)),   # x tile (batch on lanes)
                pl.BlockSpec((F, K, 1), lambda i: (0, 0, 0)),    # 2*pi*W_p (resident)
                pl.BlockSpec((F, D, K), lambda i: (0, 0, 0)),    # W_cos   (resident)
                pl.BlockSpec((F, D, K), lambda i: (0, 0, 0)),    # W_sin   (resident)
                pl.BlockSpec((F, D, 1), lambda i: (0, 0, 0)),    # bias    (resident)
            ],
            out_specs=pl.BlockSpec((F, D, bt), lambda i: (0, 0, i)),
        ),
        compiler_params=pltpu.CompilerParams(
            dimension_semantics=("parallel",),
            vmem_limit_bytes=vmem_limit,
        ),
    )(xt, pw, wc, ws, lb)

    # (F, D, B_pad) -> (B, F, D). Wrapper-side transpose is layout plumbing only;
    # it buys unmasked, lane-dense stores inside the kernel.
    out = jnp.transpose(out_fdb, (2, 0, 1))
    if B_pad != B:
        out = out[:B]
    return out


def _reference(x, p_weight, l_weight, l_bias):
    angles = 2.0 * math.pi * p_weight[None, :, :] * x[:, :, None]
    feats = jnp.concatenate([jnp.cos(angles), jnp.sin(angles)], axis=-1)
    y = jnp.einsum("bfk,fkd->bfd", feats, l_weight) + l_bias[None, :, :]
    return jnp.maximum(y, 0.0)


if __name__ == "__main__":
    # Small shapes consistent with the module defaults:
    #   n_features=4, n_frequencies(K)=48, d_embedding=24, sigma=0.01, lite=False, activation=True
    B, F, K, D = 16, 4, 48, 24
    sigma = 0.01

    key = jax.random.PRNGKey(0)
    k_x, k_pw, k_lw, k_lb = jax.random.split(key, 4)

    # Input
    x = jax.random.normal(k_x, (B, F), dtype=jnp.float32)

    # _Periodic.weight: trunc_normal(0, sigma, a=-3*sigma, b=3*sigma)
    p_weight = sigma * jax.random.truncated_normal(k_pw, -3.0, 3.0, (F, K), dtype=jnp.float32)

    # _NLinear.weight/bias: uniform(-d_in^-0.5, d_in^-0.5), d_in = 2K
    bound = (2 * K) ** (-0.5)
    l_weight = jax.random.uniform(k_lw, (F, 2 * K, D), minval=-bound, maxval=bound, dtype=jnp.float32)
    l_bias = jax.random.uniform(k_lb, (F, D), minval=-bound, maxval=bound, dtype=jnp.float32)

    ref = _reference(x, p_weight, l_weight, l_bias)

    # f32-MXU path: near-exact against the pure-JAX reference.
    out_f32 = periodic_embeddings(x, p_weight, l_weight, l_bias, matmul_dtype=jnp.float32)
    out_f32 = jax.block_until_ready(out_f32)
    assert out_f32.shape == (B, F, D), out_f32.shape
    assert jnp.allclose(out_f32, ref, atol=1e-4, rtol=1e-4), "f32 kernel mismatch vs reference"

    # Default bf16-MXU path (f32 accumulation): the fast path on v6e/v7x.
    out_bf16 = periodic_embeddings(x, p_weight, l_weight, l_bias)
    out_bf16 = jax.block_until_ready(out_bf16)
    assert out_bf16.shape == (B, F, D), out_bf16.shape
    assert jnp.allclose(out_bf16, ref, atol=5e-2, rtol=5e-2), "bf16 kernel mismatch vs reference"

    print("KERNEL_OK")
</pallas_src>

<mosaic_0001>
module attributes {stable_mosaic.version = 11 : i64} {
  func.func @_periodic_embeddings_kernel(%arg0: i32, %arg1: memref<4x1x128xf32, #tpu.memory_space<vmem>>, %arg2: memref<4x48x1xf32, #tpu.memory_space<vmem>>, %arg3: memref<4x24x48xf32, #tpu.memory_space<vmem>>, %arg4: memref<4x24x48xf32, #tpu.memory_space<vmem>>, %arg5: memref<4x24x1xf32, #tpu.memory_space<vmem>>, %arg6: memref<4x24x128xf32, #tpu.memory_space<vmem>>) attributes {dimension_semantics = [#tpu.dimension_semantics<parallel>], iteration_bounds = array<i64: 1>, scalar_prefetch = 0 : i64, scratch_operands = 0 : i64, tpu.core_type = #tpu.core_type<tc>, window_params = [{transform_indices = @transform_0, window_bounds = array<i64: 4, 1, 128>}, {pipeline_mode = #tpu.pipeline_mode<synchronous>, transform_indices = @transform_1, window_bounds = array<i64: 4, 48, 1>}, {pipeline_mode = #tpu.pipeline_mode<synchronous>, transform_indices = @transform_2, window_bounds = array<i64: 4, 24, 48>}, {pipeline_mode = #tpu.pipeline_mode<synchronous>, transform_indices = @transform_3, window_bounds = array<i64: 4, 24, 48>}, {pipeline_mode = #tpu.pipeline_mode<synchronous>, transform_indices = @transform_4, window_bounds = array<i64: 4, 24, 1>}, {transform_indices = @transform_5, window_bounds = array<i64: 4, 24, 128>}]} {
    %c0 = arith.constant 0 : index
    %c0_0 = arith.constant 0 : index
    %c0_1 = arith.constant 0 : index
    %0 = vector.load %arg1[%c0, %c0_0, %c0_1] : memref<4x1x128xf32, #tpu.memory_space<vmem>>, vector<4x1x128xf32>
    %c0_2 = arith.constant 0 : index
    %c0_3 = arith.constant 0 : index
    %c0_4 = arith.constant 0 : index
    %1 = vector.load %arg2[%c0_2, %c0_3, %c0_4] : memref<4x48x1xf32, #tpu.memory_space<vmem>>, vector<4x48x1xf32>
    %2 = vector.broadcast %1 : vector<4x48x1xf32> to vector<4x48x128xf32>
    %3 = vector.broadcast %0 : vector<4x1x128xf32> to vector<4x48x128xf32>
    %4 = arith.mulf %2, %3 : vector<4x48x128xf32>
    %5 = math.cos %4 : vector<4x48x128xf32>
    %6 = math.sin %4 : vector<4x48x128xf32>
    %c0_5 = arith.constant 0 : index
    %c0_6 = arith.constant 0 : index
    %c0_7 = arith.constant 0 : index
    %7 = vector.load %arg3[%c0_5, %c0_6, %c0_7] : memref<4x24x48xf32, #tpu.memory_space<vmem>>, vector<4x24x48xf32>
    "tpu.trace_start"() <{level = 10 : i32, message = "fdk,fkt->fdt"}> : () -> ()
    %cst = arith.constant dense<0.000000e+00> : vector<4x24x128xf32>
    %8 = tpu.matmul %7, %5, %cst {dimension_numbers = #tpu.dot_dimension_numbers<[2], [1], [1], [2], [0, 0, 0, 1, 1, 2], [0], [0]>} : vector<4x24x48xf32>, vector<4x48x128xf32>, vector<4x24x128xf32> -> vector<4x24x128xf32>
    "tpu.trace_stop"() : () -> ()
    %c0_8 = arith.constant 0 : index
    %c0_9 = arith.constant 0 : index
    %c0_10 = arith.constant 0 : index
    %9 = vector.load %arg4[%c0_8, %c0_9, %c0_10] : memref<4x24x48xf32, #tpu.memory_space<vmem>>, vector<4x24x48xf32>
    "tpu.trace_start"() <{level = 10 : i32, message = "fdk,fkt->fdt"}> : () -> ()
    %cst_11 = arith.constant dense<0.000000e+00> : vector<4x24x128xf32>
    %10 = tpu.matmul %9, %6, %cst_11 {dimension_numbers = #tpu.dot_dimension_numbers<[2], [1], [1], [2], [0, 0, 0, 1, 1, 2], [0], [0]>} : vector<4x24x48xf32>, vector<4x48x128xf32>, vector<4x24x128xf32> -> vector<4x24x128xf32>
    "tpu.trace_stop"() : () -> ()
    %11 = arith.addf %8, %10 : vector<4x24x128xf32>
    %c0_12 = arith.constant 0 : index
    %c0_13 = arith.constant 0 : index
    %c0_14 = arith.constant 0 : index
    %12 = vector.load %arg5[%c0_12, %c0_13, %c0_14] : memref<4x24x1xf32, #tpu.memory_space<vmem>>, vector<4x24x1xf32>
    %13 = vector.broadcast %12 : vector<4x24x1xf32> to vector<4x24x128xf32>
    %14 = arith.addf %11, %13 : vector<4x24x128xf32>
    %cst_15 = arith.constant 0.000000e+00 : f32
    %15 = vector.broadcast %cst_15 : f32 to vector<4x24x128xf32>
    %16 = arith.maximumf %14, %15 : vector<4x24x128xf32>
    %c0_16 = arith.constant 0 : index
    %c0_17 = arith.constant 0 : index
    %c0_18 = arith.constant 0 : index
    %17 = vector.load %arg6[%c0_16, %c0_17, %c0_18] : memref<4x24x128xf32, #tpu.memory_space<vmem>>, vector<4x24x128xf32>
    tpu.vector_store %arg6[%c0_16, %c0_17, %c0_18], %16 {strides = array<i32>} : memref<4x24x128xf32, #tpu.memory_space<vmem>>, vector<4x24x128xf32>,
    return
  }
  func.func @transform_0(%arg0: i32) -> (i32, i32, i32) {
    %c0_i32 = arith.constant 0 : i32
    %c0_i32_0 = arith.constant 0 : i32
    %c0_i32_1 = arith.constant 0 : i32
    return %c0_i32, %c0_i32_0, %arg0 : i32, i32, i32
  }
  func.func @transform_1(%arg0: i32) -> (i32, i32, i32) {
    %c0_i32 = arith.constant 0 : i32
    %c0_i32_0 = arith.constant 0 : i32
    %c0_i32_1 = arith.constant 0 : i32
    %c0_i32_2 = arith.constant 0 : i32
    return %c0_i32, %c0_i32_0, %c0_i32_1 : i32, i32, i32
  }
  func.func @transform_2(%arg0: i32) -> (i32, i32, i32) {
    %c0_i32 = arith.constant 0 : i32
    %c0_i32_0 = arith.constant 0 : i32
    %c0_i32_1 = arith.constant 0 : i32
    %c0_i32_2 = arith.constant 0 : i32
    return %c0_i32, %c0_i32_0, %c0_i32_1 : i32, i32, i32
  }
  func.func @transform_3(%arg0: i32) -> (i32, i32, i32) {
    %c0_i32 = arith.constant 0 : i32
    %c0_i32_0 = arith.constant 0 : i32
    %c0_i32_1 = arith.constant 0 : i32
    %c0_i32_2 = arith.constant 0 : i32
    return %c0_i32, %c0_i32_0, %c0_i32_1 : i32, i32, i32
  }
  func.func @transform_4(%arg0: i32) -> (i32, i32, i32) {
    %c0_i32 = arith.constant 0 : i32
    %c0_i32_0 = arith.constant 0 : i32
    %c0_i32_1 = arith.constant 0 : i32
    %c0_i32_2 = arith.constant 0 : i32
    return %c0_i32, %c0_i32_0, %c0_i32_1 : i32, i32, i32
  }
  func.func @transform_5(%arg0: i32) -> (i32, i32, i32) {
    %c0_i32 = arith.constant 0 : i32
    %c0_i32_0 = arith.constant 0 : i32
    %c0_i32_1 = arith.constant 0 : i32
    return %c0_i32, %c0_i32_0, %arg0 : i32, i32, i32
  }
}

</mosaic_0001>

<bundles_post_ra>
// kernel: tpu_custom_call.1
= control target key start
LH: loop header
LB: loop body
LE: loop exit
PB: predicated region body
PF: predicated region fallthrough
CT: control target
= control target key end

     0   :  { %v13013_v3 = vmov 0   ;;  %s13007_s0 = inlined_call_operand.vmem [shape: f32[4,1,128], index: 0, kind: input, shape index: {}]   ;;  %s13008_s1 = inlined_call_operand.vmem [shape: f32[4,48,1], index: 1, kind: input, shape index: {}]   ;;  %s13009_s2 = inlined_call_operand.vmem [shape: f32[4,24,48], index: 2, kind: input, shape index: {}]   ;;  %s13010_s3 = inlined_call_operand.vmem [shape: f32[4,24,48], index: 3, kind: input, shape index: {}]   ;;  %s13011_s4 = inlined_call_operand.vmem [shape: f32[4,24,1], index: 4, kind: input, shape index: {}]   ;;  %s13012_s5 = inlined_call_operand.hbm [shape: f32[4,24,128], index: 5, kind: output, shape index: {}]  }
   0x1   :  { %v42_v0 = vld [vmem:[%s13008_s1 + $0x88] sm:$0xff]  ;;  %v41_v1 = vld [vmem:[%s13008_s1 + $0x80] sm:$0xff]  ;;  %v40_v2 = vld [vmem:[%s13008_s1 + $0x78] sm:$0xff]  ;;  %8232 = vset.pattern.permute.xlu2 %v13013_v3  ;;  %8231 = vset.pattern.permute.xlu1 %v13013_v3 }
   0x2   :  { %8230 = vset.pattern.permute.xlu0 %v13013_v3  ;;  %131 = vperm.xlu1 %8231, %v41_v1  }
   0x3   :  { %136 = vperm.xlu0 %8230, %v42_v0   ;;  %126 = vperm.xlu2 %8232, %v40_v2  }
   0x4   :  { %10 = vsyncpa [#allocation3], 0  ;;  %v47_v4 = vld [vmem:[%s13008_s1 + $0xb0] sm:$0xff]  ;;  %v48_v5 = vld [vmem:[%s13008_s1 + $0xb8] sm:$0xff]  ;;  %s8040_s19 = sshll.u32 %s13012_s5, 4  ;;  %s8273_s20 = smov 128   ;;  %s8041_s19 = int_to_ptr.hbm [resolvable:$true] %s8040_s19 }
   0x5   :  { %v46_v6 = vld [vmem:[%s13008_s1 + $0xa8] sm:$0xff]  ;;  %v36_v7 = vld [vmem:[%s13008_s1 + $0x58] sm:$0xff]  ;;  %v39_v8 = vld [vmem:[%s13008_s1 + $0x70] sm:$0xff]  ;;  %s8274_s21 = smov 8  }
   0x6   :  { %v30_v9 = vld [vmem:[%s13008_s1 + $0x28] sm:$0xff]  ;;  %v29_v10 = vld [vmem:[%s13008_s1 + $0x20] sm:$0xff]  ;;  %v35_v11 = vld [vmem:[%s13008_s1 + $0x50] sm:$0xff] }
   0x7   :  { %v45_v12 = vld [vmem:[%s13008_s1 + $0xa0] sm:$0xff]  ;;  %v44_v13 = vld [vmem:[%s13008_s1 + $0x98] sm:$0xff]  ;;  %v38_v14 = vld [vmem:[%s13008_s1 + $0x68] sm:$0xff] }
   0x8   :  { %v28_v15 = vld [vmem:[%s13008_s1 + $0x18] sm:$0xff]  ;;  %v37_v16 = vld [vmem:[%s13008_s1 + $0x60] sm:$0xff]  ;;  %v34_v17 = vld [vmem:[%s13008_s1 + $0x48] sm:$0xff] }
   0x9   :  { %v43_v18 = vld [vmem:[%s13008_s1 + $0x90] sm:$0xff]  ;;  %v33_v19 = vld [vmem:[%s13008_s1 + $0x40] sm:$0xff]  ;;  %v26_v21 = vld [vmem:[%s13008_s1 + $0x8] sm:$0xff] }
   0xa   :  { %161 = vperm.xlu1 %8231, %v47_v4   ;;  %v27_v20 = vld [vmem:[%s13008_s1 + $0x10] sm:$0xff]  ;;  %v25_v22 = vld [vmem:[%s13008_s1] sm:$0xff]  ;;  %v32_v23 = vld [vmem:[%s13008_s1 + $0x38] sm:$0xff] }
   0xb   :  { %166 = vperm.xlu0 %8230, %v48_v5   ;;  %156 = vperm.xlu2 %8232, %v46_v6   ;;  %v31_v24 = vld [vmem:[%s13008_s1 + $0x30] sm:$0xff]  ;;  %v7927_v25 = vld [vmem:[%s13011_s4 + $0x8] sm:$0xff]  ;;  %v7926_v26 = vld [vmem:[%s13011_s4] sm:$0xff] }
   0xc   :  { %v7928_v27 = vld [vmem:[%s13011_s4 + $0x10] sm:$0xff]  ;;  %v7930_v28 = vld [vmem:[%s13011_s4 + $0x20] sm:$0xff]  ;;  %v7929_v29 = vld [vmem:[%s13011_s4 + $0x18] sm:$0xff] }
   0xd   :  { %v7931_v30 = vld [vmem:[%s13011_s4 + $0x28] sm:$0xff]  ;;  %v7933_v31 = vld [vmem:[%s13011_s4 + $0x38] sm:$0xff]  ;;  %v7932_v32 = vld [vmem:[%s13011_s4 + $0x30] sm:$0xff] }
   0xe   :  { %v7934_v33 = vld [vmem:[%s13011_s4 + $0x40] sm:$0xff]  ;;  %v7936_v34 = vld [vmem:[%s13011_s4 + $0x50] sm:$0xff]  ;;  %v7935_v35 = vld [vmem:[%s13011_s4 + $0x48] sm:$0xff] }
   0xf   :  { %v7937_v36 = vld [vmem:[%s13011_s4 + $0x58] sm:$0xff]  ;;  %v8419_v38 = vld [vmem:[%s13007_s0 + $0x2] ss:$0 sm:$0xff]  ;;  %v8427_v41 = vld [vmem:[%s13007_s0 + $0x3] ss:$0 sm:$0xff] }
  0x10   :  { %v8444_v58 = vld [vmem:[%s13007_s0 + $0x1] ss:$0 sm:$0xff] }
  0x12   :  { %106 = vperm.xlu1 %8231, %v36_v7  }
  0x13   :  { %121 = vperm.xlu2 %8232, %v39_v8   ;;  %76 = vperm.xlu0 %8230, %v30_v9  }
  0x1a   :  { %71 = vperm.xlu1 %8231, %v29_v10  }
  0x1b   :  { %101 = vperm.xlu2 %8232, %v35_v11   ;;  %151 = vperm.xlu0 %8230, %v45_v12  }
  0x22   :  { %146 = vperm.xlu1 %8231, %v44_v13  }
  0x23   :  { %116 = vperm.xlu0 %8230, %v38_v14   ;;  %66 = vperm.xlu2 %8232, %v28_v15   ;;  %v13015_v15 = vmov 2102212464  }
  0x2a   :  { %111 = vperm.xlu1 %8231, %v37_v16  }
  0x2b   :  { %96 = vperm.xlu0 %8230, %v34_v17   ;;  %141 = vperm.xlu2 %8232, %v43_v18   ;;  %v13025_v17 = vmov 920167782  }
  0x32   :  { %91 = vperm.xlu1 %8231, %v33_v19  }
  0x33   :  { %61 = vperm.xlu0 %8230, %v27_v20   ;;  %56 = vperm.xlu2 %8232, %v26_v21  }
  0x3a   :  { %51 = vperm.xlu1 %8231, %v25_v22  }
  0x3b   :  { %86 = vperm.xlu0 %8230, %v32_v23   ;;  %81 = vperm.xlu2 %8232, %v31_v24   ;;  %v13036_v24 = vmov 1326507024  }
  0x42   :  { %7945 = vperm.xlu1 %8231, %v7927_v25  }
  0x43   :  { %7940 = vperm.xlu0 %8230, %v7926_v26   ;;  %7950 = vperm.xlu2 %8232, %v7928_v27  }
  0x4a   :  { %7960 = vperm.xlu1 %8231, %v7930_v28  }
  0x4b   :  { %7955 = vperm.xlu0 %8230, %v7929_v29   ;;  %7965 = vperm.xlu2 %8232, %v7931_v30   ;;  %v8483_v29 = vld [vmem:[%s13007_s0] ss:$0 sm:$0xff] }
  0x52   :  { %7975 = vperm.xlu1 %8231, %v7933_v31  }
  0x53   :  { %7970 = vperm.xlu0 %8230, %v7932_v32   ;;  %7980 = vperm.xlu2 %8232, %v7934_v33  }
  0x5a   :  { %7990 = vperm.xlu1 %8231, %v7936_v34  }
  0x5b   :  { %7985 = vperm.xlu0 %8230, %v7935_v35   ;;  %7995 = vperm.xlu2 %8232, %v7937_v36  }
  0x5d   :  { %v127_v37 = vpop.permute.xlu2 %126 }
  0x5e   :  { %v8422_v40 = vmul.f32 %v8419_v38, %v127_v37 }
  0x60   :  { %13346 = vst [vmem:[#allocation5_spill] sm:$0xff] %v8422_v40  ;;  %v2518_v42 = vand.u32 2139095040, %v8422_v40 }
  0x62   :  { %v2519_v45 = vshrl.u32 %v2518_v42, 23 }
  0x64   :  { %v8097_v48 = vadd.s32 4294967169, %v2519_v45 }
  0x65   :  { %v157_v39 = vpop.permute.xlu2 %156 }
  0x66   :  { %v8431_v44 = vmul.f32 %v8427_v41, %v157_v39  ;;  %v2525_v51 = vadd.s32 1, %v8097_v48 }
  0x68   :  { %13347 = vst [vmem:[#allocation6_spill] sm:$0xff] %v8431_v44  ;;  %v3442_v47 = vand.u32 2139095040, %v8431_v44  ;;  %vm2526_vm0 = vcmp.gt.s32.totalorder %v2525_v51, 0 }
  0x69   :  { %v2527_v59 = vsel %vm2526_vm0, %v2525_v51, 0 }
  0x6a   :  { %v3443_v50 = vshrl.u32 %v3442_v47, 23  ;;  %v8450_v1 = vand.u32 31, %v2527_v59  ;;  %v8466_v20 = vshrl.u32 %v2527_v59, 5 }
  0x6c   :  { %v8115_v54 = vadd.s32 4294967169, %v3443_v50  ;;  %v8457_v6 = vsub.s32 32, %v8450_v1  ;;  %v2541_v16 = vshll.u32 %v13015_v15, %v8450_v1  ;;  %v2544_v23 = vshll.u32 %v13025_v17, %v8450_v1 }
  0x6d   :  { %v122_v43 = vpop.permute.xlu2 %121  ;;  %vm2550_vm3 = vcmp.lt.s32.totalorder %v8466_v20, 4 }
  0x6e   :  { %v8434_v46 = vmul.f32 %v8419_v38, %v122_v43  ;;  %v3449_v60 = vadd.s32 1, %v8115_v54  ;;  %v2542_v18 = vshrl.u32 %v13025_v17, %v8457_v6  ;;  %v2545_v25 = vshrl.u32 %v13036_v24, %v8457_v6 }
  0x70   :  { %13348 = vst [vmem:[#allocation7_spill] sm:$0xff] %v8434_v46  ;;  %v2364_v49 = vand.u32 2139095040, %v8434_v46  ;;  %vm3450_vm1 = vcmp.gt.s32.totalorder %v3449_v60, 0  ;;  %v8485_v30 = vor.u32 %v2542_v18, %v2541_v16  ;;  %v2546_v36 = vor.u32 %v2545_v25, %v2544_v23 }
  0x71   :  { %v3451_v7 = vsel %vm3450_vm1, %v3449_v60, 0 }
  0x72   :  { %v2365_v52 = vshrl.u32 %v2364_v49, 23  ;;  %v8460_v13 = vand.u32 31, %v3451_v7  ;;  %v8509_v49 = vsel %vm2550_vm3, %v8485_v30, 920167782  ;;  %v8511_v50 = vshrl.u32 %v3451_v7, 5 }
  0x74   :  { %v132_v56 = vpop.permute.xlu1 %131  ;;  %v8094_v57 = vadd.s32 4294967169, %v2365_v52  ;;  %13352 = vst [vmem:[#allocation11_spill] sm:$0xff] %v8460_v13  ;;  %v8478_v28 = vsub.s32 32, %v8460_v13  ;;  %v3465_v37 = vshll.u32 %v13015_v15, %v8460_v13  ;;  %v3468_v43 = vshll.u32 %v13025_v17, %v8460_v13 }
  0x75   :  { %v137_v53 = vpop.permute.xlu0 %136  ;;  %v8447_v61 = vmul.f32 %v8419_v38, %v132_v56  ;;  %v102_v62 = vpop.permute.xlu2 %101  ;;  %13357 = vst [vmem:[#allocation16_spill] sm:$0xff] %v8511_v50  ;;  %vm3474_vm7 = vcmp.lt.s32.totalorder %v8511_v50, 4 }
  0x76   :  { %v8439_v55 = vmul.f32 %v8419_v38, %v137_v53  ;;  %v2371_v0 = vadd.s32 1, %v8094_v57  ;;  %v8453_v2 = vmul.f32 %v8444_v58, %v102_v62  ;;  %13354 = vst [vmem:[#allocation13_spill] sm:$0xff] %v8478_v28  ;;  %v3466_v42 = vshrl.u32 %v13025_v17, %v8478_v28 }
  0x77   :  { %13350 = vst [vmem:[#allocation9_spill] sm:$0xff] %v8447_v61  ;;  %v2672_v4 = vand.u32 2139095040, %v8447_v61  ;;  %v3469_v45 = vshrl.u32 %v13036_v24, %v8478_v28 }
  0x78   :  { %13349 = vst [vmem:[#allocation8_spill] sm:$0xff] %v8439_v55  ;;  %v2826_v63 = vand.u32 2139095040, %v8439_v55  ;;  %vm2372_vm2 = vcmp.gt.s32.totalorder %v2371_v0, 0  ;;  %v1748_v8 = vand.u32 2139095040, %v8453_v2 }
  0x79   :  { %13351 = vst [vmem:[#allocation10_spill] sm:$0xff] %v8453_v2  ;;  %v2673_v9 = vshrl.u32 %v2672_v4, 23  ;;  %v2373_v11 = vsel %vm2372_vm2, %v2371_v0, 0  ;;  %v8526_v0 = vsel %vm2550_vm3, %v2546_v36, 1326507024  ;;  %v8528_v4 = vor.u32 %v3466_v42, %v3465_v37 }
  0x7a   :  { %v2827_v5 = vshrl.u32 %v2826_v63, 23  ;;  %v1749_v19 = vshrl.u32 %v1748_v8, 23  ;;  %v8468_v21 = vand.u32 31, %v2373_v11  ;;  %v8518_v59 = vshrl.u32 %v2373_v11, 5 }
  0x7b   :  { %v8100_v22 = vadd.s32 4294967169, %v2673_v9  ;;  %13358 = vst [vmem:[#allocation17_spill] sm:$0xff] %v8528_v4  ;;  %v8545_v23 = vsel %vm3474_vm7, %v8528_v4, 920167782 }
  0x7c   :  { %v8103_v12 = vadd.s32 4294967169, %v2827_v5  ;;  %v162_v14 = vpop.permute.xlu1 %161  ;;  %v8082_v31 = vadd.s32 4294967169, %v1749_v19  ;;  %v8489_v33 = vsub.s32 32, %v8468_v21  ;;  %v2387_v51 = vshll.u32 %v13015_v15, %v8468_v21  ;;  %13361 = vst [vmem:[#allocation20_spill] sm:$0xff] %v8545_v23 }
  0x7d   :  { %v167_v10 = vpop.permute.xlu0 %166  ;;  %v8475_v27 = vmul.f32 %v8427_v41, %v162_v14  ;;  %v67_v32 = vpop.permute.xlu2 %66  ;;  %v2679_v34 = vadd.s32 1, %v8100_v22  ;;  %v2390_v60 = vshll.u32 %v13025_v17, %v8468_v21  ;;  %v3470_v5 = vor.u32 %v3469_v45, %v3468_v43 }
  0x7e   :  { %v2833_v26 = vadd.s32 1, %v8103_v12  ;;  %v8492_v35 = vmul.f32 %v8427_v41, %v167_v10  ;;  %v8504_v47 = vmul.f32 %v8483_v29, %v67_v32  ;;  %v1755_v52 = vadd.s32 1, %v8082_v31 }
  0x7f   :  { %13353 = vst [vmem:[#allocation12_spill] sm:$0xff] %v8475_v27  ;;  %v3596_v39 = vand.u32 2139095040, %v8475_v27  ;;  %v2388_v53 = vshrl.u32 %v13025_v17, %v8489_v33  ;;  %vm2680_vm5 = vcmp.gt.s32.totalorder %v2679_v34, 0  ;;  %v2391_v62 = vshrl.u32 %v13036_v24, %v8489_v33 }
  0x80   :  { %13355 = vst [vmem:[#allocation14_spill] sm:$0xff] %v8492_v35  ;;  %vm2834_vm4 = vcmp.gt.s32.totalorder %v2833_v26, 0  ;;  %v3750_v56 = vand.u32 2139095040, %v8492_v35  ;;  %v670_v7 = vand.u32 2139095040, %v8504_v47  ;;  %v2681_v9 = vsel %vm2680_vm5, %v2679_v34, 0 }
  0x81   :  { %13356 = vst [vmem:[#allocation15_spill] sm:$0xff] %v8504_v47  ;;  %v2835_v54 = vsel %vm2834_vm4, %v2833_v26, 0  ;;  %v3597_v63 = vshrl.u32 %v3596_v39, 23  ;;  %vm1756_vm6 = vcmp.gt.s32.totalorder %v1755_v52, 0  ;;  %v8537_v11 = vor.u32 %v2388_v53, %v2387_v51 }
  0x82   :  { %v8531_v8 = vand.u32 31, %v2835_v54  ;;  %v3751_v12 = vshrl.u32 %v3750_v56, 23  ;;  %v2392_v14 = vor.u32 %v2391_v62, %v2390_v60  ;;  %vm2396_vm8 = vcmp.lt.s32.totalorder %v8518_v59, 4 }
  0x83   :  { %13360 = vst [vmem:[#allocation19_spill] sm:$0xff] %v8537_v11  ;;  %v8118_v16 = vadd.s32 4294967169, %v3597_v63  ;;  %v8540_v18 = vand.u32 31, %v2681_v9  ;;  %v1757_v19 = vsel %vm1756_vm6, %v1755_v52, 0  ;;  %v671_v22 = vshrl.u32 %v670_v7, 23 }
  0x84   :  { %v107_v57 = vpop.permute.xlu1 %106  ;;  %v8549_v25 = vsel %vm3474_vm7, %v3470_v5, 1326507024  ;;  %v8552_v26 = vsub.s32 32, %v8531_v8  ;;  %v8558_v34 = vsel %vm2396_vm8, %v8537_v11, 920167782  ;;  %v8560_v36 = vshrl.u32 %v2835_v54, 5 }
  0x85   :  { %v77_v48 = vpop.permute.xlu0 %76  ;;  %v8534_v10 = vmul.f32 %v8444_v58, %v107_v57  ;;  %13362 = vst [vmem:[#allocation21_spill] sm:$0xff] %v8549_v25  ;;  %v142_v32 = vpop.permute.xlu2 %141  ;;  %v8121_v37 = vadd.s32 4294967169, %v3751_v12  ;;  %v8567_v43 = vsel %vm2396_vm8, %v2392_v14, 1326507024  ;;  %v8569_v45 = vshrl.u32 %v2681_v9, 5 }
  0x86   :  { %13363 = vst [vmem:[#allocation22_spill] sm:$0xff] %v8558_v34  ;;  %v8563_v39 = vmul.f32 %v8483_v29, %v77_v48  ;;  %v8571_v51 = vand.u32 31, %v1757_v19  ;;  %v3603_v52 = vadd.s32 1, %v8118_v16  ;;  %v2849_v53 = vshll.u32 %v13015_v15, %v8531_v8 }
  0x87   :  { %13359 = vst [vmem:[#allocation18_spill] sm:$0xff] %v8534_v10  ;;  %v1902_v31 = vand.u32 2139095040, %v8534_v10  ;;  %v8576_v54 = vsub.s32 32, %v8540_v18  ;;  %v8061_v56 = vadd.s32 4294967169, %v671_v22  ;;  %v8579_v48 = vmul.f32 %v8427_v41, %v142_v32 }
  0x88   :  { %13364 = vst [vmem:[#allocation23_spill] sm:$0xff] %v8563_v39  ;;  %v2850_v57 = vshrl.u32 %v13025_v17, %v8552_v26  ;;  %v2852_v60 = vshll.u32 %v13025_v17, %v8531_v8  ;;  %v2853_v5 = vshrl.u32 %v13036_v24, %v8552_v26  ;;  %vm2858_vm9 = vcmp.lt.s32.totalorder %v8560_v36, 4 }
  0x89   :  { %13365 = vst [vmem:[#allocation24_spill] sm:$0xff] %v8567_v43  ;;  %v1903_v62 = vshrl.u32 %v1902_v31, 23  ;;  %v3757_v7 = vadd.s32 1, %v8121_v37  ;;  %v978_v9 = vand.u32 2139095040, %v8563_v39  ;;  %v2695_v12 = vshll.u32 %v13015_v15, %v8540_v18 }
  0x8a   :  { %13366 = vst [vmem:[#allocation25_spill] sm:$0xff] %v8571_v51  ;;  %v2698_v14 = vshll.u32 %v13025_v17, %v8540_v18  ;;  %v8597_v16 = vsub.s32 32, %v8571_v51  ;;  %vm3604_vm10 = vcmp.gt.s32.totalorder %v3603_v52, 0  ;;  %v2696_v22 = vshrl.u32 %v13025_v17, %v8576_v54 }
  0x8b   :  { %13367 = vst [vmem:[#allocation26_spill] sm:$0xff] %v8579_v48  ;;  %vm2704_vm11 = vcmp.lt.s32.totalorder %v8569_v45, 4  ;;  %v8602_v31 = vshrl.u32 %v1757_v19, 5  ;;  %v677_v32 = vadd.s32 1, %v8061_v56  ;;  %v2980_v37 = vand.u32 2139095040, %v8579_v48 }
  0x8c   :  { %13369 = vst [vmem:[#allocation28_spill] sm:$0xff] %v8597_v16  ;;  %v2699_v3 = vshrl.u32 %v13036_v24, %v8576_v54  ;;  %v8085_v15 = vadd.s32 4294967169, %v1903_v62  ;;  %v72_v2 = vpop.permute.xlu1 %71  ;;  %v2854_v10 = vor.u32 %v2853_v5, %v2852_v60  ;;  %vm3758_vm12 = vcmp.gt.s32.totalorder %v3757_v7, 0 }
  0x8d   :  { %v152_v42 = vpop.permute.xlu0 %151  ;;  %13370 = vst [vmem:[#allocation29_spill] sm:$0xff] %v8602_v31  ;;  %v3605_v39 = vsel %vm3604_vm10, %v3603_v52, 0  ;;  %v979_v17 = vshrl.u32 %v978_v9, 23  ;;  %v13371_v23 = vmov 2102212464   ;;  %v8618_v62 = vor.u32 %v2696_v22, %v2695_v12  ;;  %v57_v52 = vpop.permute.xlu2 %56 }
  0x8e   :  { %v8586_v63 = vmul.f32 %v8427_v41, %v152_v42  ;;  %v8605_v42 = vor.u32 %v2850_v57, %v2849_v53  ;;  %v1771_v19 = vshll.u32 %v13371_v23, %v8571_v51  ;;  %v13372_v56 = vmov 920167782  }
  0x8f   :  { %v1772_v4 = vshrl.u32 %v13372_v56, %v8597_v16  ;;  %v1774_v53 = vshll.u32 %v13372_v56, %v8571_v51  ;;  %v1775_v57 = vshrl.u32 %v13036_v24, %v8597_v16  ;;  %vm678_vm13 = vcmp.gt.s32.totalorder %v677_v32, 0 }
  0x90   :  { %13368 = vst [vmem:[#allocation27_spill] sm:$0xff] %v8586_v63  ;;  %v3288_v47 = vand.u32 2139095040, %v8586_v63  ;;  %v2981_v48 = vshrl.u32 %v2980_v37, 23  ;;  %v8621_v60 = vmul.f32 %v8483_v29, %v72_v2  ;;  %v3759_v5 = vsel %vm3758_vm12, %v3757_v7, 0 }
  0x91   :  { %v8623_v9 = vand.u32 31, %v3605_v39  ;;  %v1909_v63 = vadd.s32 1, %v8085_v15  ;;  %v8628_v51 = vsel %vm2858_vm9, %v8605_v42, 920167782  ;;  %v2700_v50 = vor.u32 %v2699_v3, %v2698_v14 }
  0x92   :  { %13373 = vst [vmem:[#allocation30_spill] sm:$0xff] %v8621_v60  ;;  %v3289_v25 = vshrl.u32 %v3288_v47, 23  ;;  %vm13157_vm14 = vcmp.lt.s32.totalorder %v8602_v31, 4  ;;  %v8067_v12 = vadd.s32 4294967169, %v979_v17  ;;  %v8631_v22 = vor.u32 %v1772_v4, %v1771_v19 }
  0x93   :  { %13374 = vst [vmem:[#allocation31_spill] sm:$0xff] %v8623_v9  ;;  %v1776_v37 = vor.u32 %v1775_v57, %v1774_v53  ;;  %v679_v2 = vsel %vm678_vm13, %v677_v32, 0  ;;  %v8634_v24 = vmul.f32 %v8483_v29, %v57_v52  ;;  %v8638_v15 = vsel %vm2858_vm9, %v2854_v10, 1326507024 }
  0x94   :  { %13375 = vst [vmem:[#allocation32_spill] sm:$0xff] %v8631_v22  ;;  %v8640_v47 = vand.u32 31, %v3759_v5  ;;  %v8106_v7 = vadd.s32 4294967169, %v2981_v48  ;;  %v824_v16 = vand.u32 2139095040, %v8621_v60  ;;  %v8646_v3 = vsel %vm2704_vm11, %v8618_v62, 920167782 }
  0x95   :  { %13376 = vst [vmem:[#allocation33_spill] sm:$0xff] %v8634_v24  ;;  %v8649_v17 = vsub.s32 32, %v8623_v9  ;;  %vm1910_vm15 = vcmp.gt.s32.totalorder %v1909_v63, 0  ;;  %v8112_v4 = vadd.s32 4294967169, %v3289_v25  ;;  %v8653_v14 = vsel %vm2704_vm11, %v2700_v50, 1326507024  ;;  %v117_v35 = vpop.permute.xlu0 %116 }
  0x96   :  { %13377 = vst [vmem:[#allocation34_spill] sm:$0xff] %v8640_v47  ;;  %v8655_v10 = vshrl.u32 %v3605_v39, 5  ;;  %v8657_v32 = vand.u32 31, %v679_v2  ;;  %v985_v48 = vadd.s32 1, %v8067_v12  ;;  %v8662_v19 = vsel %vm13157_vm14, %v8631_v22, 920167782 }
  0x97   :  { %13378 = vst [vmem:[#allocation35_spill] sm:$0xff] %v8649_v17  ;;  %v8666_v53 = vsel %vm13157_vm14, %v1776_v37, 1326507024  ;;  %v8668_v57 = vshrl.u32 %v3759_v5, 5  ;;  %v362_v25 = vand.u32 2139095040, %v8634_v24  ;;  %v8672_v50 = vsub.s32 32, %v8640_v47 }
  0x98   :  { %13379 = vst [vmem:[#allocation36_spill] sm:$0xff] %v8655_v10  ;;  %v1911_v39 = vsel %vm1910_vm15, %v1909_v63, 0  ;;  %v2987_v52 = vadd.s32 1, %v8106_v7  ;;  %v825_v60 = vshrl.u32 %v824_v16, 23  ;;  %v3619_v12 = vshll.u32 %v13371_v23, %v8623_v9 }
  0x99   :  { %13380 = vst [vmem:[#allocation37_spill] sm:$0xff] %v8657_v32  ;;  %v3622_v37 = vshll.u32 %v13372_v56, %v8623_v9  ;;  %v3295_v22 = vadd.s32 1, %v8112_v4  ;;  %v13385_v5 = vmov 1326507024   ;;  %vm3628_vm0 = vcmp.lt.s32.totalorder %v8655_v10, 4  ;;  %v147_v10 = vpop.permute.xlu1 %146 }
  0x9a   :  { %13381 = vst [vmem:[#allocation38_spill] sm:$0xff] %v8662_v19  ;;  %v3620_v19 = vshrl.u32 %v13372_v56, %v8649_v17  ;;  %v8684_v24 = vsub.s32 32, %v8657_v32  ;;  %vm986_vm1 = vcmp.gt.s32.totalorder %v985_v48, 0  ;;  %v3773_v63 = vshll.u32 %v13371_v23, %v8640_v47 }
  0x9b   :  { %13382 = vst [vmem:[#allocation39_spill] sm:$0xff] %v8666_v53  ;;  %v3623_v53 = vshrl.u32 %v13385_v5, %v8649_v17  ;;  %v3776_v16 = vshll.u32 %v13372_v56, %v8640_v47  ;;  %v8690_v7 = vand.u32 31, %v1911_v39  ;;  %v363_v31 = vshrl.u32 %v362_v25, 23 }
  0x9c   :  { %13383 = vst [vmem:[#allocation40_spill] sm:$0xff] %v8668_v57  ;;  %v3774_v4 = vshrl.u32 %v13372_v56, %v8672_v50  ;;  %vm3782_vm2 = vcmp.lt.s32.totalorder %v8668_v57, 4  ;;  %vm2988_vm4 = vcmp.gt.s32.totalorder %v2987_v52, 0  ;;  %v8064_v28 = vadd.s32 4294967169, %v825_v60 }
  0x9d   :  { %13384 = vst [vmem:[#allocation41_spill] sm:$0xff] %v8672_v50  ;;  %v3777_v13 = vshrl.u32 %v13385_v5, %v8672_v50  ;;  %v8697_v44 = vor.u32 %v3620_v19, %v3619_v12  ;;  %v987_v17 = vsel %vm986_vm1, %v985_v48, 0  ;;  %vm3296_vm5 = vcmp.gt.s32.totalorder %v3295_v22, 0 }
  0x9e   :  { %13386 = vst [vmem:[#allocation42_spill] sm:$0xff] %v8684_v24  ;;  %v3624_v9 = vor.u32 %v3623_v53, %v3622_v37  ;;  %v8699_v27 = vshrl.u32 %v679_v2, 5  ;;  %v694_v25 = vshrl.u32 %v13372_v56, %v8684_v24  ;;  %v697_v47 = vshrl.u32 %v13385_v5, %v8684_v24 }
  0x9f   :  { %13387 = vst [vmem:[#allocation43_spill] sm:$0xff] %v8690_v7  ;;  %v693_v60 = vshll.u32 %v13371_v23, %v8657_v32  ;;  %v8708_v34 = vsub.s32 32, %v8690_v7  ;;  %v2989_v19 = vsel %vm2988_vm4, %v2987_v52, 0  ;;  %v8055_v12 = vadd.s32 4294967169, %v363_v31 }
  0xa0   :  { %13388 = vst [vmem:[#allocation44_spill] sm:$0xff] %v8697_v44  ;;  %v696_v48 = vshll.u32 %v13372_v56, %v8657_v32  ;;  %v8712_v2 = vand.u32 31, %v987_v17  ;;  %v3297_v53 = vsel %vm3296_vm5, %v3295_v22, 0  ;;  %v831_v37 = vadd.s32 1, %v8064_v28 }
  0xa1   :  { %13389 = vst [vmem:[#allocation45_spill] sm:$0xff] %v8699_v27  ;;  %v8714_v50 = vor.u32 %v3774_v4, %v3773_v63  ;;  %v3778_v11 = vor.u32 %v3777_v13, %v3776_v16  ;;  %v8719_v24 = vsel %vm3628_vm0, %v8697_v44, 920167782  ;;  %v8722_v43 = vmul.f32 %v8419_v38, %v117_v35 }
  0xa2   :  { %13390 = vst [vmem:[#allocation46_spill] sm:$0xff] %v8708_v34  ;;  %v8726_v31 = vsel %vm3628_vm0, %v3624_v9, 1326507024  ;;  %v8728_v52 = vor.u32 %v694_v25, %v693_v60  ;;  %v698_v32 = vor.u32 %v697_v47, %v696_v48  ;;  %v8730_v22 = vand.u32 31, %v2989_v19 }
  0xa3   :  { %13391 = vst [vmem:[#allocation47_spill] sm:$0xff] %v8712_v2  ;;  %vm13122_vm6 = vcmp.lt.s32.totalorder %v8699_v27, 4  ;;  %v1926_v13 = vshrl.u32 %v13372_v56, %v8708_v34  ;;  %v8735_v28 = vand.u32 31, %v3297_v53  ;;  %v369_v63 = vadd.s32 1, %v8055_v12 }
  0xa4   :  { %13392 = vst [vmem:[#allocation48_spill] sm:$0xff] %v8714_v50  ;;  %v8737_v16 = vshrl.u32 %v1911_v39, 5  ;;  %v1929_v35 = vshrl.u32 %v13385_v5, %v8708_v34  ;;  %v8742_v9 = vsub.s32 32, %v8712_v2  ;;  %vm832_vm10 = vcmp.gt.s32.totalorder %v831_v37, 0 }
  0xa5   :  { %13393 = vst [vmem:[#allocation49_spill] sm:$0xff] %v8719_v24  ;;  %v8747_v47 = vsel %vm3782_vm2, %v8714_v50, 920167782  ;;  %v8751_v4 = vsel %vm3782_vm2, %v3778_v11, 1326507024  ;;  %v1925_v39 = vshll.u32 %v13371_v23, %v8690_v7  ;;  %v2210_v25 = vand.u32 2139095040, %v8722_v43 }
  0xa6   :  { %13394 = vst [vmem:[#allocation50_spill] sm:$0xff] %v8722_v43  ;;  %v8759_v60 = vsel %vm13122_vm6, %v8728_v52, 920167782  ;;  %v8763_v12 = vsel %vm13122_vm6, %v698_v32, 1326507024  ;;  %v1928_v48 = vshll.u32 %v13372_v56, %v8690_v7  ;;  %v8768_v11 = vsub.s32 32, %v8730_v22 }
  0xa7   :  { %13395 = vst [vmem:[#allocation51_spill] sm:$0xff] %v8726_v31  ;;  %v8770_v34 = vor.u32 %v1926_v13, %v1925_v39  ;;  %v8773_v24 = vsub.s32 32, %v8735_v28  ;;  %v833_v43 = vsel %vm832_vm10, %v831_v37, 0  ;;  %vm370_vm12 = vcmp.gt.s32.totalorder %v369_v63, 0 }
  0xa8   :  { %13396 = vst [vmem:[#allocation52_spill] sm:$0xff] %v8728_v52  ;;  %v1930_v44 = vor.u32 %v1929_v35, %v1928_v48  ;;  %vm1934_vm13 = vcmp.lt.s32.totalorder %v8737_v16, 4  ;;  %v1002_v32 = vshrl.u32 %v13372_v56, %v8742_v9  ;;  %v8780_v52 = vshrl.u32 %v987_v17, 5 }
  0xa9   :  { %13397 = vst [vmem:[#allocation53_spill] sm:$0xff] %v8730_v22  ;;  %v1001_v13 = vshll.u32 %v13371_v23, %v8712_v2  ;;  %v1004_v39 = vshll.u32 %v13372_v56, %v8712_v2  ;;  %v3004_v37 = vshrl.u32 %v13372_v56, %v8768_v11  ;;  %v3007_v35 = vshrl.u32 %v13385_v5, %v8768_v11 }
  0xaa   :  { %13398 = vst [vmem:[#allocation54_spill] sm:$0xff] %v8735_v28  ;;  %v8790_v48 = vand.u32 31, %v833_v43  ;;  %v371_v27 = vsel %vm370_vm12, %v369_v63, 0  ;;  %v8795_v17 = vsel %vm1934_vm13, %v8770_v34, 920167782  ;;  %v8797_v7 = vshrl.u32 %v2989_v19, 5 }
  0xab   :  { %13399 = vst [vmem:[#allocation55_spill] sm:$0xff] %v8737_v16  ;;  %v8803_v2 = vor.u32 %v1002_v32, %v1001_v13  ;;  %v3006_v63 = vshll.u32 %v13372_v56, %v8730_v22  ;;  %v3315_v19 = vshrl.u32 %v13385_v5, %v8773_v24  ;;  %v8817_v32 = vsel %vm1934_vm13, %v1930_v44, 1326507024 }
  0xac   :  { %13400 = vst [vmem:[#allocation56_spill] sm:$0xff] %v8742_v9  ;;  %vm1010_vm15 = vcmp.lt.s32.totalorder %v8780_v52, 4  ;;  %v8829_v50 = vshrl.u32 %v833_v43, 5  ;;  %vm13121_vm1 = vcmp.lt.s32.totalorder %v8797_v7, 4  ;;  %v13117_v16 = vmov 683565275  }
  0xad   :  { %13401 = vst [vmem:[#allocation57_spill] sm:$0xff] %v8747_v47  ;;  %v3008_v13 = vor.u32 %v3007_v35, %v3006_v63  ;;  %v8834_v44 = vsel %vm1010_vm15, %v8803_v2, 920167782  ;;  %v8871_v63 = vshrl.u32 %v371_v27, 5  ;;  %vm2856_vm6 = vcmp.lt.s32.totalorder %v8560_v36, 2 }
  0xae   :  { %13402 = vst [vmem:[#allocation58_spill] sm:$0xff] %v8751_v4  ;;  %vm13156_vm5 = vcmp.lt.s32.totalorder %v8829_v50, 4 }
  0xaf   :  { %13403 = vst [vmem:[#allocation59_spill] sm:$0xff] %v8759_v60  ;;  %v1005_v60 = vshrl.u32 %v13385_v5, %v8742_v9  ;;  %v8799_v9 = vshrl.u32 %v3297_v53, 5  ;;  %v8813_v53 = vand.u32 31, %v371_v27  ;;  %vm13142_vm12 = vcmp.lt.s32.totalorder %v8871_v63, 4 }
  0xb0   :  { %13404 = vst [vmem:[#allocation60_spill] sm:$0xff] %v8763_v12  ;;  %v2211_v12 = vshrl.u32 %v2210_v25, 23  ;;  %v3312_v25 = vshrl.u32 %v13372_v56, %v8773_v24 }
  0xb1   :  { %13405 = vst [vmem:[#allocation61_spill] sm:$0xff] %v8768_v11  ;;  %v1006_v31 = vor.u32 %v1005_v60, %v1004_v39  ;;  %v3003_v11 = vshll.u32 %v13371_v23, %v8730_v22  ;;  %v8822_v39 = vsub.s32 32, %v8790_v48  ;;  %vm13145_vm4 = vcmp.lt.s32.totalorder %v8799_v9, 4 }
  0xb2   :  { %13406 = vst [vmem:[#allocation62_spill] sm:$0xff] %v8770_v34  ;;  %v3311_v34 = vshll.u32 %v13371_v23, %v8735_v28  ;;  %v8846_v43 = vsub.s32 32, %v8813_v53 }
  0xb3   :  { %13407 = vst [vmem:[#allocation63_spill] sm:$0xff] %v8773_v24  ;;  %v8819_v60 = vor.u32 %v3004_v37, %v3003_v11  ;;  %v3314_v24 = vshll.u32 %v13372_v56, %v8735_v28 }
  0xb4   :  { %13408 = vst [vmem:[#allocation64_spill] sm:$0xff] %v8780_v52  ;;  %v8825_v22 = vor.u32 %v3312_v25, %v3311_v34  ;;  %v8843_v34 = vsel %vm1010_vm15, %v1006_v31, 1326507024  ;;  %v8855_v25 = vsel %vm13121_vm1, %v3008_v13, 1326507024  ;;  %v847_v31 = vshll.u32 %v13371_v23, %v8790_v48 }
  0xb5   :  { %13409 = vst [vmem:[#allocation65_spill] sm:$0xff] %v8790_v48  ;;  %v3316_v11 = vor.u32 %v3315_v19, %v3314_v24  ;;  %v8851_v35 = vsel %vm13121_vm1, %v8819_v60, 920167782  ;;  %v385_v19 = vshll.u32 %v13371_v23, %v8813_v53  ;;  %vm2857_vm1 = vcmp.lt.s32.totalorder %v8560_v36, 3 }
  0xb6   :  { %13410 = vst [vmem:[#allocation66_spill] sm:$0xff] %v8795_v17  ;;  %v8091_v17 = vadd.s32 4294967169, %v2211_v12  ;;  %v8839_v12 = vmul.f32 %v8427_v41, %v147_v10  ;;  %v848_v41 = vshrl.u32 %v13372_v56, %v8822_v39  ;;  %v851_v10 = vshrl.u32 %v13385_v5, %v8822_v39 }
  0xb7   :  { %13411 = vst [vmem:[#allocation67_spill] sm:$0xff] %v8797_v7  ;;  %v8864_v24 = vsel %vm13145_vm4, %v8825_v22, 920167782  ;;  %v13108_v7 = vmov 2475754826  }
  0xb8   :  { %13412 = vst [vmem:[#allocation68_spill] sm:$0xff] %v8799_v9  ;;  %v2217_v37 = vadd.s32 1, %v8091_v17  ;;  %v850_v17 = vshll.u32 %v13372_v56, %v8790_v48  ;;  %v3134_v13 = vand.u32 2139095040, %v8839_v12  ;;  %v8883_v28 = vor.u32 %v848_v41, %v847_v31  ;;  %v97_v48 = vpop.permute.xlu0 %96 }
  0xb9   :  { %13413 = vst [vmem:[#allocation69_spill] sm:$0xff] %v8803_v2  ;;  %v2847_v41 = vshrl.u32 %v13371_v23, %v8552_v26  ;;  %v8909_v4 = vsel %vm13145_vm4, %v3316_v11, 1326507024 }
  0xba   :  { %13414 = vst [vmem:[#allocation70_spill] sm:$0xff] %v8813_v53  ;;  %vm2218_vm10 = vcmp.gt.s32.totalorder %v2217_v37, 0  ;;  %v3135_v31 = vshrl.u32 %v3134_v13, 23 }
  0xbb   :  { %13415 = vst [vmem:[#allocation71_spill] sm:$0xff] %v8817_v32 }
  0xbc   :  { %13416 = vst [vmem:[#allocation72_spill] sm:$0xff] %v8819_v60  ;;  %v389_v60 = vshrl.u32 %v13385_v5, %v8846_v43  ;;  %v8109_v11 = vadd.s32 4294967169, %v3135_v31 }
  0xbd   :  { %13417 = vst [vmem:[#allocation73_spill] sm:$0xff] %v8822_v39  ;;  %v852_v39 = vor.u32 %v851_v10, %v850_v17  ;;  %v2219_v10 = vsel %vm2218_vm10, %v2217_v37, 0  ;;  %v13431_v17 = vand.u32 2147483647, %v8439_v55  ;;  %v8914_v37 = vsel %vm13156_vm5, %v8883_v28, 920167782 }
  0xbe   :  { %13418 = vst [vmem:[#allocation74_spill] sm:$0xff] %v8825_v22  ;;  %v13110_v22 = vmov 2131351028   ;;  %vm2855_vm10 = vcmp.lt.s32.totalorder %v8560_v36, 1  ;;  %v13444_v36 = vmov 0  }
  0xbf   :  { %13419 = vst [vmem:[#allocation75_spill] sm:$0xff] %v8829_v50  ;;  %v2844_v27 = vshrl.u32 %v13110_v22, %v8552_v26 }
  0xc0   :  { %13420 = vst [vmem:[#allocation76_spill] sm:$0xff] %v8834_v44  ;;  %v13430_v44 = vmov 2475754826  }
  0xc1   :  { %13421 = vst [vmem:[#allocation77_spill] sm:$0xff] %v8839_v12  ;;  %v388_v12 = vshll.u32 %v13372_v56, %v8813_v53  ;;  %v2843_v22 = vshll.u32 %v13430_v44, %v8531_v8  ;;  %v2830_v53 = vand.u32 8388607, %v13431_v17 }
  0xc2   :  { %13422 = vst [vmem:[#allocation78_spill] sm:$0xff] %v8843_v34  ;;  %v8905_v34 = vmul.f32 %v8444_v58, %v97_v48 }
  0xc3   :  { %13423 = vst [vmem:[#allocation79_spill] sm:$0xff] %v8846_v43  ;;  %v2845_v52 = vor.u32 %v2844_v27, %v2843_v22  ;;  %v390_v48 = vor.u32 %v389_v60, %v388_v12  ;;  %v8924_v22 = vand.u32 31, %v2219_v10  ;;  %v13440_v12 = vmov 683565275  }
  0xc4   :  { %13424 = vst [vmem:[#allocation80_spill] sm:$0xff] %v8851_v35  ;;  %v82_v35 = vpop.permute.xlu2 %81  ;;  %v2839_v27 = vshrl.u32 %v13440_v12, %v8552_v26 }
  0xc5   :  { %13425 = vst [vmem:[#allocation81_spill] sm:$0xff] %v8855_v25  ;;  %v386_v25 = vshrl.u32 %v13372_v56, %v8846_v43  ;;  %v8890_v32 = vmul.f32 %v8444_v58, %v82_v35  ;;  %v13432_v43 = vmov 2131351028  }
  0xc6   :  { %13426 = vst [vmem:[#allocation82_spill] sm:$0xff] %v8864_v24  ;;  %v2841_v24 = vshrl.u32 %v13108_v7, %v8552_v26  ;;  %v2840_v7 = vshll.u32 %v13117_v16, %v8531_v8  ;;  %v2846_v2 = vshll.u32 %v13432_v43, %v8531_v8  ;;  %v8919_v8 = vsel %vm13156_vm5, %v852_v39, 1326507024  ;;  %v112_v39 = vpop.permute.xlu1 %111 }
  0xc7   :  { %13427 = vst [vmem:[#allocation83_spill] sm:$0xff] %v8871_v63  ;;  %v8902_v35 = vor.u32 %v386_v25, %v385_v19  ;;  %v8921_v25 = vshrl.u32 %v2219_v10, 5  ;;  %v8942_v10 = vsel %vm13142_vm12, %v390_v48, 1326507024  ;;  %vm13239_vm5 = vweird.f32 %v8422_v40 }
  0xc8   :  { %13428 = vst [vmem:[#allocation84_spill] sm:$0xff] %v8883_v28  ;;  %v2842_v16 = vor.u32 %v2841_v24, %v2840_v7  ;;  %v2848_v13 = vor.u32 %v2847_v41, %v2846_v2  ;;  %v1132_v7 = vand.u32 2139095040, %v8890_v32  ;;  %v2831_v24 = vor.u32 8388608, %v2830_v53 }
  0xc9   :  { %13429 = vst [vmem:[#allocation85_spill] sm:$0xff] %v8890_v32  ;;  %v8930_v19 = vsel %vm13142_vm12, %v8902_v35, 920167782  ;;  %v8947_v32 = vmul.f32 %v8419_v38, %v112_v39  ;;  %v8958_v38 = vsub.s32 32, %v8924_v22 }
  0xca   :  { %13433 = vst [vmem:[#allocation86_spill] sm:$0xff] %v8902_v35  ;;  %v2863_v60 = vsel %vm2855_vm10, %v2842_v16, %v2845_v52  ;;  %v2860_v53 = vsel %vm2858_vm9, %v2848_v13, 2102212464  ;;  %v2865_v41 = vsel %vm2857_vm1, %v2848_v13, %v8628_v51  ;;  %v1133_v31 = vshrl.u32 %v1132_v7, 23 }
  0xcb   :  { %13434 = vst [vmem:[#allocation87_spill] sm:$0xff] %v8905_v34  ;;  %v2866_v17 = vsel %vm2856_vm6, %v2863_v60, %v2865_v41  ;;  %v2867_v2 = vsel %vm2855_vm10, %v2845_v52, %v2848_v13  ;;  %v2859_v26 = vsel %vm2855_vm10, %v2839_v27, %v2842_v16  ;;  %v8951_v35 = vshll.u32 %v2831_v24, 8 }
  0xcc   :  { %13435 = vst [vmem:[#allocation88_spill] sm:$0xff] %v8909_v4  ;;  %v2861_v4 = vsel %vm2857_vm1, %v2845_v52, %v2860_v53  ;;  %v2896_v48 = vand.u32 65535, %v2866_v17  ;;  %v8968_v52 = vadd.s32 1, %v8109_v11  ;;  %v8970_v16 = vadd.s32 4294967169, %v1133_v31 }
  0xcd   :  { %13436 = vst [vmem:[#allocation89_spill] sm:$0xff] %v8914_v37  ;;  %v2872_v7 = vand.u32 65535, %v8951_v35  ;;  %v2873_v60 = vshrl.u32 %v8951_v35, 16  ;;  %v8975_v39 = vsel %vm2856_vm6, %v2859_v26, %v2861_v4 }
  0xce   :  { %13437 = vst [vmem:[#allocation90_spill] sm:$0xff] %v8919_v8 }
  0xcf   :  { %13438 = vst [vmem:[#allocation91_spill] sm:$0xff] %v8924_v22  ;;  %v2898_v9 = vmul.u32 %v2896_v48, %v2872_v7 }
  0xd0   :  { %13439 = vst [vmem:[#allocation92_spill] sm:$0xff] %v8930_v19  ;;  %v2869_v19 = vsel %vm2857_vm1, %v8605_v42, %v8638_v15  ;;  %v8962_v42 = vshll.u32 %v13371_v23, %v8924_v22  ;;  %v8966_v15 = vshll.u32 %v13372_v56, %v8924_v22 }
  0xd1   :  { %13441 = vst [vmem:[#allocation93_spill] sm:$0xff] %v8942_v10  ;;  %v2870_v51 = vsel %vm2856_vm6, %v2867_v2, %v2869_v19  ;;  %v2897_v10 = vshrl.u32 %v2866_v17, 16  ;;  %v13137_v2 = vand.u32 2147483647, %v8447_v61  ;;  %v2900_v17 = vmul.u32 %v2896_v48, %v2873_v60 }
  0xd2   :  { %13442 = vst [vmem:[#allocation94_spill] sm:$0xff] %v8947_v32  ;;  %v2874_v13 = vand.u32 65535, %v2870_v51  ;;  %v2875_v41 = vshrl.u32 %v2870_v51, 16 }
  0xd3   :  { %13443 = vst [vmem:[#allocation95_spill] sm:$0xff] %v8958_v38  ;;  %v2899_v53 = vmul.u32 %v2897_v10, %v2872_v7  ;;  %v2901_v22 = vmul.u32 %v2897_v10, %v2873_v60  ;;  %v2676_v47 = vand.u32 8388607, %v13137_v2  ;;  %v2904_v26 = vshll.u32 %v2900_v17, 16 }
  0xd4   :  { %v2877_v24 = vmul.u32 %v2875_v41, %v2872_v7  ;;  %v2878_v19 = vmul.u32 %v2874_v13, %v2873_v60  ;;  %v2876_v27 = vmul.u32 %v2874_v13, %v2872_v7  ;;  %v2879_v51 = vmul.u32 %v2875_v41, %v2873_v60 }
  0xd5   :  { %v2902_v31 = vshll.u32 %v2899_v53, 16  ;;  %v2903_v50 = vshrl.u32 %v2899_v53, 16  ;;  %v2686_v10 = vshll.u32 %v13440_v12, %v8540_v18  ;;  %v2692_v53 = vshll.u32 %v13432_v43, %v8540_v18 }
  0xd6   :  { %v2880_v63 = vshll.u32 %v2877_v24, 16  ;;  %v2881_v37 = vshrl.u32 %v2877_v24, 16  ;;  %v2882_v11 = vshll.u32 %v2878_v19, 16  ;;  %v2883_v28 = vshrl.u32 %v2878_v19, 16 }
  0xd7   :  { %vm2906_vm6 = vc.u32 %v2898_v9, %v2902_v31  ;;  %v2908_v13 = vadd.s32 %v2902_v31, %v2898_v9  ;;  %v2687_v19 = vshrl.u32 %v13430_v44, %v8576_v54  ;;  %v2689_v9 = vshll.u32 %v13430_v44, %v8540_v18 }
  0xd8   :  { %vm2884_vm9 = vc.u32 %v2876_v27, %v2880_v63  ;;  %v2886_v8 = vadd.s32 %v2880_v63, %v2876_v27  ;;  %v2907_v48 = vsel %vm2906_vm6, 1, %v13444_v36  ;;  %v2677_v63 = vor.u32 8388608, %v2676_v47 }
  0xd9   :  { %v2885_v4 = vsel %vm2884_vm9, 1, %v13444_v36  ;;  %v2909_v60 = vadd.s32 %v2907_v48, %v2901_v22  ;;  %vm2910_vm10 = vc.u32 %v2908_v13, %v2904_v26  ;;  %v2690_v27 = vshrl.u32 %v13432_v43, %v8576_v54 }
  0xda   :  { %v2887_v57 = vadd.s32 %v2885_v4, %v2879_v51  ;;  %vm2888_vm1 = vc.u32 %v2886_v8, %v2882_v11  ;;  %v2911_v24 = vsel %vm2910_vm10, 1, %v13444_v36  ;;  %v2693_v22 = vshrl.u32 %v13371_v23, %v8576_v54 }
  0xdb   :  { %v2889_v7 = vsel %vm2888_vm1, 1, %v13444_v36  ;;  %v2913_v8 = vadd.s32 %v2911_v24, %v2909_v60  ;;  %v8995_v51 = vadd.s32 %v2908_v13, %v2904_v26  ;;  %v2688_v11 = vor.u32 %v2687_v19, %v2686_v10 }
  0xdc   :  { %v2891_v41 = vadd.s32 %v2889_v7, %v2887_v57  ;;  %v2905_v57 = vshrl.u32 %v2900_v17, 16  ;;  %v2691_v4 = vor.u32 %v2690_v27, %v2689_v9  ;;  %v2694_v48 = vor.u32 %v2693_v22, %v2692_v53 }
  0xdd   :  { %v2914_v31 = vadd.s32 %v2913_v8, %v2903_v50  ;;  %vm2701_vm9 = vcmp.lt.s32.totalorder %v8569_v45, 1  ;;  %vm2702_vm6 = vcmp.lt.s32.totalorder %v8569_v45, 2  ;;  %vm2703_vm1 = vcmp.lt.s32.totalorder %v8569_v45, 3 }
  0xde   :  { %v2892_v47 = vadd.s32 %v2891_v41, %v2881_v37  ;;  %v9002_v18 = vshll.u32 %v2677_v63, 8  ;;  %v2709_v37 = vsel %vm2701_vm9, %v2688_v11, %v2691_v4  ;;  %v2711_v50 = vsel %vm2703_vm1, %v2694_v48, %v8646_v3 }
  0xdf   :  { %v2915_v60 = vadd.s32 %v2914_v31, %v2905_v57  ;;  %v13445_v17 = vand.u32 2139095040, %v8905_v34  ;;  %v2712_v10 = vsel %vm2702_vm6, %v2709_v37, %v2711_v50  ;;  %v2916_v3 = vmul.u32 %v8951_v35, %v8975_v39 }
  0xe0   :  { %v8998_v7 = vadd.s32 %v2892_v47, %v2883_v28  ;;  %v2715_v28 = vsel %vm2703_vm1, %v8618_v62, %v8653_v14  ;;  %v2713_v41 = vsel %vm2701_vm9, %v2691_v4, %v2694_v48  ;;  %v2718_v62 = vand.u32 65535, %v9002_v18  ;;  %v92_v14 = vpop.permute.xlu1 %91 }
  0xe1   :  { %v9015_v26 = vshrl.u32 %v13445_v17, 23  ;;  %v2919_v63 = vadd.s32 1, %v2915_v60  ;;  %v2716_v24 = vsel %vm2702_vm6, %v2713_v41, %v2715_v28  ;;  %v2719_v19 = vshrl.u32 %v9002_v18, 16 }
  0xe2   :  { %vm2918_vm10 = vc.u32 %v8998_v7, %v8995_v51  ;;  %v2742_v9 = vand.u32 65535, %v2712_v10  ;;  %v2743_v8 = vshrl.u32 %v2712_v10, 16  ;;  %v9032_v27 = vshrl.u32 %v13372_v56, %v8958_v38 }
  0xe3   :  { %v2920_v53 = vsel %vm2918_vm10, %v2919_v63, %v2915_v60  ;;  %v2720_v35 = vand.u32 65535, %v2716_v24  ;;  %v2721_v39 = vshrl.u32 %v2716_v24, 16  ;;  %v9036_v22 = vshrl.u32 %v13385_v5, %v8958_v38 }
  0xe4   :  { %v2921_v47 = vadd.s32 %v2920_v53, %v2916_v3  ;;  %v2745_v57 = vmul.u32 %v2743_v8, %v2718_v62  ;;  %v2746_v31 = vmul.u32 %v2742_v9, %v2719_v19  ;;  %v9039_v37 = vmul.f32 %v8444_v58, %v92_v14  ;;  %v62_v58 = vpop.permute.xlu0 %61 }
  0xe5   :  { %v2685_v50 = vshrl.u32 %v13440_v12, %v8576_v54  ;;  %v2723_v28 = vmul.u32 %v2721_v39, %v2718_v62  ;;  %v2724_v17 = vmul.u32 %v2720_v35, %v2719_v19  ;;  %v2706_v60 = vsel %vm2704_vm11, %v2694_v48, 2102212464 }
  0xe6   :  { %13446 = vst [vmem:[#allocation96_spill] sm:$0xff] %v9039_v37  ;;  %v2922_v10 = vadd.s32 536870912, %v2921_v47  ;;  %v2744_v63 = vmul.u32 %v2742_v9, %v2718_v62  ;;  %v2748_v41 = vshll.u32 %v2745_v57, 16  ;;  %v2722_v24 = vmul.u32 %v2720_v35, %v2718_v62 }
  0xe7   :  { %v2725_v13 = vmul.u32 %v2721_v39, %v2719_v19  ;;  %v2726_v2 = vshll.u32 %v2723_v28, 16  ;;  %v2747_v3 = vmul.u32 %v2743_v8, %v2719_v19  ;;  %v2728_v34 = vshll.u32 %v2724_v17, 16 }
  0xe8   :  { %v2923_v53 = vshrl.u32 %v2922_v10, 30  ;;  %v2750_v38 = vshll.u32 %v2746_v31, 16  ;;  %vm2752_vm10 = vc.u32 %v2744_v63, %v2748_v41  ;;  %v2754_v5 = vadd.s32 %v2748_v41, %v2744_v63 }
  0xe9   :  { %vm2730_vm12 = vc.u32 %v2722_v24, %v2726_v2  ;;  %v2732_v14 = vadd.s32 %v2726_v2, %v2722_v24  ;;  %v2753_v54 = vsel %vm2752_vm10, 1, %v13444_v36  ;;  %v2705_v48 = vsel %vm2701_vm9, %v2685_v50, %v2688_v11 }
  0xea   :  { %v2924_v56 = vshll.u32 %v2923_v53, 30  ;;  %v2731_v9 = vsel %vm2730_vm12, 1, %v13444_v36  ;;  %v2755_v62 = vadd.s32 %v2753_v54, %v2747_v3  ;;  %v2707_v19 = vsel %vm2703_vm1, %v2691_v4, %v2706_v60 }
  0xeb   :  { %v2733_v8 = vadd.s32 %v2731_v9, %v2725_v13  ;;  %vm2734_vm11 = vc.u32 %v2732_v14, %v2728_v34  ;;  %vm2756_vm4 = vc.u32 %v2754_v5, %v2750_v38  ;;  %v9052_v35 = vmul.f32 %v8483_v29, %v62_v58 }
  0xec   :  { %v2925_v2 = vsub.s32 %v2921_v47, %v2924_v56  ;;  %v2735_v39 = vsel %vm2734_vm11, 1, %v13444_v36  ;;  %v2757_v10 = vsel %vm2756_vm4, 1, %v13444_v36  ;;  %v2727_v63 = vshrl.u32 %v2723_v28, 16 }
  0xed   :  { %13447 = vst [vmem:[#allocation97_spill] sm:$0xff] %v9052_v35  ;;  %v2737_v41 = vadd.s32 %v2735_v39, %v2733_v8  ;;  %v2749_v11 = vshrl.u32 %v2745_v57, 16  ;;  %v2759_v50 = vadd.s32 %v2757_v10, %v2755_v62  ;;  %v2708_v4 = vsel %vm2702_vm6, %v2705_v48, %v2707_v19 }
  0xee   :  { %vm2926_vm12 = vcmp.lt.s32.totalorder %v2925_v2, 0  ;;  %v2927_v24 = vsub.s32 0, %v2925_v2  ;;  %v13146_v34 = vand.u32 2147483647, %v8422_v40  ;;  %v2729_v13 = vshrl.u32 %v2724_v17, 16 }
  0xef   :  { %v2738_v60 = vadd.s32 %v2737_v41, %v2727_v63  ;;  %v2751_v29 = vshrl.u32 %v2746_v31, 16  ;;  %v2760_v3 = vadd.s32 %v2759_v50, %v2749_v11  ;;  %v9060_v56 = vadd.s32 1, %v8970_v16 }
  0xf0   :  { %v13448_v47 = vand.u32 2147483647, %v8439_v55  ;;  %v2928_v57 = vsel %vm2926_vm12, %v2927_v24, %v2925_v2  ;;  %v2947_v58 = vsub.s32 4, %v2923_v53  ;;  %v9070_v54 = vadd.s32 %v2754_v5, %v2750_v38 }
  0xf1   :  { %v2929_v14 = vclz %v2928_v57  ;;  %v9068_v45 = vadd.s32 %v2738_v60, %v2729_v13  ;;  %v2761_v17 = vadd.s32 %v2760_v3, %v2751_v29  ;;  %vm2825_vm9 = vcmp.lt.s32.totalorder %v8439_v55, 0 }
  0xf2   :  { %vm9064_vm4 = vcmp.le.f32.partialorder %v13448_v47, 0.7853982  ;;  %v2917_v16 = vadd.s32 %v8995_v51, %v8998_v7  ;;  %v2762_v31 = vmul.u32 %v9002_v18, %v2708_v4  ;;  %v2522_v48 = vand.u32 8388607, %v13146_v34 }
  0xf3   :  { %v8104_v9 = vadd.s32 4294967294, %v2929_v14  ;;  %vm2764_vm6 = vc.u32 %v9068_v45, %v9070_v54  ;;  %v2765_v62 = vadd.s32 1, %v2761_v17  ;;  %v2532_v5 = vshll.u32 %v13440_v12, %v8450_v1 }
  0xf4   :  { %v2533_v38 = vshrl.u32 %v13430_v44, %v8457_v6  ;;  %v2535_v19 = vshll.u32 %v13430_v44, %v8450_v1  ;;  %v2536_v51 = vshrl.u32 %v13432_v43, %v8457_v6  ;;  %v2538_v7 = vshll.u32 %v13432_v43, %v8450_v1 }
  0xf5   :  { %vm8105_vm1 = vcmp.lt.s32.totalorder %v8104_v9, 0  ;;  %v2948_v18 = vsel %vm2825_vm9, %v2947_v58, %v2923_v53  ;;  %v2766_v8 = vsel %vm2764_vm6, %v2765_v62, %v2761_v17  ;;  %v2539_v39 = vshrl.u32 %v13371_v23, %v8457_v6 }
  0xf6   :  { %v2932_v10 = vsel %vm8105_vm1, 0, %v8104_v9  ;;  %v2767_v63 = vadd.s32 %v2766_v8, %v2762_v31  ;;  %v2537_v41 = vor.u32 %v2536_v51, %v2535_v19  ;;  %vm2547_vm10 = vcmp.lt.s32.totalorder %v8466_v20, 1 }
  0xf7   :  { %v2933_v11 = vsub.s32 32, %v2932_v10  ;;  %v2937_v50 = vsub.s32 4294967266, %v2932_v10  ;;  %v2534_v24 = vor.u32 %v2533_v38, %v2532_v5  ;;  %v2540_v4 = vor.u32 %v2539_v39, %v2538_v7 }
  0xf8   :  { %v9097_v1 = vsel %vm9064_vm4, 0, %v2948_v18  ;;  %v2768_v13 = vadd.s32 536870912, %v2767_v63  ;;  %v2523_v60 = vor.u32 8388608, %v2522_v48  ;;  %vm2549_vm11 = vcmp.lt.s32.totalorder %v8466_v20, 3 }
  0xf9   :  { %13451 = vst [vmem:[#allocation98_spill] sm:$0xff] %v9097_v1  ;;  %v2934_v53 = vshll.u32 %v2925_v2, %v2932_v10  ;;  %v2935_v29 = vshrl.u32 %v2917_v16, %v2933_v11  ;;  %v2938_v3 = vadd.s32 127, %v2937_v50  ;;  %v2531_v47 = vshrl.u32 %v13440_v12, %v8457_v6 }
  0xfa   :  { %v9103_v57 = vadd.s32 4294967169, %v9015_v26  ;;  %v2769_v58 = vshrl.u32 %v2768_v13, 30  ;;  %vm2548_vm12 = vcmp.lt.s32.totalorder %v8466_v20, 2  ;;  %v2559_v14 = vsel %vm2547_vm10, %v2537_v41, %v2540_v4 }
  0xfb   :  { %v2936_v17 = vor.u32 %v2935_v29, %v2934_v53  ;;  %v2939_v31 = vshll.u32 %v2938_v3, 23  ;;  %v2555_v48 = vsel %vm2547_vm10, %v2534_v24, %v2537_v41  ;;  %v2557_v2 = vsel %vm2549_vm11, %v2540_v4, %v8509_v49 }
  0xfc   :  { %v6680_v6 = vadd.s32 3, %v9097_v1  ;;  %v2770_v16 = vshll.u32 %v2769_v58, 30  ;;  %v2561_v26 = vsel %vm2549_vm11, %v8485_v30, %v8526_v0  ;;  %v9118_v9 = vshll.u32 %v2523_v60, 8 }
  0xfd   :  { %v2940_v62 = vor.u32 4788187, %v2939_v31  ;;  %v2551_v5 = vsel %vm2547_vm10, %v2531_v47, %v2534_v24  ;;  %v2552_v38 = vsel %vm2550_vm3, %v2540_v4, 2102212464  ;;  %v2562_v49 = vsel %vm2548_vm12, %v2559_v14, %v2561_v26 }
  0xfe   :  { %v9126_v19 = vsub.s32 %v2767_v63, %v2770_v16  ;;  %v2558_v51 = vsel %vm2548_vm12, %v2555_v48, %v2557_v2  ;;  %v2564_v7 = vand.u32 65535, %v9118_v9  ;;  %v2565_v30 = vshrl.u32 %v9118_v9, 16 }
  0xff   :  { %v2941_v0 = vand.u32 2147483647, %v2940_v62  ;;  %v2943_v18 = vcvt.s32.f32 %v2936_v17  ;;  %v2566_v8 = vand.u32 65535, %v2562_v49  ;;  %v2567_v39 = vshrl.u32 %v2562_v49, 16 }
 0x100   :  { %vm2772_vm6 = vcmp.lt.s32.totalorder %v9126_v19, 0  ;;  %v2773_v10 = vsub.s32 0, %v9126_v19  ;;  %v2793_v11 = vsub.s32 4, %v2769_v58  ;;  %v2553_v63 = vsel %vm2549_vm11, %v2537_v41, %v2552_v38 }
 0x101   :  { %v2944_v50 = vmul.f32 %v2943_v18, %v2941_v0  ;;  %v2568_v24 = vmul.u32 %v2566_v8, %v2564_v7  ;;  %v2569_v4 = vmul.u32 %v2567_v39, %v2564_v7  ;;  %v9136_v13 = vmul.u32 %v2566_v8, %v2565_v30 }
 0x102   :  { %vm2671_vm3 = vcmp.lt.s32.totalorder %v8447_v61, 0  ;;  %v2774_v60 = vsel %vm2772_vm6, %v2773_v10, %v9126_v19  ;;  %v2588_v53 = vand.u32 65535, %v2558_v51  ;;  %v2589_v29 = vshrl.u32 %v2558_v51, 16 }
 0x103   :  { %v2945_v3 = vxor.u32 2147483648, %v2944_v50  ;;  %v2775_v47 = vclz %v2774_v60  ;;  %v2571_v14 = vmul.u32 %v2567_v39, %v2565_v30  ;;  %v2572_v17 = vshll.u32 %v2569_v4, 16 }
 0x104   :  { %v9140_v31 = vand.u32 3, %v6680_v6  ;;  %v2763_v41 = vadd.s32 %v9070_v54, %v9068_v45  ;;  %v9146_v48 = vsel %vm2548_vm12, %v2551_v5, %v2553_v63  ;;  %v2574_v2 = vshll.u32 %v9136_v13, 16 }
 0x105   :  { %v2946_v16 = vsel %vm2825_vm9, %v2945_v3, %v2944_v50  ;;  %v8101_v26 = vadd.s32 4294967294, %v2775_v47  ;;  %v2794_v62 = vsel %vm2671_vm3, %v2793_v11, %v2769_v58  ;;  %vm2576_vm1 = vc.u32 %v2568_v24, %v2572_v17 }
 0x106   :  { %v2949_v6 = vsel %vm9064_vm4, %v8439_v55, %v2946_v16  ;;  %v13452_v45 = vand.u32 2147483647, %v8447_v61  ;;  %v2577_v54 = vsel %vm2576_vm1, 1, %v13444_v36  ;;  %v2578_v5 = vadd.s32 %v2572_v17, %v2568_v24 }
 0x107   :  { %v2591_v38 = vmul.u32 %v2589_v29, %v2564_v7  ;;  %v2951_v49 = vmul.f32 %v2949_v6, %v2949_v6  ;;  %vm8102_vm9 = vcmp.lt.s32.totalorder %v8101_v26, 0  ;;  %v2579_v51 = vadd.s32 %v2577_v54, %v2571_v14 }
 0x108   :  { %vm9158_vm10 = vcmp.le.f32.partialorder %v13452_v45, 0.7853982  ;;  %v2592_v0 = vmul.u32 %v2588_v53, %v2565_v30  ;;  %v2778_v58 = vsel %vm8102_vm9, 0, %v8101_v26  ;;  %vm2580_vm11 = vc.u32 %v2578_v5, %v2574_v2 }
 0x109   :  { %v2590_v18 = vmul.u32 %v2588_v53, %v2564_v7  ;;  %v2594_v8 = vshll.u32 %v2591_v38, 16  ;;  %v2952_v28 = vmul.f32 -0.001358992, %v2951_v49  ;;  %v2959_v39 = vmul.f32 -0.00019511016, %v2951_v49 }
 0x10a   :  { %v2779_v10 = vsub.s32 32, %v2778_v58  ;;  %v2573_v11 = vshrl.u32 %v2569_v4, 16  ;;  %v2780_v63 = vshll.u32 %v9126_v19, %v2778_v58  ;;  %v2783_v50 = vsub.s32 4294967266, %v2778_v58 }
 0x10b   :  { %v2581_v60 = vsel %vm2580_vm11, 1, %v13444_v36  ;;  %v2596_v3 = vshll.u32 %v2592_v0, 16  ;;  %v2953_v24 = vadd.f32 0.041655596, %v2952_v28  ;;  %v2960_v47 = vadd.f32 0.008332121, %v2959_v39 }
 0x10c   :  { %v2781_v17 = vshrl.u32 %v2763_v41, %v2779_v10  ;;  %v2583_v16 = vadd.s32 %v2581_v60, %v2579_v51  ;;  %v2784_v14 = vadd.s32 127, %v2783_v50  ;;  %v2593_v45 = vmul.u32 %v2589_v29, %v2565_v30 }
 0x10d   :  { %vm2598_vm4 = vc.u32 %v2590_v18, %v2594_v8  ;;  %v2600_v2 = vadd.s32 %v2594_v8, %v2590_v18  ;;  %v2954_v7 = vmul.f32 %v2953_v24, %v2951_v49  ;;  %v2961_v53 = vmul.f32 %v2960_v47, %v2951_v49 }
 0x10e   :  { %v2782_v26 = vor.u32 %v2781_v17, %v2780_v63  ;;  %v2575_v54 = vshrl.u32 %v9136_v13, 16  ;;  %v2785_v4 = vshll.u32 %v2784_v14, 23  ;;  %v2584_v5 = vadd.s32 %v2583_v16, %v2573_v11 }
 0x10f   :  { %v2599_v19 = vsel %vm2598_vm4, 1, %v13444_v36  ;;  %vm2602_vm12 = vc.u32 %v2600_v2, %v2596_v3  ;;  %v2955_v58 = vadd.f32 -0.4999988, %v2954_v7  ;;  %v2962_v34 = vadd.f32 -0.16666654, %v2961_v53 }
 0x110   :  { %v9169_v41 = vsel %vm9158_vm10, 0, %v2794_v62  ;;  %v2595_v51 = vshrl.u32 %v2591_v38, 16  ;;  %v2786_v30 = vor.u32 4788187, %v2785_v4  ;;  %v2597_v29 = vshrl.u32 %v2592_v0, 16 }
 0x111   :  { %13455 = vst [vmem:[#allocation99_spill] sm:$0xff] %v9169_v41  ;;  %v2601_v18 = vadd.s32 %v2599_v19, %v2593_v45  ;;  %v2603_v8 = vsel %vm2602_vm12, 1, %v13444_v36  ;;  %v2956_v28 = vmul.f32 %v2955_v58, %v2951_v49  ;;  %v2963_v39 = vmul.f32 %v2962_v34, %v2951_v49 }
 0x112   :  { %v2789_v13 = vcvt.s32.f32 %v2782_v26  ;;  %v9172_v10 = vadd.s32 %v2600_v2, %v2596_v3  ;;  %v2787_v11 = vand.u32 2147483647, %v2786_v30  ;;  %v9174_v63 = vadd.s32 %v2584_v5, %v2575_v54 }
 0x113   :  { %v2605_v50 = vadd.s32 %v2603_v8, %v2601_v18  ;;  %v13153_v60 = vand.u32 2147483647, %v8434_v46  ;;  %v9177_v24 = vadd.f32 1.0, %v2956_v28  ;;  %v2964_v62 = vadd.f32 1.0, %v2963_v39 }
 0x114   :  { %vm13147_vm6 = vweird.f32 %v8439_v55  ;;  %vm6682_vm1 = vcmp.lt.s32.totalorder %v9140_v31, 2  ;;  %vm6683_vm9 = vcmp.eq.s32.totalorder %v9140_v31, 0  ;;  %vm6686_vm11 = vcmp.eq.s32.totalorder %v9140_v31, 2 }
 0x115   :  { %13456 = vst [vmem:[#allocation100_spill] sm:$0xff] %v9177_v24  ;;  %v2790_v34 = vmul.f32 %v2789_v13, %v2787_v11  ;;  %v2606_v38 = vadd.s32 %v2605_v50, %v2595_v51  ;;  %v9183_v49 = vmul.f32 %v2964_v62, %v2949_v6  ;;  %v13150_v0 = vxor.u32 2147483648, %v9177_v24 }
 0x116   :  { %v6525_v3 = vadd.s32 3, %v9169_v41  ;;  %v2608_v47 = vmul.u32 %v9118_v9, %v9146_v48  ;;  %vm3142_vm4 = vcmp.gt.s32.totalorder %v8968_v52, 0  ;;  %vm2610_vm12 = vc.u32 %v9174_v63, %v9172_v10 }
 0x117   :  { %13457 = vst [vmem:[#allocation101_spill] sm:$0xff] %v9183_v49  ;;  %v2791_v17 = vxor.u32 2147483648, %v2790_v34  ;;  %v2607_v16 = vadd.s32 %v2606_v38, %v2597_v29  ;;  %v2368_v14 = vand.u32 8388607, %v13153_v60  ;;  %v13148_v6 = vxor.u32 2147483648, %v9183_v49 }
 0x118   :  { %v2378_v45 = vshll.u32 %v13440_v12, %v8468_v21  ;;  %v2381_v2 = vshll.u32 %v13430_v44, %v8468_v21  ;;  %v2382_v9 = vshrl.u32 %v13432_v43, %v8489_v33  ;;  %v2384_v53 = vshll.u32 %v13432_v43, %v8468_v21 }
 0x119   :  { %v2792_v48 = vsel %vm2671_vm3, %v2791_v17, %v2790_v34  ;;  %v2611_v7 = vadd.s32 1, %v2607_v16  ;;  %v2385_v26 = vshrl.u32 %v13371_v23, %v8489_v33  ;;  %v6685_v54 = vsel %vm6683_vm9, %v9177_v24, %v13148_v6 }
 0x11a   :  { %v6688_v4 = vsel %vm6686_vm11, %v13150_v0, %v9183_v49  ;;  %v2795_v5 = vsel %vm9158_vm10, %v8447_v61, %v2792_v48  ;;  %v2379_v21 = vshrl.u32 %v13430_v44, %v8489_v33  ;;  %v2369_v30 = vor.u32 8388608, %v2368_v14  ;;  %v13459_v14 = vld [vmem:[#allocation24_spill] sm:$0xff] }
 0x11b   :  { %v6689_v19 = vsel %vm6682_vm1, %v6685_v54, %v6688_v4  ;;  %v2797_v58 = vmul.f32 %v2795_v5, %v2795_v5  ;;  %v2612_v51 = vsel %vm2610_vm12, %v2611_v7, %v2607_v16  ;;  %v2383_v8 = vor.u32 %v2382_v9, %v2381_v2  ;;  %v13460_v2 = vld [vmem:[#allocation19_spill] sm:$0xff]  ;;  %v13461_v54 = vld [vmem:[#allocation22_spill] sm:$0xff] }
 0x11c   :  { %v6690_v29 = vsel %vm13147_vm6, nan, %v6689_v19  ;;  %v2613_v18 = vadd.s32 %v2612_v51, %v2608_v47  ;;  %v2386_v28 = vor.u32 %v2385_v26, %v2384_v53  ;;  %vm2393_vm3 = vcmp.lt.s32.totalorder %v8518_v59, 1 }
 0x11d   :  { %7735 = vmatpush.msra.mxu2 %v6690_v29  ;;  %v2798_v20 = vmul.f32 -0.001358992, %v2797_v58  ;;  %v2805_v39 = vmul.f32 -0.00019511016, %v2797_v58  ;;  %vm2395_vm10 = vcmp.lt.s32.totalorder %v8518_v59, 3  ;;  %v13458_v31 = vand.u32 2139095040, %v8947_v32 }
 0x11e   :  { %v2614_v11 = vadd.s32 536870912, %v2613_v18  ;;  %v2380_v50 = vor.u32 %v2379_v21, %v2378_v45  ;;  %vm2394_vm1 = vcmp.lt.s32.totalorder %v8518_v59, 2  ;;  %v9238_v62 = vor.u32 %v9032_v27, %v8962_v42 }
 0x11f   :  { %v9233_v13 = vshrl.u32 %v13458_v31, 23  ;;  %v2799_v34 = vadd.f32 0.041655596, %v2798_v20  ;;  %v2806_v38 = vadd.f32 0.008332121, %v2805_v39  ;;  %v6526_v47 = vand.u32 3, %v6525_v3 }
 0x120   :  { %v9240_v17 = vshrl.u32 %v2614_v11, 30  ;;  %v2405_v16 = vsel %vm2393_vm3, %v2383_v8, %v2386_v28  ;;  %v2407_v9 = vsel %vm2395_vm10, %v13460_v2, %v13459_v14  ;;  %v9248_v45 = vshll.u32 %v2369_v30, 8 }
 0x121   :  { %v2800_v42 = vmul.f32 %v2799_v34, %v2797_v58  ;;  %v2807_v27 = vmul.f32 %v2806_v38, %v2797_v58  ;;  %v2408_v3 = vsel %vm2394_vm1, %v2405_v16, %v2407_v9  ;;  %v9257_v7 = vsel %vm3142_vm4, %v8968_v52, 0 }
 0x122   :  { %v2616_v53 = vshll.u32 %v9240_v17, 30  ;;  %v2401_v26 = vsel %vm2393_vm3, %v2380_v50, %v2383_v8  ;;  %v2403_v4 = vsel %vm2395_vm10, %v2386_v28, %v13461_v54  ;;  %v2412_v51 = vand.u32 65535, %v2408_v3 }
 0x123   :  { %v2801_v21 = vadd.f32 -0.4999988, %v2800_v42  ;;  %v2808_v19 = vadd.f32 -0.16666654, %v2807_v27  ;;  %v2413_v30 = vshrl.u32 %v2408_v3, 16  ;;  %vm6528_vm9 = vcmp.eq.s32.totalorder %v6526_v47, 0 }
 0x124   :  { %vm6531_vm11 = vcmp.eq.s32.totalorder %v6526_v47, 2  ;;  %v2609_v29 = vadd.s32 %v9172_v10, %v9174_v63  ;;  %v2617_v52 = vsub.s32 %v2613_v18, %v2616_v53  ;;  %v2410_v20 = vand.u32 65535, %v9248_v45 }
 0x125   :  { %v2802_v39 = vmul.f32 %v2801_v21, %v2797_v58  ;;  %v2809_v31 = vmul.f32 %v2808_v19, %v2797_v58  ;;  %vm6527_vm4 = vcmp.lt.s32.totalorder %v6526_v47, 2  ;;  %v2404_v11 = vsel %vm2394_vm1, %v2401_v26, %v2403_v4 }
 0x126   :  { %v2411_v34 = vshrl.u32 %v9248_v45, 16  ;;  %vm13155_vm12 = vweird.f32 %v8447_v61  ;;  %vm2618_vm6 = vcmp.lt.s32.totalorder %v2617_v52, 0  ;;  %v2619_v38 = vsub.s32 0, %v2617_v52 }
 0x127   :  { %v2377_v16 = vshrl.u32 %v13440_v12, %v8489_v33  ;;  %v2415_v14 = vmul.u32 %v2413_v30, %v2410_v20  ;;  %v9274_v10 = vadd.f32 1.0, %v2802_v39  ;;  %v2810_v63 = vadd.f32 1.0, %v2809_v31 }
 0x128   :  { %v2398_v58 = vsel %vm2396_vm8, %v2386_v28, 2102212464  ;;  %v9278_v18 = vmul.u32 %v2412_v51, %v2411_v34  ;;  %v2620_v2 = vsel %vm2618_vm6, %v2619_v38, %v2617_v52  ;;  %v2434_v42 = vand.u32 65535, %v2404_v11 }
 0x129   :  { %13462 = vst [vmem:[#allocation24_spill] sm:$0xff] %v9274_v10  ;;  %v2418_v9 = vshll.u32 %v2415_v14, 16  ;;  %v2435_v27 = vshrl.u32 %v2404_v11, 16  ;;  %v9280_v3 = vmul.f32 %v2810_v63, %v2795_v5  ;;  %v13149_v53 = vxor.u32 2147483648, %v9274_v10 }
 0x12a   :  { %v2621_v26 = vclz %v2620_v2  ;;  %v2414_v54 = vmul.u32 %v2412_v51, %v2410_v20  ;;  %v2639_v33 = vsub.s32 4, %v9240_v17  ;;  %v2397_v4 = vsel %vm2393_vm3, %v2377_v16, %v2380_v50 }
 0x12b   :  { %13463 = vst [vmem:[#allocation19_spill] sm:$0xff] %v9280_v3  ;;  %v2399_v28 = vsel %vm2395_vm10, %v2383_v8, %v2398_v58  ;;  %v2417_v21 = vmul.u32 %v2413_v30, %v2411_v34  ;;  %v13151_v19 = vxor.u32 2147483648, %v9280_v3  ;;  %v2420_v31 = vshll.u32 %v9278_v18, 16 }
 0x12c   :  { %v8098_v39 = vadd.s32 4294967294, %v2621_v26  ;;  %vm2422_vm8 = vc.u32 %v2414_v54, %v2418_v9  ;;  %v6533_v5 = vsel %vm6531_vm11, %v13149_v53, %v9280_v3  ;;  %v2424_v11 = vadd.s32 %v2418_v9, %v2414_v54 }
 0x12d   :  { %v2423_v51 = vsel %vm2422_vm8, 1, %v13444_v36  ;;  %v2437_v38 = vmul.u32 %v2435_v27, %v2410_v20  ;;  %v6530_v8 = vsel %vm6528_vm9, %v9274_v10, %v13151_v19  ;;  %v2438_v30 = vmul.u32 %v2434_v42, %v2411_v34 }
 0x12e   :  { %vm8099_vm6 = vcmp.lt.s32.totalorder %v8098_v39, 0  ;;  %v2425_v50 = vadd.s32 %v2423_v51, %v2417_v21  ;;  %v6534_v16 = vsel %vm6527_vm4, %v6530_v8, %v6533_v5  ;;  %vm2426_vm3 = vc.u32 %v2424_v11, %v2420_v31 }
 0x12f   :  { %v2624_v63 = vsel %vm8099_vm6, 0, %v8098_v39  ;;  %v2440_v58 = vshll.u32 %v2437_v38, 16  ;;  %v6535_v2 = vsel %vm13155_vm12, nan, %v6534_v16  ;;  %v2436_v9 = vmul.u32 %v2434_v42, %v2410_v20 }
 0x130   :  { %v2625_v26 = vsub.s32 32, %v2624_v63  ;;  %v2629_v6 = vsub.s32 4294967266, %v2624_v63  ;;  %7736 = vmatpush.msra.mxu2 %v6535_v2  ;;  %v2626_v54 = vshll.u32 %v2617_v52, %v2624_v63  ;;  %v2419_v53 = vshrl.u32 %v2415_v14, 16  ;;  %v13468_v2 = vld [vmem:[#allocation34_spill] sm:$0xff] }
 0x131   :  { %v2427_v0 = vsel %vm2426_vm3, 1, %v13444_v36  ;;  %v2439_v19 = vmul.u32 %v2435_v27, %v2411_v34  ;;  %vm2444_vm10 = vc.u32 %v2436_v9, %v2440_v58  ;;  %vm2517_vm9 = vcmp.lt.s32.totalorder %v8422_v40, 0 }
 0x132   :  { %v2627_v48 = vshrl.u32 %v2609_v29, %v2625_v26  ;;  %v2630_v21 = vadd.s32 127, %v2629_v6  ;;  %v2429_v51 = vadd.s32 %v2427_v0, %v2425_v50  ;;  %v2442_v47 = vshll.u32 %v2438_v30, 16  ;;  %v13467_v6 = vld [vmem:[#allocation14_spill] sm:$0xff] }
 0x133   :  { %v2445_v39 = vsel %vm2444_vm10, 1, %v13444_v36  ;;  %v2446_v31 = vadd.s32 %v2440_v58, %v2436_v9  ;;  %v13464_v52 = vand.u32 2147483647, %v8422_v40  ;;  %v2400_v0 = vsel %vm2394_vm1, %v2397_v4, %v2399_v28 }
 0x134   :  { %v2628_v5 = vor.u32 %v2627_v48, %v2626_v54  ;;  %v2631_v11 = vshll.u32 %v2630_v21, 23  ;;  %v2430_v8 = vadd.s32 %v2429_v51, %v2419_v53  ;;  %v2447_v20 = vadd.s32 %v2445_v39, %v2439_v19 }
 0x135   :  { %vm9307_vm11 = vcmp.le.f32.partialorder %v13464_v52, 0.7853982  ;;  %vm2448_vm4 = vc.u32 %v2446_v31, %v2442_v47  ;;  %v13152_v29 = vand.u32 2147483647, %v13467_v6  ;;  %v2640_v48 = vsel %vm2517_vm9, %v2639_v33, %v9240_v17  ;;  %v13469_v33 = vld [vmem:[#allocation41_spill] sm:$0xff]  ;;  %v13471_v52 = vld [vmem:[#allocation40_spill] sm:$0xff] }
 0x136   :  { %v2632_v34 = vor.u32 4788187, %v2631_v11  ;;  %v2421_v42 = vshrl.u32 %v9278_v18, 16  ;;  %v2449_v27 = vsel %vm2448_vm4, 1, %v13444_v36  ;;  %v2441_v53 = vshrl.u32 %v2437_v38, 16 }
 0x137   :  { %v2443_v19 = vshrl.u32 %v2438_v30, 16  ;;  %v2451_v50 = vadd.s32 %v2449_v27, %v2447_v20  ;;  %v3754_v16 = vand.u32 8388607, %v13152_v29  ;;  %v2635_v4 = vcvt.s32.f32 %v2628_v5 }
 0x138   :  { %v2633_v59 = vand.u32 2147483647, %v2632_v34  ;;  %v9321_v28 = vadd.s32 %v2430_v8, %v2421_v42  ;;  %v9323_v63 = vadd.s32 %v2446_v31, %v2442_v47  ;;  %v3764_v17 = vshll.u32 %v13440_v12, %v13468_v2  ;;  %v13472_v42 = vld [vmem:[#allocation57_spill] sm:$0xff] }
 0x139   :  { %v2452_v58 = vadd.s32 %v2451_v50, %v2441_v53  ;;  %v3765_v18 = vshrl.u32 %v13430_v44, %v13469_v33  ;;  %v3767_v38 = vshll.u32 %v13430_v44, %v13468_v2  ;;  %v3768_v26 = vshrl.u32 %v13432_v43, %v13469_v33  ;;  %v13473_v53 = vld [vmem:[#allocation58_spill] sm:$0xff] }
 0x13a   :  { %v2636_v30 = vmul.f32 %v2635_v4, %v2633_v59  ;;  %v3770_v9 = vshll.u32 %v13432_v43, %v13468_v2  ;;  %v3771_v54 = vshrl.u32 %v13371_v23, %v13469_v33  ;;  %v9339_v21 = vsel %vm9307_vm11, 0, %v2640_v48 }
 0x13b   :  { %13470 = vst [vmem:[#allocation22_spill] sm:$0xff] %v9339_v21  ;;  %v2453_v51 = vadd.s32 %v2452_v58, %v2443_v19  ;;  %v3755_v47 = vor.u32 8388608, %v3754_v16  ;;  %v9341_v39 = vor.u32 %v3765_v18, %v3764_v17  ;;  %vm2456_vm1 = vc.u32 %v9321_v28, %v9323_v63 }
 0x13c   :  { %v2637_v31 = vxor.u32 2147483648, %v2636_v30  ;;  %v9345_v5 = vor.u32 %v3768_v26, %v3767_v38  ;;  %v9347_v11 = vor.u32 %v3771_v54, %v3770_v9  ;;  %vm2242_vm8 = vcmp.lt.s32.totalorder %v8921_v25, 4 }
 0x13d   :  { %v2454_v8 = vmul.u32 %v9248_v45, %v2400_v0  ;;  %v2457_v20 = vadd.s32 1, %v2453_v51  ;;  %vm3779_vm6 = vcmp.lt.s32.totalorder %v13471_v52, 1  ;;  %vm3781_vm3 = vcmp.lt.s32.totalorder %v13471_v52, 3  ;;  %v13474_v45 = vld [vmem:[#allocation48_spill] sm:$0xff] }
 0x13e   :  { %v2638_v34 = vsel %vm2517_vm9, %v2637_v31, %v2636_v30  ;;  %v3787_v48 = vsel %vm3779_vm6, %v9341_v39, %v9345_v5  ;;  %v3789_v27 = vsel %vm3781_vm3, %v9347_v11, %v13472_v42  ;;  %v3793_v0 = vsel %vm3781_vm3, %v13474_v45, %v13473_v53 }
 0x13f   :  { %v9371_v50 = vsel %vm9307_vm11, %v8422_v40, %v2638_v34  ;;  %v2458_v16 = vsel %vm2456_vm1, %v2457_v20, %v2453_v51  ;;  %v9373_v59 = vshll.u32 %v3755_v47, 8  ;;  %vm3780_vm10 = vcmp.lt.s32.totalorder %v13471_v52, 2 }
 0x140   :  { %v2643_v4 = vmul.f32 %v9371_v50, %v9371_v50  ;;  %v2459_v58 = vadd.s32 %v2458_v16, %v2454_v8  ;;  %v3791_v2 = vsel %vm3779_vm6, %v9345_v5, %v9347_v11  ;;  %v9383_v17 = vshrl.u32 %v9257_v7, 5 }
 0x141   :  { %v6370_v14 = vadd.s32 3, %v9339_v21  ;;  %v9388_v18 = vsel %vm3780_vm10, %v3787_v48, %v3789_v27  ;;  %v3794_v38 = vsel %vm3780_vm10, %v3791_v2, %v3793_v0  ;;  %v9393_v51 = vand.u32 31, %v9257_v7 }
 0x142   :  { %v2644_v30 = vmul.f32 -0.001358992, %v2643_v4  ;;  %v2651_v26 = vmul.f32 -0.00019511016, %v2643_v4  ;;  %v2460_v9 = vadd.s32 536870912, %v2459_v58  ;;  %v3798_v54 = vand.u32 65535, %v3794_v38 }
 0x143   :  { %v3796_v47 = vand.u32 65535, %v9373_v59  ;;  %v3797_v31 = vshrl.u32 %v9373_v59, 16  ;;  %v3799_v8 = vshrl.u32 %v3794_v38, 16  ;;  %v9398_v20 = vadd.s32 1, %v9103_v57 }
 0x144   :  { %v2645_v34 = vadd.f32 0.041655596, %v2644_v30  ;;  %v2652_v48 = vadd.f32 0.008332121, %v2651_v26  ;;  %v9400_v42 = vshrl.u32 %v2460_v9, 30  ;;  %v9402_v27 = vand.u32 3, %v6370_v14 }
 0x145   :  { %v3801_v53 = vmul.u32 %v3799_v8, %v3796_v47  ;;  %v9404_v45 = vmul.u32 %v3798_v54, %v3797_v31  ;;  %v3821_v7 = vshrl.u32 %v9388_v18, 16  ;;  %v9410_v0 = vsel %vm2242_vm8, %v9238_v62, 920167782 }
 0x146   :  { %v2646_v16 = vmul.f32 %v2645_v34, %v2643_v4  ;;  %v2653_v2 = vmul.f32 %v2652_v48, %v2643_v4  ;;  %v2462_v57 = vshll.u32 %v9400_v42, 30  ;;  %v3763_v38 = vshrl.u32 %v13440_v12, %v13469_v33 }
 0x147   :  { %v3800_v30 = vmul.u32 %v3798_v54, %v3796_v47  ;;  %v3804_v14 = vshll.u32 %v3801_v53, 16  ;;  %v3820_v26 = vand.u32 65535, %v9388_v18  ;;  %v3803_v60 = vmul.u32 %v3799_v8, %v3797_v31 }
 0x148   :  { %v2647_v9 = vadd.f32 -0.4999988, %v2646_v16  ;;  %v2654_v19 = vadd.f32 -0.16666654, %v2653_v2  ;;  %v9416_v29 = vsub.s32 %v2459_v58, %v2462_v57  ;;  %vm6373_vm9 = vcmp.eq.s32.totalorder %v9402_v27, 0 }
 0x149   :  { %vm6376_vm11 = vcmp.eq.s32.totalorder %v9402_v27, 2  ;;  %v3806_v34 = vshll.u32 %v9404_v45, 16  ;;  %vm3808_vm4 = vc.u32 %v3800_v30, %v3804_v14  ;;  %v3810_v48 = vadd.s32 %v3804_v14, %v3800_v30 }
 0x14a   :  { %v9421_v61 = vmul.u32 %v3821_v7, %v3796_v47  ;;  %v2648_v33 = vmul.f32 %v2647_v9, %v2643_v4  ;;  %v2655_v54 = vmul.f32 %v2654_v19, %v2643_v4  ;;  %vm6372_vm1 = vcmp.lt.s32.totalorder %v9402_v27, 2 }
 0x14b   :  { %vm2464_vm12 = vcmp.lt.s32.totalorder %v9416_v29, 0  ;;  %v2465_v58 = vsub.s32 0, %v9416_v29  ;;  %v2455_v18 = vadd.s32 %v9323_v63, %v9321_v28  ;;  %v3784_v8 = vsel %vm3782_vm2, %v9347_v11, 2102212464 }
 0x14c   :  { %v3809_v16 = vsel %vm3808_vm4, 1, %v13444_v36  ;;  %vm3812_vm14 = vc.u32 %v3810_v48, %v3806_v34  ;;  %v9433_v2 = vadd.f32 1.0, %v2648_v33  ;;  %v2656_v19 = vadd.f32 1.0, %v2655_v54 }
 0x14d   :  { %v2466_v4 = vsel %vm2464_vm12, %v2465_v58, %v9416_v29  ;;  %v3811_v57 = vadd.s32 %v3809_v16, %v3803_v60  ;;  %v3813_v14 = vsel %vm3812_vm14, 1, %v13444_v36  ;;  %v3824_v9 = vmul.u32 %v3820_v26, %v3797_v31 }
 0x14e   :  { %13475 = vst [vmem:[#allocation34_spill] sm:$0xff] %v9433_v2  ;;  %v2467_v30 = vclz %v2466_v4  ;;  %v3826_v55 = vshll.u32 %v9421_v61, 16  ;;  %v9439_v28 = vmul.f32 %v2656_v19, %v9371_v50  ;;  %v13162_v63 = vxor.u32 2147483648, %v9433_v2 }
 0x14f   :  { %v3805_v11 = vshrl.u32 %v3801_v53, 16  ;;  %v3815_v10 = vadd.s32 %v3813_v14, %v3811_v57  ;;  %vm2363_vm2 = vcmp.lt.s32.totalorder %v8434_v46, 0  ;;  %v3783_v60 = vsel %vm3779_vm6, %v3763_v38, %v9341_v39 }
 0x150   :  { %13476 = vst [vmem:[#allocation41_spill] sm:$0xff] %v9439_v28  ;;  %v8095_v34 = vadd.s32 4294967294, %v2467_v30  ;;  %v3785_v48 = vsel %vm3781_vm3, %v9345_v5, %v3784_v8  ;;  %v3822_v33 = vmul.u32 %v3820_v26, %v3796_v47  ;;  %v13161_v54 = vxor.u32 2147483648, %v9439_v28 }
 0x151   :  { %v3807_v50 = vshrl.u32 %v9404_v45, 16  ;;  %v3816_v58 = vadd.s32 %v3815_v10, %v3805_v11  ;;  %v3825_v16 = vmul.u32 %v3821_v7, %v3797_v31  ;;  %v3828_v53 = vshll.u32 %v3824_v9, 16 }
 0x152   :  { %vm8096_vm14 = vcmp.lt.s32.totalorder %v8095_v34, 0  ;;  %vm3830_vm12 = vc.u32 %v3822_v33, %v3826_v55  ;;  %v3832_v19 = vadd.s32 %v3826_v55, %v3822_v33  ;;  %v6375_v39 = vsel %vm6373_vm9, %v9433_v2, %v13161_v54 }
 0x153   :  { %v6378_v5 = vsel %vm6376_vm11, %v13162_v63, %v9439_v28  ;;  %v2470_v47 = vsel %vm8096_vm14, 0, %v8095_v34  ;;  %v3831_v10 = vsel %vm3830_vm12, 1, %v13444_v36  ;;  %v2485_v7 = vsub.s32 4, %v9400_v42 }
 0x154   :  { %v6379_v31 = vsel %vm6372_vm1, %v6375_v39, %v6378_v5  ;;  %v2471_v45 = vsub.s32 32, %v2470_v47  ;;  %v2475_v55 = vsub.s32 4294967266, %v2470_v47  ;;  %v9467_v26 = vadd.s32 %v3816_v58, %v3807_v50  ;;  %v13480_v50 = vld [vmem:[#allocation12_spill] sm:$0xff] }
 0x155   :  { %v6380_v38 = vsel %vm13239_vm5, nan, %v6379_v31  ;;  %v3833_v8 = vadd.s32 %v3831_v10, %v3825_v16  ;;  %vm3834_vm6 = vc.u32 %v3832_v19, %v3828_v53  ;;  %v2472_v4 = vshll.u32 %v9416_v29, %v2470_v47 }
 0x156   :  { %7737 = vmatpush.msra.mxu2 %v6380_v38  ;;  %v2473_v57 = vshrl.u32 %v2455_v18, %v2471_v45  ;;  %v2476_v30 = vadd.s32 127, %v2475_v55  ;;  %v3835_v14 = vsel %vm3834_vm6, 1, %v13444_v36  ;;  %v13477_v27 = vand.u32 2147483647, %v8434_v46  ;;  %v13481_v45 = vld [vmem:[#allocation31_spill] sm:$0xff] }
 0x157   :  { %v3827_v34 = vshrl.u32 %v9421_v61, 16  ;;  %v3837_v33 = vadd.s32 %v3835_v14, %v3833_v8  ;;  %v13163_v58 = vand.u32 2147483647, %v13480_v50  ;;  %v3786_v29 = vsel %vm3780_vm10, %v3783_v60, %v3785_v48  ;;  %v13482_v60 = vld [vmem:[#allocation35_spill] sm:$0xff] }
 0x158   :  { %vm9473_vm3 = vcmp.le.f32.partialorder %v13477_v27, 0.7853982  ;;  %v2474_v16 = vor.u32 %v2473_v57, %v2472_v4  ;;  %v2477_v39 = vshll.u32 %v2476_v30, 23  ;;  %v9481_v18 = vadd.s32 %v3832_v19, %v3828_v53 }
 0x159   :  { %vm1140_vm9 = vcmp.gt.s32.totalorder %v9060_v56, 0  ;;  %v2486_v5 = vsel %vm2363_vm2, %v2485_v7, %v9400_v42  ;;  %v3829_v47 = vshrl.u32 %v3824_v9, 16  ;;  %v3838_v10 = vadd.s32 %v3837_v33, %v3827_v34 }
 0x15a   :  { %v3600_v61 = vand.u32 8388607, %v13163_v58  ;;  %v2478_v31 = vor.u32 4788187, %v2477_v39  ;;  %vm3842_vm11 = vc.u32 %v9467_v26, %v9481_v18  ;;  %v3610_v52 = vshll.u32 %v13440_v12, %v13481_v45  ;;  %v13484_v39 = vld [vmem:[#allocation36_spill] sm:$0xff] }
 0x15b   :  { %v3611_v48 = vshrl.u32 %v13430_v44, %v13482_v60  ;;  %v3839_v53 = vadd.s32 %v3838_v10, %v3829_v47  ;;  %v3613_v42 = vshll.u32 %v13430_v44, %v13481_v45  ;;  %v3614_v9 = vshrl.u32 %v13432_v43, %v13482_v60  ;;  %v13486_v10 = vld [vmem:[#allocation51_spill] sm:$0xff] }
 0x15c   :  { %v3601_v19 = vor.u32 8388608, %v3600_v61  ;;  %v2479_v55 = vand.u32 2147483647, %v2478_v31  ;;  %v2481_v7 = vcvt.s32.f32 %v2474_v16  ;;  %v3616_v38 = vshll.u32 %v13432_v43, %v13481_v45  ;;  %v13487_v61 = vld [vmem:[#allocation44_spill] sm:$0xff] }
 0x15d   :  { %v3617_v8 = vshrl.u32 %v13371_v23, %v13482_v60  ;;  %v9505_v4 = vsel %vm9473_vm3, 0, %v2486_v5  ;;  %v3843_v57 = vadd.s32 1, %v3839_v53  ;;  %v3612_v30 = vor.u32 %v3611_v48, %v3610_v52 }
 0x15e   :  { %13483 = vst [vmem:[#allocation40_spill] sm:$0xff] %v9505_v4  ;;  %v3615_v14 = vor.u32 %v3614_v9, %v3613_v42  ;;  %v2482_v27 = vmul.f32 %v2481_v7, %v2479_v55  ;;  %v3840_v34 = vmul.u32 %v9373_v59, %v3786_v29  ;;  %vm3627_vm10 = vcmp.lt.s32.totalorder %v13484_v39, 3 }
 0x15f   :  { %v3618_v33 = vor.u32 %v3617_v8, %v3616_v38  ;;  %v13485_v16 = vor.u32 %v9036_v22, %v8966_v15  ;;  %v3844_v5 = vsel %vm3842_vm11, %v3843_v57, %v3839_v53  ;;  %v3639_v31 = vsel %vm3627_vm10, %v13487_v61, %v13486_v10  ;;  %v13488_v22 = vld [vmem:[#allocation49_spill] sm:$0xff] }
 0x160   :  { %v9523_v59 = vshll.u32 %v3601_v19, 8  ;;  %v2483_v29 = vxor.u32 2147483648, %v2482_v27  ;;  %v6215_v45 = vadd.s32 3, %v9505_v4  ;;  %v3845_v52 = vadd.s32 %v3844_v5, %v3840_v34 }
 0x161   :  { %v9514_v47 = vsel %vm2242_vm8, %v13485_v16, 1326507024  ;;  %vm3625_vm4 = vcmp.lt.s32.totalorder %v13484_v39, 1  ;;  %vm3626_vm1 = vcmp.lt.s32.totalorder %v13484_v39, 2  ;;  %v3635_v48 = vsel %vm3627_vm10, %v3618_v33, %v13488_v22 }
 0x162   :  { %v3633_v15 = vsel %vm3625_vm4, %v3612_v30, %v3615_v14  ;;  %v3637_v53 = vsel %vm3625_vm4, %v3615_v14, %v3618_v33  ;;  %v2484_v19 = vsel %vm2363_vm2, %v2483_v29, %v2482_v27  ;;  %v3846_v42 = vadd.s32 536870912, %v3845_v52 }
 0x163   :  { %v3640_v9 = vsel %vm3626_vm1, %v3637_v53, %v3639_v31  ;;  %v9540_v55 = vand.u32 65535, %v9523_v59  ;;  %v9545_v7 = vsel %vm9473_vm3, %v8434_v46, %v2484_v19  ;;  %v9548_v38 = vshrl.u32 %v9523_v59, 16 }
 0x164   :  { %v3644_v8 = vand.u32 65535, %v3640_v9  ;;  %v3645_v57 = vshrl.u32 %v3640_v9, 16  ;;  %v9553_v27 = vsel %vm1140_vm9, %v9060_v56, 0  ;;  %v2489_v34 = vmul.f32 %v9545_v7, %v9545_v7 }
 0x165   :  { %v9557_v16 = vshrl.u32 %v3846_v42, 30  ;;  %v3636_v11 = vsel %vm3626_vm1, %v3633_v15, %v3635_v48  ;;  %v3609_v5 = vshrl.u32 %v13440_v12, %v13482_v60  ;;  %v3630_v10 = vsel %vm3628_vm0, %v3618_v33, 2102212464 }
 0x166   :  { %v3647_v61 = vmul.u32 %v3645_v57, %v9540_v55  ;;  %v9567_v31 = vmul.u32 %v3644_v8, %v9548_v38  ;;  %v2490_v56 = vmul.f32 -0.001358992, %v2489_v34  ;;  %v2497_v29 = vmul.f32 -0.00019511016, %v2489_v34 }
 0x167   :  { %v9569_v22 = vand.u32 3, %v6215_v45  ;;  %v3848_v53 = vshll.u32 %v9557_v16, 30  ;;  %v3629_v15 = vsel %vm3625_vm4, %v3609_v5, %v3612_v30  ;;  %v3646_v48 = vmul.u32 %v3644_v8, %v9540_v55 }
 0x168   :  { %v3650_v60 = vshll.u32 %v3647_v61, 16  ;;  %v3667_v19 = vshrl.u32 %v3636_v11, 16  ;;  %v2491_v42 = vadd.f32 0.041655596, %v2490_v56  ;;  %v2498_v33 = vadd.f32 0.008332121, %v2497_v29 }
 0x169   :  { %v9575_v9 = vsub.s32 %v3845_v52, %v3848_v53  ;;  %v3631_v54 = vsel %vm3627_vm10, %v3615_v14, %v3630_v10  ;;  %v3649_v63 = vmul.u32 %v3645_v57, %v9548_v38  ;;  %v3652_v45 = vshll.u32 %v9567_v31, 16 }
 0x16a   :  { %vm3654_vm0 = vc.u32 %v3646_v48, %v3650_v60  ;;  %v3656_v58 = vadd.s32 %v3650_v60, %v3646_v48  ;;  %v2492_v40 = vmul.f32 %v2491_v42, %v2489_v34  ;;  %v2499_v3 = vmul.f32 %v2498_v33, %v2489_v34 }
 0x16b   :  { %vm3850_vm2 = vcmp.lt.s32.totalorder %v9575_v9, 0  ;;  %v3851_v30 = vsub.s32 0, %v9575_v9  ;;  %v3655_v8 = vsel %vm3654_vm0, 1, %v13444_v36  ;;  %v3666_v52 = vand.u32 65535, %v3636_v11 }
 0x16c   :  { %vm3658_vm14 = vc.u32 %v3656_v58, %v3652_v45  ;;  %v9585_v5 = vmul.u32 %v3667_v19, %v9540_v55  ;;  %v2493_v14 = vadd.f32 -0.4999988, %v2492_v40  ;;  %v2500_v10 = vadd.f32 -0.16666654, %v2499_v3 }
 0x16d   :  { %v3852_v57 = vsel %vm3850_vm2, %v3851_v30, %v9575_v9  ;;  %v3657_v56 = vadd.s32 %v3655_v8, %v3649_v63  ;;  %v9589_v29 = vadd.s32 4294967169, %v9233_v13  ;;  %vm6218_vm12 = vcmp.eq.s32.totalorder %v9569_v22, 0 }
 0x16e   :  { %v3853_v53 = vclz %v3852_v57  ;;  %v3659_v48 = vsel %vm3658_vm14, 1, %v13444_v36  ;;  %v2494_v60 = vmul.f32 %v2493_v14, %v2489_v34  ;;  %v2501_v42 = vmul.f32 %v2500_v10, %v2489_v34 }
 0x16f   :  { %vm6217_vm6 = vcmp.lt.s32.totalorder %v9569_v22, 2  ;;  %vm6221_vm3 = vcmp.eq.s32.totalorder %v9569_v22, 2  ;;  %v3841_v40 = vadd.s32 %v9481_v18, %v9467_v26  ;;  %vm13196_vm9 = vweird.f32 %v8434_v46 }
 0x170   :  { %v8122_v3 = vadd.s32 4294967294, %v3853_v53  ;;  %v3871_v13 = vsub.s32 4, %v9557_v16  ;;  %v9601_v63 = vsel %vm3626_vm1, %v3629_v15, %v3631_v54  ;;  %v3661_v58 = vadd.s32 %v3659_v48, %v3657_v56 }
 0x171   :  { %v9603_v11 = vadd.f32 1.0, %v2494_v60  ;;  %v2502_v34 = vadd.f32 1.0, %v2501_v42  ;;  %vm3749_vm11 = vcmp.lt.s32.totalorder %v13467_v6, 0  ;;  %v3670_v33 = vmul.u32 %v3666_v52, %v9548_v38  ;;  %v13491_v60 = vld [vmem:[#allocation6_spill] sm:$0xff] }
 0x172   :  { %v3672_v45 = vshll.u32 %v9585_v5, 16  ;;  %vm8123_vm10 = vcmp.lt.s32.totalorder %v8122_v3, 0  ;;  %v3651_v26 = vshrl.u32 %v3647_v61, 16  ;;  %v3653_v18 = vshrl.u32 %v9567_v31, 16 }
 0x173   :  { %13489 = vst [vmem:[#allocation57_spill] sm:$0xff] %v9603_v11  ;;  %v3668_v30 = vmul.u32 %v3666_v52, %v9540_v55  ;;  %v9611_v39 = vmul.f32 %v2502_v34, %v9545_v7  ;;  %v13168_v54 = vxor.u32 2147483648, %v9603_v11  ;;  %v3856_v15 = vsel %vm8123_vm10, 0, %v8122_v3 }
 0x174   :  { %v3671_v8 = vmul.u32 %v3667_v19, %v9548_v38  ;;  %v3857_v14 = vsub.s32 32, %v3856_v15  ;;  %v3861_v10 = vsub.s32 4294967266, %v3856_v15  ;;  %v3662_v57 = vadd.s32 %v3661_v58, %v3651_v26 }
 0x175   :  { %13490 = vst [vmem:[#allocation58_spill] sm:$0xff] %v9611_v39  ;;  %vm3676_vm4 = vc.u32 %v3668_v30, %v3672_v45  ;;  %v13167_v56 = vxor.u32 2147483648, %v9611_v39  ;;  %v3674_v53 = vshll.u32 %v3670_v33, 16  ;;  %v3678_v31 = vadd.s32 %v3672_v45, %v3668_v30 }
 0x176   :  { %v3677_v61 = vsel %vm3676_vm4, 1, %v13444_v36  ;;  %v3858_v55 = vshll.u32 %v9575_v9, %v3856_v15  ;;  %v3859_v52 = vshrl.u32 %v3841_v40, %v3857_v14  ;;  %v3862_v7 = vadd.s32 127, %v3861_v10 }
 0x177   :  { %v3679_v48 = vadd.s32 %v3677_v61, %v3671_v8  ;;  %v6220_v38 = vsel %vm6218_vm12, %v9603_v11, %v13167_v56  ;;  %v6223_v19 = vsel %vm6221_vm3, %v13168_v54, %v9611_v39  ;;  %vm3680_vm1 = vc.u32 %v3678_v31, %v3674_v53 }
 0x178   :  { %v13169_v42 = vand.u32 2147483647, %v13491_v60  ;;  %v6224_v9 = vsel %vm6217_vm6, %v6220_v38, %v6223_v19  ;;  %v3860_v40 = vor.u32 %v3859_v52, %v3858_v55  ;;  %v3863_v3 = vshll.u32 %v3862_v7, 23  ;;  %v13492_v52 = vld [vmem:[#allocation11_spill] sm:$0xff] }
 0x179   :  { %v3681_v58 = vsel %vm3680_vm1, 1, %v13444_v36  ;;  %v6225_v34 = vsel %vm13196_vm9, nan, %v6224_v9  ;;  %v9634_v45 = vadd.s32 %v3662_v57, %v3653_v18  ;;  %v3673_v26 = vshrl.u32 %v9585_v5, 16  ;;  %v13493_v5 = vld [vmem:[#allocation13_spill] sm:$0xff]  ;;  %v13494_v9 = vld [vmem:[#allocation16_spill] sm:$0xff] }
 0x17a   :  { %v3683_v30 = vadd.s32 %v3681_v58, %v3679_v48  ;;  %7738 = vmatpush.msra.mxu2 %v6225_v34  ;;  %v3864_v15 = vor.u32 4788187, %v3863_v3  ;;  %v3872_v8 = vsel %vm3749_vm11, %v3871_v13, %v9557_v16  ;;  %v3675_v22 = vshrl.u32 %v3670_v33, 16 }
 0x17b   :  { %v9640_v14 = vadd.s32 %v3678_v31, %v3674_v53  ;;  %v3867_v10 = vcvt.s32.f32 %v3860_v40  ;;  %v3446_v55 = vand.u32 8388607, %v13169_v42  ;;  %v3456_v18 = vshll.u32 %v13440_v12, %v13492_v52 }
 0x17c   :  { %v3684_v61 = vadd.s32 %v3683_v30, %v3673_v26  ;;  %v3865_v57 = vand.u32 2147483647, %v3864_v15  ;;  %v3457_v7 = vshrl.u32 %v13430_v44, %v13493_v5  ;;  %v3459_v48 = vshll.u32 %v13430_v44, %v13492_v52  ;;  %v13495_v30 = vld [vmem:[#allocation21_spill] sm:$0xff] }
 0x17d   :  { %v3460_v16 = vshrl.u32 %v13432_v43, %v13493_v5  ;;  %vm3688_vm0 = vc.u32 %v9634_v45, %v9640_v14  ;;  %v3462_v33 = vshll.u32 %v13432_v43, %v13492_v52  ;;  %v3463_v53 = vshrl.u32 %v13371_v23, %v13493_v5  ;;  %v13496_v15 = vld [vmem:[#allocation17_spill] sm:$0xff] }
 0x17e   :  { %v3685_v13 = vadd.s32 %v3684_v61, %v3675_v22  ;;  %v3868_v31 = vmul.f32 %v3867_v10, %v3865_v57  ;;  %v9658_v38 = vor.u32 %v3457_v7, %v3456_v18  ;;  %vm3471_vm2 = vcmp.lt.s32.totalorder %v13494_v9, 1 }
 0x17f   :  { %v9660_v19 = vor.u32 %v3460_v16, %v3459_v48  ;;  %v3447_v3 = vor.u32 8388608, %v3446_v55  ;;  %v9663_v58 = vor.u32 %v3463_v53, %v3462_v33  ;;  %vm3473_vm14 = vcmp.lt.s32.totalorder %v13494_v9, 3  ;;  %v13499_v48 = vld [vmem:[#allocation20_spill] sm:$0xff] }
 0x180   :  { %v3689_v40 = vadd.s32 1, %v3685_v13  ;;  %v3869_v34 = vxor.u32 2147483648, %v3868_v31  ;;  %v3686_v26 = vmul.u32 %v9523_v59, %v9601_v63  ;;  %vm3472_vm12 = vcmp.lt.s32.totalorder %v13494_v9, 2 }
 0x181   :  { %v3485_v22 = vsel %vm3473_vm14, %v13496_v15, %v13495_v30  ;;  %v9674_v10 = vsub.s32 32, %v9393_v51  ;;  %v13497_v61 = vand.u32 2147483647, %v13467_v6  ;;  %v3483_v59 = vsel %vm3471_vm2, %v9660_v19, %v9663_v58 }
 0x182   :  { %v3690_v55 = vsel %vm3688_vm0, %v3689_v40, %v3685_v13  ;;  %v3870_v63 = vsel %vm3749_vm11, %v3869_v34, %v3868_v31  ;;  %v3479_v57 = vsel %vm3471_vm2, %v9658_v38, %v9660_v19  ;;  %v3481_v16 = vsel %vm3473_vm14, %v9663_v58, %v13499_v48 }
 0x183   :  { %vm3748_vm6 = vcmp.le.f32.partialorder %v13497_v61, 0.7853982  ;;  %v3691_v18 = vadd.s32 %v3690_v55, %v3686_v26  ;;  %v3486_v13 = vsel %vm3472_vm12, %v3483_v59, %v3485_v22  ;;  %v9702_v33 = vshll.u32 %v3447_v3, 8 }
 0x184   :  { %v9687_v52 = vsel %vm3748_vm6, 0, %v3872_v8  ;;  %v9694_v7 = vsel %vm3748_vm6, %v13467_v6, %v3870_v63  ;;  %v3490_v31 = vand.u32 65535, %v3486_v13  ;;  %v3491_v40 = vshrl.u32 %v3486_v13, 16 }
 0x185   :  { %13498 = vst [vmem:[#allocation48_spill] sm:$0xff] %v9687_v52  ;;  %v3875_v8 = vmul.f32 %v9694_v7, %v9694_v7  ;;  %v3692_v53 = vadd.s32 536870912, %v3691_v18  ;;  %v9708_v34 = vshll.u32 %v13371_v23, %v9393_v51  ;;  %v7610_v26 = vadd.s32 3, %v9687_v52 }
 0x186   :  { %v3488_v30 = vand.u32 65535, %v9702_v33  ;;  %v3489_v15 = vshrl.u32 %v9702_v33, 16  ;;  %v3482_v55 = vsel %vm3472_vm12, %v3479_v57, %v3481_v16  ;;  %v13500_v59 = vmov 920167782  }
 0x187   :  { %v3876_v61 = vmul.f32 -0.001358992, %v3875_v8  ;;  %v3883_v22 = vmul.f32 -0.00019511016, %v3875_v8  ;;  %v9713_v3 = vshrl.u32 %v3692_v53, 30  ;;  %v9719_v63 = vshll.u32 %v13500_v59, %v9393_v51 }
 0x188   :  { %v3492_v48 = vmul.u32 %v3490_v31, %v3488_v30  ;;  %v3493_v13 = vmul.u32 %v3491_v40, %v3488_v30  ;;  %v9721_v56 = vmul.u32 %v3490_v31, %v3489_v15  ;;  %v9724_v54 = vshrl.u32 %v9553_v27, 5 }
 0x189   :  { %v3877_v42 = vadd.f32 0.041655596, %v3876_v61  ;;  %v3884_v46 = vadd.f32 0.008332121, %v3883_v22  ;;  %v3694_v11 = vshll.u32 %v9713_v3, 30  ;;  %v7611_v53 = vand.u32 3, %v7610_v26 }
 0x18a   :  { %13501 = vst [vmem:[#allocation31_spill] sm:$0xff] %v9724_v54  ;;  %v3496_v39 = vshll.u32 %v3493_v13, 16  ;;  %v3498_v24 = vshll.u32 %v9721_v56, 16  ;;  %v3513_v57 = vshrl.u32 %v3482_v55, 16  ;;  %v3495_v28 = vmul.u32 %v3491_v40, %v3489_v15 }
 0x18b   :  { %v3878_v16 = vmul.f32 %v3877_v42, %v3875_v8  ;;  %v3885_v49 = vmul.f32 %v3884_v46, %v3875_v8  ;;  %v9728_v2 = vsub.s32 %v3691_v18, %v3694_v11  ;;  %v9731_v31 = vand.u32 31, %v9553_v27 }
 0x18c   :  { %vm3500_vm3 = vc.u32 %v3492_v48, %v3496_v39  ;;  %v3502_v4 = vadd.s32 %v3496_v39, %v3492_v48  ;;  %v3512_v54 = vand.u32 65535, %v3482_v55  ;;  %vm7613_vm10 = vcmp.eq.s32.totalorder %v7611_v53, 0 }
 0x18d   :  { %13502 = vst [vmem:[#allocation35_spill] sm:$0xff] %v9731_v31  ;;  %v3879_v61 = vadd.f32 -0.4999988, %v3878_v16  ;;  %v3886_v22 = vadd.f32 -0.16666654, %v3885_v49  ;;  %vm3696_vm11 = vcmp.lt.s32.totalorder %v9728_v2, 0  ;;  %v3455_v42 = vshrl.u32 %v13440_v12, %v13493_v5 }
 0x18e   :  { %v3697_v26 = vsub.s32 0, %v9728_v2  ;;  %v3501_v46 = vsel %vm3500_vm3, 1, %v13444_v36  ;;  %vm3504_vm4 = vc.u32 %v3502_v4, %v3498_v24  ;;  %v9738_v11 = vmul.u32 %v3513_v57, %v3488_v30 }
 0x18f   :  { %v3880_v27 = vmul.f32 %v3879_v61, %v3875_v8  ;;  %v3887_v18 = vmul.f32 %v3886_v22, %v3875_v8  ;;  %vm7612_vm1 = vcmp.lt.s32.totalorder %v7611_v53, 2  ;;  %v3503_v40 = vadd.s32 %v3501_v46, %v3495_v28 }
 0x190   :  { %v3698_v39 = vsel %vm3696_vm11, %v3697_v26, %v9728_v2  ;;  %vm3890_vm0 = vweird.f32 %v13467_v6  ;;  %v3476_v55 = vsel %vm3474_vm7, %v9663_v58, 2102212464  ;;  %v3497_v48 = vshrl.u32 %v3493_v13, 16 }
 0x191   :  { %v3699_v49 = vclz %v3698_v39  ;;  %v3505_v5 = vsel %vm3504_vm4, 1, %v13444_v36  ;;  %v9746_v16 = vadd.f32 1.0, %v3880_v27  ;;  %v3888_v24 = vadd.f32 1.0, %v3887_v18 }
 0x192   :  { %v3507_v4 = vadd.s32 %v3505_v5, %v3503_v40  ;;  %v3516_v61 = vmul.u32 %v3512_v54, %v3489_v15  ;;  %vm7616_vm6 = vcmp.eq.s32.totalorder %v7611_v53, 2  ;;  %vm3595_vm3 = vcmp.lt.s32.totalorder %v13480_v50, 0 }
 0x193   :  { %13503 = vst [vmem:[#allocation36_spill] sm:$0xff] %v9746_v16  ;;  %v3687_v28 = vadd.s32 %v9640_v14, %v9634_v45  ;;  %v8119_v8 = vadd.s32 4294967294, %v3699_v49  ;;  %v3514_v22 = vmul.u32 %v3512_v54, %v3488_v30  ;;  %v9752_v26 = vmul.f32 %v3888_v24, %v9694_v7 }
 0x194   :  { %v13185_v58 = vxor.u32 2147483648, %v9746_v16  ;;  %v3475_v13 = vsel %vm3471_vm2, %v3455_v42, %v9658_v38  ;;  %v3518_v46 = vshll.u32 %v9738_v11, 16  ;;  %v3717_v27 = vsub.s32 4, %v9713_v3 }
 0x195   :  { %13504 = vst [vmem:[#allocation51_spill] sm:$0xff] %v9752_v26  ;;  %vm8120_vm7 = vcmp.lt.s32.totalorder %v8119_v8, 0  ;;  %v3477_v45 = vsel %vm3473_vm14, %v9660_v19, %v3476_v55  ;;  %v3517_v14 = vmul.u32 %v3513_v57, %v3489_v15  ;;  %v13186_v54 = vxor.u32 2147483648, %v9752_v26 }
 0x196   :  { %v3702_v7 = vsel %vm8120_vm7, 0, %v8119_v8  ;;  %v3508_v30 = vadd.s32 %v3507_v4, %v3497_v48  ;;  %v3520_v18 = vshll.u32 %v3516_v61, 16  ;;  %v7618_v38 = vsel %vm7616_vm6, %v13185_v58, %v9752_v26 }
 0x197   :  { %v3703_v42 = vsub.s32 32, %v3702_v7  ;;  %v3707_v39 = vsub.s32 4294967266, %v3702_v7  ;;  %vm3522_vm2 = vc.u32 %v3514_v22, %v3518_v46  ;;  %v7615_v40 = vsel %vm7613_vm10, %v9746_v16, %v13186_v54 }
 0x198   :  { %v3704_v19 = vshll.u32 %v9728_v2, %v3702_v7  ;;  %v3523_v15 = vsel %vm3522_vm2, 1, %v13444_v36  ;;  %v3524_v57 = vadd.s32 %v3518_v46, %v3514_v22  ;;  %v7619_v49 = vsel %vm7612_vm1, %v7615_v40, %v7618_v38  ;;  %v13508_v2 = vld [vmem:[#allocation23_spill] sm:$0xff] }
 0x199   :  { %v3705_v55 = vshrl.u32 %v3687_v28, %v3703_v42  ;;  %v3708_v48 = vadd.s32 127, %v3707_v39  ;;  %v3525_v5 = vadd.s32 %v3523_v15, %v3517_v14  ;;  %v7620_v24 = vsel %vm3890_vm0, nan, %v7619_v49 }
 0x19a   :  { %v13505_v4 = vand.u32 2147483647, %v13480_v50  ;;  %v3519_v58 = vshrl.u32 %v9738_v11, 16  ;;  %vm3526_vm11 = vc.u32 %v3524_v57, %v3520_v18  ;;  %v13187_v7 = vand.u32 2147483647, %v13508_v2  ;;  %7770 = vmatpush.msra.mxu3 %v7620_v24  ;;  %v13510_v24 = vld [vmem:[#allocation56_spill] sm:$0xff] }
 0x19b   :  { %v3706_v53 = vor.u32 %v3705_v55, %v3704_v19  ;;  %v3709_v22 = vshll.u32 %v3708_v48, 23  ;;  %v3499_v28 = vshrl.u32 %v9721_v56, 16  ;;  %v3527_v46 = vsel %vm3526_vm11, 1, %v13444_v36  ;;  %v13509_v55 = vld [vmem:[#allocation47_spill] sm:$0xff] }
 0x19c   :  { %vm9779_vm14 = vcmp.le.f32.partialorder %v13505_v4, 0.7853982  ;;  %v3718_v14 = vsel %vm3595_vm3, %v3717_v27, %v9713_v3  ;;  %v3478_v38 = vsel %vm3472_vm12, %v3475_v13, %v3477_v45  ;;  %v3521_v42 = vshrl.u32 %v3516_v61, 16 }
 0x19d   :  { %v3529_v39 = vadd.s32 %v3527_v46, %v3525_v5  ;;  %v3710_v11 = vor.u32 4788187, %v3709_v22  ;;  %v3509_v40 = vadd.s32 %v3508_v30, %v3499_v28  ;;  %v3528_v15 = vadd.s32 %v3524_v57, %v3520_v18  ;;  %v13511_v28 = vld [vmem:[#allocation64_spill] sm:$0xff] }
 0x19e   :  { %v982_v19 = vand.u32 8388607, %v13187_v7  ;;  %vm1602_vm10 = vcmp.gt.s32.totalorder %v9398_v20, 0  ;;  %v3713_v56 = vcvt.s32.f32 %v3706_v53  ;;  %v992_v48 = vshll.u32 %v13440_v12, %v13509_v55 }
 0x19f   :  { %v3530_v49 = vadd.s32 %v3529_v39, %v3519_v58  ;;  %v993_v3 = vshrl.u32 %v13430_v44, %v13510_v24  ;;  %v3711_v9 = vand.u32 2147483647, %v3710_v11  ;;  %v995_v61 = vshll.u32 %v13430_v44, %v13509_v55 }
 0x1a0   :  { %v983_v13 = vor.u32 8388608, %v982_v19  ;;  %v996_v27 = vshrl.u32 %v13432_v43, %v13510_v24  ;;  %v998_v58 = vshll.u32 %v13432_v43, %v13509_v55  ;;  %v999_v18 = vshrl.u32 %v13371_v23, %v13510_v24 }
 0x1a1   :  { %v3531_v45 = vadd.s32 %v3530_v49, %v3521_v42  ;;  %v9803_v30 = vor.u32 %v993_v3, %v992_v48  ;;  %v3714_v57 = vmul.f32 %v3713_v56, %v3711_v9  ;;  %v3532_v5 = vmul.u32 %v9702_v33, %v3478_v38  ;;  %v13513_v33 = vld [vmem:[#allocation78_spill] sm:$0xff]  ;;  %v13514_v38 = vld [vmem:[#allocation69_spill] sm:$0xff]  ;;  %v13515_v56 = vld [vmem:[#allocation76_spill] sm:$0xff] }
 0x1a2   :  { %vm3534_vm12 = vc.u32 %v3509_v40, %v3528_v15  ;;  %v9810_v4 = vor.u32 %v996_v27, %v995_v61  ;;  %v1000_v22 = vor.u32 %v999_v18, %v998_v58  ;;  %vm1007_vm4 = vcmp.lt.s32.totalorder %v13511_v28, 1 }
 0x1a3   :  { %v3535_v53 = vadd.s32 1, %v3531_v45  ;;  %vm1009_vm1 = vcmp.lt.s32.totalorder %v13511_v28, 3  ;;  %v3715_v46 = vxor.u32 2147483648, %v3714_v57  ;;  %v9816_v42 = vsel %vm9779_vm14, 0, %v3718_v14 }
 0x1a4   :  { %13512 = vst [vmem:[#allocation44_spill] sm:$0xff] %v9816_v42  ;;  %v1015_v39 = vsel %vm1007_vm4, %v9803_v30, %v9810_v4  ;;  %v1021_v11 = vsel %vm1009_vm1, %v13514_v38, %v13513_v33  ;;  %v1017_v49 = vsel %vm1009_vm1, %v1000_v22, %v13515_v56  ;;  %v1019_v14 = vsel %vm1007_vm4, %v9810_v4, %v1000_v22 }
 0x1a5   :  { %v3536_v19 = vsel %vm3534_vm12, %v3535_v53, %v3531_v45  ;;  %v9832_v55 = vshll.u32 %v983_v13, 8  ;;  %v9835_v48 = vadd.s32 1, %v9589_v29  ;;  %v3716_v3 = vsel %vm3595_vm3, %v3715_v46, %v3714_v57 }
 0x1a6   :  { %v3537_v9 = vadd.s32 %v3536_v19, %v3532_v5  ;;  %vm1008_vm6 = vcmp.lt.s32.totalorder %v13511_v28, 2  ;;  %v9842_v61 = vshrl.u32 %v13500_v59, %v9674_v10  ;;  %v9847_v27 = vsel %vm9779_vm14, %v13480_v50, %v3716_v3 }
 0x1a7   :  { %v7455_v13 = vadd.s32 3, %v9816_v42  ;;  %v1022_v29 = vsel %vm1008_vm6, %v1019_v14, %v1021_v11  ;;  %v3721_v45 = vmul.f32 %v9847_v27, %v9847_v27  ;;  %v9856_v18 = vsel %vm1008_vm6, %v1015_v39, %v1017_v49 }
 0x1a8   :  { %v3538_v58 = vadd.s32 536870912, %v3537_v9  ;;  %v1026_v57 = vand.u32 65535, %v1022_v29  ;;  %v13516_v5 = vmov 1326507024   ;;  %v1024_v8 = vand.u32 65535, %v9832_v55 }
 0x1a9   :  { %v9860_v53 = vshrl.u32 %v13516_v5, %v9674_v10  ;;  %v9864_v46 = vshrl.u32 %v9832_v55, 16  ;;  %v1027_v33 = vshrl.u32 %v1022_v29, 16  ;;  %v9869_v38 = vsel %vm1602_vm10, %v9398_v20, 0 }
 0x1aa   :  { %v3722_v11 = vmul.f32 -0.001358992, %v3721_v45  ;;  %v3729_v19 = vmul.f32 -0.00019511016, %v3721_v45  ;;  %v3539_v39 = vshrl.u32 %v3538_v58, 30  ;;  %v9871_v56 = vand.u32 3, %v7455_v13 }
 0x1ab   :  { %v1029_v49 = vmul.u32 %v1027_v33, %v1024_v8  ;;  %v9874_v14 = vmul.u32 %v1026_v57, %v9864_v46  ;;  %v1049_v3 = vshrl.u32 %v9856_v18, 16  ;;  %v9877_v41 = vadd.s32 %v3528_v15, %v3509_v40 }
 0x1ac   :  { %v3723_v54 = vadd.f32 0.041655596, %v3722_v11  ;;  %v3730_v7 = vadd.f32 0.008332121, %v3729_v19  ;;  %v3540_v29 = vshll.u32 %v3539_v39, 30  ;;  %v991_v20 = vshrl.u32 %v13440_v12, %v13510_v24 }
 0x1ad   :  { %v1028_v21 = vmul.u32 %v1026_v57, %v1024_v8  ;;  %v1032_v1 = vshll.u32 %v1029_v49, 16  ;;  %v1048_v58 = vand.u32 65535, %v9856_v18  ;;  %vm3441_vm3 = vcmp.lt.s32.totalorder %v13491_v60, 0 }
 0x1ae   :  { %v3724_v13 = vmul.f32 %v3723_v54, %v3721_v45  ;;  %v3731_v6 = vmul.f32 %v3730_v7, %v3721_v45  ;;  %v9883_v16 = vsub.s32 %v3537_v9, %v3540_v29  ;;  %v1031_v26 = vmul.u32 %v1027_v33, %v9864_v46 }
 0x1af   :  { %vm7461_vm7 = vcmp.eq.s32.totalorder %v9871_v56, 2  ;;  %v1034_v40 = vshll.u32 %v9874_v14, 16  ;;  %vm1036_vm2 = vc.u32 %v1028_v21, %v1032_v1  ;;  %v1038_v15 = vadd.s32 %v1032_v1, %v1028_v21 }
 0x1b0   :  { %v9888_v11 = vmul.u32 %v1049_v3, %v1024_v8  ;;  %v3725_v24 = vadd.f32 -0.4999988, %v3724_v13  ;;  %v3732_v57 = vadd.f32 -0.16666654, %v3731_v6  ;;  %vm3542_vm14 = vcmp.lt.s32.totalorder %v9883_v16, 0 }
 0x1b1   :  { %v3543_v54 = vsub.s32 0, %v9883_v16  ;;  %vm7458_vm11 = vcmp.eq.s32.totalorder %v9871_v56, 0  ;;  %v3563_v7 = vsub.s32 4, %v3539_v39  ;;  %v1012_v9 = vsel %vm1010_vm15, %v1000_v22, 2102212464 }
 0x1b2   :  { %v1037_v18 = vsel %vm1036_vm2, 1, %v13444_v36  ;;  %vm1040_vm10 = vc.u32 %v1038_v15, %v1034_v40  ;;  %v3726_v33 = vmul.f32 %v3725_v24, %v3721_v45  ;;  %v3733_v19 = vmul.f32 %v3732_v57, %v3721_v45 }
 0x1b3   :  { %vm7457_vm12 = vcmp.lt.s32.totalorder %v9871_v56, 2  ;;  %v3544_v1 = vsel %vm3542_vm14, %v3543_v54, %v9883_v16  ;;  %v1039_v6 = vadd.s32 %v1037_v18, %v1031_v26  ;;  %vm3736_vm9 = vweird.f32 %v13480_v50 }
 0x1b4   :  { %v3545_v21 = vclz %v3544_v1  ;;  %v1033_v29 = vshrl.u32 %v1029_v49, 16  ;;  %v1041_v13 = vsel %vm1040_vm10, 1, %v13444_v36  ;;  %v1052_v32 = vmul.u32 %v1048_v58, %v9864_v46 }
 0x1b5   :  { %v9901_v42 = vadd.f32 1.0, %v3726_v33  ;;  %v3734_v22 = vadd.f32 1.0, %v3733_v19  ;;  %v1043_v52 = vadd.s32 %v1041_v13, %v1039_v6  ;;  %v1054_v40 = vshll.u32 %v9888_v11, 16 }
 0x1b6   :  { %v13518_v45 = vand.u32 2147483647, %v13491_v60  ;;  %v8116_v26 = vadd.s32 4294967294, %v3545_v21  ;;  %v1011_v49 = vsel %vm1007_vm4, %v991_v20, %v9803_v30  ;;  %v1013_v24 = vsel %vm1009_vm1, %v9810_v4, %v1012_v9 }
 0x1b7   :  { %13517 = vst [vmem:[#allocation49_spill] sm:$0xff] %v9901_v42  ;;  %v1050_v57 = vmul.u32 %v1048_v58, %v1024_v8  ;;  %v9917_v54 = vmul.f32 %v3734_v22, %v9847_v27  ;;  %v13201_v18 = vxor.u32 2147483648, %v9901_v42  ;;  %v1035_v33 = vshrl.u32 %v9874_v14, 16 }
 0x1b8   :  { %vm9906_vm15 = vcmp.le.f32.partialorder %v13518_v45, 0.7853982  ;;  %v1044_v19 = vadd.s32 %v1043_v52, %v1033_v29  ;;  %vm8117_vm2 = vcmp.lt.s32.totalorder %v8116_v26, 0  ;;  %v3564_v1 = vsel %vm3441_vm3, %v3563_v7, %v3539_v39  ;;  %v13522_v7 = vld [vmem:[#allocation18_spill] sm:$0xff] }
 0x1b9   :  { %13521 = vst [vmem:[#allocation11_spill] sm:$0xff] %v9917_v54  ;;  %v1053_v6 = vmul.u32 %v1049_v3, %v9864_v46  ;;  %vm1058_vm4 = vc.u32 %v1050_v57, %v1054_v40  ;;  %v13202_v30 = vxor.u32 2147483648, %v9917_v54  ;;  %v7463_v4 = vsel %vm7461_vm7, %v13201_v18, %v9917_v54 }
 0x1ba   :  { %v3548_v27 = vsel %vm8117_vm2, 0, %v8116_v26  ;;  %v1056_v8 = vshll.u32 %v1052_v32, 16  ;;  %v9930_v52 = vadd.s32 %v1044_v19, %v1035_v33  ;;  %v1059_v58 = vsel %vm1058_vm4, 1, %v13444_v36 }
 0x1bb   :  { %v3549_v20 = vsub.s32 32, %v3548_v27  ;;  %v3553_v14 = vsub.s32 4294967266, %v3548_v27  ;;  %v7460_v46 = vsel %vm7458_vm11, %v9901_v42, %v13202_v30  ;;  %v1060_v39 = vadd.s32 %v1054_v40, %v1050_v57 }
 0x1bc   :  { %v1061_v3 = vadd.s32 %v1059_v58, %v1053_v6  ;;  %v13203_v9 = vand.u32 2147483647, %v13522_v7  ;;  %v7464_v21 = vsel %vm7457_vm12, %v7460_v46, %v7463_v4  ;;  %v3550_v29 = vshll.u32 %v9883_v16, %v3548_v27  ;;  %v13524_v4 = vld [vmem:[#allocation43_spill] sm:$0xff] }
 0x1bd   :  { %v3551_v13 = vshrl.u32 %v9877_v41, %v3549_v20  ;;  %v3554_v22 = vadd.s32 127, %v3553_v14  ;;  %v7465_v45 = vsel %vm3736_vm9, nan, %v7464_v21  ;;  %v1014_v26 = vsel %vm1008_vm6, %v1011_v49, %v1013_v24  ;;  %v13525_v20 = vld [vmem:[#allocation46_spill] sm:$0xff] }
 0x1be   :  { %vm1062_vm1 = vc.u32 %v1060_v39, %v1056_v8  ;;  %v9947_v33 = vadd.s32 %v1060_v39, %v1056_v8  ;;  %7771 = vmatpush.msra.mxu3 %v7465_v45  ;;  %v1906_v16 = vand.u32 8388607, %v13203_v9  ;;  %v9954_v41 = vsel %vm9906_vm15, 0, %v3564_v1 }
 0x1bf   :  { %v3552_v40 = vor.u32 %v3551_v13, %v3550_v29  ;;  %v3555_v57 = vshll.u32 %v3554_v22, 23  ;;  %v1063_v56 = vsel %vm1062_vm1, 1, %v13444_v36  ;;  %13523 = vst [vmem:[#allocation13_spill] sm:$0xff] %v9954_v41  ;;  %v1055_v19 = vshrl.u32 %v9888_v11, 16  ;;  %v13526_v13 = vld [vmem:[#allocation55_spill] sm:$0xff] }
 0x1c0   :  { %v1057_v6 = vshrl.u32 %v1052_v32, 16  ;;  %v1065_v28 = vadd.s32 %v1063_v56, %v1061_v3  ;;  %vm1070_vm6 = vc.u32 %v9930_v52, %v9947_v33  ;;  %v1907_v24 = vor.u32 8388608, %v1906_v16 }
 0x1c1   :  { %v3556_v49 = vor.u32 4788187, %v3555_v57  ;;  %v1916_v27 = vshll.u32 %v13440_v12, %v13524_v4  ;;  %v1917_v14 = vshrl.u32 %v13430_v44, %v13525_v20  ;;  %v1919_v1 = vshll.u32 %v13430_v44, %v13524_v4 }
 0x1c2   :  { %v1066_v8 = vadd.s32 %v1065_v28, %v1055_v19  ;;  %v1920_v11 = vshrl.u32 %v13432_v43, %v13525_v20  ;;  %v3559_v58 = vcvt.s32.f32 %v3552_v40  ;;  %v1922_v46 = vshll.u32 %v13432_v43, %v13524_v4  ;;  %v13527_v19 = vld [vmem:[#allocation71_spill] sm:$0xff]  ;;  %v13529_v4 = vld [vmem:[#allocation66_spill] sm:$0xff] }
 0x1c3   :  { %v3557_v32 = vand.u32 2147483647, %v3556_v49  ;;  %v1923_v39 = vshrl.u32 %v13371_v23, %v13525_v20  ;;  %v9971_v21 = vor.u32 %v1917_v14, %v1916_v27  ;;  %vm1931_vm7 = vcmp.lt.s32.totalorder %v13526_v13, 1 }
 0x1c4   :  { %v1067_v3 = vadd.s32 %v1066_v8, %v1057_v6  ;;  %v9973_v29 = vor.u32 %v1920_v11, %v1919_v1  ;;  %vm1933_vm14 = vcmp.lt.s32.totalorder %v13526_v13, 3  ;;  %v9977_v57 = vshll.u32 %v1907_v24, 8  ;;  %v13528_v6 = vld [vmem:[#allocation62_spill] sm:$0xff] }
 0x1c5   :  { %v3560_v22 = vmul.f32 %v3559_v58, %v3557_v32  ;;  %v1924_v45 = vor.u32 %v1923_v39, %v1922_v46  ;;  %v1068_v40 = vmul.u32 %v9832_v55, %v1014_v26  ;;  %v1945_v28 = vsel %vm1933_vm14, %v13528_v6, %v13527_v19 }
 0x1c6   :  { %v1071_v56 = vadd.s32 1, %v1067_v3  ;;  %v1939_v16 = vsel %vm1931_vm7, %v9971_v21, %v9973_v29  ;;  %vm1932_vm11 = vcmp.lt.s32.totalorder %v13526_v13, 2  ;;  %v13530_v26 = vand.u32 2139095040, %v9039_v37 }
 0x1c7   :  { %v3561_v49 = vxor.u32 2147483648, %v3560_v22  ;;  %v1941_v24 = vsel %vm1933_vm14, %v1924_v45, %v13529_v4  ;;  %v1943_v55 = vsel %vm1931_vm7, %v9973_v29, %v1924_v45  ;;  %v7300_v8 = vadd.s32 3, %v9954_v41 }
 0x1c8   :  { %v9997_v27 = vshrl.u32 %v13530_v26, 23  ;;  %v1072_v14 = vsel %vm1070_vm6, %v1071_v56, %v1067_v3  ;;  %v1946_v1 = vsel %vm1932_vm11, %v1943_v55, %v1945_v28  ;;  %v10009_v58 = vsel %vm1932_vm11, %v1939_v16, %v1941_v24 }
 0x1c9   :  { %v3562_v11 = vsel %vm3441_vm3, %v3561_v49, %v3560_v22  ;;  %v1073_v32 = vadd.s32 %v1072_v14, %v1068_v40  ;;  %v1948_v46 = vand.u32 65535, %v9977_v57  ;;  %v10018_v3 = vshrl.u32 %v9977_v57, 16 }
 0x1ca   :  { %v10015_v39 = vsel %vm9906_vm15, %v13491_v60, %v3562_v11  ;;  %v1950_v56 = vand.u32 65535, %v1946_v1  ;;  %v1951_v19 = vshrl.u32 %v1946_v1, 16  ;;  %v10021_v6 = vsub.s32 32, %v9731_v31 }
 0x1cb   :  { %v10025_v22 = vshll.u32 %v13371_v23, %v9731_v31  ;;  %v3567_v40 = vmul.f32 %v10015_v39, %v10015_v39  ;;  %v1074_v16 = vadd.s32 536870912, %v1073_v32  ;;  %v10031_v15 = vshll.u32 %v13500_v59, %v9731_v31 }
 0x1cc   :  { %13531 = vst [vmem:[#allocation16_spill] sm:$0xff] %v10021_v6  ;;  %v1953_v28 = vmul.u32 %v1951_v19, %v1948_v46  ;;  %v10034_v49 = vmul.u32 %v1950_v56, %v10018_v3  ;;  %v1973_v4 = vshrl.u32 %v10009_v58, 16  ;;  %v10039_v24 = vor.u32 %v9842_v61, %v9708_v34 }
 0x1cd   :  { %13532 = vst [vmem:[#allocation21_spill] sm:$0xff] %v10025_v22  ;;  %v3568_v55 = vmul.f32 -0.001358992, %v3567_v40  ;;  %v3575_v26 = vmul.f32 -0.00019511016, %v3567_v40  ;;  %v10041_v14 = vshrl.u32 %v1074_v16, 30  ;;  %v1952_v18 = vmul.u32 %v1950_v56, %v1948_v46 }
 0x1ce   :  { %13533 = vst [vmem:[#allocation17_spill] sm:$0xff] %v10031_v15  ;;  %v10045_v11 = vand.u32 3, %v7300_v8  ;;  %v1956_v30 = vshll.u32 %v1953_v28, 16  ;;  %v10049_v15 = vadd.s32 %v9947_v33, %v9930_v52  ;;  %v1958_v61 = vshll.u32 %v10034_v49, 16 }
 0x1cf   :  { %v3569_v9 = vadd.f32 0.041655596, %v3568_v55  ;;  %v3576_v31 = vadd.f32 0.008332121, %v3575_v26  ;;  %v1076_v34 = vshll.u32 %v10041_v14, 30  ;;  %v10053_v22 = vmul.u32 %v1973_v4, %v1948_v46 }
 0x1d0   :  { %vm1960_vm3 = vc.u32 %v1952_v18, %v1956_v30  ;;  %v1962_v16 = vadd.s32 %v1956_v30, %v1952_v18  ;;  %v1972_v56 = vand.u32 65535, %v10009_v58  ;;  %v1915_v55 = vshrl.u32 %v13440_v12, %v13525_v20 }
 0x1d1   :  { %v3570_v6 = vmul.f32 %v3569_v9, %v3567_v40  ;;  %v3577_v1 = vmul.f32 %v3576_v31, %v3567_v40  ;;  %v10055_v8 = vsub.s32 %v1073_v32, %v1076_v34  ;;  %v1955_v52 = vmul.u32 %v1951_v19, %v10018_v3 }
 0x1d2   :  { %v1961_v33 = vsel %vm1960_vm3, 1, %v13444_v36  ;;  %vm1964_vm10 = vc.u32 %v1962_v16, %v1958_v61  ;;  %vm7306_vm12 = vcmp.eq.s32.totalorder %v10045_v11, 2  ;;  %vm7303_vm2 = vcmp.eq.s32.totalorder %v10045_v11, 0 }
 0x1d3   :  { %v3571_v26 = vadd.f32 -0.4999988, %v3570_v6  ;;  %v3578_v37 = vadd.f32 -0.16666654, %v3577_v1  ;;  %vm1078_vm15 = vcmp.lt.s32.totalorder %v10055_v8, 0  ;;  %v1079_v31 = vsub.s32 0, %v10055_v8 }
 0x1d4   :  { %v1936_v18 = vsel %vm1934_vm13, %v1924_v45, 2102212464  ;;  %v1963_v30 = vadd.s32 %v1961_v33, %v1955_v52  ;;  %v1965_v9 = vsel %vm1964_vm10, 1, %v13444_v36  ;;  %v1978_v20 = vshll.u32 %v10053_v22, 16 }
 0x1d5   :  { %v3572_v32 = vmul.f32 %v3571_v26, %v3567_v40  ;;  %v3579_v58 = vmul.f32 %v3578_v37, %v3567_v40  ;;  %vm7302_vm4 = vcmp.lt.s32.totalorder %v10045_v11, 2  ;;  %v1080_v19 = vsel %vm1078_vm15, %v1079_v31, %v10055_v8 }
 0x1d6   :  { %v1974_v6 = vmul.u32 %v1972_v56, %v1948_v46  ;;  %vm3582_vm1 = vweird.f32 %v13491_v60  ;;  %v1081_v1 = vclz %v1080_v19  ;;  %v1935_v34 = vsel %vm1931_vm7, %v1915_v55, %v9971_v21 }
 0x1d7   :  { %v1967_v45 = vadd.s32 %v1965_v9, %v1963_v30  ;;  %v1976_v61 = vmul.u32 %v1972_v56, %v10018_v3  ;;  %v10077_v16 = vadd.f32 1.0, %v3572_v32  ;;  %v3580_v52 = vadd.f32 1.0, %v3579_v58 }
 0x1d8   :  { %v1957_v33 = vshrl.u32 %v1953_v28, 16  ;;  %vm1982_vm13 = vc.u32 %v1974_v6, %v1978_v20  ;;  %vm977_vm6 = vcmp.lt.s32.totalorder %v13508_v2, 0  ;;  %v8068_v37 = vadd.s32 4294967294, %v1081_v1 }
 0x1d9   :  { %13534 = vst [vmem:[#allocation20_spill] sm:$0xff] %v10077_v16  ;;  %v1937_v46 = vsel %vm1933_vm14, %v9973_v29, %v1936_v18  ;;  %v1959_v40 = vshrl.u32 %v10034_v49, 16  ;;  %v1977_v26 = vmul.u32 %v1973_v4, %v10018_v3  ;;  %v10086_v21 = vmul.f32 %v3580_v52, %v10015_v39 }
 0x1da   :  { %v13210_v56 = vxor.u32 2147483648, %v10077_v16  ;;  %v1968_v55 = vadd.s32 %v1967_v45, %v1957_v33  ;;  %v1983_v28 = vsel %vm1982_vm13, 1, %v13444_v36  ;;  %vm8069_vm7 = vcmp.lt.s32.totalorder %v8068_v37, 0 }
 0x1db   :  { %13535 = vst [vmem:[#allocation47_spill] sm:$0xff] %v10086_v21  ;;  %v1980_v31 = vshll.u32 %v1976_v61, 16  ;;  %v1984_v30 = vadd.s32 %v1978_v20, %v1974_v6  ;;  %v1985_v9 = vadd.s32 %v1983_v28, %v1977_v26  ;;  %v13209_v32 = vxor.u32 2147483648, %v10086_v21 }
 0x1dc   :  { %v1084_v58 = vsel %vm8069_vm7, 0, %v8068_v37  ;;  %v1099_v29 = vsub.s32 4, %v10041_v14  ;;  %v1979_v49 = vshrl.u32 %v10053_v22, 16  ;;  %v7308_v39 = vsel %vm7306_vm12, %v13210_v56, %v10086_v21 }
 0x1dd   :  { %v1085_v3 = vsub.s32 32, %v1084_v58  ;;  %v1089_v4 = vsub.s32 4294967266, %v1084_v58  ;;  %vm1986_vm14 = vc.u32 %v1984_v30, %v1980_v31  ;;  %v7305_v18 = vsel %vm7303_vm2, %v10077_v16, %v13209_v32 }
 0x1de   :  { %v1086_v20 = vshll.u32 %v10055_v8, %v1084_v58  ;;  %v10104_v19 = vadd.s32 %v1968_v55, %v1959_v40  ;;  %v1987_v22 = vsel %vm1986_vm14, 1, %v13444_v36  ;;  %v7309_v6 = vsel %vm7302_vm4, %v7305_v18, %v7308_v39  ;;  %v13539_v40 = vld [vmem:[#allocation10_spill] sm:$0xff] }
 0x1df   :  { %v1087_v1 = vshrl.u32 %v10049_v15, %v1085_v3  ;;  %v1090_v45 = vadd.s32 127, %v1089_v4  ;;  %v1989_v52 = vadd.s32 %v1987_v22, %v1985_v9  ;;  %v7310_v33 = vsel %vm3582_vm1, nan, %v7309_v6  ;;  %v13540_v4 = vld [vmem:[#allocation25_spill] sm:$0xff] }
 0x1e0   :  { %v13536_v37 = vand.u32 2147483647, %v13508_v2  ;;  %v1981_v8 = vshrl.u32 %v1976_v61, 16  ;;  %v13211_v55 = vand.u32 2147483647, %v13539_v40  ;;  %7772 = vmatpush.msra.mxu3 %v7310_v33  ;;  %v10119_v58 = vadd.s32 %v1984_v30, %v1980_v31  ;;  %v13541_v31 = vld [vmem:[#allocation28_spill] sm:$0xff] }
 0x1e1   :  { %v1088_v28 = vor.u32 %v1087_v1, %v1086_v20  ;;  %v1091_v11 = vshll.u32 %v1090_v45, 23  ;;  %v1990_v15 = vadd.s32 %v1989_v52, %v1979_v49  ;;  %v1100_v9 = vsel %vm977_vm6, %v1099_v29, %v10041_v14 }
 0x1e2   :  { %vm10114_vm3 = vcmp.le.f32.partialorder %v13536_v37, 0.7853982  ;;  %v1938_v39 = vsel %vm1932_vm11, %v1935_v34, %v1937_v46  ;;  %v1752_v3 = vand.u32 8388607, %v13211_v55  ;;  %v1762_v61 = vshll.u32 %v13440_v12, %v13540_v4 }
 0x1e3   :  { %v1092_v18 = vor.u32 4788187, %v1091_v11  ;;  %v1991_v22 = vadd.s32 %v1990_v15, %v1981_v8  ;;  %vm1994_vm10 = vc.u32 %v10104_v19, %v10119_v58  ;;  %v1763_v30 = vshrl.u32 %v13430_v44, %v13541_v31  ;;  %v13543_v15 = vld [vmem:[#allocation29_spill] sm:$0xff] }
 0x1e4   :  { %vm3166_vm12 = vcmp.lt.s32.totalorder %v9383_v17, 4  ;;  %v1753_v14 = vor.u32 8388608, %v1752_v3  ;;  %v1765_v13 = vshll.u32 %v13430_v44, %v13540_v4  ;;  %v1766_v34 = vshrl.u32 %v13432_v43, %v13541_v31  ;;  %v13544_v3 = vld [vmem:[#allocation39_spill] sm:$0xff] }
 0x1e5   :  { %v1768_v46 = vshll.u32 %v13432_v43, %v13540_v4  ;;  %v1093_v29 = vand.u32 2147483647, %v1092_v18  ;;  %v1095_v49 = vcvt.s32.f32 %v1088_v28  ;;  %v1995_v20 = vadd.s32 1, %v1991_v22  ;;  %v13545_v4 = vld [vmem:[#allocation32_spill] sm:$0xff] }
 0x1e6   :  { %v1769_v6 = vshrl.u32 %v13371_v23, %v13541_v31  ;;  %v10145_v1 = vsel %vm10114_vm3, 0, %v1100_v9  ;;  %v1992_v45 = vmul.u32 %v9977_v57, %v1938_v39  ;;  %v1764_v52 = vor.u32 %v1763_v30, %v1762_v61 }
 0x1e7   :  { %13542 = vst [vmem:[#allocation56_spill] sm:$0xff] %v10145_v1  ;;  %v1767_v33 = vor.u32 %v1766_v34, %v1765_v13  ;;  %v1096_v37 = vmul.f32 %v1095_v49, %v1093_v29  ;;  %v1996_v8 = vsel %vm1994_vm10, %v1995_v20, %v1991_v22  ;;  %vm1779_vm11 = vcmp.lt.s32.totalorder %v13543_v15, 3  ;;  %v13546_v29 = vld [vmem:[#allocation38_spill] sm:$0xff] }
 0x1e8   :  { %v1770_v11 = vor.u32 %v1769_v6, %v1768_v46  ;;  %v1997_v28 = vadd.s32 %v1996_v8, %v1992_v45  ;;  %vm1777_vm15 = vcmp.lt.s32.totalorder %v13543_v15, 1  ;;  %v1791_v9 = vsel %vm1779_vm11, %v13545_v4, %v13544_v3 }
 0x1e9   :  { %v10157_v18 = vshll.u32 %v1753_v14, 8  ;;  %v10160_v57 = vshrl.u32 %v9869_v38, 5  ;;  %v1097_v39 = vxor.u32 2147483648, %v1096_v37  ;;  %vm1778_vm2 = vcmp.lt.s32.totalorder %v13543_v15, 2 }
 0x1ea   :  { %v1789_v61 = vsel %vm1777_vm15, %v1767_v33, %v1770_v11  ;;  %v4820_v22 = vadd.s32 3, %v10145_v1  ;;  %v1998_v30 = vadd.s32 536870912, %v1997_v28  ;;  %v1761_v13 = vshrl.u32 %v13440_v12, %v13541_v31 }
 0x1eb   :  { %v1792_v34 = vsel %vm1778_vm2, %v1789_v61, %v1791_v9  ;;  %v1098_v14 = vsel %vm977_vm6, %v1097_v39, %v1096_v37  ;;  %v1785_v46 = vsel %vm1777_vm15, %v1764_v52, %v1767_v33  ;;  %v1787_v49 = vsel %vm1779_vm11, %v1770_v11, %v13546_v29 }
 0x1ec   :  { %v10178_v20 = vand.u32 65535, %v10157_v18  ;;  %v1101_v31 = vsel %vm10114_vm3, %v13508_v2, %v1098_v14  ;;  %v10183_v6 = vshrl.u32 %v1998_v30, 30  ;;  %v1796_v45 = vand.u32 65535, %v1792_v34 }
 0x1ed   :  { %v1797_v8 = vshrl.u32 %v1792_v34, 16  ;;  %v10188_v37 = vsel %vm3166_vm12, %v10039_v24, 920167782  ;;  %v10191_v3 = vand.u32 31, %v9869_v38  ;;  %v10194_v4 = vadd.s32 4294967169, %v9997_v27 }
 0x1ee   :  { %v1103_v9 = vmul.f32 %v1101_v31, %v1101_v31  ;;  %v2000_v39 = vshll.u32 %v10183_v6, 30  ;;  %vm13548_vm4 = vcmp.lt.s32.totalorder %v13543_v15, 4  ;;  %v1795_v61 = vshrl.u32 %v10157_v18, 16 }
 0x1ef   :  { %13547 = vst [vmem:[#allocation64_spill] sm:$0xff] %v10191_v3  ;;  %v1782_v26 = vsel %vm13548_vm4, %v1770_v11, 2102212464  ;;  %v1799_v30 = vmul.u32 %v1797_v8, %v10178_v20  ;;  %v10201_v29 = vand.u32 3, %v4820_v22  ;;  %v1788_v38 = vsel %vm1778_vm2, %v1785_v46, %v1787_v49 }
 0x1f0   :  { %v1104_v34 = vmul.f32 -0.001358992, %v1103_v9  ;;  %v1111_v14 = vmul.f32 -0.00019511016, %v1103_v9  ;;  %v10205_v32 = vsub.s32 %v1997_v28, %v2000_v39  ;;  %v1781_v27 = vsel %vm1777_vm15, %v1761_v13, %v1764_v52 }
 0x1f1   :  { %v10209_v56 = vmul.u32 %v1796_v45, %v1795_v61  ;;  %v1802_v55 = vshll.u32 %v1799_v30, 16  ;;  %v1783_v50 = vsel %vm1779_vm11, %v1767_v33, %v1782_v26  ;;  %v1798_v42 = vmul.u32 %v1796_v45, %v10178_v20 }
 0x1f2   :  { %v1105_v11 = vadd.f32 0.041655596, %v1104_v34  ;;  %v1112_v1 = vadd.f32 0.008332121, %v1111_v14  ;;  %vm2002_vm13 = vcmp.lt.s32.totalorder %v10205_v32, 0  ;;  %v2003_v22 = vsub.s32 0, %v10205_v32 }
 0x1f3   :  { %v1801_v46 = vmul.u32 %v1797_v8, %v1795_v61  ;;  %v1818_v28 = vand.u32 65535, %v1788_v38  ;;  %vm1806_vm6 = vc.u32 %v1798_v42, %v1802_v55  ;;  %v1808_v52 = vadd.s32 %v1802_v55, %v1798_v42 }
 0x1f4   :  { %v1106_v49 = vmul.f32 %v1105_v11, %v1103_v9  ;;  %v1113_v39 = vmul.f32 %v1112_v1, %v1103_v9  ;;  %v2004_v13 = vsel %vm2002_vm13, %v2003_v22, %v10205_v32  ;;  %v1804_v34 = vshll.u32 %v10209_v56, 16 }
 0x1f5   :  { %v1807_v14 = vsel %vm1806_vm6, 1, %v13444_v36  ;;  %v1819_v54 = vshrl.u32 %v1788_v38, 16  ;;  %v2005_v45 = vclz %v2004_v13  ;;  %v13549_v16 = vor.u32 %v9860_v53, %v9719_v63 }
 0x1f6   :  { %v1107_v33 = vadd.f32 -0.4999988, %v1106_v49  ;;  %v1114_v26 = vadd.f32 -0.16666654, %v1113_v39  ;;  %v1809_v60 = vadd.s32 %v1807_v14, %v1801_v46  ;;  %vm4823_vm7 = vcmp.eq.s32.totalorder %v10201_v29, 0 }
 0x1f7   :  { %v10224_v8 = vsel %vm3166_vm12, %v13549_v16, 1326507024  ;;  %vm4826_vm14 = vcmp.eq.s32.totalorder %v10201_v29, 2  ;;  %vm1810_vm3 = vc.u32 %v1808_v52, %v1804_v34  ;;  %vm4822_vm10 = vcmp.lt.s32.totalorder %v10201_v29, 2 }
 0x1f8   :  { %v1108_v42 = vmul.f32 %v1107_v33, %v1103_v9  ;;  %v1115_v55 = vmul.f32 %v1114_v26, %v1103_v9  ;;  %v8086_v1 = vadd.s32 4294967294, %v2005_v45  ;;  %v1811_v38 = vsel %vm1810_vm3, 1, %v13444_v36 }
 0x1f9   :  { %vm13238_vm11 = vweird.f32 %v13508_v2  ;;  %v1993_v63 = vadd.s32 %v10119_v58, %v10104_v19  ;;  %v10235_v53 = vsel %vm1778_vm2, %v1781_v27, %v1783_v50  ;;  %v1813_v16 = vadd.s32 %v1811_v38, %v1809_v60 }
 0x1fa   :  { %v1821_v11 = vmul.u32 %v1819_v54, %v10178_v20  ;;  %v10238_v22 = vadd.f32 1.0, %v1108_v42  ;;  %v1116_v9 = vadd.f32 1.0, %v1115_v55  ;;  %vm8087_vm15 = vcmp.lt.s32.totalorder %v8086_v1, 0 }
 0x1fb   :  { %v1822_v46 = vmul.u32 %v1818_v28, %v1795_v61  ;;  %v2008_v49 = vsel %vm8087_vm15, 0, %v8086_v1  ;;  %v1803_v39 = vshrl.u32 %v1799_v30, 16  ;;  %v1805_v52 = vshrl.u32 %v10209_v56, 16 }
 0x1fc   :  { %13550 = vst [vmem:[#allocation78_spill] sm:$0xff] %v10238_v22  ;;  %v1824_v13 = vshll.u32 %v1821_v11, 16  ;;  %v10241_v34 = vmul.f32 %v1116_v9, %v1101_v31  ;;  %v13221_v19 = vxor.u32 2147483648, %v10238_v22  ;;  %v2009_v58 = vsub.s32 32, %v2008_v49 }
 0x1fd   :  { %v1820_v50 = vmul.u32 %v1818_v28, %v10178_v20  ;;  %v2010_v60 = vshll.u32 %v10205_v32, %v2008_v49  ;;  %v2013_v15 = vsub.s32 4294967266, %v2008_v49  ;;  %v1814_v27 = vadd.s32 %v1813_v16, %v1803_v39  ;;  %v13552_v28 = vld [vmem:[#allocation30_spill] sm:$0xff] }
 0x1fe   :  { %13551 = vst [vmem:[#allocation69_spill] sm:$0xff] %v10241_v34  ;;  %v1823_v14 = vmul.u32 %v1819_v54, %v1795_v61  ;;  %v13222_v33 = vxor.u32 2147483648, %v10241_v34  ;;  %v2011_v26 = vshrl.u32 %v1993_v63, %v2009_v58  ;;  %v1826_v45 = vshll.u32 %v1822_v46, 16 }
 0x1ff   :  { %vm1828_vm2 = vc.u32 %v1820_v50, %v1824_v13  ;;  %v4828_v56 = vsel %vm4826_vm14, %v13221_v19, %v10241_v34  ;;  %vm1901_vm4 = vcmp.lt.s32.totalorder %v13522_v7, 0  ;;  %v2014_v31 = vadd.s32 127, %v2013_v15 }
 0x200   :  { %v1829_v20 = vsel %vm1828_vm2, 1, %v13444_v36  ;;  %v1830_v32 = vadd.s32 %v1824_v13, %v1820_v50  ;;  %v4825_v54 = vsel %vm4823_vm7, %v10238_v22, %v13222_v33  ;;  %v2012_v61 = vor.u32 %v2011_v26, %v2010_v60  ;;  %v13556_v26 = vld [vmem:[#allocation65_spill] sm:$0xff] }
 0x201   :  { %v1831_v30 = vadd.s32 %v1829_v20, %v1823_v14  ;;  %v13223_v42 = vand.u32 2147483647, %v13552_v28  ;;  %v4829_v55 = vsel %vm4822_vm10, %v4825_v54, %v4828_v56  ;;  %v2015_v1 = vshll.u32 %v2014_v31, 23  ;;  %v13557_v31 = vld [vmem:[#allocation73_spill] sm:$0xff] }
 0x202   :  { %v2023_v38 = vsub.s32 4, %v10183_v6  ;;  %vm1832_vm13 = vc.u32 %v1830_v32, %v1826_v45  ;;  %v4830_v63 = vsel %vm13238_vm11, nan, %v4829_v55  ;;  %v13553_v16 = vand.u32 2147483647, %v13522_v7 }
 0x203   :  { %v10271_v49 = vadd.s32 %v1814_v27, %v1805_v52  ;;  %v1825_v39 = vshrl.u32 %v1821_v11, 16  ;;  %v1833_v13 = vsel %vm1832_vm13, 1, %v13444_v36  ;;  %7665 = vmatpush.msra.mxu0 %v4830_v63  ;;  %v2016_v29 = vor.u32 4788187, %v2015_v1 }
 0x204   :  { %vm10267_vm6 = vcmp.le.f32.partialorder %v13553_v16, 0.7853982  ;;  %v1827_v58 = vshrl.u32 %v1822_v46, 16  ;;  %v10274_v50 = vadd.s32 %v1830_v32, %v1826_v45  ;;  %v1835_v60 = vadd.s32 %v1833_v13, %v1831_v30  ;;  %v13558_v13 = vld [vmem:[#allocation75_spill] sm:$0xff] }
 0x205   :  { %v2019_v15 = vcvt.s32.f32 %v2012_v61  ;;  %v828_v14 = vand.u32 8388607, %v13223_v42  ;;  %v838_v56 = vshll.u32 %v13440_v12, %v13556_v26  ;;  %v839_v52 = vshrl.u32 %v13430_v44, %v13557_v31 }
 0x206   :  { %v2017_v27 = vand.u32 2147483647, %v2016_v29  ;;  %v1836_v11 = vadd.s32 %v1835_v60, %v1825_v39  ;;  %v841_v20 = vshll.u32 %v13430_v44, %v13556_v26  ;;  %v842_v46 = vshrl.u32 %v13432_v43, %v13557_v31 }
 0x207   :  { %v829_v45 = vor.u32 8388608, %v828_v14  ;;  %v10286_v32 = vor.u32 %v839_v52, %v838_v56  ;;  %v844_v54 = vshll.u32 %v13432_v43, %v13556_v26  ;;  %v845_v61 = vshrl.u32 %v13371_v23, %v13557_v31 }
 0x208   :  { %v2020_v30 = vmul.f32 %v2019_v15, %v2017_v27  ;;  %v1837_v55 = vadd.s32 %v1836_v11, %v1827_v58  ;;  %v1838_v1 = vmul.u32 %v10157_v18, %v10235_v53  ;;  %v10294_v63 = vor.u32 %v842_v46, %v841_v20  ;;  %v13559_v58 = vld [vmem:[#allocation90_spill] sm:$0xff]  ;;  %v13560_v15 = vld [vmem:[#allocation84_spill] sm:$0xff]  ;;  %v13561_v53 = vld [vmem:[#allocation89_spill] sm:$0xff] }
 0x209   :  { %v2024_v16 = vsel %vm1901_vm4, %v2023_v38, %v10183_v6  ;;  %vm1840_vm7 = vc.u32 %v10271_v49, %v10274_v50  ;;  %v10301_v39 = vor.u32 %v845_v61, %v844_v54  ;;  %vm855_vm14 = vcmp.lt.s32.totalorder %v13558_v13, 3 }
 0x20a   :  { %v2021_v29 = vxor.u32 2147483648, %v2020_v30  ;;  %v1841_v60 = vadd.s32 1, %v1837_v55  ;;  %vm853_vm3 = vcmp.lt.s32.totalorder %v13558_v13, 1  ;;  %v867_v18 = vsel %vm855_vm14, %v13560_v15, %v13559_v58 }
 0x20b   :  { %v861_v6 = vsel %vm853_vm3, %v10286_v32, %v10294_v63  ;;  %v863_v38 = vsel %vm855_vm14, %v10301_v39, %v13561_v53  ;;  %v865_v14 = vsel %vm853_vm3, %v10294_v63, %v10301_v39  ;;  %v10321_v26 = vshll.u32 %v829_v45, 8 }
 0x20c   :  { %v2022_v56 = vsel %vm1901_vm4, %v2021_v29, %v2020_v30  ;;  %v10327_v52 = vsel %vm10267_vm6, 0, %v2024_v16  ;;  %v1842_v27 = vsel %vm1840_vm7, %v1841_v60, %v1837_v55  ;;  %vm854_vm10 = vcmp.lt.s32.totalorder %v13558_v13, 2 }
 0x20d   :  { %13562 = vst [vmem:[#allocation76_spill] sm:$0xff] %v10327_v52  ;;  %v10331_v11 = vsub.s32 32, %v10191_v3  ;;  %v10336_v20 = vsel %vm10267_vm6, %v13522_v7, %v2022_v56  ;;  %v1843_v46 = vadd.s32 %v1842_v27, %v1838_v1  ;;  %v868_v45 = vsel %vm854_vm10, %v865_v14, %v867_v18 }
 0x20e   :  { %v10342_v54 = vshll.u32 %v13371_v23, %v10191_v3  ;;  %v2027_v61 = vmul.f32 %v10336_v20, %v10336_v20  ;;  %v10348_v30 = vsel %vm854_vm10, %v861_v6, %v863_v38  ;;  %v872_v55 = vand.u32 65535, %v868_v45 }
 0x20f   :  { %13563 = vst [vmem:[#allocation43_spill] sm:$0xff] %v10331_v11  ;;  %v5750_v9 = vadd.s32 3, %v10327_v52  ;;  %v1844_v16 = vadd.s32 536870912, %v1843_v46  ;;  %v870_v1 = vand.u32 65535, %v10321_v26  ;;  %v873_v29 = vshrl.u32 %v868_v45, 16 }
 0x210   :  { %v10354_v60 = vshll.u32 %v13500_v59, %v10191_v3  ;;  %v2028_v58 = vmul.f32 -0.001358992, %v2027_v61  ;;  %v2035_v15 = vmul.f32 -0.00019511016, %v2027_v61  ;;  %v10357_v18 = vshrl.u32 %v10321_v26, 16 }
 0x211   :  { %v10361_v6 = vshrl.u32 %v13500_v59, %v10331_v11  ;;  %v10363_v53 = vshrl.u32 %v1844_v16, 30  ;;  %v875_v38 = vmul.u32 %v873_v29, %v870_v1  ;;  %v895_v14 = vshrl.u32 %v10348_v30, 16 }
 0x212   :  { %v10368_v56 = vshrl.u32 %v13516_v5, %v10331_v11  ;;  %v2029_v27 = vadd.f32 0.041655596, %v2028_v58  ;;  %v2036_v45 = vadd.f32 0.008332121, %v2035_v15  ;;  %v10371_v19 = vmul.u32 %v872_v55, %v10357_v18 }
 0x213   :  { %v10373_v33 = vand.u32 3, %v5750_v9  ;;  %v1846_v42 = vshll.u32 %v10363_v53, 30  ;;  %v874_v52 = vmul.u32 %v872_v55, %v870_v1  ;;  %v878_v2 = vshll.u32 %v875_v38, 16 }
 0x214   :  { %v2030_v16 = vmul.f32 %v2029_v27, %v2027_v61  ;;  %v2037_v22 = vmul.f32 %v2036_v45, %v2027_v61  ;;  %v877_v34 = vmul.u32 %v873_v29, %v10357_v18  ;;  %v894_v21 = vand.u32 65535, %v10348_v30 }
 0x215   :  { %v10378_v41 = vsub.s32 %v1843_v46, %v1846_v42  ;;  %vm882_vm15 = vc.u32 %v874_v52, %v878_v2  ;;  %v884_v58 = vadd.s32 %v878_v2, %v874_v52  ;;  %v10380_v15 = vmul.u32 %v895_v14, %v870_v1 }
 0x216   :  { %v2031_v11 = vadd.f32 -0.4999988, %v2030_v16  ;;  %v2038_v3 = vadd.f32 -0.16666654, %v2037_v22  ;;  %v880_v9 = vshll.u32 %v10371_v19, 16  ;;  %v883_v5 = vsel %vm882_vm15, 1, %v13444_v36 }
 0x217   :  { %vm5753_vm2 = vcmp.eq.s32.totalorder %v10373_v33, 0  ;;  %vm5756_vm4 = vcmp.eq.s32.totalorder %v10373_v33, 2  ;;  %vm1848_vm13 = vcmp.lt.s32.totalorder %v10378_v41, 0  ;;  %v1849_v30 = vsub.s32 0, %v10378_v41 }
 0x218   :  { %v837_v42 = vshrl.u32 %v13440_v12, %v13557_v31  ;;  %v885_v2 = vadd.s32 %v883_v5, %v877_v34  ;;  %v2032_v52 = vmul.f32 %v2031_v11, %v2027_v61  ;;  %v2039_v46 = vmul.f32 %v2038_v3, %v2027_v61 }
 0x219   :  { %vm5752_vm6 = vcmp.lt.s32.totalorder %v10373_v33, 2  ;;  %vm13564_vm7 = vcmp.lt.s32.totalorder %v13558_v13, 4  ;;  %vm886_vm15 = vc.u32 %v884_v58, %v880_v9  ;;  %vm13261_vm11 = vweird.f32 %v13522_v7  ;;  %v13572_v13 = vld [vmem:[#allocation63_spill] sm:$0xff] }
 0x21a   :  { %v858_v22 = vsel %vm13564_vm7, %v10301_v39, 2102212464  ;;  %v1850_v55 = vsel %vm1848_vm13, %v1849_v30, %v10378_v41  ;;  %v887_v29 = vsel %vm886_vm15, 1, %v13444_v36  ;;  %v898_v27 = vmul.u32 %v894_v21, %v10357_v18 }
 0x21b   :  { %v900_v31 = vshll.u32 %v10380_v15, 16  ;;  %v10399_v5 = vadd.f32 1.0, %v2032_v52  ;;  %v2040_v3 = vadd.f32 1.0, %v2039_v46  ;;  %v1851_v34 = vclz %v1850_v55 }
 0x21c   :  { %v889_v11 = vadd.s32 %v887_v29, %v885_v2  ;;  %v1839_v61 = vadd.s32 %v10274_v50, %v10271_v49  ;;  %v857_v39 = vsel %vm853_vm3, %v837_v42, %v10286_v32  ;;  %v879_v45 = vshrl.u32 %v875_v38, 16 }
 0x21d   :  { %13565 = vst [vmem:[#allocation46_spill] sm:$0xff] %v10399_v5  ;;  %v896_v16 = vmul.u32 %v894_v21, %v870_v1  ;;  %v10407_v58 = vmul.f32 %v2040_v3, %v10336_v20  ;;  %v13240_v9 = vxor.u32 2147483648, %v10399_v5  ;;  %vm1747_vm13 = vcmp.lt.s32.totalorder %v13539_v40, 0 }
 0x21e   :  { %v8083_v30 = vadd.s32 4294967294, %v1851_v34  ;;  %v859_v2 = vsel %vm855_vm14, %v10294_v63, %v858_v22  ;;  %v890_v52 = vadd.s32 %v889_v11, %v879_v45  ;;  %v902_v49 = vshll.u32 %v898_v27, 16 }
 0x21f   :  { %13566 = vst [vmem:[#allocation55_spill] sm:$0xff] %v10407_v58  ;;  %vm904_vm7 = vc.u32 %v896_v16, %v900_v31  ;;  %v906_v50 = vadd.s32 %v900_v31, %v896_v16  ;;  %v13241_v32 = vxor.u32 2147483648, %v10407_v58  ;;  %v1869_v21 = vsub.s32 4, %v10363_v53 }
 0x220   :  { %vm8084_vm3 = vcmp.lt.s32.totalorder %v8083_v30, 0  ;;  %v881_v20 = vshrl.u32 %v10371_v19, 16  ;;  %v899_v38 = vmul.u32 %v895_v14, %v10357_v18  ;;  %v905_v42 = vsel %vm904_vm7, 1, %v13444_v36 }
 0x221   :  { %v1854_v1 = vsel %vm8084_vm3, 0, %v8083_v30  ;;  %vm908_vm15 = vc.u32 %v906_v50, %v902_v49  ;;  %vm2064_vm5 = vcmp.gt.s32.totalorder %v9835_v48, 0  ;;  %v5755_v63 = vsel %vm5753_vm2, %v10399_v5, %v13241_v32 }
 0x222   :  { %v5758_v19 = vsel %vm5756_vm4, %v13240_v9, %v10407_v58  ;;  %v1855_v46 = vsub.s32 32, %v1854_v1  ;;  %v1859_v22 = vsub.s32 4294967266, %v1854_v1  ;;  %v10432_v14 = vadd.s32 %v890_v52, %v881_v20  ;;  %v13570_v52 = vld [vmem:[#allocation27_spill] sm:$0xff] }
 0x223   :  { %v5759_v18 = vsel %vm5752_vm6, %v5755_v63, %v5758_v19  ;;  %v907_v55 = vadd.s32 %v905_v42, %v899_v38  ;;  %v909_v29 = vsel %vm908_vm15, 1, %v13444_v36  ;;  %v1856_v3 = vshll.u32 %v10378_v41, %v1854_v1 }
 0x224   :  { %v5760_v31 = vsel %vm13261_vm11, nan, %v5759_v18  ;;  %v1857_v34 = vshrl.u32 %v1839_v61, %v1855_v46  ;;  %v1860_v11 = vadd.s32 127, %v1859_v22  ;;  %v13567_v45 = vand.u32 2147483647, %v13539_v40  ;;  %v13571_v22 = vld [vmem:[#allocation54_spill] sm:$0xff] }
 0x225   :  { %7700 = vmatpush.msra.mxu1 %v5760_v31  ;;  %v901_v33 = vshrl.u32 %v10380_v15, 16  ;;  %v911_v30 = vadd.s32 %v909_v29, %v907_v55  ;;  %v13242_v20 = vand.u32 2147483647, %v13570_v52  ;;  %v860_v63 = vsel %vm854_vm10, %v857_v39, %v859_v2 }
 0x226   :  { %vm10440_vm14 = vcmp.le.f32.partialorder %v13567_v45, 0.7853982  ;;  %v1858_v38 = vor.u32 %v1857_v34, %v1856_v3  ;;  %v1861_v42 = vshll.u32 %v1860_v11, 23  ;;  %v10448_v41 = vadd.s32 %v906_v50, %v902_v49 }
 0x227   :  { %v1870_v61 = vsel %vm1747_vm13, %v1869_v21, %v10363_v53  ;;  %v903_v1 = vshrl.u32 %v898_v27, 16  ;;  %v912_v19 = vadd.s32 %v911_v30, %v901_v33  ;;  %v3292_v46 = vand.u32 8388607, %v13242_v20 }
 0x228   :  { %v1862_v15 = vor.u32 4788187, %v1861_v42  ;;  %vm916_vm2 = vc.u32 %v10432_v14, %v10448_v41  ;;  %v3302_v18 = vshll.u32 %v13440_v12, %v13571_v22  ;;  %v3303_v39 = vshrl.u32 %v13430_v44, %v13572_v13  ;;  %v13574_v42 = vld [vmem:[#allocation68_spill] sm:$0xff] }
 0x229   :  { %v913_v2 = vadd.s32 %v912_v19, %v903_v1  ;;  %v3293_v49 = vor.u32 8388608, %v3292_v46  ;;  %v3305_v53 = vshll.u32 %v13430_v44, %v13571_v22  ;;  %v3306_v27 = vshrl.u32 %v13432_v43, %v13572_v13  ;;  %v13575_v19 = vld [vmem:[#allocation88_spill] sm:$0xff] }
 0x22a   :  { %v1863_v50 = vand.u32 2147483647, %v1862_v15  ;;  %v1865_v21 = vcvt.s32.f32 %v1858_v38  ;;  %v3308_v55 = vshll.u32 %v13432_v43, %v13571_v22  ;;  %v3309_v29 = vshrl.u32 %v13371_v23, %v13572_v13 }
 0x22b   :  { %v10471_v31 = vsel %vm10440_vm14, 0, %v1870_v61  ;;  %v917_v3 = vadd.s32 1, %v913_v2  ;;  %v3304_v34 = vor.u32 %v3303_v39, %v3302_v18  ;;  %v3307_v11 = vor.u32 %v3306_v27, %v3305_v53  ;;  %v13576_v61 = vld [vmem:[#allocation74_spill] sm:$0xff] }
 0x22c   :  { %13573 = vst [vmem:[#allocation71_spill] sm:$0xff] %v10471_v31  ;;  %v1866_v45 = vmul.f32 %v1865_v21, %v1863_v50  ;;  %v914_v33 = vmul.u32 %v10321_v26, %v860_v63  ;;  %v3310_v30 = vor.u32 %v3309_v29, %v3308_v55  ;;  %vm3319_vm10 = vcmp.lt.s32.totalorder %v13574_v42, 3  ;;  %v13577_v18 = vld [vmem:[#allocation82_spill] sm:$0xff] }
 0x22d   :  { %v2065_v38 = vsel %vm2064_vm5, %v9835_v48, 0  ;;  %v918_v1 = vsel %vm916_vm2, %v917_v3, %v913_v2  ;;  %v3331_v46 = vsel %vm3319_vm10, %v13576_v61, %v13575_v19  ;;  %v10485_v15 = vshll.u32 %v3293_v49, 8 }
 0x22e   :  { %v1867_v22 = vxor.u32 2147483648, %v1866_v45  ;;  %v5595_v26 = vadd.s32 3, %v10471_v31  ;;  %v919_v63 = vadd.s32 %v918_v1, %v914_v33  ;;  %vm3317_vm4 = vcmp.lt.s32.totalorder %v13574_v42, 1 }
 0x22f   :  { %vm3318_vm6 = vcmp.lt.s32.totalorder %v13574_v42, 2  ;;  %v3325_v48 = vsel %vm3317_vm4, %v3304_v34, %v3307_v11  ;;  %v3327_v39 = vsel %vm3319_vm10, %v3310_v30, %v13577_v18  ;;  %v3329_v2 = vsel %vm3317_vm4, %v3307_v11, %v3310_v30 }
 0x230   :  { %v1868_v49 = vsel %vm1747_vm13, %v1867_v22, %v1866_v45  ;;  %v920_v53 = vadd.s32 536870912, %v919_v63  ;;  %v3332_v27 = vsel %vm3318_vm6, %v3329_v2, %v3331_v46  ;;  %v3334_v50 = vand.u32 65535, %v10485_v15 }
 0x231   :  { %v1871_v21 = vsel %vm10440_vm14, %v13539_v40, %v1868_v49  ;;  %v10506_v55 = vshrl.u32 %v10485_v15, 16  ;;  %v3336_v29 = vand.u32 65535, %v3332_v27  ;;  %v3337_v3 = vshrl.u32 %v3332_v27, 16 }
 0x232   :  { %v10509_v33 = vadd.s32 1, %v10194_v4  ;;  %v1873_v1 = vmul.f32 %v1871_v21, %v1871_v21  ;;  %v10511_v45 = vshrl.u32 %v920_v53, 30  ;;  %v3328_v19 = vsel %vm3318_vm6, %v3325_v48, %v3327_v39 }
 0x233   :  { %v3301_v61 = vshrl.u32 %v13440_v12, %v13572_v13  ;;  %vm13578_vm5 = vcmp.lt.s32.totalorder %v13574_v42, 4  ;;  %v3339_v46 = vmul.u32 %v3337_v3, %v3334_v50  ;;  %v10520_v22 = vmul.u32 %v3336_v29, %v10506_v55 }
 0x234   :  { %v3322_v16 = vsel %vm13578_vm5, %v3310_v30, 2102212464  ;;  %v1874_v18 = vmul.f32 -0.001358992, %v1873_v1  ;;  %v1881_v2 = vmul.f32 -0.00019511016, %v1873_v1  ;;  %v3338_v48 = vmul.u32 %v3336_v29, %v3334_v50 }
 0x235   :  { %v10522_v4 = vand.u32 3, %v5595_v26  ;;  %v922_v49 = vshll.u32 %v10511_v45, 30  ;;  %v3321_v53 = vsel %vm3317_vm4, %v3301_v61, %v3304_v34  ;;  %v3342_v39 = vshll.u32 %v3339_v46, 16 }
 0x236   :  { %v3359_v27 = vshrl.u32 %v3328_v19, 16  ;;  %v1875_v13 = vadd.f32 0.041655596, %v1874_v18  ;;  %v1882_v9 = vadd.f32 0.008332121, %v1881_v2  ;;  %v3323_v30 = vsel %vm3319_vm10, %v3307_v11, %v3322_v16 }
 0x237   :  { %v10527_v32 = vsub.s32 %v919_v63, %v922_v49  ;;  %v3341_v20 = vmul.u32 %v3337_v3, %v10506_v55  ;;  %v3344_v26 = vshll.u32 %v10520_v22, 16  ;;  %vm3346_vm13 = vc.u32 %v3338_v48, %v3342_v39 }
 0x238   :  { %v3348_v7 = vadd.s32 %v3342_v39, %v3338_v48  ;;  %v1876_v5 = vmul.f32 %v1875_v13, %v1873_v1  ;;  %v1883_v58 = vmul.f32 %v1882_v9, %v1873_v1  ;;  %v3347_v29 = vsel %vm3346_vm13, 1, %v13444_v36 }
 0x239   :  { %vm924_vm7 = vcmp.lt.s32.totalorder %v10527_v32, 0  ;;  %v925_v34 = vsub.s32 0, %v10527_v32  ;;  %v3358_v63 = vand.u32 65535, %v3328_v19  ;;  %v10536_v61 = vmul.u32 %v3359_v27, %v3334_v50 }
 0x23a   :  { %vm3350_vm3 = vc.u32 %v3348_v7, %v3344_v26  ;;  %v1877_v18 = vadd.f32 -0.4999988, %v1876_v5  ;;  %v1884_v11 = vadd.f32 -0.16666654, %v1883_v58  ;;  %v3349_v16 = vadd.s32 %v3347_v29, %v3341_v20 }
 0x23b   :  { %v926_v3 = vsel %vm924_vm7, %v925_v34, %v10527_v32  ;;  %v10539_v2 = vshrl.u32 %v2065_v38, 5  ;;  %v10541_v49 = vand.u32 31, %v2065_v38  ;;  %v3351_v48 = vsel %vm3350_vm3, 1, %v13444_v36 }
 0x23c   :  { %v927_v9 = vclz %v926_v3  ;;  %v1878_v39 = vmul.f32 %v1877_v18, %v1873_v1  ;;  %v1885_v13 = vmul.f32 %v1884_v11, %v1873_v1  ;;  %vm5597_vm15 = vcmp.lt.s32.totalorder %v10522_v4, 2 }
 0x23d   :  { %13579 = vst [vmem:[#allocation62_spill] sm:$0xff] %v10539_v2  ;;  %vm5598_vm14 = vcmp.eq.s32.totalorder %v10522_v4, 0  ;;  %vm5601_vm2 = vcmp.eq.s32.totalorder %v10522_v4, 2  ;;  %vm13260_vm10 = vweird.f32 %v13539_v40  ;;  %v915_v7 = vadd.s32 %v10448_v41, %v10432_v14 }
 0x23e   :  { %v8065_v5 = vadd.s32 4294967294, %v927_v9  ;;  %v10552_v58 = vsel %vm3318_vm6, %v3321_v53, %v3323_v30  ;;  %v3353_v20 = vadd.s32 %v3351_v48, %v3349_v16  ;;  %v10554_v38 = vadd.f32 1.0, %v1878_v39  ;;  %v13582_v39 = vld [vmem:[#allocation15_spill] sm:$0xff] }
 0x23f   :  { %v1886_v1 = vadd.f32 1.0, %v1885_v13  ;;  %v3362_v19 = vmul.u32 %v3358_v63, %v10506_v55  ;;  %v3364_v26 = vshll.u32 %v10536_v61, 16  ;;  %v3343_v34 = vshrl.u32 %v3339_v46, 16 }
 0x240   :  { %13580 = vst [vmem:[#allocation66_spill] sm:$0xff] %v10554_v38  ;;  %vm8066_vm4 = vcmp.lt.s32.totalorder %v8065_v5, 0  ;;  %v3345_v29 = vshrl.u32 %v10520_v22, 16  ;;  %v3360_v18 = vmul.u32 %v3358_v63, %v3334_v50  ;;  %v13248_v14 = vxor.u32 2147483648, %v10554_v38 }
 0x241   :  { %v10559_v11 = vmul.f32 %v1886_v1, %v1871_v21  ;;  %v930_v41 = vsel %vm8066_vm4, 0, %v8065_v5  ;;  %v3363_v42 = vmul.u32 %v3359_v27, %v10506_v55  ;;  %vm823_vm6 = vcmp.lt.s32.totalorder %v13552_v28, 0 }
 0x242   :  { %v931_v53 = vsub.s32 32, %v930_v41  ;;  %v935_v30 = vsub.s32 4294967266, %v930_v41  ;;  %v3354_v3 = vadd.s32 %v3353_v20, %v3343_v34  ;;  %vm3368_vm5 = vc.u32 %v3360_v18, %v3364_v26 }
 0x243   :  { %13581 = vst [vmem:[#allocation25_spill] sm:$0xff] %v10559_v11  ;;  %v13249_v16 = vxor.u32 2147483648, %v10559_v11  ;;  %v3366_v9 = vshll.u32 %v3362_v19, 16  ;;  %v3369_v46 = vsel %vm3368_vm5, 1, %v13444_v36  ;;  %v3370_v22 = vadd.s32 %v3364_v26, %v3360_v18 }
 0x244   :  { %v932_v50 = vshll.u32 %v10527_v32, %v930_v41  ;;  %v933_v21 = vshrl.u32 %v915_v7, %v931_v53  ;;  %v936_v63 = vadd.s32 127, %v935_v30  ;;  %v3371_v48 = vadd.s32 %v3369_v46, %v3363_v42 }
 0x245   :  { %v5600_v55 = vsel %vm5598_vm14, %v10554_v38, %v13249_v16  ;;  %v5603_v27 = vsel %vm5601_vm2, %v13248_v14, %v10559_v11  ;;  %vm3372_vm13 = vc.u32 %v3370_v22, %v3366_v9  ;;  %v13250_v13 = vand.u32 2147483647, %v13582_v39 }
 0x246   :  { %v5604_v32 = vsel %vm5597_vm15, %v5600_v55, %v5603_v27  ;;  %v13583_v7 = vand.u32 2147483647, %v13552_v28  ;;  %v934_v20 = vor.u32 %v933_v21, %v932_v50  ;;  %v937_v1 = vshll.u32 %v936_v63, 23  ;;  %v13586_v63 = vld [vmem:[#allocation37_spill] sm:$0xff] }
 0x247   :  { %v3373_v26 = vsel %vm3372_vm13, 1, %v13444_v36  ;;  %v5605_v34 = vsel %vm13260_vm10, nan, %v5604_v32  ;;  %v945_v18 = vsub.s32 4, %v10511_v45  ;;  %v3365_v41 = vshrl.u32 %v10536_v61, 16 }
 0x248   :  { %vm10582_vm7 = vcmp.le.f32.partialorder %v13583_v7, 0.7853982  ;;  %v3375_v42 = vadd.s32 %v3373_v26, %v3371_v48  ;;  %7701 = vmatpush.msra.mxu1 %v5605_v34  ;;  %v938_v4 = vor.u32 4788187, %v937_v1  ;;  %v10591_v53 = vadd.s32 %v3354_v3, %v3345_v29  ;;  %v13587_v7 = vld [vmem:[#allocation42_spill] sm:$0xff] }
 0x249   :  { %v3367_v30 = vshrl.u32 %v3362_v19, 16  ;;  %v10593_v46 = vadd.s32 %v3370_v22, %v3366_v9  ;;  %v941_v55 = vcvt.s32.f32 %v934_v20  ;;  %v674_v21 = vand.u32 8388607, %v13250_v13 }
 0x24a   :  { %v3376_v50 = vadd.s32 %v3375_v42, %v3365_v41  ;;  %v684_v27 = vshll.u32 %v13440_v12, %v13586_v63  ;;  %v939_v32 = vand.u32 2147483647, %v938_v4  ;;  %v685_v61 = vshrl.u32 %v13430_v44, %v13587_v7  ;;  %v13588_v4 = vld [vmem:[#allocation45_spill] sm:$0xff] }
 0x24b   :  { %v687_v48 = vshll.u32 %v13430_v44, %v13586_v63  ;;  %v688_v19 = vshrl.u32 %v13432_v43, %v13587_v7  ;;  %v946_v29 = vsel %vm823_vm6, %v945_v18, %v10511_v45  ;;  %v690_v9 = vshll.u32 %v13432_v43, %v13586_v63 }
 0x24c   :  { %v3377_v3 = vadd.s32 %v3376_v50, %v3367_v30  ;;  %v691_v22 = vshrl.u32 %v13371_v23, %v13587_v7  ;;  %v942_v20 = vmul.f32 %v941_v55, %v939_v32  ;;  %vm3380_vm3 = vc.u32 %v10591_v53, %v10593_v46  ;;  %v13589_v30 = vld [vmem:[#allocation60_spill] sm:$0xff] }
 0x24d   :  { %v10614_v1 = vor.u32 %v685_v61, %v684_v27  ;;  %v10616_v26 = vor.u32 %v688_v19, %v687_v48  ;;  %v675_v41 = vor.u32 8388608, %v674_v21  ;;  %vm701_vm15 = vcmp.lt.s32.totalorder %v13588_v4, 3  ;;  %v13590_v55 = vld [vmem:[#allocation52_spill] sm:$0xff]  ;;  %v13592_v61 = vld [vmem:[#allocation59_spill] sm:$0xff] }
 0x24e   :  { %v3381_v34 = vadd.s32 1, %v3377_v3  ;;  %v692_v42 = vor.u32 %v691_v22, %v690_v9  ;;  %v943_v45 = vxor.u32 2147483648, %v942_v20  ;;  %v3378_v18 = vmul.u32 %v10485_v15, %v10552_v58 }
 0x24f   :  { %vm699_vm14 = vcmp.lt.s32.totalorder %v13588_v4, 1  ;;  %v713_v50 = vsel %vm701_vm15, %v13590_v55, %v13589_v30  ;;  %v10628_v63 = vor.u32 %v10361_v6, %v10342_v54  ;;  %v10632_v21 = vsel %vm10582_vm7, 0, %v946_v29 }
 0x250   :  { %13591 = vst [vmem:[#allocation28_spill] sm:$0xff] %v10632_v21  ;;  %v3382_v27 = vsel %vm3380_vm3, %v3381_v34, %v3377_v3  ;;  %v711_v15 = vsel %vm699_vm14, %v10616_v26, %v692_v42  ;;  %v944_v58 = vsel %vm823_vm6, %v943_v45, %v942_v20  ;;  %vm700_vm2 = vcmp.lt.s32.totalorder %v13588_v4, 2 }
 0x251   :  { %v3383_v32 = vadd.s32 %v3382_v27, %v3378_v18  ;;  %v707_v54 = vsel %vm699_vm14, %v10614_v1, %v10616_v26  ;;  %v10647_v6 = vsel %vm10582_vm7, %v13552_v28, %v944_v58  ;;  %v709_v48 = vsel %vm701_vm15, %v692_v42, %v13592_v61 }
 0x252   :  { %v714_v19 = vsel %vm700_vm2, %v711_v15, %v713_v50  ;;  %v10654_v29 = vshll.u32 %v675_v41, 8  ;;  %v949_v3 = vmul.f32 %v10647_v6, %v10647_v6  ;;  %v4665_v34 = vadd.s32 3, %v10632_v21 }
 0x253   :  { %v3384_v9 = vadd.s32 536870912, %v3383_v32  ;;  %v718_v22 = vand.u32 65535, %v714_v19  ;;  %v719_v20 = vshrl.u32 %v714_v19, 16  ;;  %v710_v41 = vsel %vm700_vm2, %v707_v54, %v709_v48 }
 0x254   :  { %v716_v45 = vand.u32 65535, %v10654_v29  ;;  %v717_v18 = vshrl.u32 %v10654_v29, 16  ;;  %v950_v30 = vmul.f32 -0.001358992, %v949_v3  ;;  %v957_v55 = vmul.f32 -0.00019511016, %v949_v3 }
 0x255   :  { %v10663_v50 = vshrl.u32 %v3384_v9, 30  ;;  %v10668_v27 = vsub.s32 32, %v10541_v49  ;;  %v10675_v19 = vshll.u32 %v13371_v23, %v10541_v49  ;;  %v4666_v13 = vand.u32 3, %v4665_v34 }
 0x256   :  { %v721_v58 = vmul.u32 %v719_v20, %v716_v45  ;;  %v10671_v61 = vmul.u32 %v718_v22, %v717_v18  ;;  %v951_v14 = vadd.f32 0.041655596, %v950_v30  ;;  %v958_v16 = vadd.f32 0.008332121, %v957_v55 }
 0x257   :  { %13593 = vst [vmem:[#allocation29_spill] sm:$0xff] %v10668_v27  ;;  %v3386_v9 = vshll.u32 %v10663_v50, 30  ;;  %v720_v5 = vmul.u32 %v718_v22, %v716_v45  ;;  %v741_v54 = vshrl.u32 %v710_v41, 16  ;;  %v740_v15 = vand.u32 65535, %v710_v41 }
 0x258   :  { %13594 = vst [vmem:[#allocation39_spill] sm:$0xff] %v10675_v19  ;;  %v724_v40 = vshll.u32 %v721_v58, 16  ;;  %v952_v48 = vmul.f32 %v951_v14, %v949_v3  ;;  %v959_v38 = vmul.f32 %v958_v16, %v949_v3  ;;  %v723_v31 = vmul.u32 %v719_v20, %v717_v18 }
 0x259   :  { %v10678_v11 = vsub.s32 %v3383_v32, %v3386_v9  ;;  %v726_v21 = vshll.u32 %v10671_v61, 16  ;;  %vm4668_vm5 = vcmp.eq.s32.totalorder %v4666_v13, 0  ;;  %vm13595_vm13 = vcmp.lt.s32.totalorder %v13588_v4, 4 }
 0x25a   :  { %vm728_vm4 = vc.u32 %v720_v5, %v724_v40  ;;  %v730_v2 = vadd.s32 %v724_v40, %v720_v5  ;;  %v953_v27 = vadd.f32 -0.4999988, %v952_v48  ;;  %v960_v19 = vadd.f32 -0.16666654, %v959_v38 }
 0x25b   :  { %vm3388_vm6 = vcmp.lt.s32.totalorder %v10678_v11, 0  ;;  %v3389_v30 = vsub.s32 0, %v10678_v11  ;;  %v704_v22 = vsel %vm13595_vm13, %v692_v42, 2102212464  ;;  %v729_v14 = vsel %vm728_vm4, 1, %v13444_v36 }
 0x25c   :  { %vm732_vm7 = vc.u32 %v730_v2, %v726_v21  ;;  %v10686_v16 = vmul.u32 %v741_v54, %v716_v45  ;;  %v954_v32 = vmul.f32 %v953_v27, %v949_v3  ;;  %v961_v20 = vmul.f32 %v960_v19, %v949_v3 }
 0x25d   :  { %vm4667_vm3 = vcmp.lt.s32.totalorder %v4666_v13, 2  ;;  %v3390_v40 = vsel %vm3388_vm6, %v3389_v30, %v10678_v11  ;;  %v731_v5 = vadd.s32 %v729_v14, %v723_v31  ;;  %vm13266_vm10 = vweird.f32 %v13552_v28 }
 0x25e   :  { %vm4671_vm11 = vcmp.eq.s32.totalorder %v4666_v13, 2  ;;  %v3391_v38 = vclz %v3390_v40  ;;  %v683_v34 = vshrl.u32 %v13440_v12, %v13587_v7  ;;  %v733_v42 = vsel %vm732_vm7, 1, %v13444_v36 }
 0x25f   :  { %v10693_v55 = vadd.f32 1.0, %v954_v32  ;;  %v962_v2 = vadd.f32 1.0, %v961_v20  ;;  %v735_v21 = vadd.s32 %v733_v42, %v731_v5  ;;  %v744_v41 = vmul.u32 %v740_v15, %v717_v18 }
 0x260   :  { %vm3287_vm4 = vcmp.lt.s32.totalorder %v13570_v52, 0  ;;  %v3379_v3 = vadd.s32 %v10593_v46, %v10591_v53  ;;  %v8113_v31 = vadd.s32 4294967294, %v3391_v38  ;;  %v703_v27 = vsel %vm699_vm14, %v683_v34, %v10614_v1 }
 0x261   :  { %13596 = vst [vmem:[#allocation32_spill] sm:$0xff] %v10693_v55  ;;  %v705_v7 = vsel %vm701_vm15, %v10616_v26, %v704_v22  ;;  %v10705_v19 = vmul.f32 %v962_v2, %v10647_v6  ;;  %v13262_v9 = vxor.u32 2147483648, %v10693_v55  ;;  %v725_v48 = vshrl.u32 %v721_v58, 16 }
 0x262   :  { %v746_v30 = vshll.u32 %v10686_v16, 16  ;;  %vm8114_vm6 = vcmp.lt.s32.totalorder %v8113_v31, 0  ;;  %v3409_v53 = vsub.s32 4, %v10663_v50  ;;  %v742_v46 = vmul.u32 %v740_v15, %v716_v45 }
 0x263   :  { %13597 = vst [vmem:[#allocation38_spill] sm:$0xff] %v10705_v19  ;;  %v745_v14 = vmul.u32 %v741_v54, %v717_v18  ;;  %v13263_v32 = vxor.u32 2147483648, %v10705_v19  ;;  %v3394_v1 = vsel %vm8114_vm6, 0, %v8113_v31  ;;  %v736_v20 = vadd.s32 %v735_v21, %v725_v48  ;;  %v13601_v31 = vld [vmem:[#allocation50_spill] sm:$0xff] }
 0x264   :  { %v748_v40 = vshll.u32 %v744_v41, 16  ;;  %v4673_v26 = vsel %vm4671_vm11, %v13262_v9, %v10705_v19  ;;  %v3395_v6 = vsub.s32 32, %v3394_v1  ;;  %v3399_v22 = vsub.s32 4294967266, %v3394_v1 }
 0x265   :  { %vm750_vm15 = vc.u32 %v742_v46, %v746_v30  ;;  %v4670_v58 = vsel %vm4668_vm5, %v10693_v55, %v13263_v32  ;;  %v3396_v45 = vshll.u32 %v10678_v11, %v3394_v1  ;;  %v752_v15 = vadd.s32 %v746_v30, %v742_v46 }
 0x266   :  { %v751_v18 = vsel %vm750_vm15, 1, %v13444_v36  ;;  %v4674_v54 = vsel %vm4667_vm3, %v4670_v58, %v4673_v26  ;;  %v13598_v5 = vand.u32 2147483647, %v13570_v52  ;;  %v3397_v34 = vshrl.u32 %v3379_v3, %v3395_v6 }
 0x267   :  { %v3400_v42 = vadd.s32 127, %v3399_v22  ;;  %v753_v2 = vadd.s32 %v751_v18, %v745_v14  ;;  %v4675_v21 = vsel %vm13266_vm10, nan, %v4674_v54  ;;  %v706_v11 = vsel %vm700_vm2, %v703_v27, %v705_v7 }
 0x268   :  { %vm10724_vm14 = vcmp.le.f32.partialorder %v13598_v5, 0.7853982  ;;  %vm754_vm11 = vc.u32 %v752_v15, %v748_v40  ;;  %v13264_v48 = vand.u32 2147483647, %v13601_v31  ;;  %7666 = vmatpush.msra.mxu0 %v4675_v21  ;;  %v3398_v13 = vor.u32 %v3397_v34, %v3396_v45  ;;  %v13602_v45 = vld [vmem:[#allocation91_spill] sm:$0xff] }
 0x269   :  { %v3401_v30 = vshll.u32 %v3400_v42, 23  ;;  %v727_v46 = vshrl.u32 %v10671_v61, 16  ;;  %v755_v1 = vsel %vm754_vm11, 1, %v13444_v36  ;;  %v3410_v3 = vsel %vm3287_vm4, %v3409_v53, %v10663_v50  ;;  %v13603_v50 = vld [vmem:[#allocation95_spill] sm:$0xff] }
 0x26a   :  { %v747_v14 = vshrl.u32 %v10686_v16, 16  ;;  %v749_v26 = vshrl.u32 %v744_v41, 16  ;;  %v757_v6 = vadd.s32 %v755_v1, %v753_v2  ;;  %vm1626_vm2 = vcmp.lt.s32.totalorder %v10160_v57, 4 }
 0x26b   :  { %v3402_v4 = vor.u32 4788187, %v3401_v30  ;;  %v737_v27 = vadd.s32 %v736_v20, %v727_v46  ;;  %v756_v7 = vadd.s32 %v752_v15, %v748_v40  ;;  %v2214_v22 = vand.u32 8388607, %v13264_v48 }
 0x26c   :  { %vm1448_vm5 = vcmp.gt.s32.totalorder %v10509_v33, 0  ;;  %v3405_v61 = vcvt.s32.f32 %v3398_v13  ;;  %v758_v58 = vadd.s32 %v757_v6, %v747_v14  ;;  %v2224_v18 = vshll.u32 %v13440_v12, %v13602_v45 }
 0x26d   :  { %v2225_v16 = vshrl.u32 %v13430_v44, %v13603_v50  ;;  %v3403_v41 = vand.u32 2147483647, %v3402_v4  ;;  %v2215_v53 = vor.u32 8388608, %v2214_v22  ;;  %v2227_v54 = vshll.u32 %v13430_v44, %v13602_v45 }
 0x26e   :  { %v2228_v20 = vshrl.u32 %v13432_v43, %v13603_v50  ;;  %v759_v40 = vadd.s32 %v758_v58, %v749_v26  ;;  %v2230_v5 = vshll.u32 %v13432_v43, %v13602_v45  ;;  %v2231_v34 = vshrl.u32 %v13371_v23, %v13603_v50 }
 0x26f   :  { %v10751_v15 = vor.u32 %v2225_v16, %v2224_v18  ;;  %v3406_v42 = vmul.f32 %v3405_v61, %v3403_v41  ;;  %v760_v2 = vmul.u32 %v10654_v29, %v706_v11  ;;  %vm762_vm13 = vc.u32 %v737_v27, %v756_v7 }
 0x270   :  { %v10758_v21 = vor.u32 %v2228_v20, %v2227_v54  ;;  %v10762_v13 = vsel %vm10724_vm14, 0, %v3410_v3  ;;  %v763_v30 = vadd.s32 1, %v759_v40  ;;  %v2232_v46 = vor.u32 %v2231_v34, %v2230_v5 }
 0x271   :  { %13604 = vst [vmem:[#allocation65_spill] sm:$0xff] %v10762_v13  ;;  %vm2241_vm7 = vcmp.lt.s32.totalorder %v8921_v25, 3  ;;  %v3407_v1 = vxor.u32 2147483648, %v3406_v42  ;;  %vm2239_vm3 = vcmp.lt.s32.totalorder %v8921_v25, 1  ;;  %v10770_v29 = vshll.u32 %v2215_v53, 8 }
 0x272   :  { %v2253_v14 = vsel %vm2241_vm7, %v9238_v62, %v9514_v47  ;;  %v764_v11 = vsel %vm762_vm13, %v763_v30, %v759_v40  ;;  %v2247_v3 = vsel %vm2239_vm3, %v10751_v15, %v10758_v21  ;;  %v2249_v26 = vsel %vm2241_vm7, %v2232_v46, %v9410_v0 }
 0x273   :  { %v2251_v6 = vsel %vm2239_vm3, %v10758_v21, %v2232_v46  ;;  %v10784_v4 = vshll.u32 %v13500_v59, %v10541_v49  ;;  %v3408_v62 = vsel %vm3287_vm4, %v3407_v1, %v3406_v42  ;;  %v765_v47 = vadd.s32 %v764_v11, %v760_v2 }
 0x274   :  { %vm2240_vm6 = vcmp.lt.s32.totalorder %v8921_v25, 2  ;;  %v10792_v22 = vsel %vm1626_vm2, %v10628_v63, 920167782  ;;  %v10797_v0 = vsel %vm10724_vm14, %v13570_v52, %v3408_v62  ;;  %v7145_v61 = vadd.s32 3, %v10762_v13 }
 0x275   :  { %v2254_v58 = vsel %vm2240_vm6, %v2251_v6, %v2253_v14  ;;  %v3413_v45 = vmul.f32 %v10797_v0, %v10797_v0  ;;  %v766_v18 = vadd.s32 536870912, %v765_v47  ;;  %v10806_v16 = vsel %vm2240_vm6, %v2247_v3, %v2249_v26 }
 0x276   :  { %v2258_v41 = vand.u32 65535, %v2254_v58  ;;  %v13605_v53 = vor.u32 %v10368_v56, %v10354_v60  ;;  %v2256_v54 = vand.u32 65535, %v10770_v29  ;;  %v2257_v20 = vshrl.u32 %v10770_v29, 16 }
 0x277   :  { %v2259_v40 = vshrl.u32 %v2254_v58, 16  ;;  %v10820_v5 = vsel %vm1448_vm5, %v10509_v33, 0  ;;  %v3414_v34 = vmul.f32 -0.001358992, %v3413_v45  ;;  %v3421_v42 = vmul.f32 -0.00019511016, %v3413_v45 }
 0x278   :  { %v10813_v38 = vsel %vm1626_vm2, %v13605_v53, 1326507024  ;;  %v10822_v2 = vshrl.u32 %v766_v18, 30  ;;  %v10824_v30 = vand.u32 3, %v7145_v61  ;;  %v2262_v56 = vmul.u32 %v2258_v41, %v2257_v20 }
 0x279   :  { %v2261_v60 = vmul.u32 %v2259_v40, %v2256_v54  ;;  %v2281_v1 = vshrl.u32 %v10806_v16, 16  ;;  %v13606_v14 = vand.u32 2139095040, %v9052_v35  ;;  %v3415_v3 = vadd.f32 0.041655596, %v3414_v34 }
 0x27a   :  { %v3422_v26 = vadd.f32 0.008332121, %v3421_v42  ;;  %v768_v6 = vshll.u32 %v10822_v2, 30  ;;  %v10832_v33 = vadd.s32 %v756_v7, %v737_v27  ;;  %v2260_v62 = vmul.u32 %v2258_v41, %v2256_v54 }
 0x27b   :  { %v10829_v11 = vshrl.u32 %v13606_v14, 23  ;;  %v2264_v58 = vshll.u32 %v2261_v60, 16  ;;  %v2280_v18 = vand.u32 65535, %v10806_v16  ;;  %v3416_v61 = vmul.f32 %v3415_v3, %v3413_v45 }
 0x27c   :  { %v3423_v53 = vmul.f32 %v3422_v26, %v3413_v45  ;;  %v10835_v9 = vsub.s32 %v765_v47, %v768_v6  ;;  %v2263_v32 = vmul.u32 %v2259_v40, %v2257_v20  ;;  %vm7151_vm4 = vcmp.eq.s32.totalorder %v10824_v30, 2 }
 0x27d   :  { %v2266_v48 = vshll.u32 %v2262_v56, 16  ;;  %vm2268_vm15 = vc.u32 %v2260_v62, %v2264_v58  ;;  %v2270_v14 = vadd.s32 %v2264_v58, %v2260_v62  ;;  %v10838_v34 = vmul.u32 %v2281_v1, %v2256_v54 }
 0x27e   :  { %v3417_v42 = vadd.f32 -0.4999988, %v3416_v61  ;;  %v3424_v28 = vadd.f32 -0.16666654, %v3423_v53  ;;  %vm770_vm14 = vcmp.lt.s32.totalorder %v10835_v9, 0  ;;  %v771_v27 = vsub.s32 0, %v10835_v9 }
 0x27f   :  { %vm7148_vm11 = vcmp.eq.s32.totalorder %v10824_v30, 0  ;;  %v2223_v7 = vshrl.u32 %v13440_v12, %v13603_v50  ;;  %v2244_v47 = vsel %vm2242_vm8, %v2232_v46, 2102212464  ;;  %v2269_v16 = vsel %vm2268_vm15, 1, %v13444_v36 }
 0x280   :  { %vm2272_vm5 = vc.u32 %v2270_v14, %v2266_v48  ;;  %v3418_v41 = vmul.f32 %v3417_v42, %v3413_v45  ;;  %v3425_v40 = vmul.f32 %v3424_v28, %v3413_v45  ;;  %vm7147_vm13 = vcmp.lt.s32.totalorder %v10824_v30, 2 }
 0x281   :  { %v772_v3 = vsel %vm770_vm14, %v771_v27, %v10835_v9  ;;  %v2271_v26 = vadd.s32 %v2269_v16, %v2263_v32  ;;  %vm13300_vm10 = vweird.f32 %v13570_v52  ;;  %v2265_v62 = vshrl.u32 %v2261_v60, 16 }
 0x282   :  { %v773_v6 = vclz %v772_v3  ;;  %v2273_v58 = vsel %vm2272_vm5, 1, %v13444_v36  ;;  %v2284_v50 = vmul.u32 %v2280_v18, %v2257_v20  ;;  %v10852_v61 = vadd.f32 1.0, %v3418_v41 }
 0x283   :  { %v3426_v46 = vadd.f32 1.0, %v3425_v40  ;;  %v2275_v53 = vadd.s32 %v2273_v58, %v2271_v26  ;;  %v2286_v48 = vshll.u32 %v10838_v34, 16  ;;  %vm669_vm8 = vcmp.lt.s32.totalorder %v13582_v39, 0  ;;  %v13609_v26 = vld [vmem:[#allocation77_spill] sm:$0xff] }
 0x284   :  { %13607 = vst [vmem:[#allocation73_spill] sm:$0xff] %v10852_v61  ;;  %v8062_v28 = vadd.s32 4294967294, %v773_v6  ;;  %v2243_v32 = vsel %vm2239_vm3, %v2223_v7, %v10751_v15  ;;  %v2245_v45 = vsel %vm2241_vm7, %v10758_v21, %v2244_v47  ;;  %v2282_v60 = vmul.u32 %v2280_v18, %v2256_v54 }
 0x285   :  { %v10863_v14 = vmul.f32 %v3426_v46, %v10797_v0  ;;  %v13267_v42 = vxor.u32 2147483648, %v10852_v61  ;;  %v791_v27 = vsub.s32 4, %v10822_v2  ;;  %v2276_v16 = vadd.s32 %v2275_v53, %v2265_v62 }
 0x286   :  { %vm8063_vm15 = vcmp.lt.s32.totalorder %v8062_v28, 0  ;;  %v2267_v41 = vshrl.u32 %v2262_v56, 16  ;;  %v2285_v40 = vmul.u32 %v2281_v1, %v2257_v20  ;;  %vm2290_vm14 = vc.u32 %v2282_v60, %v2286_v48 }
 0x287   :  { %13608 = vst [vmem:[#allocation75_spill] sm:$0xff] %v10863_v14  ;;  %v13268_v3 = vxor.u32 2147483648, %v10863_v14  ;;  %v7153_v15 = vsel %vm7151_vm4, %v13267_v42, %v10863_v14  ;;  %v776_v21 = vsel %vm8063_vm15, 0, %v8062_v28  ;;  %v2288_v0 = vshll.u32 %v2284_v50, 16 }
 0x288   :  { %v777_v54 = vsub.s32 32, %v776_v21  ;;  %v781_v18 = vsub.s32 4294967266, %v776_v21  ;;  %v10873_v7 = vadd.s32 %v2276_v16, %v2267_v41  ;;  %v2291_v47 = vsel %vm2290_vm14, 1, %v13444_v36 }
 0x289   :  { %v7150_v20 = vsel %vm7148_vm11, %v10852_v61, %v13268_v3  ;;  %v2292_v56 = vadd.s32 %v2286_v48, %v2282_v60  ;;  %v2293_v1 = vadd.s32 %v2291_v47, %v2285_v40  ;;  %v13269_v6 = vand.u32 2147483647, %v13609_v26 }
 0x28a   :  { %v7154_v62 = vsel %vm7147_vm13, %v7150_v20, %v7153_v15  ;;  %v778_v58 = vshll.u32 %v10835_v9, %v776_v21  ;;  %v779_v46 = vshrl.u32 %v10832_v33, %v777_v54  ;;  %v782_v53 = vadd.s32 127, %v781_v18 }
 0x28b   :  { %v7155_v28 = vsel %vm13300_vm10, nan, %v7154_v62  ;;  %v2246_v16 = vsel %vm2240_vm6, %v2243_v32, %v2245_v45  ;;  %vm2294_vm7 = vc.u32 %v2292_v56, %v2288_v0  ;;  %v10890_v41 = vadd.s32 %v2292_v56, %v2288_v0 }
 0x28c   :  { %7773 = vmatpush.msra.mxu3 %v7155_v28  ;;  %v13610_v48 = vand.u32 2147483647, %v13582_v39  ;;  %v780_v9 = vor.u32 %v779_v46, %v778_v58  ;;  %v783_v60 = vshll.u32 %v782_v53, 23  ;;  %v2295_v33 = vsel %vm2294_vm7, 1, %v13444_v36 }
 0x28d   :  { %v3138_v40 = vand.u32 8388607, %v13269_v6  ;;  %v792_v25 = vsel %vm669_vm8, %v791_v27, %v10822_v2  ;;  %v2287_v32 = vshrl.u32 %v10838_v34, 16  ;;  %v2289_v45 = vshrl.u32 %v2284_v50, 16 }
 0x28e   :  { %vm10894_vm3 = vcmp.le.f32.partialorder %v13610_v48, 0.7853982  ;;  %v2297_v15 = vadd.s32 %v2295_v33, %v2293_v1  ;;  %v784_v21 = vor.u32 4788187, %v783_v60  ;;  %vm2302_vm6 = vc.u32 %v10873_v7, %v10890_v41 }
 0x28f   :  { %v3139_v0 = vor.u32 8388608, %v3138_v40  ;;  %v3148_v54 = vshll.u32 %v13440_v12, %v9393_v51  ;;  %v3149_v47 = vshrl.u32 %v13430_v44, %v9674_v10  ;;  %v3151_v20 = vshll.u32 %v13430_v44, %v9393_v51 }
 0x290   :  { %v2298_v18 = vadd.s32 %v2297_v15, %v2287_v32  ;;  %v3152_v2 = vshrl.u32 %v13432_v43, %v9674_v10  ;;  %v785_v34 = vand.u32 2147483647, %v784_v21  ;;  %v787_v50 = vcvt.s32.f32 %v780_v9 }
 0x291   :  { %v3154_v27 = vshll.u32 %v13432_v43, %v9393_v51  ;;  %v3155_v56 = vshrl.u32 %v13371_v23, %v9674_v10  ;;  %v10919_v62 = vor.u32 %v3149_v47, %v3148_v54  ;;  %vm3163_vm4 = vcmp.lt.s32.totalorder %v9383_v17, 1 }
 0x292   :  { %v2299_v1 = vadd.s32 %v2298_v18, %v2289_v45  ;;  %v10921_v58 = vor.u32 %v3152_v2, %v3151_v20  ;;  %v788_v46 = vmul.f32 %v787_v50, %v785_v34  ;;  %vm3165_vm11 = vcmp.lt.s32.totalorder %v9383_v17, 3  ;;  %v87_v34 = vpop.permute.xlu0 %86 }
 0x293   :  { %v10924_v53 = vor.u32 %v3155_v56, %v3154_v27  ;;  %v10927_v28 = vshll.u32 %v3139_v0, 8  ;;  %v2300_v48 = vmul.u32 %v10770_v29, %v2246_v16  ;;  %v3177_v60 = vsel %vm3165_vm11, %v10039_v24, %v10224_v8  ;;  %v13613_v16 = vld [vmem:[#allocation29_spill] sm:$0xff] }
 0x294   :  { %v2303_v51 = vadd.s32 1, %v2299_v1  ;;  %v3171_v9 = vsel %vm3163_vm4, %v10919_v62, %v10921_v58  ;;  %v789_v33 = vxor.u32 2147483648, %v788_v46  ;;  %vm3164_vm5 = vcmp.lt.s32.totalorder %v9383_v17, 2 }
 0x295   :  { %v3173_v40 = vsel %vm3165_vm11, %v10924_v53, %v10188_v37  ;;  %v3175_v29 = vsel %vm3163_vm4, %v10921_v58, %v10924_v53  ;;  %v10949_v32 = vshrl.u32 %v13500_v59, %v13613_v16  ;;  %v10953_v24 = vsel %vm10894_vm3, 0, %v792_v25 }
 0x296   :  { %13614 = vst [vmem:[#allocation90_spill] sm:$0xff] %v10953_v24  ;;  %v2304_v8 = vsel %vm2302_vm6, %v2303_v51, %v2299_v1  ;;  %v3178_v37 = vsel %vm3164_vm5, %v3175_v29, %v3177_v60  ;;  %v790_v45 = vsel %vm669_vm8, %v789_v33, %v788_v46  ;;  %v10964_v21 = vsel %vm3164_vm5, %v3171_v9, %v3173_v40  ;;  %v8237_v29 = vld [vmem:[%s13007_s0 + $0x1] ss:$0 sm:$0xff] }
 0x297   :  { %v2305_v15 = vadd.s32 %v2304_v8, %v2300_v48  ;;  %v3180_v0 = vand.u32 65535, %v10927_v28  ;;  %v10970_v25 = vsel %vm10894_vm3, %v13582_v39, %v790_v45  ;;  %v10973_v54 = vshrl.u32 %v10927_v28, 16 }
 0x298   :  { %v3182_v18 = vand.u32 65535, %v3178_v37  ;;  %v3183_v47 = vshrl.u32 %v3178_v37, 16  ;;  %v13615_v20 = vmov 1326507024   ;;  %v795_v50 = vmul.f32 %v10970_v25, %v10970_v25 }
 0x299   :  { %v10977_v2 = vshrl.u32 %v13615_v20, %v13613_v16  ;;  %v4510_v27 = vadd.s32 3, %v10953_v24  ;;  %v2306_v56 = vadd.s32 536870912, %v2305_v15  ;;  %v10983_v30 = vshrl.u32 %v10820_v5, 5 }
 0x29a   :  { %v3185_v1 = vmul.u32 %v3183_v47, %v3180_v0  ;;  %v10986_v46 = vmul.u32 %v3182_v18, %v10973_v54  ;;  %v3205_v48 = vshrl.u32 %v10964_v21, 16  ;;  %v10990_v51 = vand.u32 31, %v10820_v5 }
 0x29b   :  { %v796_v9 = vmul.f32 -0.001358992, %v795_v50  ;;  %v803_v60 = vmul.f32 -0.00019511016, %v795_v50  ;;  %v10992_v33 = vshrl.u32 %v2306_v56, 30  ;;  %v10995_v40 = vadd.s32 4294967169, %v10829_v11 }
 0x29c   :  { %13616 = vst [vmem:[#allocation84_spill] sm:$0xff] %v10990_v51  ;;  %v11000_v8 = vmul.f32 %v8237_v29, %v87_v34  ;;  %v3184_v37 = vmul.u32 %v3182_v18, %v3180_v0  ;;  %v3188_v45 = vshll.u32 %v3185_v1, 16  ;;  %v11002_v6 = vand.u32 3, %v4510_v27 }
 0x29d   :  { %v797_v42 = vadd.f32 0.041655596, %v796_v9  ;;  %v804_v3 = vadd.f32 0.008332121, %v803_v60  ;;  %v2308_v5 = vshll.u32 %v10992_v33, 30  ;;  %v3190_v56 = vshll.u32 %v10986_v46, 16 }
 0x29e   :  { %13617 = vst [vmem:[#allocation89_spill] sm:$0xff] %v11000_v8  ;;  %vm3192_vm13 = vc.u32 %v3184_v37, %v3188_v45  ;;  %v3194_v55 = vadd.s32 %v3188_v45, %v3184_v37  ;;  %v11006_v11 = vmul.u32 %v3205_v48, %v3180_v0  ;;  %v3204_v34 = vand.u32 65535, %v10964_v21 }
 0x29f   :  { %v798_v19 = vmul.f32 %v797_v42, %v795_v50  ;;  %v805_v24 = vmul.f32 %v804_v3, %v795_v50  ;;  %v11008_v52 = vsub.s32 %v2305_v15, %v2308_v5  ;;  %v2301_v18 = vadd.s32 %v10890_v41, %v10873_v7 }
 0x2a0   :  { %v3187_v27 = vmul.u32 %v3183_v47, %v10973_v54  ;;  %v3193_v9 = vsel %vm3192_vm13, 1, %v13444_v36  ;;  %vm3196_vm8 = vc.u32 %v3194_v55, %v3190_v56  ;;  %vm4516_vm15 = vcmp.eq.s32.totalorder %v11002_v6, 2 }
 0x2a1   :  { %v799_v60 = vadd.f32 -0.4999988, %v798_v19  ;;  %v806_v29 = vadd.f32 -0.16666654, %v805_v24  ;;  %vm2310_vm14 = vcmp.lt.s32.totalorder %v11008_v52, 0  ;;  %v2311_v42 = vsub.s32 0, %v11008_v52 }
 0x2a2   :  { %vm4513_vm7 = vcmp.eq.s32.totalorder %v11002_v6, 0  ;;  %v3168_v3 = vsel %vm3166_vm12, %v10924_v53, 2102212464  ;;  %v3195_v7 = vadd.s32 %v3193_v9, %v3187_v27  ;;  %v3197_v41 = vsel %vm3196_vm8, 1, %v13444_v36 }
 0x2a3   :  { %v3210_v15 = vshll.u32 %v11006_v11, 16  ;;  %v800_v55 = vmul.f32 %v799_v60, %v795_v50  ;;  %v807_v19 = vmul.f32 %v806_v29, %v795_v50  ;;  %vm4512_vm3 = vcmp.lt.s32.totalorder %v11002_v6, 2 }
 0x2a4   :  { %v2312_v24 = vsel %vm2310_vm14, %v2311_v42, %v11008_v52  ;;  %v3206_v21 = vmul.u32 %v3204_v34, %v3180_v0  ;;  %vm13294_vm6 = vweird.f32 %v13582_v39  ;;  %v3147_v37 = vshrl.u32 %v13440_v12, %v9674_v10 }
 0x2a5   :  { %v2313_v47 = vclz %v2312_v24  ;;  %v3199_v45 = vadd.s32 %v3197_v41, %v3195_v7  ;;  %v3208_v53 = vmul.u32 %v3204_v34, %v10973_v54  ;;  %v11030_v5 = vadd.f32 1.0, %v800_v55 }
 0x2a6   :  { %v808_v56 = vadd.f32 1.0, %v807_v19  ;;  %v3189_v27 = vshrl.u32 %v3185_v1, 16  ;;  %vm3214_vm12 = vc.u32 %v3206_v21, %v3210_v15  ;;  %v3167_v9 = vsel %vm3163_vm4, %v3147_v37, %v10919_v62 }
 0x2a7   :  { %13618 = vst [vmem:[#allocation54_spill] sm:$0xff] %v11030_v5  ;;  %v8092_v50 = vadd.s32 4294967294, %v2313_v47  ;;  %v3169_v0 = vsel %vm3165_vm11, %v10921_v58, %v3168_v3  ;;  %v3209_v60 = vmul.u32 %v3205_v48, %v10973_v54  ;;  %v13277_v34 = vxor.u32 2147483648, %v11030_v5 }
 0x2a8   :  { %v11040_v10 = vmul.f32 %v808_v56, %v10970_v25  ;;  %v3200_v29 = vadd.s32 %v3199_v45, %v3189_v27  ;;  %v3215_v1 = vsel %vm3214_vm12, 1, %v13444_v36  ;;  %v3212_v42 = vshll.u32 %v3208_v53, 16  ;;  %v13620_v27 = vld [vmem:[#allocation26_spill] sm:$0xff] }
 0x2a9   :  { %vm8093_vm13 = vcmp.lt.s32.totalorder %v8092_v50, 0  ;;  %v3216_v7 = vadd.s32 %v3210_v15, %v3206_v21  ;;  %v3217_v41 = vadd.s32 %v3215_v1, %v3209_v60  ;;  %v3191_v19 = vshrl.u32 %v10986_v46, 16 }
 0x2aa   :  { %13619 = vst [vmem:[#allocation63_spill] sm:$0xff] %v11040_v10  ;;  %v13276_v62 = vxor.u32 2147483648, %v11040_v10  ;;  %v2316_v55 = vsel %vm8093_vm13, 0, %v8092_v50  ;;  %v3211_v58 = vshrl.u32 %v11006_v11, 16  ;;  %v4518_v25 = vsel %vm4516_vm15, %v13277_v34, %v11040_v10 }
 0x2ab   :  { %v2317_v54 = vsub.s32 32, %v2316_v55  ;;  %v2321_v48 = vsub.s32 4294967266, %v2316_v55  ;;  %vm3218_vm4 = vc.u32 %v3216_v7, %v3212_v42  ;;  %v2318_v15 = vshll.u32 %v11008_v52, %v2316_v55 }
 0x2ac   :  { %v4515_v3 = vsel %vm4513_vm7, %v11030_v5, %v13276_v62  ;;  %v11058_v46 = vadd.s32 %v3200_v29, %v3191_v19  ;;  %v3219_v11 = vsel %vm3218_vm4, 1, %v13444_v36  ;;  %vm2209_vm11 = vcmp.lt.s32.totalorder %v13601_v31, 0 }
 0x2ad   :  { %v4519_v24 = vsel %vm4512_vm3, %v4515_v3, %v4518_v25  ;;  %v2319_v21 = vshrl.u32 %v2301_v18, %v2317_v54  ;;  %v2322_v47 = vadd.s32 127, %v2321_v48  ;;  %v3221_v37 = vadd.s32 %v3219_v11, %v3217_v41  ;;  %v13625_v48 = vld [vmem:[#allocation53_spill] sm:$0xff] }
 0x2ae   :  { %v4520_v45 = vsel %vm13294_vm6, nan, %v4519_v24  ;;  %v3213_v56 = vshrl.u32 %v3208_v53, 16  ;;  %v13278_v50 = vand.u32 2147483647, %v13620_v27  ;;  %v11067_v29 = vadd.s32 %v3216_v7, %v3212_v42  ;;  %v13624_v7 = vld [vmem:[#allocation61_spill] sm:$0xff] }
 0x2af   :  { %7667 = vmatpush.msra.mxu0 %v4520_v45  ;;  %v2320_v52 = vor.u32 %v2319_v21, %v2318_v15  ;;  %v2323_v60 = vshll.u32 %v2322_v47, 23  ;;  %v3222_v1 = vadd.s32 %v3221_v37, %v3211_v58  ;;  %v13621_v6 = vand.u32 2147483647, %v13601_v31  ;;  %v52_v45 = vpop.permute.xlu1 %51 }
 0x2b0   :  { %v2331_v41 = vsub.s32 4, %v10992_v33  ;;  %v3170_v55 = vsel %vm3164_vm5, %v3167_v9, %v3169_v0  ;;  %v2984_v53 = vand.u32 8388607, %v13278_v50  ;;  %vm3226_vm15 = vc.u32 %v11058_v46, %v11067_v29 }
 0x2b1   :  { %vm11071_vm8 = vcmp.le.f32.partialorder %v13621_v6, 0.7853982  ;;  %v2324_v19 = vor.u32 4788187, %v2323_v60  ;;  %v2327_v25 = vcvt.s32.f32 %v2320_v52  ;;  %v3223_v54 = vadd.s32 %v3222_v1, %v3213_v56  ;;  %v13626_v1 = vld [vmem:[#allocation67_spill] sm:$0xff] }
 0x2b2   :  { %v2985_v42 = vor.u32 8388608, %v2984_v53  ;;  %v2995_v58 = vshrl.u32 %v13430_v44, %v13624_v7  ;;  %v2997_v3 = vshll.u32 %v13430_v44, %v13625_v48  ;;  %v2998_v17 = vshrl.u32 %v13432_v43, %v13624_v7  ;;  %v13627_v53 = vld [vmem:[#allocation81_spill] sm:$0xff] }
 0x2b3   :  { %v2325_v9 = vand.u32 2147483647, %v2324_v19  ;;  %v3227_v0 = vadd.s32 1, %v3223_v54  ;;  %v3000_v15 = vshll.u32 %v13432_v43, %v13625_v48  ;;  %v3001_v11 = vshrl.u32 %v13371_v23, %v13624_v7  ;;  %v13628_v19 = vld [vmem:[#allocation72_spill] sm:$0xff] }
 0x2b4   :  { %v2332_v24 = vsel %vm2209_vm11, %v2331_v41, %v10992_v33  ;;  %v3224_v21 = vmul.u32 %v10927_v28, %v3170_v55  ;;  %v2994_v47 = vshll.u32 %v13440_v12, %v13625_v48  ;;  %v11098_v37 = vor.u32 %v2998_v17, %v2997_v3  ;;  %v13631_v17 = vld [vmem:[#allocation39_spill] sm:$0xff] }
 0x2b5   :  { %v2328_v56 = vmul.f32 %v2327_v25, %v2325_v9  ;;  %v3228_v52 = vsel %vm3226_vm15, %v3227_v0, %v3223_v54  ;;  %v11100_v60 = vor.u32 %v3001_v11, %v3000_v15  ;;  %vm3011_vm5 = vcmp.lt.s32.totalorder %v13626_v1, 3  ;;  %v8238_v54 = vld [vmem:[%s13007_s0] ss:$0 sm:$0xff] }
 0x2b6   :  { %v3229_v6 = vadd.s32 %v3228_v52, %v3224_v21  ;;  %vm3009_vm14 = vcmp.lt.s32.totalorder %v13626_v1, 1  ;;  %v3023_v28 = vsel %vm3011_vm5, %v13628_v19, %v13627_v53  ;;  %v11108_v33 = vshll.u32 %v2985_v42, 8  ;;  %v13632_v52 = vld [vmem:[#allocation62_spill] sm:$0xff] }
 0x2b7   :  { %v2329_v41 = vxor.u32 2147483648, %v2328_v56  ;;  %v11110_v55 = vor.u32 %v2995_v58, %v2994_v47  ;;  %vm3010_vm7 = vcmp.lt.s32.totalorder %v13626_v1, 2  ;;  %v3021_v25 = vsel %vm3009_vm14, %v11098_v37, %v11100_v60 }
 0x2b8   :  { %v11120_v48 = vmul.f32 %v8238_v54, %v52_v45  ;;  %v11124_v42 = vsel %vm11071_vm8, 0, %v2332_v24  ;;  %v3230_v3 = vadd.s32 536870912, %v3229_v6  ;;  %v3024_v58 = vsel %vm3010_vm7, %v3021_v25, %v3023_v28  ;;  %v13634_v28 = vld [vmem:[#allocation80_spill] sm:$0xff] }
 0x2b9   :  { %13630 = vst [vmem:[#allocation88_spill] sm:$0xff] %v11124_v42  ;;  %v11130_v9 = vor.u32 %v10949_v32, %v13631_v17  ;;  %v2330_v15 = vsel %vm2209_vm11, %v2329_v41, %v2328_v56  ;;  %v3026_v11 = vand.u32 65535, %v11108_v33  ;;  %v3028_v47 = vand.u32 65535, %v3024_v58 }
 0x2ba   :  { %13629 = vst [vmem:[#allocation68_spill] sm:$0xff] %v11120_v48  ;;  %v11140_v24 = vsel %vm11071_vm8, %v13601_v31, %v2330_v15  ;;  %v11142_v21 = vshrl.u32 %v3230_v3, 30  ;;  %v3029_v45 = vshrl.u32 %v3024_v58, 16  ;;  %vm2088_vm3 = vcmp.lt.s32.totalorder %v13632_v52, 4 }
 0x2bb   :  { %v11146_v32 = vsub.s32 32, %v10990_v51  ;;  %v2335_v53 = vmul.f32 %v11140_v24, %v11140_v24  ;;  %v6060_v56 = vadd.s32 3, %v11124_v42  ;;  %v3017_v18 = vsel %vm3009_vm14, %v11110_v55, %v11098_v37 }
 0x2bc   :  { %v3232_v19 = vshll.u32 %v11142_v21, 30  ;;  %v3019_v41 = vsel %vm3011_vm5, %v11100_v60, %v13634_v28  ;;  %v3027_v25 = vshrl.u32 %v11108_v33, 16  ;;  %v11161_v54 = vmul.u32 %v3029_v45, %v3026_v11 }
 0x2bd   :  { %13633 = vst [vmem:[#allocation74_spill] sm:$0xff] %v11146_v32  ;;  %v11165_v3 = vshll.u32 %v13371_v23, %v10990_v51  ;;  %v11169_v58 = vshll.u32 %v13500_v59, %v10990_v51  ;;  %v2336_v17 = vmul.f32 -0.001358992, %v2335_v53  ;;  %v2343_v15 = vmul.f32 -0.00019511016, %v2335_v53 }
 0x2be   :  { %v11172_v62 = vadd.s32 1, %v10995_v40  ;;  %v11174_v34 = vsub.s32 %v3229_v6, %v3232_v19  ;;  %v11176_v28 = vmul.u32 %v3028_v47, %v3027_v25  ;;  %v3034_v50 = vshll.u32 %v11161_v54, 16 }
 0x2bf   :  { %v2337_v0 = vadd.f32 0.041655596, %v2336_v17  ;;  %v2344_v39 = vadd.f32 0.008332121, %v2343_v15  ;;  %v3020_v5 = vsel %vm3010_vm7, %v3017_v18, %v3019_v41  ;;  %v3030_v10 = vmul.u32 %v3028_v47, %v3026_v11 }
 0x2c0   :  { %v6061_v51 = vand.u32 3, %v6060_v56  ;;  %vm3234_vm12 = vcmp.lt.s32.totalorder %v11174_v34, 0  ;;  %v3235_v40 = vsub.s32 0, %v11174_v34  ;;  %v3036_v17 = vshll.u32 %v11176_v28, 16 }
 0x2c1   :  { %v2338_v61 = vmul.f32 %v2337_v0, %v2335_v53  ;;  %v2345_v6 = vmul.f32 %v2344_v39, %v2335_v53  ;;  %vm3038_vm13 = vc.u32 %v3030_v10, %v3034_v50  ;;  %v3040_v19 = vadd.s32 %v3034_v50, %v3030_v10 }
 0x2c2   :  { %v3236_v14 = vsel %vm3234_vm12, %v3235_v40, %v11174_v34  ;;  %v3039_v15 = vsel %vm3038_vm13, 1, %v13444_v36  ;;  %v3051_v13 = vshrl.u32 %v3020_v5, 16  ;;  %v3033_v42 = vmul.u32 %v3029_v45, %v3027_v25 }
 0x2c3   :  { %v2339_v18 = vadd.f32 -0.4999988, %v2338_v61  ;;  %v2346_v47 = vadd.f32 -0.16666654, %v2345_v6  ;;  %v3237_v41 = vclz %v3236_v14  ;;  %v11190_v56 = vsel %vm2088_vm3, %v11130_v9, 920167782 }
 0x2c4   :  { %vm6063_vm4 = vcmp.eq.s32.totalorder %v6061_v51, 0  ;;  %vm3042_vm11 = vc.u32 %v3040_v19, %v3036_v17  ;;  %v3050_v39 = vand.u32 65535, %v3020_v5  ;;  %vm6062_vm8 = vcmp.lt.s32.totalorder %v6061_v51, 2 }
 0x2c5   :  { %v2340_v10 = vmul.f32 %v2339_v18, %v2335_v53  ;;  %v2347_v50 = vmul.f32 %v2346_v47, %v2335_v53  ;;  %v8110_v0 = vadd.s32 4294967294, %v3237_v41  ;;  %v3041_v40 = vadd.s32 %v3039_v15, %v3033_v42 }
 0x2c6   :  { %vm13299_vm15 = vweird.f32 %v13601_v31  ;;  %vm6066_vm12 = vcmp.eq.s32.totalorder %v6061_v51, 2  ;;  %v3225_v61 = vadd.s32 %v11067_v29, %v11058_v46  ;;  %v3043_v14 = vsel %vm3042_vm11, 1, %v13444_v36 }
 0x2c7   :  { %v3053_v45 = vmul.u32 %v3051_v13, %v3026_v11  ;;  %v11196_v6 = vadd.f32 1.0, %v2340_v10  ;;  %v2348_v35 = vadd.f32 1.0, %v2347_v50  ;;  %vm8111_vm13 = vcmp.lt.s32.totalorder %v8110_v0, 0 }
 0x2c8   :  { %v2993_v5 = vshrl.u32 %v13440_v12, %v13624_v7  ;;  %v3240_v53 = vsel %vm8111_vm13, 0, %v8110_v0  ;;  %v3052_v19 = vmul.u32 %v3050_v39, %v3026_v11  ;;  %v3054_v17 = vmul.u32 %v3050_v39, %v3027_v25 }
 0x2c9   :  { %13635 = vst [vmem:[#allocation82_spill] sm:$0xff] %v11196_v6  ;;  %v3056_v42 = vshll.u32 %v3053_v45, 16  ;;  %v11201_v15 = vmul.f32 %v2348_v35, %v11140_v24  ;;  %v3241_v46 = vsub.s32 32, %v3240_v53  ;;  %v3045_v29 = vadd.s32 %v3043_v14, %v3041_v40 }
 0x2ca   :  { %v3245_v47 = vsub.s32 4294967266, %v3240_v53  ;;  %vm13637_vm11 = vcmp.lt.s32.totalorder %v13626_v1, 4  ;;  %v3035_v10 = vshrl.u32 %v11161_v54, 16  ;;  %v3055_v50 = vmul.u32 %v3051_v13, %v3027_v25 }
 0x2cb   :  { %13636 = vst [vmem:[#allocation37_spill] sm:$0xff] %v11201_v15  ;;  %v3014_v41 = vsel %vm13637_vm11, %v11100_v60, 2102212464  ;;  %v13295_v7 = vxor.u32 2147483648, %v11201_v15  ;;  %v3242_v11 = vshll.u32 %v11174_v34, %v3240_v53  ;;  %v3243_v39 = vshrl.u32 %v3225_v61, %v3241_v46 }
 0x2cc   :  { %vm3060_vm13 = vc.u32 %v3052_v19, %v3056_v42  ;;  %v3246_v35 = vadd.s32 127, %v3245_v47  ;;  %v3058_v24 = vshll.u32 %v3054_v17, 16  ;;  %v3062_v18 = vadd.s32 %v3056_v42, %v3052_v19 }
 0x2cd   :  { %v3061_v0 = vsel %vm3060_vm13, 1, %v13444_v36  ;;  %v6065_v40 = vsel %vm6063_vm4, %v11196_v6, %v13295_v7  ;;  %v13638_v60 = vxor.u32 2147483648, %v11196_v6  ;;  %v3046_v25 = vadd.s32 %v3045_v29, %v3035_v10 }
 0x2ce   :  { %v3063_v54 = vadd.s32 %v3061_v0, %v3055_v50  ;;  %v3244_v61 = vor.u32 %v3243_v39, %v3242_v11  ;;  %v3247_v14 = vshll.u32 %v3246_v35, 23  ;;  %vm3064_vm11 = vc.u32 %v3062_v18, %v3058_v24  ;;  %v13640_v39 = vld [vmem:[#allocation87_spill] sm:$0xff] }
 0x2cf   :  { %v6068_v13 = vsel %vm6066_vm12, %v13638_v60, %v11201_v15  ;;  %v13639_v53 = vor.u32 %v10977_v2, %v10784_v4  ;;  %v3037_v46 = vshrl.u32 %v11176_v28, 16  ;;  %v3065_v29 = vsel %vm3064_vm11, 1, %v13444_v36 }
 0x2d0   :  { %v6069_v34 = vsel %vm6062_vm8, %v6065_v40, %v6068_v13  ;;  %v3248_v51 = vor.u32 4788187, %v3247_v14  ;;  %v3013_v47 = vsel %vm3009_vm14, %v2993_v5, %v11110_v55  ;;  %v3057_v10 = vshrl.u32 %v3053_v45, 16 }
 0x2d1   :  { %v11225_v19 = vsel %vm2088_vm3, %v13639_v53, 1326507024  ;;  %v6070_v42 = vsel %vm13299_vm15, nan, %v6069_v34  ;;  %v3067_v50 = vadd.s32 %v3065_v29, %v3063_v54  ;;  %v3255_v4 = vsub.s32 4, %v11142_v21  ;;  %v13646_v53 = vld [vmem:[#allocation43_spill] sm:$0xff] }
 0x2d2   :  { %7739 = vmatpush.msra.mxu2 %v6070_v42  ;;  %v3015_v2 = vsel %vm3011_vm5, %v11098_v37, %v3014_v41  ;;  %v11238_v11 = vadd.s32 %v3046_v25, %v3037_v46  ;;  %v13296_v28 = vand.u32 2147483647, %v13640_v39  ;;  %v3249_v35 = vand.u32 2147483647, %v3248_v51 }
 0x2d3   :  { %v3251_v0 = vcvt.s32.f32 %v3244_v61  ;;  %v3059_v40 = vshrl.u32 %v3054_v17, 16  ;;  %v3068_v60 = vadd.s32 %v3067_v50, %v3057_v10  ;;  %v1464_v13 = vshrl.u32 %v13500_v59, %v11146_v32  ;;  %v13645_v61 = vld [vmem:[#allocation64_spill] sm:$0xff] }
 0x2d4   :  { %vm524_vm14 = vcmp.gt.s32.totalorder %v11172_v62, 0  ;;  %v13641_v55 = vand.u32 2139095040, %v11000_v8  ;;  %v11246_v5 = vadd.s32 %v3062_v18, %v3058_v24  ;;  %vm3133_vm5 = vcmp.lt.s32.totalorder %v13609_v26, 0 }
 0x2d5   :  { %v3252_v37 = vmul.f32 %v3251_v0, %v3249_v35  ;;  %v3016_v41 = vsel %vm3010_vm7, %v3013_v47, %v3015_v2  ;;  %v3069_v25 = vadd.s32 %v3068_v60, %v3059_v40  ;;  %v13642_v17 = vand.u32 2147483647, %v13609_v26 }
 0x2d6   :  { %v1287_v45 = vshrl.u32 %v13641_v55, 23  ;;  %v3256_v34 = vsel %vm3133_vm5, %v3255_v4, %v11142_v21  ;;  %vm3072_vm8 = vc.u32 %v11238_v11, %v11246_v5  ;;  %v1598_v18 = vand.u32 8388607, %v13296_v28 }
 0x2d7   :  { %vm11253_vm4 = vcmp.le.f32.partialorder %v13642_v17, 0.7853982  ;;  %v3253_v24 = vxor.u32 2147483648, %v3252_v37  ;;  %v3073_v1 = vadd.s32 1, %v3069_v25  ;;  %v1611_v14 = vshll.u32 %v13430_v44, %v13645_v61 }
 0x2d8   :  { %v1612_v42 = vshrl.u32 %v13432_v43, %v13646_v53  ;;  %v3070_v46 = vmul.u32 %v11108_v33, %v3016_v41  ;;  %v1609_v29 = vshrl.u32 %v13430_v44, %v13646_v53  ;;  %v1614_v21 = vshll.u32 %v13432_v43, %v13645_v61 }
 0x2d9   :  { %v1615_v51 = vshrl.u32 %v13371_v23, %v13646_v53  ;;  %v3254_v47 = vsel %vm3133_vm5, %v3253_v24, %v3252_v37  ;;  %v11279_v10 = vsel %vm11253_vm4, 0, %v3256_v34  ;;  %v3074_v50 = vsel %vm3072_vm8, %v3073_v1, %v3069_v25 }
 0x2da   :  { %13647 = vst [vmem:[#allocation42_spill] sm:$0xff] %v11279_v10  ;;  %v11281_v4 = vor.u32 %v1612_v42, %v1611_v14  ;;  %v11286_v33 = vsel %vm11253_vm4, %v13609_v26, %v3254_v47  ;;  %v3075_v2 = vadd.s32 %v3074_v50, %v3070_v46  ;;  %v1608_v35 = vshll.u32 %v13440_v12, %v13645_v61 }
 0x2db   :  { %v11290_v0 = vor.u32 %v1615_v51, %v1614_v21  ;;  %v11295_v40 = vsel %vm524_vm14, %v11172_v62, 0  ;;  %v3259_v60 = vmul.f32 %v11286_v33, %v11286_v33  ;;  %v1599_v55 = vor.u32 8388608, %v1598_v18 }
 0x2dc   :  { %vm1623_vm7 = vcmp.lt.s32.totalorder %v10160_v57, 1  ;;  %v6990_v37 = vadd.s32 3, %v11279_v10  ;;  %v3076_v41 = vadd.s32 536870912, %v3075_v2  ;;  %v11301_v25 = vor.u32 %v1609_v29, %v1608_v35 }
 0x2dd   :  { %v1635_v17 = vsel %vm1623_vm7, %v11281_v4, %v11290_v0  ;;  %v11309_v62 = vshrl.u32 %v13615_v20, %v11146_v32  ;;  %v3260_v54 = vmul.f32 -0.001358992, %v3259_v60  ;;  %v3267_v34 = vmul.f32 -0.00019511016, %v3259_v60 }
 0x2de   :  { %vm1625_vm12 = vcmp.lt.s32.totalorder %v10160_v57, 3  ;;  %v11313_v18 = vand.u32 31, %v11295_v40  ;;  %v11315_v24 = vshrl.u32 %v3076_v41, 30  ;;  %vm1624_vm13 = vcmp.lt.s32.totalorder %v10160_v57, 2 }
 0x2df   :  { %v1637_v1 = vsel %vm1625_vm12, %v10628_v63, %v10813_v38  ;;  %v3261_v61 = vadd.f32 0.041655596, %v3260_v54  ;;  %v3268_v14 = vadd.f32 0.008332121, %v3267_v34  ;;  %v11324_v46 = vshll.u32 %v1599_v55, 8 }
 0x2e0   :  { %v1638_v42 = vsel %vm1624_vm13, %v1635_v17, %v1637_v1  ;;  %v8073_v29 = vadd.s32 4294967169, %v1287_v45  ;;  %v6991_v21 = vand.u32 3, %v6990_v37  ;;  %v3078_v51 = vshll.u32 %v11315_v24, 30 }
 0x2e1   :  { %v1631_v47 = vsel %vm1623_vm7, %v11301_v25, %v11281_v4  ;;  %v3262_v50 = vmul.f32 %v3261_v61, %v3259_v60  ;;  %v3269_v35 = vmul.f32 %v3268_v14, %v3259_v60  ;;  %v1633_v63 = vsel %vm1625_vm12, %v11290_v0, %v10792_v22 }
 0x2e2   :  { %v1643_v38 = vshrl.u32 %v1638_v42, 16  ;;  %v11336_v55 = vor.u32 %v1464_v13, %v11165_v3  ;;  %v11339_v45 = vsub.s32 32, %v11313_v18  ;;  %v11342_v41 = vsub.s32 %v3075_v2, %v3078_v51 }
 0x2e3   :  { %v3263_v17 = vadd.f32 -0.4999988, %v3262_v50  ;;  %v3270_v54 = vadd.f32 -0.16666654, %v3269_v35  ;;  %v1640_v34 = vand.u32 65535, %v11324_v46  ;;  %v1642_v1 = vand.u32 65535, %v1638_v42 }
 0x2e4   :  { %13648 = vst [vmem:[#allocation45_spill] sm:$0xff] %v11336_v55  ;;  %v11345_v61 = vadd.s32 1, %v8073_v29  ;;  %vm3080_vm11 = vcmp.lt.s32.totalorder %v11342_v41, 0  ;;  %v3081_v22 = vsub.s32 0, %v11342_v41  ;;  %v11351_v3 = vsel %vm1624_vm13, %v1631_v47, %v1633_v63  ;;  %v13649_v29 = vld [vmem:[#allocation13_spill] sm:$0xff] }
 0x2e5   :  { %v3264_v13 = vmul.f32 %v3263_v17, %v3259_v60  ;;  %v3271_v14 = vmul.f32 %v3270_v54, %v3259_v60  ;;  %vm6992_vm14 = vcmp.lt.s32.totalorder %v6991_v21, 2  ;;  %v11354_v2 = vshrl.u32 %v11324_v46, 16  ;;  %v13651_v54 = vld [vmem:[#allocation48_spill] sm:$0xff] }
 0x2e6   :  { %v11356_v51 = vmul.u32 %v1643_v38, %v1640_v34  ;;  %vm13313_vm5 = vweird.f32 %v13609_v26  ;;  %vm6993_vm4 = vcmp.eq.s32.totalorder %v6991_v21, 0  ;;  %vm6996_vm8 = vcmp.eq.s32.totalorder %v6991_v21, 2 }
 0x2e7   :  { %v3082_v42 = vsel %vm3080_vm11, %v3081_v22, %v11342_v41  ;;  %v11361_v50 = vand.u32 3, %v13649_v29  ;;  %v11363_v35 = vadd.f32 1.0, %v3264_v13  ;;  %v3272_v47 = vadd.f32 1.0, %v3271_v14 }
 0x2e8   :  { %v3083_v63 = vclz %v3082_v42  ;;  %v11366_v60 = vmul.u32 %v1642_v1, %v11354_v2  ;;  %vm2979_vm6 = vcmp.lt.s32.totalorder %v13620_v27, 0  ;;  %v3071_v17 = vadd.s32 %v11246_v5, %v11238_v11 }
 0x2e9   :  { %13650 = vst [vmem:[#allocation60_spill] sm:$0xff] %v11363_v35  ;;  %v11372_v7 = vand.u32 3, %v13651_v54  ;;  %v1644_v28 = vmul.u32 %v1642_v1, %v1640_v34  ;;  %v1665_v22 = vshrl.u32 %v11351_v3, 16  ;;  %v11376_v29 = vmul.f32 %v3272_v47, %v11286_v33 }
 0x2ea   :  { %v8107_v14 = vadd.s32 4294967294, %v3083_v63  ;;  %v1648_v42 = vshll.u32 %v11356_v51, 16  ;;  %v3101_v37 = vsub.s32 4, %v11315_v24  ;;  %v1607_v8 = vshrl.u32 %v13440_v12, %v13646_v53 }
 0x2eb   :  { %v1647_v11 = vmul.u32 %v1643_v38, %v11354_v2  ;;  %v1664_v5 = vand.u32 65535, %v11351_v3  ;;  %v13310_v1 = vxor.u32 2147483648, %v11376_v29  ;;  %v13652_v54 = vand.u32 2147483647, %v13620_v27 }
 0x2ec   :  { %vm8108_vm15 = vcmp.lt.s32.totalorder %v8107_v14, 0  ;;  %v1650_v47 = vshll.u32 %v11366_v60, 16  ;;  %vm1652_vm10 = vc.u32 %v1644_v28, %v1648_v42  ;;  %v1654_v53 = vadd.s32 %v1648_v42, %v1644_v28 }
 0x2ed   :  { %vm11388_vm11 = vcmp.le.f32.partialorder %v13652_v54, 0.7853982  ;;  %v3086_v63 = vsel %vm8108_vm15, 0, %v8107_v14  ;;  %v1653_v13 = vsel %vm1652_vm10, 1, %v13444_v36  ;;  %v1667_v31 = vmul.u32 %v1665_v22, %v1640_v34 }
 0x2ee   :  { %v6995_v38 = vsel %vm6993_vm4, %v11363_v35, %v13310_v1  ;;  %v13655_v3 = vxor.u32 2147483648, %v11363_v35  ;;  %v3087_v6 = vsub.s32 32, %v3086_v63  ;;  %v3091_v15 = vsub.s32 4294967266, %v3086_v63 }
 0x2ef   :  { %v3088_v14 = vshll.u32 %v11342_v41, %v3086_v63  ;;  %v1655_v10 = vadd.s32 %v1653_v13, %v1647_v11  ;;  %vm1656_vm10 = vc.u32 %v1654_v53, %v1650_v47  ;;  %v1666_v35 = vmul.u32 %v1664_v5, %v1640_v34  ;;  %v13658_v47 = vld [vmem:[#allocation20_spill] sm:$0xff] }
 0x2f0   :  { %v6998_v54 = vsel %vm6996_vm8, %v13655_v3, %v11376_v29  ;;  %v3089_v42 = vshrl.u32 %v3071_v17, %v3087_v6  ;;  %v3092_v55 = vadd.s32 127, %v3091_v15  ;;  %v1657_v1 = vsel %vm1656_vm10, 1, %v13444_v36  ;;  %v13656_v6 = vld [vmem:[#allocation44_spill] sm:$0xff] }
 0x2f1   :  { %v6999_v32 = vsel %vm6992_vm14, %v6995_v38, %v6998_v54  ;;  %v1628_v3 = vsel %vm1626_vm2, %v11290_v0, 2102212464  ;;  %v1668_v21 = vmul.u32 %v1664_v5, %v11354_v2  ;;  %v1670_v38 = vshll.u32 %v1667_v31, 16 }
 0x2f2   :  { %v7000_v28 = vsel %vm13313_vm5, nan, %v6999_v32  ;;  %v3090_v54 = vor.u32 %v3089_v42, %v3088_v14  ;;  %v3093_v41 = vshll.u32 %v3092_v55, 23  ;;  %v3102_v13 = vsel %vm2979_vm6, %v3101_v37, %v11315_v24 }
 0x2f3   :  { %7774 = vmatpush.msra.mxu3 %v7000_v28  ;;  %v1659_v32 = vadd.s32 %v1657_v1, %v1655_v10  ;;  %v11415_v15 = vand.u32 3, %v13656_v6  ;;  %vm3585_vm15 = vcmp.eq.s32.totalorder %v11361_v50, 0  ;;  %vm1674_vm14 = vc.u32 %v1666_v35, %v1670_v38  ;;  %v13660_v28 = vld [vmem:[#allocation94_spill] sm:$0xff] }
 0x2f4   :  { %v1676_v17 = vadd.s32 %v1670_v38, %v1666_v35  ;;  %v3094_v11 = vor.u32 4788187, %v3093_v41  ;;  %v1627_v0 = vsel %vm1623_vm7, %v1607_v8, %v11301_v25  ;;  %v1629_v55 = vsel %vm1625_vm12, %v11281_v4, %v1628_v3  ;;  %v13657_v25 = vld [vmem:[#allocation47_spill] sm:$0xff] }
 0x2f5   :  { %v1649_v34 = vshrl.u32 %v11356_v51, 16  ;;  %v11427_v10 = vsel %vm11388_vm11, 0, %v3102_v13  ;;  %vm3588_vm2 = vcmp.eq.s32.totalorder %v11361_v50, 2  ;;  %v1669_v24 = vmul.u32 %v1665_v22, %v11354_v2 }
 0x2f6   :  { %v1672_v37 = vshll.u32 %v1668_v21, 16  ;;  %v3095_v35 = vand.u32 2147483647, %v3094_v11  ;;  %v3097_v5 = vcvt.s32.f32 %v3090_v54  ;;  %v1675_v8 = vsel %vm1674_vm14, 1, %v13444_v36 }
 0x2f7   :  { %v1660_v1 = vadd.s32 %v1659_v32, %v1649_v34  ;;  %v13659_v63 = vxor.u32 2147483648, %v13658_v47  ;;  %v1630_v51 = vsel %vm1624_vm13, %v1627_v0, %v1629_v55  ;;  %v1677_v53 = vadd.s32 %v1675_v8, %v1669_v24 }
 0x2f8   :  { %vm1678_vm7 = vc.u32 %v1676_v17, %v1672_v37  ;;  %v3098_v14 = vmul.f32 %v3097_v5, %v3095_v35  ;;  %vm3584_vm12 = vcmp.lt.s32.totalorder %v11361_v50, 2  ;;  %v1651_v2 = vshrl.u32 %v11366_v60, 16 }
 0x2f9   :  { %v3590_v4 = vsel %vm3588_vm2, %v13659_v63, %v13657_v25  ;;  %v1679_v22 = vsel %vm1678_vm7, 1, %v13444_v36  ;;  %v13315_v42 = vand.u32 2147483647, %v13660_v28  ;;  %v6835_v3 = vadd.s32 3, %v11427_v10 }
 0x2fa   :  { %v13661_v38 = vxor.u32 2147483648, %v13657_v25  ;;  %v1671_v54 = vshrl.u32 %v1667_v31, 16  ;;  %v1681_v41 = vadd.s32 %v1679_v22, %v1677_v53  ;;  %v3099_v13 = vxor.u32 2147483648, %v3098_v14 }
 0x2fb   :  { %v11447_v32 = vadd.s32 %v1660_v1, %v1651_v2  ;;  %v1673_v6 = vshrl.u32 %v1668_v21, 16  ;;  %v2060_v60 = vand.u32 8388607, %v13315_v42  ;;  %v11451_v11 = vadd.s32 %v1676_v17, %v1672_v37 }
 0x2fc   :  { %v3587_v57 = vsel %vm3585_vm15, %v13658_v47, %v13661_v38  ;;  %v1682_v0 = vadd.s32 %v1681_v41, %v1671_v54  ;;  %v1684_v55 = vmul.u32 %v11324_v46, %v1630_v51  ;;  %v2071_v34 = vshrl.u32 %v13430_v44, %v13613_v16 }
 0x2fd   :  { %v3100_v24 = vsel %vm2979_vm6, %v3099_v13, %v3098_v14  ;;  %v2070_v31 = vshll.u32 %v13440_v12, %v10541_v49  ;;  %v2073_v21 = vshll.u32 %v13430_v44, %v10541_v49  ;;  %v2074_v35 = vshrl.u32 %v13432_v43, %v13613_v16 }
 0x2fe   :  { %v11467_v17 = vsel %vm11388_vm11, %v13620_v27, %v3100_v24  ;;  %v1683_v46 = vadd.s32 %v1682_v0, %v1673_v6  ;;  %v2076_v37 = vshll.u32 %v13432_v43, %v10541_v49  ;;  %v2077_v5 = vshrl.u32 %v13371_v23, %v13613_v16 }
 0x2ff   :  { %v3105_v1 = vmul.f32 %v11467_v17, %v11467_v17  ;;  %vm1686_vm6 = vc.u32 %v11447_v32, %v11451_v11  ;;  %v2061_v8 = vor.u32 8388608, %v2060_v60  ;;  %v11477_v25 = vor.u32 %v2074_v35, %v2073_v21 }
 0x300   :  { %vm3893_vm13 = vcmp.eq.s32.totalorder %v11372_v7, 0  ;;  %v1687_v33 = vadd.s32 1, %v1683_v46  ;;  %v11480_v47 = vor.u32 %v2071_v34, %v2070_v31  ;;  %v11482_v63 = vor.u32 %v2077_v5, %v2076_v37 }
 0x301   :  { %vm13316_vm4 = vcmp.lt.s32.totalorder %v13632_v52, 3  ;;  %v3106_v49 = vmul.f32 -0.001358992, %v3105_v1  ;;  %v3113_v51 = vmul.f32 -0.00019511016, %v3105_v1  ;;  %vm3739_vm8 = vcmp.eq.s32.totalorder %v11415_v15, 0 }
 0x302   :  { %vm2085_vm11 = vcmp.lt.s32.totalorder %v13632_v52, 1  ;;  %v2099_v53 = vsel %vm13316_vm4, %v11130_v9, %v11225_v19  ;;  %v11491_v14 = vand.u32 3, %v6835_v3  ;;  %v3591_v2 = vsel %vm3584_vm12, %v3587_v57, %v3590_v4 }
 0x303   :  { %v1688_v22 = vsel %vm1686_vm6, %v1687_v33, %v1683_v46  ;;  %v2097_v38 = vsel %vm2085_vm11, %v11477_v25, %v11482_v63  ;;  %v3107_v54 = vadd.f32 0.041655596, %v3106_v49  ;;  %v3114_v41 = vadd.f32 0.008332121, %v3113_v51  ;;  %v13663_v49 = vld [vmem:[#allocation51_spill] sm:$0xff] }
 0x304   :  { %v1689_v13 = vadd.s32 %v1688_v22, %v1684_v55  ;;  %vm13314_vm10 = vcmp.lt.s32.totalorder %v13632_v52, 2  ;;  %v2093_v9 = vsel %vm2085_vm11, %v11480_v47, %v11477_v25  ;;  %v2095_v19 = vsel %vm13316_vm4, %v11482_v63, %v11190_v56 }
 0x305   :  { %v2100_v50 = vsel %vm13314_vm10, %v2097_v38, %v2099_v53  ;;  %v11510_v4 = vshll.u32 %v2061_v8, 8  ;;  %v3108_v3 = vmul.f32 %v3107_v54, %v3105_v1  ;;  %v3115_v57 = vmul.f32 %v3114_v41, %v3105_v1  ;;  %v13665_v53 = vld [vmem:[#allocation36_spill] sm:$0xff]  ;;  %v13666_v38 = vld [vmem:[#allocation11_spill] sm:$0xff]  ;;  %v13668_v41 = vld [vmem:[#allocation49_spill] sm:$0xff] }
 0x306   :  { %vm3896_vm15 = vcmp.eq.s32.totalorder %v11372_v7, 2  ;;  %v1690_v6 = vadd.s32 536870912, %v1689_v13  ;;  %v2104_v60 = vand.u32 65535, %v2100_v50  ;;  %vm3742_vm14 = vcmp.eq.s32.totalorder %v11415_v15, 2 }
 0x307   :  { %v11516_v55 = vsel %vm3582_vm1, nan, %v3591_v2  ;;  %v2102_v34 = vand.u32 65535, %v11510_v4  ;;  %v11520_v56 = vshrl.u32 %v11510_v4, 16  ;;  %v2105_v24 = vshrl.u32 %v2100_v50, 16 }
 0x308   :  { %v3109_v31 = vadd.f32 -0.4999988, %v3108_v3  ;;  %v3116_v21 = vadd.f32 -0.16666654, %v3115_v57  ;;  %vm3892_vm2 = vcmp.lt.s32.totalorder %v11372_v7, 2  ;;  %vm3738_vm7 = vcmp.lt.s32.totalorder %v11415_v15, 2 }
 0x309   :  { %v11524_v35 = vshrl.u32 %v1690_v6, 30  ;;  %v2096_v46 = vsel %vm13314_vm10, %v2093_v9, %v2095_v19  ;;  %vm6838_vm1 = vcmp.eq.s32.totalorder %v11491_v14, 0  ;;  %vm6841_vm12 = vcmp.eq.s32.totalorder %v11491_v14, 2 }
 0x30a   :  { %v11530_v37 = vmul.u32 %v2105_v24, %v2102_v34  ;;  %v11533_v5 = vmul.u32 %v2104_v60, %v11520_v56  ;;  %v3110_v8 = vmul.f32 %v3109_v31, %v3105_v1  ;;  %v3117_v33 = vmul.f32 %v3116_v21, %v3105_v1 }
 0x30b   :  { %vm6837_vm6 = vcmp.lt.s32.totalorder %v11491_v14, 2  ;;  %v13664_v51 = vxor.u32 2147483648, %v13663_v49  ;;  %v1692_v22 = vshll.u32 %v11524_v35, 30  ;;  %vm13322_vm5 = vweird.f32 %v13620_v27 }
 0x30c   :  { %vm13323_vm10 = vcmask 392192   ;;  %v13667_v54 = vxor.u32 2147483648, %v13666_v38  ;;  %v2106_v1 = vmul.u32 %v2104_v60, %v2102_v34  ;;  %v2110_v19 = vshll.u32 %v11530_v37, 16 }
 0x30d   :  { %v3895_v2 = vsel %vm3893_vm13, %v13665_v53, %v13664_v51  ;;  %v2127_v50 = vshrl.u32 %v2096_v46, 16  ;;  %v11549_v3 = vadd.f32 1.0, %v3110_v8  ;;  %v3118_v57 = vadd.f32 1.0, %v3117_v33 }
 0x30e   :  { %v3741_v9 = vsel %vm3739_vm8, %v13668_v41, %v13667_v54  ;;  %v11551_v6 = vsub.s32 %v1689_v13, %v1692_v22  ;;  %v2126_v0 = vand.u32 65535, %v2096_v46  ;;  %v2109_v31 = vmul.u32 %v2105_v24, %v11520_v56 }
 0x30f   :  { %v2112_v21 = vshll.u32 %v11533_v5, 16  ;;  %vm2114_vm13 = vc.u32 %v2106_v1, %v2110_v19  ;;  %v2116_v51 = vadd.s32 %v2110_v19, %v2106_v1  ;;  %v11556_v42 = vmul.f32 %v3118_v57, %v11467_v17 }
 0x310   :  { %v13318_v60 = vxor.u32 2147483648, %v11549_v3  ;;  %vm1694_vm8 = vcmp.lt.s32.totalorder %v11551_v6, 0  ;;  %v1695_v8 = vsub.s32 0, %v11551_v6  ;;  %v13669_v13 = vxor.u32 2147483648, %v13665_v53 }
 0x311   :  { %v2115_v24 = vsel %vm2114_vm13, 1, %v13444_v36  ;;  %vm2118_vm4 = vc.u32 %v2116_v51, %v2112_v21  ;;  %v2129_v33 = vmul.u32 %v2127_v50, %v2102_v34  ;;  %v13319_v22 = vxor.u32 2147483648, %v11556_v42 }
 0x312   :  { %v3898_v46 = vsel %vm3896_vm15, %v13669_v13, %v13663_v49  ;;  %v13670_v17 = vxor.u32 2147483648, %v13668_v41  ;;  %v1696_v1 = vsel %vm1694_vm8, %v1695_v8, %v11551_v6  ;;  %v2117_v19 = vadd.s32 %v2115_v24, %v2109_v31 }
 0x313   :  { %v3899_v53 = vsel %vm3892_vm2, %v3895_v2, %v3898_v46  ;;  %v1697_v57 = vclz %v1696_v1  ;;  %v2119_v21 = vsel %vm2118_vm4, 1, %v13444_v36  ;;  %v6840_v41 = vsel %vm6838_vm1, %v11549_v3, %v13319_v22 }
 0x314   :  { %v3744_v54 = vsel %vm3742_vm14, %v13670_v17, %v13666_v38  ;;  %v6843_v38 = vsel %vm6841_vm12, %v13318_v60, %v11556_v42  ;;  %v2130_v7 = vmul.u32 %v2126_v0, %v11520_v56  ;;  %v2132_v2 = vshll.u32 %v2129_v33, 16 }
 0x315   :  { %v3745_v49 = vsel %vm3738_vm7, %v3741_v9, %v3744_v54  ;;  %v6844_v15 = vsel %vm6837_vm6, %v6840_v41, %v6843_v38  ;;  %v7642_v9 = vld [vmem:[%s13010_s3 + $0x48] sm:$0xff]  ;;  %v8080_v31 = vadd.s32 4294967294, %v1697_v57  ;;  %v2121_v51 = vadd.s32 %v2119_v21, %v2117_v19 }
 0x316   :  { %v2128_v8 = vmul.u32 %v2126_v0, %v2102_v34  ;;  %v6845_v13 = vsel %vm13322_vm5, nan, %v6844_v15  ;;  %v3900_v24 = vsel %vm3890_vm0, nan, %v3899_v53  ;;  %v3746_v54 = vsel %vm3736_vm9, nan, %v3745_v49 }
 0x317   :  { %v1685_v14 = vadd.s32 %v11451_v11, %v11447_v32  ;;  %7775 = vmatpush.msra.mxu3 %v6845_v13  ;;  %vm8081_vm4 = vcmp.lt.s32.totalorder %v8080_v31, 0  ;;  %v2111_v1 = vshrl.u32 %v11530_v37, 16  ;;  %v2131_v57 = vmul.u32 %v2127_v50, %v11520_v56 }
 0x318   :  { %vm2136_vm15 = vc.u32 %v2128_v8, %v2132_v2  ;;  %8205 = vmatmul.msk.f32.vlgmr.msra.gmra.mxu3 %vm13323_vm10, %v7642_v9  ;;  %v1700_v34 = vsel %vm8081_vm4, 0, %v8080_v31  ;;  %v2134_v0 = vshll.u32 %v2130_v7, 16  ;;  %v2138_v53 = vadd.s32 %v2132_v2, %v2128_v8 }
 0x319   :  { %v2137_v19 = vsel %vm2136_vm15, 1, %v13444_v36  ;;  %7910 = vmatpush.msrb.mxu3 %v3900_v24  ;;  %v1701_v21 = vsub.s32 32, %v1700_v34  ;;  %v1705_v49 = vsub.s32 4294967266, %v1700_v34  ;;  %v2122_v41 = vadd.s32 %v2121_v51, %v2111_v1 }
 0x31a   :  { %v2139_v38 = vadd.s32 %v2137_v19, %v2131_v57  ;;  %v2069_v32 = vshrl.u32 %v13440_v12, %v13613_v16  ;;  %v2090_v11 = vsel %vm2088_vm3, %v11482_v63, 2102212464  ;;  %v2113_v56 = vshrl.u32 %v11533_v5, 16 }
 0x31b   :  { %vm2140_vm9 = vc.u32 %v2138_v53, %v2134_v0  ;;  %vm13320_vm0 = vcmp.lt.s32.totalorder %v10983_v30, 4  ;;  %7911 = vmatpush.msrb.mxu3 %v3746_v54  ;;  %v1702_v37 = vshll.u32 %v11551_v6, %v1700_v34  ;;  %v1703_v50 = vshrl.u32 %v1685_v14, %v1701_v21 }
 0x31c   :  { %v1706_v2 = vadd.s32 127, %v1705_v49  ;;  %v2141_v15 = vsel %vm2140_vm9, 1, %v13444_v36  ;;  %v1715_v9 = vsub.s32 4, %v11524_v35  ;;  %v2089_v16 = vsel %vm2085_vm11, %v2069_v32, %v11480_v47  ;;  %v13680_v49 = vld [vmem:[#allocation45_spill] sm:$0xff] }
 0x31d   :  { %v2133_v31 = vshrl.u32 %v2129_v33, 16  ;;  %v2143_v63 = vadd.s32 %v2141_v15, %v2139_v38  ;;  %7912 = vmatpush.msrb.mxu3 %v11516_v55  ;;  %v1704_v5 = vor.u32 %v1703_v50, %v1702_v37  ;;  %vm13673_vm3 = vcmp.lt.s32.totalorder %v13632_v52, 3 }
 0x31e   :  { %v1707_v51 = vshll.u32 %v1706_v2, 23  ;;  %v2091_v6 = vsel %vm13673_vm3, %v11477_v25, %v2090_v11  ;;  %v2123_v8 = vadd.s32 %v2122_v41, %v2113_v56  ;;  %v1468_v13 = vor.u32 %v11309_v62, %v11169_v58 }
 0x31f   :  { %v13674_v46 = vand.u32 2139095040, %v11120_v48  ;;  %v2135_v17 = vshrl.u32 %v2130_v7, 16  ;;  %v2144_v54 = vadd.s32 %v2143_v63, %v2133_v31  ;;  %v11629_v47 = vshrl.u32 %v11295_v40, 5 }
 0x320   :  { %vm1593_vm11 = vcmp.lt.s32.totalorder %v13640_v39, 0  ;;  %v1708_v55 = vor.u32 4788187, %v1707_v51  ;;  %v2142_v33 = vadd.s32 %v2138_v53, %v2134_v0  ;;  %v540_v14 = vshrl.u32 %v13500_v59, %v11339_v45  ;;  %v13682_v51 = vld [vmem:[#allocation98_spill] sm:$0xff] }
 0x321   :  { %v209_v24 = vshrl.u32 %v13674_v46, 23  ;;  %v1716_v25 = vsel %vm1593_vm11, %v1715_v9, %v11524_v35  ;;  %vm13675_vm14 = vcmp.lt.s32.totalorder %v13632_v52, 2  ;;  %v2145_v62 = vadd.s32 %v2144_v54, %v2135_v17 }
 0x322   :  { %v2092_v58 = vsel %vm13675_vm14, %v2089_v16, %v2091_v6  ;;  %vm1294_vm2 = vcmp.gt.s32.totalorder %v11345_v61, 0  ;;  %v1709_v7 = vand.u32 2147483647, %v1708_v55  ;;  %v1711_v40 = vcvt.s32.f32 %v1704_v5 }
 0x323   :  { %vm2148_vm7 = vc.u32 %v2123_v8, %v2142_v33  ;;  %v543_v1 = vshrl.u32 %v13615_v20, %v11339_v45  ;;  %v8052_v57 = vadd.s32 4294967169, %v209_v24  ;;  %v13676_v34 = vand.u32 2147483647, %v13640_v39  ;;  %v13684_v24 = vld [vmem:[#allocation97_spill] sm:$0xff] }
 0x324   :  { %v2149_v35 = vadd.s32 1, %v2145_v62  ;;  %v539_v52 = vshll.u32 %v13371_v23, %v11313_v18  ;;  %v1712_v19 = vmul.f32 %v1711_v40, %v1709_v7  ;;  %v2146_v21 = vmul.u32 %v11510_v4, %v2092_v58 }
 0x325   :  { %vm11644_vm1 = vcmp.le.f32.partialorder %v13676_v34, 0.7853982  ;;  %v11658_v41 = vsel %vm13320_vm0, %v13680_v49, 920167782  ;;  %v542_v38 = vshll.u32 %v13500_v59, %v11313_v18  ;;  %v1295_v32 = vsel %vm1294_vm2, %v11345_v61, 0 }
 0x326   :  { %v11652_v53 = vsel %vm11644_vm1, 0, %v1716_v25  ;;  %v2150_v11 = vsel %vm2148_vm7, %v2149_v35, %v2145_v62  ;;  %v11665_v56 = vsel %vm13320_vm0, %v1468_v13, 1326507024  ;;  %v11667_v37 = vor.u32 %v540_v14, %v539_v52  ;;  %v13683_v13 = vld [vmem:[#allocation22_spill] sm:$0xff]  ;;  %v13685_v25 = vld [vmem:[#allocation99_spill] sm:$0xff]  ;;  %v13689_v52 = vld [vmem:[#allocation65_spill] sm:$0xff] }
 0x327   :  { %13679 = vst [vmem:[#allocation52_spill] sm:$0xff] %v11652_v53  ;;  %v1713_v50 = vxor.u32 2147483648, %v1712_v19  ;;  %v2151_v2 = vadd.s32 %v2150_v11, %v2146_v21  ;;  %v544_v4 = vor.u32 %v543_v1, %v542_v38  ;;  %vm548_vm12 = vcmp.lt.s32.totalorder %v11629_v47, 4  ;;  %v13690_v21 = vld [vmem:[#allocation40_spill] sm:$0xff] }
 0x328   :  { %v11670_v15 = vadd.s32 1, %v8052_v57  ;;  %v5440_v9 = vadd.s32 3, %v11652_v53  ;;  %v11673_v16 = vshrl.u32 %v1295_v32, 5  ;;  %v11675_v31 = vand.u32 31, %v1295_v32 }
 0x329   :  { %v1714_v61 = vsel %vm1593_vm11, %v1713_v50, %v1712_v19  ;;  %v2152_v63 = vadd.s32 536870912, %v2151_v2  ;;  %v11685_v6 = vand.u32 3, %v13682_v51  ;;  %v11688_v46 = vand.u32 3, %v13683_v13 }
 0x32a   :  { %13681 = vst [vmem:[#allocation59_spill] sm:$0xff] %v11673_v16  ;;  %v11682_v5 = vsel %vm11644_vm1, %v13640_v39, %v1714_v61  ;;  %v13317_v17 = vand.u32 2147483647, %v13684_v24  ;;  %v11694_v54 = vsel %vm548_vm12, %v11667_v37, 920167782  ;;  %v11699_v58 = vand.u32 3, %v13685_v25 }
 0x32b   :  { %v1719_v55 = vmul.f32 %v11682_v5, %v11682_v5  ;;  %v2153_v14 = vshrl.u32 %v2152_v63, 30  ;;  %v11703_v62 = vsel %vm548_vm12, %v544_v4, 1326507024  ;;  %v11705_v7 = vand.u32 3, %v5440_v9  ;;  %v13691_v4 = vld [vmem:[#allocation42_spill] sm:$0xff] }
 0x32c   :  { %vm13321_vm6 = vcmp.lt.s32.totalorder %v13660_v28, 0  ;;  %v11708_v40 = vadd.s32 %v2142_v33, %v2123_v8  ;;  %v13686_v34 = vand.u32 2147483647, %v13660_v28  ;;  %v11717_v19 = vand.u32 3, %v13689_v52 }
 0x32d   :  { %v1720_v1 = vmul.f32 -0.001358992, %v1719_v55  ;;  %v1727_v57 = vmul.f32 -0.00019511016, %v1719_v55  ;;  %v2154_v35 = vshll.u32 %v2153_v14, 30  ;;  %vm2972_vm8 = vcmp.eq.s32.totalorder %v11685_v6, 2 }
 0x32e   :  { %vm11712_vm13 = vcmp.le.f32.partialorder %v13686_v34, 0.7853982  ;;  %vm2661_vm4 = vcmp.eq.s32.totalorder %v11688_v46, 0  ;;  %v11722_v38 = vand.u32 3, %v13690_v21  ;;  %v11726_v8 = vand.u32 8388607, %v13317_v17 }
 0x32f   :  { %v1721_v33 = vadd.f32 0.041655596, %v1720_v1  ;;  %v1728_v32 = vadd.f32 0.008332121, %v1727_v57  ;;  %v11728_v11 = vsub.s32 %v2151_v2, %v2154_v35  ;;  %v2177_v50 = vsub.s32 4, %v2153_v14 }
 0x330   :  { %vm2818_vm15 = vcmp.eq.s32.totalorder %v11699_v58, 2  ;;  %vm2660_vm9 = vcmp.lt.s32.totalorder %v11688_v46, 2  ;;  %v11733_v9 = vand.u32 3, %v13691_v4  ;;  %vm2664_vm3 = vcmp.eq.s32.totalorder %v11688_v46, 2 }
 0x331   :  { %v11738_v61 = vshrl.u32 %v13440_v12, %v11339_v45  ;;  %v531_v63 = vshrl.u32 %v13430_v44, %v11339_v45  ;;  %v1722_v51 = vmul.f32 %v1721_v33, %v1719_v55  ;;  %v1729_v2 = vmul.f32 %v1728_v32, %v1719_v55  ;;  %v13692_v32 = vld [vmem:[#allocation41_spill] sm:$0xff] }
 0x332   :  { %vm2156_vm11 = vcmp.lt.s32.totalorder %v11728_v11, 0  ;;  %v2157_v13 = vsub.s32 0, %v11728_v11  ;;  %vm2969_vm14 = vcmp.eq.s32.totalorder %v11685_v6, 0  ;;  %vm2815_vm2 = vcmp.eq.s32.totalorder %v11699_v58, 0 }
 0x333   :  { %v11747_v25 = vand.u32 3, %v11427_v10  ;;  %v521_v1 = vor.u32 8388608, %v11726_v8  ;;  %v530_v57 = vshll.u32 %v13440_v12, %v11313_v18  ;;  %v534_v34 = vshrl.u32 %v13432_v43, %v11339_v45  ;;  %v13693_v8 = vld [vmem:[#allocation34_spill] sm:$0xff] }
 0x334   :  { %v1723_v35 = vadd.f32 -0.4999988, %v1722_v51  ;;  %v1730_v52 = vadd.f32 -0.16666654, %v1729_v2  ;;  %vm5446_vm7 = vcmp.eq.s32.totalorder %v11705_v7, 2  ;;  %v2158_v21 = vsel %vm2156_vm11, %v2157_v13, %v11728_v11 }
 0x335   :  { %v2178_v33 = vsel %vm13321_vm6, %v2177_v50, %v2153_v14  ;;  %vm5443_vm1 = vcmp.eq.s32.totalorder %v11705_v7, 0  ;;  %v2159_v10 = vclz %v2158_v21  ;;  %v13694_v4 = vxor.u32 2147483648, %v13693_v8 }
 0x336   :  { %v533_v51 = vshll.u32 %v13430_v44, %v11313_v18  ;;  %v537_v2 = vshrl.u32 %v13371_v23, %v11339_v45  ;;  %v1724_v60 = vmul.f32 %v1723_v35, %v1719_v55  ;;  %v1731_v13 = vmul.f32 %v1730_v52, %v1719_v55 }
 0x337   :  { %v2666_v17 = vsel %vm2664_vm3, %v13694_v4, %v13692_v32  ;;  %vm5442_vm11 = vcmp.lt.s32.totalorder %v11705_v7, 2  ;;  %v13695_v14 = vxor.u32 2147483648, %v13692_v32  ;;  %v11774_v21 = vor.u32 %v531_v63, %v530_v57  ;;  %v13697_v32 = vld [vmem:[#allocation101_spill] sm:$0xff]  ;;  %v13698_v63 = vld [vmem:[#allocation100_spill] sm:$0xff] }
 0x338   :  { %vm1734_vm3 = vweird.f32 %v13640_v39  ;;  %v8089_v4 = vadd.s32 4294967294, %v2159_v10  ;;  %v11779_v22 = vsel %vm11712_vm13, 0, %v2178_v33  ;;  %vm2968_vm0 = vcmp.lt.s32.totalorder %v11685_v6, 2  ;;  %v13701_v33 = vld [vmem:[#allocation24_spill] sm:$0xff] }
 0x339   :  { %v2663_v50 = vsel %vm2661_vm4, %v13693_v8, %v13695_v14  ;;  %v11782_v45 = vor.u32 %v534_v34, %v533_v51  ;;  %v536_v55 = vshll.u32 %v13432_v43, %v11313_v18  ;;  %v11786_v35 = vadd.f32 1.0, %v1724_v60  ;;  %v13700_v34 = vld [vmem:[#allocation19_spill] sm:$0xff] }
 0x33a   :  { %v1732_v52 = vadd.f32 1.0, %v1731_v13  ;;  %v13699_v57 = vxor.u32 2147483648, %v13698_v63  ;;  %vm545_vm4 = vcmp.lt.s32.totalorder %v11629_v47, 1  ;;  %vm8090_vm6 = vcmp.lt.s32.totalorder %v8089_v4, 0 }
 0x33b   :  { %13696 = vst [vmem:[#allocation91_spill] sm:$0xff] %v11786_v35  ;;  %vm3431_vm5 = vcmp.eq.s32.totalorder %v11717_v19, 0  ;;  %vm3434_vm10 = vcmp.eq.s32.totalorder %v11717_v19, 2  ;;  %v13702_v8 = vxor.u32 2147483648, %v13701_v33  ;;  %v11805_v60 = vsel %vm2660_vm9, %v2663_v50, %v2666_v17 }
 0x33c   :  { %v2974_v10 = vsel %vm2972_vm8, %v13699_v57, %v13697_v32  ;;  %v538_v51 = vor.u32 %v537_v2, %v536_v55  ;;  %v11808_v13 = vmul.f32 %v1732_v52, %v11682_v5  ;;  %v13328_v14 = vxor.u32 2147483648, %v11786_v35 }
 0x33d   :  { %v11801_v18 = vsel %vm2818_vm15, %v13702_v8, %v13700_v34  ;;  %v2162_v57 = vsel %vm8090_vm6, 0, %v8089_v4  ;;  %v11812_v53 = vadd.s32 3, %v11779_v22  ;;  %v13704_v8 = vxor.u32 2147483648, %v13697_v32 }
 0x33e   :  { %13703 = vst [vmem:[#allocation95_spill] sm:$0xff] %v11808_v13  ;;  %v2163_v16 = vsub.s32 32, %v2162_v57  ;;  %v2167_v48 = vsub.s32 4294967266, %v2162_v57  ;;  %v13705_v17 = vxor.u32 2147483648, %v13700_v34  ;;  %vm3277_vm6 = vcmp.eq.s32.totalorder %v11733_v9, 0 }
 0x33f   :  { %v2971_v46 = vsel %vm2969_vm14, %v13698_v63, %v13704_v8  ;;  %vm3280_vm15 = vcmp.eq.s32.totalorder %v11733_v9, 2  ;;  %v13329_v2 = vxor.u32 2147483648, %v11808_v13  ;;  %v2164_v50 = vshll.u32 %v11728_v11, %v2162_v57 }
 0x340   :  { %v11825_v5 = vsel %vm2815_vm2, %v13701_v33, %v13705_v17  ;;  %vm547_vm8 = vcmp.lt.s32.totalorder %v11629_v47, 3  ;;  %v553_v4 = vsel %vm545_vm4, %v11774_v21, %v11782_v45  ;;  %v5448_v55 = vsel %vm5446_vm7, %v13328_v14, %v11808_v13 }
 0x341   :  { %v2165_v52 = vshrl.u32 %v11708_v40, %v2163_v16  ;;  %v2168_v32 = vadd.s32 127, %v2167_v48  ;;  %vm3123_vm14 = vcmp.eq.s32.totalorder %v11747_v25, 0  ;;  %vm3126_vm2 = vcmp.eq.s32.totalorder %v11747_v25, 2 }
 0x342   :  { %v557_v11 = vsel %vm545_vm4, %v11782_v45, %v538_v51  ;;  %v5445_v63 = vsel %vm5443_vm1, %v11786_v35, %v13329_v2  ;;  %vm3122_vm9 = vcmp.lt.s32.totalorder %v11747_v25, 2  ;;  %v555_v48 = vsel %vm547_vm8, %v538_v51, %v11694_v54 }
 0x343   :  { %v559_v16 = vsel %vm547_vm8, %v11667_v37, %v11703_v62  ;;  %v11861_v40 = vshll.u32 %v521_v1, 8  ;;  %v5449_v34 = vsel %vm5442_vm11, %v5445_v63, %v5448_v55  ;;  %v2166_v33 = vor.u32 %v2165_v52, %v2164_v50  ;;  %v13706_v55 = vld [vmem:[#allocation75_spill] sm:$0xff] }
 0x344   :  { %v2169_v57 = vshll.u32 %v2168_v32, 23  ;;  %vm546_vm7 = vcmp.lt.s32.totalorder %v11629_v47, 2  ;;  %v5450_v8 = vsel %vm1734_vm3, nan, %v5449_v34  ;;  %v11870_v54 = vsel %vm2968_vm0, %v2971_v46, %v2974_v10  ;;  %v13708_v32 = vld [vmem:[#allocation73_spill] sm:$0xff]  ;;  %v7643_v46 = vld [vmem:[%s13010_s3 + $0x50] sm:$0xff] }
 0x345   :  { %v550_v17 = vsel %vm548_vm12, %v538_v51, 2102212464  ;;  %v560_v37 = vsel %vm546_vm7, %v557_v11, %v559_v16  ;;  %7702 = vmatpush.msra.mxu1 %v5450_v8  ;;  %v556_v7 = vsel %vm546_vm7, %v553_v4, %v555_v48  ;;  %v563_v1 = vshrl.u32 %v11861_v40, 16 }
 0x346   :  { %v2170_v62 = vor.u32 4788187, %v2169_v57  ;;  %v564_v50 = vand.u32 65535, %v560_v37  ;;  %v13707_v52 = vxor.u32 2147483648, %v13706_v55  ;;  %v13709_v10 = vxor.u32 2147483648, %v13708_v32  ;;  %v13712_v57 = vld [vmem:[#allocation27_spill] sm:$0xff] }
 0x347   :  { %v562_v4 = vand.u32 65535, %v11861_v40  ;;  %v565_v11 = vshrl.u32 %v560_v37, 16  ;;  %v2173_v48 = vcvt.s32.f32 %v2166_v33  ;;  %vm13710_vm0 = vcmp.lt.s32.totalorder %v11717_v19, 2 }
 0x348   :  { %v3433_v6 = vsel %vm3431_vm5, %v13708_v32, %v13707_v52  ;;  %v3436_v51 = vsel %vm3434_vm10, %v13709_v10, %v13706_v55  ;;  %v2171_v63 = vand.u32 2147483647, %v2170_v62  ;;  %vm13711_vm12 = vcmask 392192   ;;  %v13715_v52 = vld [vmem:[#allocation60_spill] sm:$0xff] }
 0x349   :  { %v3437_v16 = vsel %vm13710_vm0, %v3433_v6, %v3436_v51  ;;  %8206 = vmatmul.msk.f32.gmra.mxu3 %vm13711_vm12, %v7643_v46  ;;  %v568_v34 = vmul.u32 %v564_v50, %v563_v1  ;;  %vm13713_vm5 = vweird.f32 %v13712_v57  ;;  %v13714_v55 = vxor.u32 2147483648, %v11376_v29 }
 0x34a   :  { %v3438_v8 = vsel %vm13713_vm5, nan, %v3437_v16  ;;  %v13716_v37 = vxor.u32 2147483648, %v13715_v52  ;;  %v567_v19 = vmul.u32 %v565_v11, %v562_v4  ;;  %v2174_v62 = vmul.f32 %v2173_v48, %v2171_v63 }
 0x34b   :  { %v3279_v32 = vsel %vm3277_vm6, %v13715_v52, %v13714_v55  ;;  %7913 = vmatpush.msrb.mxu3 %v3438_v8  ;;  %vm13717_vm10 = vcmp.lt.s32.totalorder %v11733_v9, 2  ;;  %v566_v10 = vmul.u32 %v564_v50, %v562_v4  ;;  %v586_v51 = vand.u32 65535, %v556_v7 }
 0x34c   :  { %v3282_v33 = vsel %vm3280_vm15, %v13716_v37, %v11376_v29  ;;  %vm13718_vm1 = vweird.f32 %v13609_v26  ;;  %v13719_v16 = vxor.u32 2147483648, %v11556_v42  ;;  %v13720_v29 = vxor.u32 2147483648, %v11549_v3 }
 0x34d   :  { %v3283_v6 = vsel %vm13717_vm10, %v3279_v32, %v3282_v33  ;;  %v570_v48 = vshll.u32 %v567_v19, 16  ;;  %v2175_v9 = vxor.u32 2147483648, %v2174_v62  ;;  %v569_v26 = vmul.u32 %v565_v11, %v563_v1 }
 0x34e   :  { %v3284_v46 = vsel %vm13718_vm1, nan, %v3283_v6  ;;  %v3125_v57 = vsel %vm3123_vm14, %v11549_v3, %v13719_v16  ;;  %v3128_v63 = vsel %vm3126_vm2, %v13720_v29, %v11556_v42  ;;  %v572_v8 = vshll.u32 %v568_v34, 16 }
 0x34f   :  { %7914 = vmatpush.msrb.mxu3 %v3284_v46  ;;  %v3129_v50 = vsel %vm3122_vm9, %v3125_v57, %v3128_v63  ;;  %vm2814_vm11 = vcmp.lt.s32.totalorder %v11699_v58, 2  ;;  %vm13721_vm6 = vweird.f32 %v13620_v27  ;;  %vm574_vm15 = vc.u32 %v566_v10, %v570_v48 }
 0x350   :  { %v3130_v55 = vsel %vm13721_vm6, nan, %v3129_v50  ;;  %v576_v52 = vadd.s32 %v570_v48, %v566_v10  ;;  %v587_v32 = vshrl.u32 %v556_v7, 16  ;;  %vm13722_vm14 = vcmp.lt.s32.totalorder %v13660_v28, 0  ;;  %v13723_v50 = vld [vmem:[#allocation96_spill] sm:$0xff] }
 0x351   :  { %v2176_v3 = vsel %vm13722_vm14, %v2175_v9, %v2174_v62  ;;  %7915 = vmatpush.msrb.mxu3 %v3130_v55  ;;  %v549_v42 = vsel %vm545_vm4, %v11738_v61, %v11774_v21  ;;  %v575_v25 = vsel %vm574_vm15, 1, %v13444_v36  ;;  %v590_v11 = vmul.u32 %v586_v51, %v563_v1 }
 0x352   :  { %v11937_v27 = vsel %vm11712_vm13, %v13660_v28, %v2176_v3  ;;  %v577_v37 = vadd.s32 %v575_v25, %v569_v26  ;;  %vm578_vm9 = vc.u32 %v576_v52, %v572_v8  ;;  %v589_v7 = vmul.u32 %v587_v32, %v562_v4 }
 0x353   :  { %v2181_v33 = vmul.f32 %v11937_v27, %v11937_v27  ;;  %v551_v62 = vsel %vm547_vm8, %v11782_v45, %v550_v17  ;;  %v571_v6 = vshrl.u32 %v567_v19, 16  ;;  %v579_v61 = vsel %vm578_vm9, 1, %v13444_v36 }
 0x354   :  { %v573_v21 = vshrl.u32 %v568_v34, 16  ;;  %v581_v10 = vadd.s32 %v579_v61, %v577_v37  ;;  %v588_v46 = vmul.u32 %v586_v51, %v562_v4  ;;  %v592_v16 = vshll.u32 %v589_v7, 16 }
 0x355   :  { %v2182_v0 = vmul.f32 -0.001358992, %v2181_v33  ;;  %v2189_v57 = vmul.f32 -0.00019511016, %v2181_v33  ;;  %v591_v29 = vmul.u32 %v587_v32, %v563_v1  ;;  %v594_v63 = vshll.u32 %v590_v11, 16 }
 0x356   :  { %v582_v48 = vadd.s32 %v581_v10, %v571_v6  ;;  %vm596_vm13 = vc.u32 %v588_v46, %v592_v16  ;;  %v598_v9 = vadd.s32 %v592_v16, %v588_v46  ;;  %v13333_v26 = vand.u32 2147483647, %v13723_v50 }
 0x357   :  { %v2183_v8 = vadd.f32 0.041655596, %v2182_v0  ;;  %v2190_v55 = vadd.f32 0.008332121, %v2189_v57  ;;  %v11947_v45 = vand.u32 3, %v11812_v53  ;;  %v597_v17 = vsel %vm596_vm13, 1, %v13444_v36 }
 0x358   :  { %v552_v4 = vsel %vm546_vm7, %v549_v42, %v551_v62  ;;  %v11952_v34 = vadd.s32 %v582_v48, %v573_v21  ;;  %v599_v19 = vadd.s32 %v597_v17, %v591_v29  ;;  %vm600_vm4 = vc.u32 %v598_v9, %v594_v63 }
 0x359   :  { %v2184_v1 = vmul.f32 %v2183_v8, %v2181_v33  ;;  %v2191_v51 = vmul.f32 %v2190_v55, %v2181_v33  ;;  %v11958_v52 = vsel %vm2814_vm11, %v11825_v5, %v11801_v18  ;;  %vm2510_vm8 = vcmp.eq.s32.totalorder %v11722_v38, 2  ;;  %v13724_v5 = vld [vmem:[#allocation84_spill] sm:$0xff] }
 0x35a   :  { %v601_v53 = vsel %vm600_vm4, 1, %v13444_v36  ;;  %vm2507_vm2 = vcmp.eq.s32.totalorder %v11722_v38, 0  ;;  %v593_v47 = vshrl.u32 %v589_v7, 16  ;;  %v595_v32 = vshrl.u32 %v590_v11, 16  ;;  %v13725_v7 = vld [vmem:[#allocation74_spill] sm:$0xff] }
 0x35b   :  { %v11963_v3 = vadd.s32 %v598_v9, %v594_v63  ;;  %v603_v42 = vadd.s32 %v601_v53, %v599_v19  ;;  %v2185_v25 = vadd.f32 -0.4999988, %v2184_v1  ;;  %v2192_v37 = vadd.f32 -0.16666654, %v2191_v51  ;;  %v13726_v1 = vld [vmem:[#allocation58_spill] sm:$0xff]  ;;  %v13727_v51 = vld [vmem:[#allocation57_spill] sm:$0xff] }
 0x35c   :  { %vm5911_vm7 = vcmp.eq.s32.totalorder %v11947_v45, 2  ;;  %v606_v62 = vmul.u32 %v11861_v40, %v552_v4  ;;  %v1444_v58 = vand.u32 8388607, %v13333_v26  ;;  %vm5908_vm0 = vcmp.eq.s32.totalorder %v11947_v45, 0 }
 0x35d   :  { %v604_v18 = vadd.s32 %v603_v42, %v593_v47  ;;  %vm608_vm12 = vc.u32 %v11952_v34, %v11963_v3  ;;  %v1454_v11 = vshll.u32 %v13440_v12, %v13724_v5  ;;  %v1455_v6 = vshrl.u32 %v13430_v44, %v13725_v7 }
 0x35e   :  { %vm216_vm5 = vcmp.gt.s32.totalorder %v11670_v15, 0  ;;  %v2186_v61 = vmul.f32 %v2185_v25, %v2181_v33  ;;  %v2193_v21 = vmul.f32 %v2192_v37, %v2181_v33  ;;  %vm5907_vm10 = vcmp.lt.s32.totalorder %v11947_v45, 2 }
 0x35f   :  { %vm2506_vm1 = vcmp.lt.s32.totalorder %v11722_v38, 2  ;;  %v1457_v40 = vshll.u32 %v13430_v44, %v13724_v5  ;;  %v1458_v10 = vshrl.u32 %v13432_v43, %v13725_v7  ;;  %vm2196_vm11 = vweird.f32 %v13660_v28 }
 0x360   :  { %v605_v46 = vadd.s32 %v604_v18, %v595_v32  ;;  %v11984_v16 = vor.u32 %v1455_v6, %v1454_v11  ;;  %v1460_v0 = vshll.u32 %v13432_v43, %v13724_v5  ;;  %v1461_v33 = vshrl.u32 %v13371_v23, %v13725_v7 }
 0x361   :  { %v11990_v57 = vadd.f32 1.0, %v2186_v61  ;;  %v2194_v29 = vadd.f32 1.0, %v2193_v21  ;;  %v1445_v63 = vor.u32 8388608, %v1444_v58  ;;  %v11992_v48 = vor.u32 %v1458_v10, %v1457_v40  ;;  %v7639_v40 = vld [vmem:[%s13010_s3 + $0x30] sm:$0xff] }
 0x362   :  { %v609_v9 = vadd.s32 1, %v605_v46  ;;  %v1462_v8 = vor.u32 %v1461_v33, %v1460_v0  ;;  %vm1469_vm6 = vcmp.lt.s32.totalorder %v10983_v30, 1  ;;  %vm1471_vm15 = vcmp.lt.s32.totalorder %v10983_v30, 3 }
 0x363   :  { %v11997_v55 = vmul.f32 %v2194_v29, %v11937_v27  ;;  %v13330_v17 = vxor.u32 2147483648, %v11990_v57  ;;  %v1477_v4 = vsel %vm1469_vm6, %v11984_v16, %v11992_v48  ;;  %v1483_v19 = vsel %vm1471_vm15, %v13680_v49, %v11665_v56 }
 0x364   :  { %v13728_v53 = vxor.u32 2147483648, %v13727_v51  ;;  %v610_v27 = vsel %vm608_vm12, %v609_v9, %v605_v46  ;;  %v1479_v32 = vsel %vm1471_vm15, %v1462_v8, %v11658_v41  ;;  %v1481_v42 = vsel %vm1469_vm6, %v11992_v48, %v1462_v8 }
 0x365   :  { %v13331_v49 = vxor.u32 2147483648, %v11997_v55  ;;  %v13729_v56 = vxor.u32 2147483648, %v13726_v1  ;;  %v611_v37 = vadd.s32 %v610_v27, %v606_v62  ;;  %vm1470_vm14 = vcmp.lt.s32.totalorder %v10983_v30, 2 }
 0x366   :  { %v2512_v47 = vsel %vm2510_vm8, %v13728_v53, %v13726_v1  ;;  %v5913_v41 = vsel %vm5911_vm7, %v13330_v17, %v11997_v55  ;;  %v1480_v58 = vsel %vm1470_vm14, %v1477_v4, %v1479_v32  ;;  %v1484_v18 = vsel %vm1470_vm14, %v1481_v42, %v1483_v19  ;;  %v13731_v1 = vld [vmem:[#allocation8_spill] sm:$0xff]  ;;  %v13733_v53 = vld [vmem:[#allocation5_spill] sm:$0xff] }
 0x367   :  { %v2509_v25 = vsel %vm2507_vm2, %v13727_v51, %v13729_v56  ;;  %v12038_v5 = vshll.u32 %v1445_v63, 8  ;;  %v5910_v62 = vsel %vm5908_vm0, %v11990_v57, %v13331_v49  ;;  %v612_v11 = vadd.s32 536870912, %v611_v37  ;;  %v13737_v56 = vld [vmem:[#allocation7_spill] sm:$0xff] }
 0x368   :  { %v1488_v6 = vand.u32 65535, %v1484_v18  ;;  %v1489_v61 = vshrl.u32 %v1484_v18, 16  ;;  %v5914_v21 = vsel %vm5907_vm10, %v5910_v62, %v5913_v41  ;;  %v2513_v10 = vsel %vm2506_vm1, %v2509_v25, %v2512_v47 }
 0x369   :  { %v1486_v46 = vand.u32 65535, %v12038_v5  ;;  %v1487_v0 = vshrl.u32 %v12038_v5, 16  ;;  %v5915_v33 = vsel %vm2196_vm11, nan, %v5914_v21  ;;  %v12056_v29 = vshrl.u32 %v612_v11, 30 }
 0x36a   :  { %v1510_v63 = vand.u32 65535, %v1480_v58  ;;  %v1511_v9 = vshrl.u32 %v1480_v58, 16  ;;  %v12059_v45 = vsub.s32 32, %v11675_v31  ;;  %v12064_v4 = vsel %vm216_vm5, %v11670_v15, 0  ;;  %7740 = vmatpush.msra.mxu2 %v5915_v33  ;;  %v13735_v15 = vld [vmem:[#allocation9_spill] sm:$0xff] }
 0x36b   :  { %v1491_v38 = vmul.u32 %v1489_v61, %v1486_v46  ;;  %v1492_v19 = vmul.u32 %v1488_v6, %v1487_v0  ;;  %vm13730_vm9 = vcmask 392192   ;;  %vm13732_vm13 = vweird.f32 %v13731_v1 }
 0x36c   :  { %8202 = vmatmul.msk.f32.vlgmr.msra.gmra.mxu2 %vm13730_vm9, %v7639_v40  ;;  %v2976_v51 = vsel %vm13732_vm13, nan, %v11870_v54  ;;  %vm13734_vm4 = vweird.f32 %v13733_v53  ;;  %v614_v27 = vshll.u32 %v12056_v29, 30  ;;  %v1513_v32 = vmul.u32 %v1511_v9, %v1486_v46 }
 0x36d   :  { %v2668_v47 = vsel %vm13734_vm4, nan, %v11805_v60  ;;  %7875 = vmatpush.msrb.mxu2 %v2976_v51  ;;  %vm13736_vm8 = vweird.f32 %v13735_v15  ;;  %vm13738_vm2 = vweird.f32 %v13737_v56  ;;  %v1490_v41 = vmul.u32 %v1488_v6, %v1486_v46 }
 0x36e   :  { %v2822_v42 = vsel %vm13736_vm8, nan, %v11958_v52  ;;  %v2514_v25 = vsel %vm13738_vm2, nan, %v2513_v10  ;;  %v1494_v58 = vshll.u32 %v1491_v38, 16  ;;  %v12079_v18 = vsub.s32 %v611_v37, %v614_v27 }
 0x36f   :  { %v1453_v54 = vshrl.u32 %v13440_v12, %v13725_v7  ;;  %v1493_v62 = vmul.u32 %v1489_v61, %v1487_v0  ;;  %v1514_v60 = vmul.u32 %v1510_v63, %v1487_v0  ;;  %7876 = vmatpush.msrb.mxu2 %v2822_v42  ;;  %v1496_v11 = vshll.u32 %v1492_v19, 16 }
 0x370   :  { %vm1498_vm7 = vc.u32 %v1490_v41, %v1494_v58  ;;  %v1500_v21 = vadd.s32 %v1494_v58, %v1490_v41  ;;  %v1516_v40 = vshll.u32 %v1513_v32, 16  ;;  %vm616_vm0 = vcmp.lt.s32.totalorder %v12079_v18, 0  ;;  %v13740_v41 = vld [vmem:[#allocation33_spill] sm:$0xff] }
 0x371   :  { %v617_v52 = vsub.s32 0, %v12079_v18  ;;  %vm13739_vm12 = vcmp.lt.s32.totalorder %v10983_v30, 4  ;;  %v1499_v37 = vsel %vm1498_vm7, 1, %v13444_v36  ;;  %7877 = vmatpush.msrb.mxu2 %v2668_v47  ;;  %v1495_v10 = vshrl.u32 %v1491_v38, 16 }
 0x372   :  { %v1474_v6 = vsel %vm13739_vm12, %v1462_v8, 2102212464  ;;  %v1501_v33 = vadd.s32 %v1499_v37, %v1493_v62  ;;  %vm1502_vm5 = vc.u32 %v1500_v21, %v1496_v11  ;;  %v1512_v7 = vmul.u32 %v1510_v63, %v1486_v46 }
 0x373   :  { %v618_v61 = vsel %vm616_vm0, %v617_v52, %v12079_v18  ;;  %v1503_v1 = vsel %vm1502_vm5, 1, %v13444_v36  ;;  %v1515_v51 = vmul.u32 %v1511_v9, %v1487_v0  ;;  %v1518_v53 = vshll.u32 %v1514_v60, 16  ;;  %7878 = vmatpush.msrb.mxu2 %v2514_v25 }
 0x374   :  { %v619_v27 = vclz %v618_v61  ;;  %v1505_v15 = vadd.s32 %v1503_v1, %v1501_v33  ;;  %vm1520_vm10 = vc.u32 %v1512_v7, %v1516_v40  ;;  %v1522_v42 = vadd.s32 %v1516_v40, %v1512_v7 }
 0x375   :  { %v637_v8 = vsub.s32 4, %v12056_v29  ;;  %v1473_v38 = vsel %vm1469_vm6, %v1453_v54, %v11984_v16  ;;  %v1475_v46 = vsel %vm1471_vm15, %v11992_v48, %v1474_v6  ;;  %v1521_v63 = vsel %vm1520_vm10, 1, %v13444_v36 }
 0x376   :  { %v8059_v47 = vadd.s32 4294967294, %v619_v27  ;;  %v1506_v0 = vadd.s32 %v1505_v15, %v1495_v10  ;;  %v1523_v9 = vadd.s32 %v1521_v63, %v1515_v51  ;;  %vm1524_vm1 = vc.u32 %v1522_v42, %v1518_v53 }
 0x377   :  { %vm515_vm9 = vcmp.lt.s32.totalorder %v13684_v24, 0  ;;  %v1497_v56 = vshrl.u32 %v1492_v19, 16  ;;  %v1525_v25 = vsel %vm1524_vm1, 1, %v13444_v36  ;;  %v13332_v58 = vand.u32 2147483647, %v13740_v41 }
 0x378   :  { %v607_v16 = vadd.s32 %v11963_v3, %v11952_v34  ;;  %vm8060_vm6 = vcmp.lt.s32.totalorder %v8059_v47, 0  ;;  %v1517_v54 = vshrl.u32 %v1513_v32, 16  ;;  %v1527_v62 = vadd.s32 %v1525_v25, %v1523_v9 }
 0x379   :  { %v622_v48 = vsel %vm8060_vm6, 0, %v8059_v47  ;;  %v638_v11 = vsel %vm515_vm9, %v637_v8, %v12056_v29  ;;  %v1476_v21 = vsel %vm1470_vm14, %v1473_v38, %v1475_v46  ;;  %v12108_v40 = vadd.s32 %v1506_v0, %v1497_v56  ;;  %v13745_v8 = vld [vmem:[#allocation70_spill] sm:$0xff] }
 0x37a   :  { %v623_v19 = vsub.s32 32, %v622_v48  ;;  %v627_v52 = vsub.s32 4294967266, %v622_v48  ;;  %v1519_v6 = vshrl.u32 %v1514_v60, 16  ;;  %v1528_v37 = vadd.s32 %v1527_v62, %v1517_v54 }
 0x37b   :  { %v12112_v34 = vshll.u32 %v13371_v23, %v11675_v31  ;;  %v13741_v3 = vand.u32 2147483647, %v13684_v24  ;;  %v1526_v29 = vadd.s32 %v1522_v42, %v1518_v53  ;;  %v366_v30 = vand.u32 8388607, %v13332_v58  ;;  %v13744_v42 = vld [vmem:[#allocation79_spill] sm:$0xff] }
 0x37c   :  { %v624_v10 = vshll.u32 %v12079_v18, %v622_v48  ;;  %v625_v33 = vshrl.u32 %v607_v16, %v623_v19  ;;  %v628_v7 = vadd.s32 127, %v627_v52  ;;  %v1529_v60 = vadd.s32 %v1528_v37, %v1519_v6 }
 0x37d   :  { %vm12116_vm15 = vcmp.le.f32.partialorder %v13741_v3, 0.7853982  ;;  %v12125_v61 = vshll.u32 %v13500_v59, %v11675_v31  ;;  %v1530_v51 = vmul.u32 %v12038_v5, %v1476_v21  ;;  %vm1532_vm14 = vc.u32 %v12108_v40, %v1526_v29  ;;  %v13746_v3 = vld [vmem:[#allocation83_spill] sm:$0xff] }
 0x37e   :  { %v12129_v1 = vsel %vm12116_vm15, 0, %v638_v11  ;;  %v626_v53 = vor.u32 %v625_v33, %v624_v10  ;;  %v629_v27 = vshll.u32 %v628_v7, 23  ;;  %v1533_v15 = vadd.s32 1, %v1529_v60 }
 0x37f   :  { %v377_v18 = vshrl.u32 %v13430_v44, %v13744_v42  ;;  %v379_v38 = vshll.u32 %v13430_v44, %v13745_v8  ;;  %v380_v46 = vshrl.u32 %v13432_v43, %v13744_v42  ;;  %v382_v63 = vshll.u32 %v13432_v43, %v13745_v8 }
 0x380   :  { %v383_v5 = vshrl.u32 %v13371_v23, %v13744_v42  ;;  %v630_v47 = vor.u32 4788187, %v629_v27  ;;  %v1534_v0 = vsel %vm1532_vm14, %v1533_v15, %v1529_v60  ;;  %v367_v9 = vor.u32 8388608, %v366_v30 }
 0x381   :  { %v376_v56 = vshll.u32 %v13440_v12, %v13745_v8  ;;  %v12146_v25 = vand.u32 31, %v12064_v4  ;;  %v1535_v16 = vadd.s32 %v1534_v0, %v1530_v51  ;;  %v12148_v54 = vor.u32 %v380_v46, %v379_v38  ;;  %v13747_v51 = vld [vmem:[#allocation93_spill] sm:$0xff] }
 0x382   :  { %v384_v62 = vor.u32 %v383_v5, %v382_v63  ;;  %v12152_v48 = vshrl.u32 %v13500_v59, %v12059_v45  ;;  %v631_v11 = vand.u32 2147483647, %v630_v47  ;;  %v633_v21 = vcvt.s32.f32 %v626_v53  ;;  %v13748_v53 = vld [vmem:[#allocation86_spill] sm:$0xff]  ;;  %v13749_v63 = vld [vmem:[#allocation92_spill] sm:$0xff] }
 0x383   :  { %v378_v19 = vor.u32 %v377_v18, %v376_v56  ;;  %v12156_v52 = vshrl.u32 %v13615_v20, %v12059_v45  ;;  %v4355_v6 = vadd.s32 3, %v12129_v1  ;;  %v1536_v37 = vadd.s32 536870912, %v1535_v16 }
 0x384   :  { %vm391_vm13 = vcmp.lt.s32.totalorder %v13746_v3, 1  ;;  %v634_v30 = vmul.f32 %v633_v21, %v631_v11  ;;  %vm393_vm4 = vcmp.lt.s32.totalorder %v13746_v3, 3  ;;  %v12164_v33 = vshll.u32 %v367_v9, 8 }
 0x385   :  { %v403_v10 = vsel %vm391_vm13, %v12148_v54, %v384_v62  ;;  %v12167_v7 = vsub.s32 32, %v12146_v25  ;;  %v12169_v60 = vshrl.u32 %v1536_v37, 30  ;;  %vm392_vm8 = vcmp.lt.s32.totalorder %v13746_v3, 2 }
 0x386   :  { %v405_v27 = vsel %vm393_vm4, %v13748_v53, %v13747_v51  ;;  %v12178_v15 = vshll.u32 %v13371_v23, %v12146_v25  ;;  %v635_v18 = vxor.u32 2147483648, %v634_v30  ;;  %v399_v8 = vsel %vm391_vm13, %v378_v19, %v12148_v54  ;;  %v13750_v51 = vld [vmem:[#allocation88_spill] sm:$0xff] }
 0x387   :  { %v406_v38 = vsel %vm392_vm8, %v403_v10, %v405_v27  ;;  %v1538_v46 = vshll.u32 %v12169_v60, 30  ;;  %v401_v5 = vsel %vm393_vm4, %v384_v62, %v13749_v63  ;;  %v12191_v9 = vshll.u32 %v13500_v59, %v12146_v25 }
 0x388   :  { %v410_v47 = vand.u32 65535, %v406_v38  ;;  %v411_v0 = vshrl.u32 %v406_v38, 16  ;;  %v636_v56 = vsel %vm515_vm9, %v635_v18, %v634_v30  ;;  %v12195_v11 = vand.u32 3, %v4355_v6 }
 0x389   :  { %v408_v21 = vand.u32 65535, %v12164_v33  ;;  %v12201_v37 = vsel %vm12116_vm15, %v13684_v24, %v636_v56  ;;  %v12203_v10 = vsub.s32 %v1535_v16, %v1538_v46  ;;  %v12206_v53 = vand.u32 3, %v13750_v51 }
 0x38a   :  { %v409_v27 = vshrl.u32 %v12164_v33, 16  ;;  %v641_v38 = vmul.f32 %v12201_v37, %v12201_v37  ;;  %v1531_v6 = vadd.s32 %v1526_v29, %v12108_v40  ;;  %v402_v30 = vsel %vm392_vm8, %v399_v8, %v401_v5 }
 0x38b   :  { %v413_v18 = vmul.u32 %v411_v0, %v408_v21  ;;  %vm1540_vm2 = vcmp.lt.s32.totalorder %v12203_v10, 0  ;;  %v1541_v32 = vsub.s32 0, %v12203_v10  ;;  %v375_v16 = vshrl.u32 %v13440_v12, %v13744_v42 }
 0x38c   :  { %v12218_v46 = vmul.u32 %v410_v47, %v409_v27  ;;  %v642_v63 = vmul.f32 -0.001358992, %v641_v38  ;;  %v649_v56 = vmul.f32 -0.00019511016, %v641_v38  ;;  %v412_v51 = vmul.u32 %v410_v47, %v408_v21 }
 0x38d   :  { %v416_v14 = vshll.u32 %v413_v18, 16  ;;  %v1542_v2 = vsel %vm1540_vm2, %v1541_v32, %v12203_v10  ;;  %v12223_v40 = vsel %vm391_vm13, %v375_v16, %v378_v19  ;;  %v432_v29 = vand.u32 65535, %v402_v30 }
 0x38e   :  { %v433_v8 = vshrl.u32 %v402_v30, 16  ;;  %v643_v5 = vadd.f32 0.041655596, %v642_v63  ;;  %v650_v17 = vadd.f32 0.008332121, %v649_v56  ;;  %v1543_v49 = vclz %v1542_v2 }
 0x38f   :  { %vm420_vm7 = vc.u32 %v412_v51, %v416_v14  ;;  %vm13751_vm0 = vcmp.lt.s32.totalorder %v13746_v3, 4  ;;  %v415_v58 = vmul.u32 %v411_v0, %v409_v27  ;;  %v418_v26 = vshll.u32 %v12218_v46, 16 }
 0x390   :  { %v396_v42 = vsel %vm13751_vm0, %v384_v62, 2102212464  ;;  %v421_v47 = vsel %vm420_vm7, 1, %v13444_v36  ;;  %v644_v39 = vmul.f32 %v643_v5, %v641_v38  ;;  %v651_v32 = vmul.f32 %v650_v17, %v641_v38 }
 0x391   :  { %v8077_v35 = vadd.s32 4294967294, %v1543_v49  ;;  %v422_v13 = vadd.s32 %v416_v14, %v412_v51  ;;  %vm2353_vm12 = vcmp.eq.s32.totalorder %v12206_v53, 0  ;;  %v423_v19 = vadd.s32 %v421_v47, %v415_v58 }
 0x392   :  { %v434_v30 = vmul.u32 %v432_v29, %v408_v21  ;;  %v12230_v16 = vmul.u32 %v433_v8, %v408_v21  ;;  %v12232_v2 = vmul.u32 %v432_v29, %v409_v27  ;;  %v645_v63 = vadd.f32 -0.4999988, %v644_v39 }
 0x393   :  { %v652_v56 = vadd.f32 -0.16666654, %v651_v32  ;;  %vm8078_vm5 = vcmp.lt.s32.totalorder %v8077_v35, 0  ;;  %vm2356_vm10 = vcmp.eq.s32.totalorder %v12206_v53, 2  ;;  %vm424_vm1 = vc.u32 %v422_v13, %v418_v26 }
 0x394   :  { %vm4358_vm9 = vcmp.eq.s32.totalorder %v12195_v11, 0  ;;  %vm4361_vm6 = vcmp.eq.s32.totalorder %v12195_v11, 2  ;;  %v1546_v17 = vsel %vm8078_vm5, 0, %v8077_v35  ;;  %vm2352_vm15 = vcmp.lt.s32.totalorder %v12206_v53, 2 }
 0x395   :  { %v417_v14 = vshrl.u32 %v413_v18, 16  ;;  %v425_v49 = vsel %vm424_vm1, 1, %v13444_v36  ;;  %v438_v58 = vshll.u32 %v12230_v16, 16  ;;  %v646_v62 = vmul.f32 %v645_v63, %v641_v38 }
 0x396   :  { %v653_v0 = vmul.f32 %v652_v56, %v641_v38  ;;  %vm4357_vm14 = vcmp.lt.s32.totalorder %v12195_v11, 2  ;;  %v1547_v39 = vsub.s32 32, %v1546_v17  ;;  %v437_v21 = vmul.u32 %v433_v8, %v409_v27 }
 0x397   :  { %vm656_vm13 = vweird.f32 %v13684_v24  ;;  %v1551_v13 = vsub.s32 4294967266, %v1546_v17  ;;  %v427_v26 = vadd.s32 %v425_v49, %v423_v19  ;;  %v440_v51 = vshll.u32 %v12232_v2, 16 }
 0x398   :  { %vm442_vm2 = vc.u32 %v434_v30, %v438_v58  ;;  %v12243_v35 = vadd.f32 1.0, %v646_v62  ;;  %v654_v18 = vadd.f32 1.0, %v653_v0  ;;  %vm1439_vm7 = vcmp.lt.s32.totalorder %v13723_v50, 0 }
 0x399   :  { %v1549_v29 = vshrl.u32 %v1531_v6, %v1547_v39  ;;  %v443_v5 = vsel %vm442_vm2, 1, %v13444_v36  ;;  %v1548_v38 = vshll.u32 %v12203_v10, %v1546_v17  ;;  %v1552_v47 = vadd.s32 127, %v1551_v13 }
 0x39a   :  { %v428_v32 = vadd.s32 %v427_v26, %v417_v14  ;;  %v444_v27 = vadd.s32 %v438_v58, %v434_v30  ;;  %v12249_v8 = vmul.f32 %v654_v18, %v12201_v37  ;;  %v13339_v19 = vxor.u32 2147483648, %v12243_v35  ;;  %v7640_v37 = vld [vmem:[%s13010_s3 + $0x38] sm:$0xff]  ;;  %v13752_v30 = vld [vmem:[#allocation37_spill] sm:$0xff]  ;;  %v13754_v58 = vld [vmem:[#allocation82_spill] sm:$0xff] }
 0x39b   :  { %v397_v63 = vsel %vm393_vm4, %v12148_v54, %v396_v42  ;;  %v445_v56 = vadd.s32 %v443_v5, %v437_v21  ;;  %v1550_v49 = vor.u32 %v1549_v29, %v1548_v38  ;;  %v1553_v62 = vshll.u32 %v1552_v47, 23 }
 0x39c   :  { %v419_v6 = vshrl.u32 %v12218_v46, 16  ;;  %vm446_vm0 = vc.u32 %v444_v27, %v440_v51  ;;  %v13340_v10 = vxor.u32 2147483648, %v12249_v8  ;;  %v1561_v17 = vsub.s32 4, %v12169_v60 }
 0x39d   :  { %v13753_v14 = vxor.u32 2147483648, %v13752_v30  ;;  %v439_v42 = vshrl.u32 %v12230_v16, 16  ;;  %v1554_v0 = vor.u32 4788187, %v1553_v62  ;;  %vm13755_vm4 = vcmask 392192  }
 0x39e   :  { %8203 = vmatmul.msk.f32.gmra.mxu2 %vm13755_vm4, %v7640_v37  ;;  %v13756_v46 = vxor.u32 2147483648, %v13754_v58  ;;  %v12273_v21 = vadd.s32 %v428_v32, %v419_v6  ;;  %v447_v13 = vsel %vm446_vm0, 1, %v13444_v36  ;;  %v4360_v26 = vsel %vm4358_vm9, %v12243_v35, %v13340_v10  ;;  %v13757_v32 = vld [vmem:[#allocation50_spill] sm:$0xff] }
 0x39f   :  { %v2355_v54 = vsel %vm2353_vm12, %v13754_v58, %v13753_v14  ;;  %v4363_v16 = vsel %vm4361_vm6, %v13339_v19, %v12249_v8  ;;  %v449_v29 = vadd.s32 %v447_v13, %v445_v56  ;;  %v1555_v38 = vand.u32 2147483647, %v1554_v0  ;;  %v13759_v14 = vld [vmem:[#allocation68_spill] sm:$0xff] }
 0x3a0   :  { %v2358_v39 = vsel %vm2356_vm10, %v13756_v46, %v13752_v30  ;;  %v4364_v5 = vsel %vm4357_vm14, %v4360_v26, %v4363_v16  ;;  %v1557_v47 = vcvt.s32.f32 %v1550_v49  ;;  %vm13758_vm12 = vweird.f32 %v13757_v32  ;;  %v13761_v46 = vld [vmem:[#allocation89_spill] sm:$0xff] }
 0x3a1   :  { %v2359_v18 = vsel %vm2352_vm15, %v2355_v54, %v2358_v39  ;;  %v4365_v6 = vsel %vm656_vm13, nan, %v4364_v5  ;;  %v441_v37 = vshrl.u32 %v12232_v2, 16  ;;  %v450_v30 = vadd.s32 %v449_v29, %v439_v42 }
 0x3a2   :  { %v2360_v62 = vsel %vm13758_vm12, nan, %v2359_v18  ;;  %v13344_v58 = vand.u32 2147483647, %v13759_v14  ;;  %v12298_v53 = vor.u32 %v12152_v48, %v12112_v34  ;;  %7668 = vmatpush.msra.mxu0 %v4365_v6  ;;  %v1558_v11 = vmul.f32 %v1557_v47, %v1555_v38  ;;  %v13763_v38 = vld [vmem:[#allocation16_spill] sm:$0xff] }
 0x3a3   :  { %7879 = vmatpush.msrb.mxu2 %v2360_v62  ;;  %v1562_v56 = vsel %vm1439_vm7, %v1561_v17, %v12169_v60  ;;  %v12303_v49 = vadd.s32 %v444_v27, %v440_v51  ;;  %v232_v54 = vshrl.u32 %v13500_v59, %v12167_v7  ;;  %v235_v2 = vshrl.u32 %v13615_v20, %v12167_v7 }
 0x3a4   :  { %v398_v42 = vsel %vm392_vm8, %v12223_v40, %v397_v63  ;;  %v451_v34 = vadd.s32 %v450_v30, %v441_v37  ;;  %v1314_v48 = vor.u32 %v12156_v52, %v12125_v61  ;;  %v13760_v0 = vand.u32 2147483647, %v13723_v50  ;;  %v13762_v40 = vld [vmem:[#allocation59_spill] sm:$0xff] }
 0x3a5   :  { %v1559_v60 = vxor.u32 2147483648, %v1558_v11  ;;  %vm454_vm10 = vc.u32 %v12273_v21, %v12303_v49  ;;  %v212_v17 = vand.u32 8388607, %v13344_v58  ;;  %v13343_v3 = vand.u32 2147483647, %v13761_v46 }
 0x3a6   :  { %vm1438_vm5 = vcmp.le.f32.partialorder %v13760_v0, 0.7853982  ;;  %v455_v27 = vadd.s32 1, %v451_v34  ;;  %vm1318_vm8 = vcmp.lt.s32.totalorder %v13762_v40, 4  ;;  %v12325_v63 = vshrl.u32 %v12064_v4, 5 }
 0x3a7   :  { %v12318_v51 = vsel %vm1438_vm5, 0, %v1562_v56  ;;  %v1560_v61 = vsel %vm1439_vm7, %v1559_v60, %v1558_v11  ;;  %v452_v52 = vmul.u32 %v12164_v33, %v398_v42  ;;  %v12331_v39 = vor.u32 %v232_v54, %v12178_v15 }
 0x3a8   :  { %v236_v13 = vor.u32 %v235_v2, %v12191_v9  ;;  %v1563_v26 = vsel %vm1438_vm5, %v13723_v50, %v1560_v61  ;;  %v456_v16 = vsel %vm454_vm10, %v455_v27, %v451_v34  ;;  %v12338_v18 = vsel %vm1318_vm8, %v12298_v53, 920167782 }
 0x3a9   :  { %v1565_v4 = vmul.f32 %v1563_v26, %v1563_v26  ;;  %v5285_v29 = vadd.s32 3, %v12318_v51  ;;  %v457_v5 = vadd.s32 %v456_v16, %v452_v52  ;;  %v12343_v33 = vshrl.u32 %v13500_v59, %v13763_v38 }
 0x3aa   :  { %v12347_v15 = vsel %vm1318_vm8, %v1314_v48, 1326507024  ;;  %v213_v9 = vor.u32 8388608, %v212_v17  ;;  %v1290_v47 = vand.u32 8388607, %v13343_v3  ;;  %vm240_vm1 = vcmp.lt.s32.totalorder %v12325_v63, 4 }
 0x3ab   :  { %v1566_v32 = vmul.f32 -0.001358992, %v1565_v4  ;;  %v1573_v62 = vmul.f32 -0.00019511016, %v1565_v4  ;;  %v458_v6 = vadd.s32 536870912, %v457_v5  ;;  %v12354_v37 = vshrl.u32 %v13615_v20, %v13763_v38 }
 0x3ac   :  { %v246_v59 = vsel %vm240_vm1, %v12331_v39, 920167782  ;;  %v250_v30 = vsel %vm240_vm1, %v236_v13, 1326507024  ;;  %vm361_vm9 = vcmp.lt.s32.totalorder %v13740_v41, 0  ;;  %v12362_v54 = vand.u32 3, %v5285_v29 }
 0x3ad   :  { %v1567_v11 = vadd.f32 0.041655596, %v1566_v32  ;;  %v1574_v56 = vadd.f32 0.008332121, %v1573_v62  ;;  %v459_v2 = vshrl.u32 %v458_v6, 30  ;;  %v222_v42 = vshll.u32 %v13440_v12, %v12146_v25 }
 0x3ae   :  { %v225_v20 = vshll.u32 %v13430_v44, %v12146_v25  ;;  %v12368_v34 = vshll.u32 %v213_v9, 8  ;;  %v1291_v48 = vor.u32 8388608, %v1290_v47  ;;  %v223_v61 = vshrl.u32 %v13430_v44, %v12167_v7 }
 0x3af   :  { %v1568_v0 = vmul.f32 %v1567_v11, %v1565_v4  ;;  %v1575_v60 = vmul.f32 %v1574_v56, %v1565_v4  ;;  %v460_v27 = vshll.u32 %v459_v2, 30  ;;  %v483_v17 = vsub.s32 4, %v459_v2 }
 0x3b0   :  { %v226_v52 = vshrl.u32 %v13432_v43, %v12167_v7  ;;  %v228_v13 = vshll.u32 %v13432_v43, %v12146_v25  ;;  %v229_v16 = vshrl.u32 %v13371_v23, %v12167_v7  ;;  %v13764_v47 = vand.u32 2147483647, %v13740_v41 }
 0x3b1   :  { %v1569_v29 = vadd.f32 -0.4999988, %v1568_v0  ;;  %v1576_v9 = vadd.f32 -0.16666654, %v1575_v60  ;;  %v461_v62 = vsub.s32 %v457_v5, %v460_v27  ;;  %vm5288_vm15 = vcmp.eq.s32.totalorder %v12362_v54, 0 }
 0x3b2   :  { %vm12380_vm6 = vcmp.le.f32.partialorder %v13764_v47, 0.7853982  ;;  %v484_v6 = vsel %vm361_vm9, %v483_v17, %v459_v2  ;;  %v224_v11 = vor.u32 %v223_v61, %v222_v42  ;;  %v227_v56 = vor.u32 %v226_v52, %v225_v20 }
 0x3b3   :  { %v230_v25 = vor.u32 %v229_v16, %v228_v13  ;;  %v1570_v19 = vmul.f32 %v1569_v29, %v1565_v4  ;;  %v1577_v10 = vmul.f32 %v1576_v9, %v1565_v4  ;;  %vm5287_vm14 = vcmp.lt.s32.totalorder %v12362_v54, 2 }
 0x3b4   :  { %vm462_vm2 = vcmp.lt.s32.totalorder %v461_v62, 0  ;;  %v463_v0 = vsub.s32 0, %v461_v62  ;;  %vm1580_vm7 = vweird.f32 %v13723_v50  ;;  %vm5291_vm0 = vcmp.eq.s32.totalorder %v12362_v54, 2 }
 0x3b5   :  { %v453_v5 = vadd.s32 %v12303_v49, %v12273_v21  ;;  %v12393_v60 = vand.u32 65535, %v12368_v34  ;;  %v12395_v2 = vshll.u32 %v1291_v48, 8  ;;  %v12397_v42 = vadd.f32 1.0, %v1570_v19 }
 0x3b6   :  { %v1578_v20 = vadd.f32 1.0, %v1577_v10  ;;  %v464_v4 = vsel %vm462_vm2, %v463_v0, %v461_v62  ;;  %vm237_vm4 = vcmp.lt.s32.totalorder %v12325_v63, 1  ;;  %v12402_v17 = vsel %vm12380_vm6, 0, %v484_v6 }
 0x3b7   :  { %v465_v27 = vclz %v464_v4  ;;  %vm239_vm12 = vcmp.lt.s32.totalorder %v12325_v63, 3  ;;  %v245_v21 = vsel %vm237_vm4, %v224_v11, %v227_v56  ;;  %v13341_v48 = vxor.u32 2147483648, %v12397_v42 }
 0x3b8   :  { %v12407_v49 = vmul.f32 %v1578_v20, %v1563_v26  ;;  %v247_v19 = vsel %vm239_vm12, %v230_v25, %v246_v59  ;;  %v249_v10 = vsel %vm237_vm4, %v227_v56, %v230_v25  ;;  %v221_v52 = vshrl.u32 %v13440_v12, %v12167_v7 }
 0x3b9   :  { %v8056_v61 = vadd.s32 4294967294, %v465_v27  ;;  %vm238_vm5 = vcmp.lt.s32.totalorder %v12325_v63, 2  ;;  %v255_v13 = vshrl.u32 %v12368_v34, 16  ;;  %v4200_v26 = vadd.s32 3, %v12402_v17 }
 0x3ba   :  { %v13342_v16 = vxor.u32 2147483648, %v12407_v49  ;;  %v248_v29 = vsel %vm238_vm5, %v245_v21, %v247_v19  ;;  %v251_v59 = vsel %vm239_vm12, %v12331_v39, %v250_v30  ;;  %v5293_v7 = vsel %vm5291_vm0, %v13341_v48, %v12407_v49 }
 0x3bb   :  { %vm8057_vm10 = vcmp.lt.s32.totalorder %v8056_v61, 0  ;;  %v242_v9 = vsel %vm240_vm1, %v230_v25, 2102212464  ;;  %v252_v47 = vsel %vm238_vm5, %v249_v10, %v251_v59  ;;  %v279_v21 = vshrl.u32 %v248_v29, 16 }
 0x3bc   :  { %v5290_v6 = vsel %vm5288_vm15, %v12397_v42, %v13342_v16  ;;  %v468_v39 = vsel %vm8057_vm10, 0, %v8056_v61  ;;  %v256_v30 = vand.u32 65535, %v252_v47  ;;  %v257_v0 = vshrl.u32 %v252_v47, 16 }
 0x3bd   :  { %v5294_v20 = vsel %vm5287_vm14, %v5290_v6, %v5293_v7  ;;  %v469_v4 = vsub.s32 32, %v468_v39  ;;  %v473_v27 = vsub.s32 4294967266, %v468_v39  ;;  %v278_v59 = vand.u32 65535, %v248_v29 }
 0x3be   :  { %v5295_v25 = vsel %vm1580_vm7, nan, %v5294_v20  ;;  %v259_v19 = vmul.u32 %v257_v0, %v12393_v60  ;;  %v12444_v10 = vmul.u32 %v256_v30, %v255_v13  ;;  %v470_v48 = vshll.u32 %v461_v62, %v468_v39  ;;  %v7644_v62 = vld [vmem:[%s13010_s3 + $0x58] sm:$0xff] }
 0x3bf   :  { %7703 = vmatpush.msra.mxu1 %v5295_v25  ;;  %v471_v16 = vshrl.u32 %v453_v5, %v469_v4  ;;  %v474_v61 = vadd.s32 127, %v473_v27  ;;  %v241_v47 = vsel %vm237_vm4, %v221_v52, %v224_v11  ;;  %v243_v54 = vsel %vm239_vm12, %v227_v56, %v242_v9 }
 0x3c0   :  { %v258_v7 = vmul.u32 %v256_v30, %v12393_v60  ;;  %v261_v6 = vmul.u32 %v257_v0, %v255_v13  ;;  %v262_v3 = vshll.u32 %v259_v19, 16  ;;  %v264_v50 = vshll.u32 %v12444_v10, 16 }
 0x3c1   :  { %v472_v20 = vor.u32 %v471_v16, %v470_v48  ;;  %v475_v58 = vshll.u32 %v474_v61, 23  ;;  %v281_v29 = vmul.u32 %v279_v21, %v12393_v60  ;;  %v2197_v5 = vand.u32 3, %v11779_v22 }
 0x3c2   :  { %vm266_vm1 = vc.u32 %v258_v7, %v262_v3  ;;  %v268_v11 = vadd.s32 %v262_v3, %v258_v7  ;;  %v282_v52 = vmul.u32 %v278_v59, %v255_v13  ;;  %vm13767_vm15 = vcmask 392192  }
 0x3c3   :  { %v476_v56 = vor.u32 4788187, %v475_v58  ;;  %v479_v9 = vcvt.s32.f32 %v472_v20  ;;  %8207 = vmatmul.msk.f32.gmra.mxu3 %vm13767_vm15, %v7644_v62  ;;  %v267_v48 = vsel %vm266_vm1, 1, %v13444_v36  ;;  %v284_v16 = vshll.u32 %v281_v29, 16 }
 0x3c4   :  { %vm2198_vm14 = vcmp.lt.s32.totalorder %v2197_v5, 2  ;;  %vm2199_vm2 = vcmp.eq.s32.totalorder %v2197_v5, 0  ;;  %vm2202_vm0 = vcmp.eq.s32.totalorder %v2197_v5, 2  ;;  %v269_v39 = vadd.s32 %v267_v48, %v261_v6 }
 0x3c5   :  { %v477_v30 = vand.u32 2147483647, %v476_v56  ;;  %v13768_v0 = vxor.u32 2147483648, %v11997_v55  ;;  %v13769_v22 = vxor.u32 2147483648, %v11990_v57  ;;  %vm270_vm4 = vc.u32 %v268_v11, %v264_v50 }
 0x3c6   :  { %v12465_v58 = vand.u32 3, %v4200_v26  ;;  %v271_v25 = vsel %vm270_vm4, 1, %v13444_v36  ;;  %v280_v61 = vmul.u32 %v278_v59, %v12393_v60  ;;  %v263_v20 = vshrl.u32 %v259_v19, 16 }
 0x3c7   :  { %v2201_v4 = vsel %vm2199_vm2, %v11990_v57, %v13768_v0  ;;  %v2204_v3 = vsel %vm2202_vm0, %v13769_v22, %v11997_v55  ;;  %v480_v7 = vmul.f32 %v479_v9, %v477_v30  ;;  %v273_v62 = vadd.s32 %v271_v25, %v269_v39 }
 0x3c8   :  { %v2205_v27 = vsel %vm2198_vm14, %v2201_v4, %v2204_v3  ;;  %v283_v5 = vmul.u32 %v279_v21, %v255_v13  ;;  %v286_v56 = vshll.u32 %v282_v52, 16  ;;  %vm288_vm12 = vc.u32 %v280_v61, %v284_v16 }
 0x3c9   :  { %v2206_v6 = vsel %vm2196_vm11, nan, %v2205_v27  ;;  %v290_v57 = vadd.s32 %v284_v16, %v280_v61  ;;  %v481_v55 = vxor.u32 2147483648, %v480_v7  ;;  %v265_v50 = vshrl.u32 %v12444_v10, 16 }
 0x3ca   :  { %7880 = vmatpush.msrb.mxu2 %v2206_v6  ;;  %v274_v26 = vadd.s32 %v273_v62, %v263_v20  ;;  %v289_v11 = vsel %vm288_vm12, 1, %v13444_v36  ;;  %v1300_v60 = vshll.u32 %v13440_v12, %v11675_v31  ;;  %v1301_v28 = vshrl.u32 %v13430_v44, %v12059_v45 }
 0x3cb   :  { %v291_v48 = vadd.s32 %v289_v11, %v283_v5  ;;  %vm292_vm10 = vc.u32 %v290_v57, %v286_v56  ;;  %v482_v13 = vsel %vm361_vm9, %v481_v55, %v480_v7  ;;  %v285_v21 = vshrl.u32 %v281_v29, 16 }
 0x3cc   :  { %v293_v19 = vsel %vm292_vm10, 1, %v13444_v36  ;;  %v1303_v10 = vshll.u32 %v13430_v44, %v11675_v31  ;;  %v485_v59 = vsel %vm12380_vm6, %v13740_v41, %v482_v13  ;;  %v12485_v16 = vor.u32 %v1301_v28, %v1300_v60 }
 0x3cd   :  { %v295_v9 = vadd.s32 %v293_v19, %v291_v48  ;;  %v1304_v39 = vshrl.u32 %v13432_v43, %v12059_v45  ;;  %v487_v30 = vmul.f32 %v485_v59, %v485_v59  ;;  %v244_v0 = vsel %vm238_vm5, %v241_v47, %v243_v54 }
 0x3ce   :  { %v12491_v29 = vadd.s32 %v274_v26, %v265_v50  ;;  %v287_v4 = vshrl.u32 %v282_v52, 16  ;;  %v1306_v32 = vshll.u32 %v13432_v43, %v11675_v31  ;;  %v1307_v27 = vshrl.u32 %v13371_v23, %v12059_v45  ;;  %v13770_v26 = vld [vmem:[#allocation21_spill] sm:$0xff] }
 0x3cf   :  { %v296_v22 = vadd.s32 %v295_v9, %v285_v21  ;;  %v12493_v3 = vor.u32 %v1304_v39, %v1303_v10  ;;  %v488_v25 = vmul.f32 -0.001358992, %v487_v30  ;;  %v495_v61 = vmul.f32 -0.00019511016, %v487_v30 }
 0x3d0   :  { %v12499_v7 = vadd.s32 %v290_v57, %v286_v56  ;;  %vm1315_vm11 = vcmp.lt.s32.totalorder %v13762_v40, 1  ;;  %v1308_v47 = vor.u32 %v1307_v27, %v1306_v32  ;;  %vm1317_vm9 = vcmp.lt.s32.totalorder %v13762_v40, 3 }
 0x3d1   :  { %v297_v63 = vadd.s32 %v296_v22, %v287_v4  ;;  %v1323_v54 = vsel %vm1315_vm11, %v12485_v16, %v12493_v3  ;;  %v489_v52 = vadd.f32 0.041655596, %v488_v25  ;;  %v496_v31 = vadd.f32 0.008332121, %v495_v61 }
 0x3d2   :  { %vm300_vm6 = vc.u32 %v12491_v29, %v12499_v7  ;;  %v1329_v6 = vsel %vm1317_vm9, %v12298_v53, %v12347_v15  ;;  %vm1316_vm5 = vcmp.lt.s32.totalorder %v13762_v40, 2  ;;  %v1325_v62 = vsel %vm1317_vm9, %v1308_v47, %v12338_v18  ;;  %v13771_v18 = vld [vmem:[#allocation85_spill] sm:$0xff] }
 0x3d3   :  { %v301_v20 = vadd.s32 1, %v297_v63  ;;  %v1327_v5 = vsel %vm1315_vm11, %v12493_v3, %v1308_v47  ;;  %v490_v56 = vmul.f32 %v489_v52, %v487_v30  ;;  %v497_v57 = vmul.f32 %v496_v31, %v487_v30 }
 0x3d4   :  { %v298_v55 = vmul.u32 %v12368_v34, %v244_v0  ;;  %v1326_v50 = vsel %vm1316_vm5, %v1323_v54, %v1325_v62  ;;  %v12525_v53 = vor.u32 %v12343_v33, %v13770_v26  ;;  %v1330_v11 = vsel %vm1316_vm5, %v1327_v5, %v1329_v6  ;;  %v13772_v54 = vld [vmem:[#allocation31_spill] sm:$0xff] }
 0x3d5   :  { %v302_v15 = vsel %vm300_vm6, %v301_v20, %v297_v63  ;;  %v1129_v48 = vand.u32 2147483647, %v13771_v18  ;;  %v491_v60 = vadd.f32 -0.4999988, %v490_v56  ;;  %v498_v28 = vadd.f32 -0.16666654, %v497_v57 }
 0x3d6   :  { %v303_v13 = vadd.s32 %v302_v15, %v298_v55  ;;  %v1334_v21 = vand.u32 65535, %v1330_v11  ;;  %v1332_v19 = vand.u32 65535, %v12395_v2  ;;  %v1333_v34 = vshrl.u32 %v12395_v2, 16 }
 0x3d7   :  { %v1335_v10 = vshrl.u32 %v1330_v11, 16  ;;  %v1357_v9 = vshrl.u32 %v1326_v50, 16  ;;  %v492_v39 = vmul.f32 %v491_v60, %v487_v30  ;;  %v499_v0 = vmul.f32 %v498_v28, %v487_v30 }
 0x3d8   :  { %vm4202_vm1 = vcmp.lt.s32.totalorder %v12465_v58, 2  ;;  %v304_v33 = vadd.s32 536870912, %v303_v13  ;;  %vm502_vm15 = vweird.f32 %v13740_v41  ;;  %vm4203_vm14 = vcmp.eq.s32.totalorder %v12465_v58, 0 }
 0x3d9   :  { %v1337_v4 = vmul.u32 %v1335_v10, %v1332_v19  ;;  %v12535_v22 = vmul.u32 %v1334_v21, %v1333_v34  ;;  %v1356_v32 = vand.u32 65535, %v1326_v50  ;;  %v12537_v27 = vadd.f32 1.0, %v492_v39 }
 0x3da   :  { %v500_v25 = vadd.f32 1.0, %v499_v0  ;;  %v12539_v61 = vshrl.u32 %v304_v33, 30  ;;  %v12541_v63 = vmul.u32 %v1357_v9, %v1332_v19  ;;  %vm1164_vm2 = vcmp.lt.s32.totalorder %v13772_v54, 4 }
 0x3db   :  { %vm4206_vm0 = vcmp.eq.s32.totalorder %v12465_v58, 2  ;;  %v1299_v30 = vshrl.u32 %v13440_v12, %v12059_v45  ;;  %v1336_v52 = vmul.u32 %v1334_v21, %v1332_v19  ;;  %v1340_v31 = vshll.u32 %v1337_v4, 16 }
 0x3dc   :  { %v12547_v6 = vmul.f32 %v500_v25, %v485_v59  ;;  %v509_v20 = vxor.u32 2147483648, %v12537_v27  ;;  %v306_v62 = vshll.u32 %v12539_v61, 30  ;;  %v1320_v5 = vsel %vm1318_vm8, %v1308_v47, 2102212464 }
 0x3dd   :  { %v1342_v56 = vshll.u32 %v12535_v22, 16  ;;  %vm1344_vm4 = vc.u32 %v1336_v52, %v1340_v31  ;;  %v1346_v57 = vadd.s32 %v1340_v31, %v1336_v52  ;;  %v1358_v55 = vmul.u32 %v1356_v32, %v1332_v19  ;;  %v13773_v31 = vld [vmem:[#allocation17_spill] sm:$0xff] }
 0x3de   :  { %v506_v50 = vxor.u32 2147483648, %v12547_v6  ;;  %v307_v26 = vsub.s32 %v303_v13, %v306_v62  ;;  %v1360_v45 = vmul.u32 %v1356_v32, %v1333_v34  ;;  %v1362_v15 = vshll.u32 %v12541_v63, 16 }
 0x3df   :  { %v1339_v59 = vmul.u32 %v1335_v10, %v1333_v34  ;;  %v1345_v11 = vsel %vm1344_vm4, 1, %v13444_v36  ;;  %vm1348_vm12 = vc.u32 %v1346_v57, %v1342_v56  ;;  %v1361_v60 = vmul.u32 %v1357_v9, %v1333_v34 }
 0x3e0   :  { %v4205_v47 = vsel %vm4203_vm14, %v12537_v27, %v506_v50  ;;  %v4208_v28 = vsel %vm4206_vm0, %v509_v20, %v12547_v6  ;;  %vm308_vm8 = vcmp.lt.s32.totalorder %v307_v26, 0  ;;  %v309_v13 = vsub.s32 0, %v307_v26 }
 0x3e1   :  { %v4209_v21 = vsel %vm4202_vm1, %v4205_v47, %v4208_v28  ;;  %v1341_v19 = vshrl.u32 %v1337_v4, 16  ;;  %v1347_v10 = vadd.s32 %v1345_v11, %v1339_v59  ;;  %v1349_v34 = vsel %vm1348_vm12, 1, %v13444_v36 }
 0x3e2   :  { %v4210_v9 = vsel %vm502_vm15, nan, %v4209_v21  ;;  %v310_v39 = vsel %vm308_vm8, %v309_v13, %v307_v26  ;;  %v1364_v0 = vshll.u32 %v1360_v45, 16  ;;  %vm1366_vm10 = vc.u32 %v1358_v55, %v1362_v15 }
 0x3e3   :  { %7669 = vmatpush.msra.mxu0 %v4210_v9  ;;  %v311_v33 = vclz %v310_v39  ;;  %v1351_v32 = vadd.s32 %v1349_v34, %v1347_v10  ;;  %v1367_v25 = vsel %vm1366_vm10, 1, %v13444_v36  ;;  %v1368_v52 = vadd.s32 %v1362_v15, %v1358_v55 }
 0x3e4   :  { %v1160_v58 = vor.u32 %v12354_v37, %v13773_v31  ;;  %v1170_v4 = vsel %vm1164_vm2, %v12525_v53, 920167782  ;;  %v1319_v62 = vsel %vm1315_vm11, %v1299_v30, %v12485_v16  ;;  %v1369_v56 = vadd.s32 %v1367_v25, %v1361_v60 }
 0x3e5   :  { %v8053_v57 = vadd.s32 4294967294, %v311_v33  ;;  %v1321_v59 = vsel %vm1317_vm9, %v12493_v3, %v1320_v5  ;;  %v1352_v11 = vadd.s32 %v1351_v32, %v1341_v19  ;;  %vm1370_vm6 = vc.u32 %v1368_v52, %v1364_v0 }
 0x3e6   :  { %vm207_vm1 = vcmp.lt.s32.totalorder %v13759_v14, 0  ;;  %v1343_v37 = vshrl.u32 %v12535_v22, 16  ;;  %v1371_v55 = vsel %vm1370_vm6, 1, %v13444_v36  ;;  %v1136_v15 = vand.u32 8388607, %v1129_v48 }
 0x3e7   :  { %v299_v16 = vadd.s32 %v12499_v7, %v12491_v29  ;;  %vm8054_vm11 = vcmp.lt.s32.totalorder %v8053_v57, 0  ;;  %v1363_v30 = vshrl.u32 %v12541_v63, 16  ;;  %v1373_v60 = vadd.s32 %v1371_v55, %v1369_v56  ;;  %v13774_v29 = vld [vmem:[#allocation35_spill] sm:$0xff] }
 0x3e8   :  { %v314_v47 = vsel %vm8054_vm11, 0, %v8053_v57  ;;  %v329_v3 = vsub.s32 4, %v12539_v61  ;;  %v1322_v5 = vsel %vm1316_vm5, %v1319_v62, %v1321_v59  ;;  %v12595_v28 = vadd.s32 %v1352_v11, %v1343_v37 }
 0x3e9   :  { %v315_v22 = vsub.s32 32, %v314_v47  ;;  %v319_v13 = vsub.s32 4294967266, %v314_v47  ;;  %v1365_v21 = vshrl.u32 %v1360_v45, 16  ;;  %v1374_v19 = vadd.s32 %v1373_v60, %v1363_v30 }
 0x3ea   :  { %v316_v10 = vshll.u32 %v307_v26, %v314_v47  ;;  %v12597_v34 = vadd.s32 %v1368_v52, %v1364_v0  ;;  %v1146_v7 = vshll.u32 %v13440_v12, %v13774_v29  ;;  %v1147_v63 = vshrl.u32 %v13430_v44, %v13763_v38 }
 0x3eb   :  { %v317_v9 = vshrl.u32 %v299_v16, %v315_v22  ;;  %v320_v39 = vadd.s32 127, %v319_v13  ;;  %v1375_v33 = vadd.s32 %v1374_v19, %v1365_v21  ;;  %v1150_v40 = vshrl.u32 %v13432_v43, %v13763_v38 }
 0x3ec   :  { %vm1378_vm9 = vc.u32 %v12595_v28, %v12597_v34  ;;  %v1149_v26 = vshll.u32 %v13430_v44, %v13774_v29  ;;  %v1152_v45 = vshll.u32 %v13432_v43, %v13774_v29  ;;  %v1153_v0 = vshrl.u32 %v13371_v23, %v13763_v38 }
 0x3ed   :  { %v318_v32 = vor.u32 %v317_v9, %v316_v10  ;;  %v321_v25 = vshll.u32 %v320_v39, 23  ;;  %v330_v52 = vsel %vm207_vm1, %v329_v3, %v12539_v61  ;;  %v1379_v31 = vadd.s32 1, %v1375_v33 }
 0x3ee   :  { %v1376_v62 = vmul.u32 %v12395_v2, %v1322_v5  ;;  %v12617_v56 = vor.u32 %v1147_v63, %v1146_v7  ;;  %v12619_v57 = vor.u32 %v1150_v40, %v1149_v26  ;;  %v12621_v44 = vor.u32 %v1153_v0, %v1152_v45 }
 0x3ef   :  { %v13775_v43 = vand.u32 2147483647, %v13759_v14  ;;  %v322_v23 = vor.u32 4788187, %v321_v25  ;;  %v1380_v11 = vsel %vm1378_vm9, %v1379_v31, %v1375_v33  ;;  %v1137_v37 = vor.u32 8388608, %v1136_v15  ;;  %v13778_v25 = vld [vmem:[#allocation56_spill] sm:$0xff] }
 0x3f0   :  { %v1174_v61 = vsel %vm1164_vm2, %v1160_v58, 1326507024  ;;  %v1381_v55 = vadd.s32 %v1380_v11, %v1376_v62  ;;  %v325_v30 = vcvt.s32.f32 %v318_v32  ;;  %vm1161_vm14 = vcmp.lt.s32.totalorder %v13772_v54, 1 }
 0x3f1   :  { %vm12625_vm5 = vcmp.le.f32.partialorder %v13775_v43, 0.7853982  ;;  %v323_v16 = vand.u32 2147483647, %v322_v23  ;;  %vm1163_vm0 = vcmp.lt.s32.totalorder %v13772_v54, 3  ;;  %v1169_v15 = vsel %vm1161_vm14, %v12617_v56, %v12619_v57 }
 0x3f2   :  { %v12633_v2 = vsel %vm12625_vm5, 0, %v330_v52  ;;  %v1382_v60 = vadd.s32 536870912, %v1381_v55  ;;  %v1171_v58 = vsel %vm1163_vm0, %v12621_v44, %v1170_v4  ;;  %v1173_v47 = vsel %vm1161_vm14, %v12619_v57, %v12621_v44 }
 0x3f3   :  { %v326_v3 = vmul.f32 %v325_v30, %v323_v16  ;;  %vm1162_vm4 = vcmp.lt.s32.totalorder %v13772_v54, 2  ;;  %v1175_v5 = vsel %vm1163_vm0, %v12525_v53, %v1174_v61  ;;  %v12652_v22 = vshll.u32 %v1137_v37, 8 }
 0x3f4   :  { %v12654_v13 = vshrl.u32 %v1382_v60, 30  ;;  %v1176_v21 = vsel %vm1162_vm4, %v1173_v47, %v1175_v5  ;;  %v4045_v19 = vadd.s32 3, %v12633_v2  ;;  %v12661_v10 = vsel %vm1162_vm4, %v1169_v15, %v1171_v58 }
 0x3f5   :  { %v327_v4 = vxor.u32 2147483648, %v326_v3  ;;  %v1180_v29 = vand.u32 65535, %v1176_v21  ;;  %v1178_v63 = vand.u32 65535, %v12652_v22  ;;  %v1179_v53 = vshrl.u32 %v12652_v22, 16 }
 0x3f6   :  { %v1384_v7 = vshll.u32 %v12654_v13, 30  ;;  %v1181_v9 = vshrl.u32 %v1176_v21, 16  ;;  %v12681_v32 = vand.u32 3, %v4045_v19  ;;  %v12684_v52 = vand.u32 3, %v13778_v25 }
 0x3f7   :  { %v328_v39 = vsel %vm207_vm1, %v327_v4, %v326_v3  ;;  %v12677_v45 = vmul.u32 %v1180_v29, %v1179_v53  ;;  %v1202_v31 = vand.u32 65535, %v12661_v10  ;;  %v1182_v43 = vmul.u32 %v1180_v29, %v1178_v63 }
 0x3f8   :  { %v12671_v33 = vsel %vm12625_vm5, %v13759_v14, %v328_v39  ;;  %v12673_v40 = vsub.s32 %v1381_v55, %v1384_v7  ;;  %v12675_v26 = vmul.u32 %v1181_v9, %v1178_v63  ;;  %v1185_v37 = vmul.u32 %v1181_v9, %v1179_v53 }
 0x3f9   :  { %v333_v0 = vmul.f32 %v12671_v33, %v12671_v33  ;;  %v1203_v61 = vshrl.u32 %v12661_v10, 16  ;;  %v1188_v16 = vshll.u32 %v12677_v45, 16  ;;  %v1377_v3 = vadd.s32 %v12597_v34, %v12595_v28 }
 0x3fa   :  { %vm1386_vm12 = vcmp.lt.s32.totalorder %v12673_v40, 0  ;;  %v1387_v62 = vsub.s32 0, %v12673_v40  ;;  %v1186_v59 = vshll.u32 %v12675_v26, 16  ;;  %vm1121_vm10 = vcmp.eq.s32.totalorder %v12684_v52, 0 }
 0x3fb   :  { %v334_v23 = vmul.f32 -0.001358992, %v333_v0  ;;  %v341_v11 = vmul.f32 -0.00019511016, %v333_v0  ;;  %v1145_v5 = vshrl.u32 %v13440_v12, %v13763_v38  ;;  %vm1124_vm6 = vcmp.eq.s32.totalorder %v12684_v52, 2 }
 0x3fc   :  { %v1388_v55 = vsel %vm1386_vm12, %v1387_v62, %v12673_v40  ;;  %vm1190_vm8 = vc.u32 %v1182_v43, %v1186_v59  ;;  %v1192_v30 = vadd.s32 %v1186_v59, %v1182_v43  ;;  %v1166_v29 = vsel %vm1164_vm2, %v12621_v44, 2102212464 }
 0x3fd   :  { %v335_v60 = vadd.f32 0.041655596, %v334_v23  ;;  %v342_v15 = vadd.f32 0.008332121, %v341_v11  ;;  %v1389_v58 = vclz %v1388_v55  ;;  %v1191_v47 = vsel %vm1190_vm8, 1, %v13444_v36 }
 0x3fe   :  { %v1193_v21 = vadd.s32 %v1191_v47, %v1185_v37  ;;  %vm1194_vm1 = vc.u32 %v1192_v30, %v1188_v16  ;;  %v1205_v9 = vmul.u32 %v1203_v61, %v1178_v63  ;;  %v12704_v28 = vmul.u32 %v1202_v31, %v1179_v53 }
 0x3ff   :  { %v336_v4 = vmul.f32 %v335_v60, %v333_v0  ;;  %v343_v19 = vmul.f32 %v342_v15, %v333_v0  ;;  %v8074_v10 = vadd.s32 4294967294, %v1389_v58  ;;  %v1195_v7 = vsel %vm1194_vm1, 1, %v13444_v36 }
 0x400   :  { %vm1120_vm9 = vcmp.lt.s32.totalorder %v12684_v52, 2  ;;  %v1165_v12 = vsel %vm1161_vm14, %v1145_v5, %v12617_v56  ;;  %vm4048_vm5 = vcmp.eq.s32.totalorder %v12681_v32, 0  ;;  %vm4051_vm12 = vcmp.eq.s32.totalorder %v12681_v32, 2  ;;  %v13781_v5 = vld [vmem:[#allocation78_spill] sm:$0xff] }
 0x401   :  { %v337_v34 = vadd.f32 -0.4999988, %v336_v4  ;;  %v344_v39 = vadd.f32 -0.16666654, %v343_v19  ;;  %vm8075_vm11 = vcmp.lt.s32.totalorder %v8074_v10, 0  ;;  %v1187_v44 = vshrl.u32 %v12675_v26, 16 }
 0x402   :  { %v1392_v38 = vsel %vm8075_vm11, 0, %v8074_v10  ;;  %v1204_v25 = vmul.u32 %v1202_v31, %v1178_v63  ;;  %v1208_v62 = vshll.u32 %v1205_v9, 16  ;;  %vm4047_vm2 = vcmp.lt.s32.totalorder %v12681_v32, 2  ;;  %v13785_v32 = vld [vmem:[#allocation23_spill] sm:$0xff] }
 0x403   :  { %v338_v43 = vmul.f32 %v337_v34, %v333_v0  ;;  %v345_v59 = vmul.f32 %v344_v39, %v333_v0  ;;  %v1393_v23 = vsub.s32 32, %v1392_v38  ;;  %v1197_v11 = vadd.s32 %v1195_v7, %v1193_v21  ;;  %v7641_v7 = vld [vmem:[%s13010_s3 + $0x40] sm:$0xff] }
 0x404   :  { %vm348_vm8 = vweird.f32 %v13759_v14  ;;  %v1397_v37 = vsub.s32 4294967266, %v1392_v38  ;;  %v1207_v55 = vmul.u32 %v1203_v61, %v1179_v53  ;;  %v1210_v56 = vshll.u32 %v12704_v28, 16  ;;  %v13779_v53 = vld [vmem:[#allocation69_spill] sm:$0xff]  ;;  %v7632_v14 = vld [vmem:[%s13009_s2 + $0x58] sm:$0xff] }
 0x405   :  { %vm1212_vm14 = vc.u32 %v1204_v25, %v1208_v62  ;;  %v12716_v16 = vadd.f32 1.0, %v338_v43  ;;  %v346_v30 = vadd.f32 1.0, %v345_v59  ;;  %v1395_v60 = vshrl.u32 %v1377_v3, %v1393_v23  ;;  %v7633_v23 = vld [vmem:[%s13010_s3] sm:$0xff] }
 0x406   :  { %v1213_v63 = vsel %vm1212_vm14, 1, %v13444_v36  ;;  %v1394_v26 = vshll.u32 %v12673_v40, %v1392_v38  ;;  %v1398_v0 = vadd.s32 127, %v1397_v37  ;;  %v1214_v31 = vadd.s32 %v1208_v62, %v1204_v25 }
 0x407   :  { %v1215_v15 = vadd.s32 %v1213_v63, %v1207_v55  ;;  %v12721_v58 = vmul.f32 %v346_v30, %v12671_v33  ;;  %v355_v47 = vxor.u32 2147483648, %v12716_v16  ;;  %v13780_v61 = vxor.u32 2147483648, %v13779_v53 }
 0x408   :  { %v1198_v4 = vadd.s32 %v1197_v11, %v1187_v44  ;;  %v1396_v3 = vor.u32 %v1395_v60, %v1394_v26  ;;  %v1399_v19 = vshll.u32 %v1398_v0, 23  ;;  %v13782_v40 = vxor.u32 2147483648, %v13781_v5 }
 0x409   :  { %v1123_v21 = vsel %vm1121_vm10, %v13781_v5, %v13780_v61  ;;  %vm1216_vm1 = vc.u32 %v1214_v31, %v1210_v56  ;;  %v352_v33 = vxor.u32 2147483648, %v12721_v58  ;;  %v1167_v34 = vsel %vm1163_vm0, %v12619_v57, %v1166_v29 }
 0x40a   :  { %v1126_v10 = vsel %vm1124_vm6, %v13782_v40, %v13779_v53  ;;  %v1189_v39 = vshrl.u32 %v12677_v45, 16  ;;  %v1217_v38 = vsel %vm1216_vm1, 1, %v13444_v36  ;;  %v1400_v44 = vor.u32 4788187, %v1399_v19 }
 0x40b   :  { %vm13783_vm10 = vcmask 392192   ;;  %v1127_v25 = vsel %vm1120_vm9, %v1123_v21, %v1126_v10  ;;  %v1209_v62 = vshrl.u32 %v1205_v9, 16  ;;  %v1219_v43 = vadd.s32 %v1217_v38, %v1215_v15 }
 0x40c   :  { %8204 = vmatmul.msk.f32.gmra.mxu2 %vm13783_vm10, %v7641_v7  ;;  %v4050_v59 = vsel %vm4048_vm5, %v12716_v16, %v352_v33  ;;  %v4053_v36 = vsel %vm4051_vm12, %v355_v47, %v12721_v58  ;;  %v1199_v57 = vadd.s32 %v1198_v4, %v1189_v39  ;;  %v1211_v45 = vshrl.u32 %v12704_v28, 16  ;;  %vm13784_vm0 = vmmov %vm13783_vm10 }
 0x40d   :  { %v4054_v52 = vsel %vm4047_vm2, %v4050_v59, %v4053_v36  ;;  %v1401_v29 = vand.u32 2147483647, %v1400_v44  ;;  %v1403_v9 = vcvt.s32.f32 %v1396_v3  ;;  %v1220_v11 = vadd.s32 %v1219_v43, %v1209_v62 }
 0x40e   :  { %v4055_v37 = vsel %vm348_vm8, nan, %v4054_v52  ;;  %v1218_v55 = vadd.s32 %v1214_v31, %v1210_v56  ;;  %v1168_v60 = vsel %vm1162_vm4, %v1165_v12, %v1167_v34  ;;  %vm13786_vm6 = vweird.f32 %v13785_v32 }
 0x40f   :  { %7670 = vmatpush.msra.mxu0 %v4055_v37  ;;  %v1404_v30 = vmul.f32 %v1403_v9, %v1401_v29  ;;  %v1221_v28 = vadd.s32 %v1220_v11, %v1211_v45  ;;  %v1128_v63 = vsel %vm13786_vm6, nan, %v1127_v25  ;;  %vm1285_vm9 = vcmp.lt.s32.totalorder %v13761_v46, 0 }
 0x410   :  { %8196 = vmatmul.msk.f32.vlgmr.msra.gmra.mxu0 %vm13784_vm0, %v7633_v23  ;;  %vm1224_vm11 = vc.u32 %v1199_v57, %v1218_v55  ;;  %v1222_v15 = vmul.u32 %v12652_v22, %v1168_v60  ;;  %v13787_v56 = vand.u32 2147483647, %v13761_v46  ;;  %v1407_v54 = vsub.s32 4, %v12654_v13 }
 0x411   :  { %v1405_v26 = vxor.u32 2147483648, %v1404_v30  ;;  %7805 = vmatpush.msrb.mxu0 %v1128_v63  ;;  %v1225_v0 = vadd.s32 1, %v1221_v28  ;;  %v13788_v63 = vld [vmem:[#allocation90_spill] sm:$0xff]  ;;  %vm1426_vm10 = vweird.f32 %v13761_v46 }
 0x412   :  { %vm1284_vm5 = vcmp.le.f32.partialorder %v13787_v56, 0.7853982  ;;  %v1408_v4 = vsel %vm1285_vm9, %v1407_v54, %v12654_v13 }
 0x413   :  { %v1406_v31 = vsel %vm1285_vm9, %v1405_v26, %v1404_v30  ;;  %v1226_v12 = vsel %vm1224_vm11, %v1225_v0, %v1221_v28  ;;  %v12778_v7 = vsel %vm1284_vm5, 0, %v1408_v4  ;;  %v1223_v28 = vadd.s32 %v1218_v55, %v1199_v57 }
 0x414   :  { %v1409_v53 = vsel %vm1284_vm5, %v13761_v46, %v1406_v31  ;;  %v1227_v61 = vadd.s32 %v1226_v12, %v1222_v15  ;;  %v5130_v43 = vadd.s32 3, %v12778_v7  ;;  %v811_v26 = vand.u32 3, %v13788_v63  ;;  %v13789_v12 = vld [vmem:[#allocation28_spill] sm:$0xff]  ;;  %v7625_v46 = vld [vmem:[%s13009_s2 + $0x20] sm:$0xff] }
 0x415   :  { %v1411_v5 = vmul.f32 %v1409_v53, %v1409_v53 }
 0x416   :  { %v1228_v21 = vadd.s32 536870912, %v1227_v61  ;;  %v5131_v9 = vand.u32 3, %v5130_v43  ;;  %vm812_vm0 = vcmp.lt.s32.totalorder %v811_v26, 2  ;;  %vm813_vm6 = vcmp.eq.s32.totalorder %v811_v26, 0 }
 0x417   :  { %v1412_v3 = vmul.f32 -0.001358992, %v1411_v5  ;;  %v1419_v19 = vmul.f32 -0.00019511016, %v1411_v5  ;;  %vm816_vm11 = vcmp.eq.s32.totalorder %v811_v26, 2  ;;  %v7634_v26 = vld [vmem:[%s13010_s3 + $0x8] sm:$0xff] }
 0x418   :  { %v12776_v40 = vshrl.u32 %v1228_v21, 30  ;;  %vm5132_vm12 = vcmp.lt.s32.totalorder %v5131_v9, 2  ;;  %vm5133_vm2 = vcmp.eq.s32.totalorder %v5131_v9, 0  ;;  %vm5136_vm1 = vcmp.eq.s32.totalorder %v5131_v9, 2 }
 0x419   :  { %v1413_v10 = vadd.f32 0.041655596, %v1412_v3  ;;  %v1420_v22 = vadd.f32 0.008332121, %v1419_v19  ;;  %v657_v21 = vand.u32 3, %v12129_v1  ;;  %v503_v19 = vand.u32 3, %v12402_v17 }
 0x41a   :  { %v1230_v34 = vshll.u32 %v12776_v40, 30  ;;  %v13795_v1 = vld [vmem:[#allocation54_spill] sm:$0xff] }
 0x41b   :  { %v1414_v39 = vmul.f32 %v1413_v10, %v1411_v5  ;;  %v1421_v38 = vmul.f32 %v1420_v22, %v1411_v5  ;;  %v13790_v22 = vld [vmem:[#allocation38_spill] sm:$0xff]  ;;  %v13796_v43 = vxor.u32 2147483648, %v13795_v1 }
 0x41c   :  { %v1231_v44 = vsub.s32 %v1227_v61, %v1230_v34  ;;  %v13791_v34 = vxor.u32 2147483648, %v13790_v22 }
 0x41d   :  { %v1415_v25 = vadd.f32 -0.4999988, %v1414_v39  ;;  %v1422_v62 = vadd.f32 -0.16666654, %v1421_v38  ;;  %v13792_v39 = vld [vmem:[#allocation32_spill] sm:$0xff] }
 0x41e   :  { %vm1232_vm4 = vcmp.lt.s32.totalorder %v1231_v44, 0  ;;  %v1233_v59 = vsub.s32 0, %v1231_v44 }
 0x41f   :  { %v1416_v13 = vmul.f32 %v1415_v25, %v1411_v5  ;;  %v1423_v36 = vmul.f32 %v1422_v62, %v1411_v5  ;;  %v13794_v62 = vld [vmem:[#allocation63_spill] sm:$0xff] }
 0x420   :  { %v1234_v45 = vsel %vm1232_vm4, %v1233_v59, %v1231_v44  ;;  %v818_v59 = vsel %vm816_vm11, %v13796_v43, %v13794_v62  ;;  %v13797_v17 = vxor.u32 2147483648, %v13794_v62  ;;  %vm658_vm11 = vcmp.lt.s32.totalorder %v657_v21, 2  ;;  %v7621_v43 = vld [vmem:[%s13009_s2] sm:$0xff] }
 0x421   :  { %v12782_v52 = vadd.f32 1.0, %v1416_v13  ;;  %v1424_v29 = vadd.f32 1.0, %v1423_v36  ;;  %v1235_v23 = vclz %v1234_v45  ;;  %v7630_v36 = vld [vmem:[%s13009_s2 + $0x48] sm:$0xff] }
 0x422   :  { %v815_v45 = vsel %vm813_vm6, %v13795_v1, %v13797_v17  ;;  %vm505_vm6 = vcmp.eq.s32.totalorder %v503_v19, 0 }
 0x423   :  { %v12784_v11 = vmul.f32 %v1424_v29, %v1409_v53  ;;  %v1433_v37 = vxor.u32 2147483648, %v12782_v52  ;;  %v8071_v30 = vadd.s32 4294967294, %v1235_v23  ;;  %v965_v53 = vand.u32 3, %v13789_v12  ;;  %v13798_v23 = vld [vmem:[#allocation30_spill] sm:$0xff] }
 0x425   :  { %v1430_v60 = vxor.u32 2147483648, %v12784_v11  ;;  %vm8072_vm14 = vcmp.lt.s32.totalorder %v8071_v30, 0  ;;  %v5138_v15 = vsel %vm5136_vm1, %v1433_v37, %v12784_v11  ;;  %vm966_vm9 = vcmp.lt.s32.totalorder %v965_v53, 2 }
 0x426   :  { %v1238_v32 = vsel %vm8072_vm14, 0, %v8071_v30  ;;  %vm967_vm5 = vcmp.eq.s32.totalorder %v965_v53, 0  ;;  %vm970_vm4 = vcmp.eq.s32.totalorder %v965_v53, 2  ;;  %vm13799_vm14 = vweird.f32 %v13798_v23 }
 0x427   :  { %v5135_v0 = vsel %vm5133_vm2, %v12782_v52, %v1430_v60  ;;  %v1239_v56 = vsub.s32 32, %v1238_v32  ;;  %v1243_v31 = vsub.s32 4294967266, %v1238_v32  ;;  %v1240_v55 = vshll.u32 %v1231_v44, %v1238_v32 }
 0x428   :  { %v5139_v54 = vsel %vm5132_vm12, %v5135_v0, %v5138_v15  ;;  %v969_v38 = vsel %vm967_vm5, %v13792_v39, %v13791_v34  ;;  %v13793_v44 = vxor.u32 2147483648, %v13792_v39  ;;  %vm659_vm12 = vcmp.eq.s32.totalorder %v657_v21, 0  ;;  %v7628_v34 = vld [vmem:[%s13009_s2 + $0x38] sm:$0xff] }
 0x429   :  { %v5140_v57 = vsel %vm1426_vm10, nan, %v5139_v54  ;;  %v1241_v61 = vshrl.u32 %v1223_v28, %v1239_v56  ;;  %v1244_v5 = vadd.s32 127, %v1243_v31  ;;  %vm662_vm2 = vcmp.eq.s32.totalorder %v657_v21, 2  ;;  %v13803_v31 = vld [vmem:[#allocation15_spill] sm:$0xff] }
 0x42a   :  { %7704 = vmatpush.msra.mxu1 %v5140_v57  ;;  %v972_v25 = vsel %vm970_vm4, %v13793_v44, %v13790_v22  ;;  %vm13800_vm1 = vcmask 392192   ;;  %v819_v28 = vsel %vm812_vm0, %v815_v45, %v818_v59  ;;  %v13801_v32 = vxor.u32 2147483648, %v12249_v8  ;;  %v13812_v59 = vld [vmem:[#allocation76_spill] sm:$0xff] }
 0x42b   :  { %v1242_v4 = vor.u32 %v1241_v61, %v1240_v55  ;;  %v1245_v3 = vshll.u32 %v1244_v5, 23  ;;  %v973_v13 = vsel %vm966_vm9, %v969_v38, %v972_v25  ;;  %8217 = vmatmul.msk.f32.vlgmr.msrb.gmra.mxu3 %vm13800_vm1, %v7630_v36  ;;  %v13802_v0 = vxor.u32 2147483648, %v12243_v35  ;;  %vm13805_vm4 = vmmov %vm13800_vm1  ;;  %v7627_v61 = vld [vmem:[%s13009_s2 + $0x30] sm:$0xff]  ;;  %v7629_v36 = vld [vmem:[%s13009_s2 + $0x40] sm:$0xff] }
 0x42c   :  { %v974_v30 = vsel %vm13799_vm14, nan, %v973_v13  ;;  %v661_v63 = vsel %vm659_vm12, %v12243_v35, %v13801_v32  ;;  %vm13804_vm9 = vweird.f32 %v13803_v31  ;;  %vm508_vm5 = vcmp.eq.s32.totalorder %v503_v19, 2  ;;  %8197 = vmatmul.msk.f32.gmra.mxu0 %vm13805_vm4, %v7634_v26  ;;  %vm13815_vm4 = vmmov %vm13800_vm1  ;;  %v13816_v32 = vld [vmem:[#allocation52_spill] sm:$0xff]  ;;  %v13819_v31 = vld [vmem:[#allocation46_spill] sm:$0xff] }
 0x42d   :  { %v1246_v10 = vor.u32 4788187, %v1245_v3  ;;  %v1249_v9 = vcvt.s32.f32 %v1242_v4  ;;  %7806 = vmatpush.msrb.mxu0 %v974_v30  ;;  %v664_v15 = vsel %vm662_vm2, %v13802_v0, %v12249_v8  ;;  %v820_v54 = vsel %vm13804_vm9, nan, %v819_v28  ;;  %vm13810_vm9 = vmmov %vm13800_vm1 }
 0x42e   :  { %v665_v12 = vsel %vm658_vm11, %v661_v63, %v664_v15  ;;  %vm504_vm0 = vcmp.lt.s32.totalorder %v503_v19, 2  ;;  %v507_v53 = vsel %vm505_vm6, %v12537_v27, %v506_v50  ;;  %v510_v35 = vsel %vm508_vm5, %v509_v20, %v12547_v6  ;;  %vm13809_vm6 = vmmov %vm13800_vm1  ;;  %v13817_v15 = vld [vmem:[#allocation55_spill] sm:$0xff]  ;;  %v7622_v27 = vld [vmem:[%s13009_s2 + $0x8] sm:$0xff] }
 0x42f   :  { %v1247_v29 = vand.u32 2147483647, %v1246_v10  ;;  %7807 = vmatpush.msrb.mxu0 %v820_v54  ;;  %v666_v57 = vsel %vm656_vm13, nan, %v665_v12  ;;  %v511_v55 = vsel %vm504_vm0, %v507_v53, %v510_v35  ;;  %vm1131_vm12 = vcmp.lt.s32.totalorder %v13771_v18, 0  ;;  %vm13808_vm13 = vmmov %vm13800_vm1  ;;  %v7635_v10 = vld [vmem:[%s13010_s3 + $0x10] sm:$0xff] }
 0x430   :  { %v349_v50 = vand.u32 3, %v12633_v2  ;;  %vm12847_vm2 = vcmp.le.f32.partialorder %v1129_v48, 0.7853982  ;;  %v512_v6 = vsel %vm502_vm15, nan, %v511_v55  ;;  %8214 = vmatmul.msk.f32.vlgmr.msrb.gmra.mxu2 %vm13808_vm13, %v7627_v61  ;;  %v1253_v20 = vsub.s32 4, %v12776_v40  ;;  %v7631_v48 = vld [vmem:[%s13009_s2 + $0x50] sm:$0xff]  ;;  %vm13814_vm5 = vmmov %vm13800_vm1 }
 0x431   :  { %v1250_v56 = vmul.f32 %v1249_v9, %v1247_v29  ;;  %7808 = vmatpush.msrb.mxu0 %v666_v57  ;;  %v2043_v13 = vand.u32 3, %v13812_v59  ;;  %v13813_v29 = vld [vmem:[#allocation71_spill] sm:$0xff]  ;;  %vm1272_vm0 = vweird.f32 %v13771_v18  ;;  %v1735_v63 = vand.u32 3, %v13816_v32  ;;  %v13821_v57 = vld [vmem:[#allocation25_spill] sm:$0xff]  ;;  %v13823_v61 = vld [vmem:[#allocation66_spill] sm:$0xff] }
 0x432   :  { %vm351_vm14 = vcmp.eq.s32.totalorder %v349_v50, 0  ;;  %vm354_vm15 = vcmp.eq.s32.totalorder %v349_v50, 2  ;;  %vm350_vm11 = vcmp.lt.s32.totalorder %v349_v50, 2  ;;  %v1254_v22 = vsel %vm1131_vm12, %v1253_v20, %v12776_v40 }
 0x433   :  { %v1251_v8 = vxor.u32 2147483648, %v1250_v56  ;;  %7809 = vmatpush.msrb.mxu0 %v512_v6  ;;  %v353_v41 = vsel %vm351_vm14, %v12716_v16, %v352_v33  ;;  %8218 = vmatmul.msk.f32.gmra.mxu3 %vm13800_vm1, %v7631_v48  ;;  %v356_v21 = vsel %vm354_vm15, %v355_v47, %v12721_v58  ;;  %v1256_v47 = vsel %vm12847_vm2, 0, %v1254_v22 }
 0x434   :  { %v357_v19 = vsel %vm350_vm11, %v353_v41, %v356_v21  ;;  %8198 = vmatmul.msk.f32.gmra.mxu0 %vm13809_vm6, %v7635_v10  ;;  %v4975_v25 = vadd.s32 3, %v1256_v47  ;;  %v1889_v9 = vand.u32 3, %v13813_v29  ;;  %vm2048_vm13 = vcmp.eq.s32.totalorder %v2043_v13, 2  ;;  %v13825_v41 = vld [vmem:[#allocation95_spill] sm:$0xff]  ;;  %v7638_v29 = vld [vmem:[%s13010_s3 + $0x28] sm:$0xff] }
 0x435   :  { %v1252_v24 = vsel %vm1131_vm12, %v1251_v8, %v1250_v56  ;;  %v358_v33 = vsel %vm348_vm8, nan, %v357_v19  ;;  %vm13811_vm8 = vmmov %vm13800_vm1  ;;  %vm2044_vm12 = vcmp.lt.s32.totalorder %v2043_v13, 2  ;;  %v13818_v56 = vxor.u32 2147483648, %v13817_v15 }
 0x436   :  { %v1255_v2 = vsel %vm12847_vm2, %v13771_v18, %v1252_v24  ;;  %7810 = vmatpush.msrb.mxu0 %v358_v33  ;;  %v4976_v23 = vand.u32 3, %v4975_v25  ;;  %vm2045_vm2 = vcmp.eq.s32.totalorder %v2043_v13, 0  ;;  %vm1891_vm14 = vcmp.eq.s32.totalorder %v1889_v9, 0  ;;  %v7626_v18 = vld [vmem:[%s13009_s2 + $0x28] sm:$0xff] }
 0x437   :  { %v1257_v5 = vmul.f32 %v1255_v2, %v1255_v2  ;;  %v2047_v54 = vsel %vm2045_vm2, %v13819_v31, %v13818_v56  ;;  %vm1894_vm15 = vcmp.eq.s32.totalorder %v1889_v9, 2  ;;  %v1581_v12 = vand.u32 3, %v12318_v51  ;;  %v7636_v51 = vld [vmem:[%s13010_s3 + $0x18] sm:$0xff] }
 0x438   :  { %8215 = vmatmul.msk.f32.gmra.mxu2 %vm13810_vm9, %v7628_v34  ;;  %vm4977_vm1 = vcmp.lt.s32.totalorder %v4976_v23, 2  ;;  %vm4978_vm11 = vcmp.eq.s32.totalorder %v4976_v23, 0  ;;  %vm4981_vm6 = vcmp.eq.s32.totalorder %v4976_v23, 2  ;;  %v13820_v35 = vxor.u32 2147483648, %v13819_v31  ;;  %v7941_v23 = vpop.permute.xlu0 %7940 }
 0x439   :  { %v1258_v4 = vmul.f32 -0.001358992, %v1257_v5  ;;  %v1265_v3 = vmul.f32 -0.00019511016, %v1257_v5  ;;  %v13822_v55 = vxor.u32 2147483648, %v13821_v57  ;;  %vm1737_vm9 = vcmp.eq.s32.totalorder %v1735_v63, 0 }
 0x43a   :  { %v2050_v8 = vsel %vm2048_vm13, %v13820_v35, %v13817_v15  ;;  %v1427_v20 = vand.u32 3, %v12778_v7  ;;  %v13824_v48 = vxor.u32 2147483648, %v13823_v61  ;;  %v13826_v21 = vxor.u32 2147483648, %v13825_v41  ;;  %v13830_v7 = vld [vmem:[#allocation18_spill] sm:$0xff]  ;;  %v7951_v15 = vpop.permute.xlu2 %7950 }
 0x43b   :  { %v1259_v16 = vadd.f32 0.041655596, %v1258_v4  ;;  %v1266_v58 = vadd.f32 0.008332121, %v1265_v3  ;;  %8219 = vmatmul.msk.f32.gmra.mxu3 %vm13811_vm8, %v7632_v14  ;;  %v1893_v50 = vsel %vm1891_vm14, %v13823_v61, %v13822_v55  ;;  %v2051_v6 = vsel %vm2044_vm12, %v2047_v54, %v2050_v8  ;;  %v13827_v4 = vld [vmem:[#allocation91_spill] sm:$0xff] }
 0x43c   :  { %8208 = vmatmul.msk.f32.vlgmr.msrb.gmra.mxu0 %vm13814_vm5, %v7621_v43  ;;  %vm1890_vm8 = vcmp.lt.s32.totalorder %v1889_v9, 2  ;;  %v1739_v3 = vsel %vm1737_vm9, %v13827_v4, %v13826_v21  ;;  %vm1740_vm5 = vcmp.eq.s32.totalorder %v1735_v63, 2  ;;  %v1273_v10 = vand.u32 3, %v1256_v47  ;;  %v13834_v47 = vld [vmem:[#allocation10_spill] sm:$0xff]  ;;  %v7777_v9 = vpop.f32.mrf.mxu3 }
 0x43d   :  { %v1260_v39 = vmul.f32 %v1259_v16, %v1257_v5  ;;  %v1267_v38 = vmul.f32 %v1266_v58, %v1257_v5  ;;  %vm13828_vm12 = vcmask 392192   ;;  %vm13831_vm13 = vweird.f32 %v13830_v7 }
 0x43e   :  { %vm13829_vm2 = vmmov %vm13828_vm12  ;;  %v2052_v22 = vsel %vm13831_vm13, nan, %v2051_v6  ;;  %vm1736_vm14 = vcmp.lt.s32.totalorder %v1735_v63, 2  ;;  %v13832_v33 = vxor.u32 2147483648, %v13827_v4  ;;  %v13833_v16 = vxor.u32 2147483648, %v12407_v49 }
 0x43f   :  { %v1261_v40 = vadd.f32 -0.4999988, %v1260_v39  ;;  %v1268_v44 = vadd.f32 -0.16666654, %v1267_v38  ;;  %v13836_v14 = vxor.u32 2147483648, %v12397_v42  ;;  %vm1432_vm9 = vcmp.eq.s32.totalorder %v1427_v20, 2  ;;  %vm13841_vm13 = vmmov %vm13829_vm2 }
 0x440   :  { %8216 = vmatmul.msk.f32.gmra.mxu2 %vm13815_vm4, %v7629_v36  ;;  %vm1583_vm4 = vcmp.eq.s32.totalorder %v1581_v12, 0  ;;  %v1742_v34 = vsel %vm1740_vm5, %v13832_v33, %v13825_v41  ;;  %vm1428_vm5 = vcmp.lt.s32.totalorder %v1427_v20, 2  ;;  %v1434_v43 = vsel %vm1432_vm9, %v1433_v37, %v12784_v11  ;;  %v12995_v63 = vpop.permute.xlu0 %7955 }
 0x441   :  { %v1262_v62 = vmul.f32 %v1261_v40, %v1257_v5  ;;  %v1269_v1 = vmul.f32 %v1268_v44, %v1257_v5  ;;  %v1896_v5 = vsel %vm1894_vm15, %v13824_v48, %v13821_v57  ;;  %v1585_v58 = vsel %vm1583_vm4, %v12397_v42, %v13833_v16  ;;  %v7623_v42 = vld [vmem:[%s13009_s2 + $0x10] sm:$0xff] }
 0x442   :  { %v1897_v19 = vsel %vm1890_vm8, %v1893_v50, %v1896_v5  ;;  %v1743_v39 = vsel %vm1736_vm14, %v1739_v3, %v1742_v34  ;;  %vm1586_vm15 = vcmp.eq.s32.totalorder %v1581_v12, 2  ;;  %vm1275_vm8 = vcmp.eq.s32.totalorder %v1273_v10, 0 }
 0x443   :  { %v12896_v17 = vadd.f32 1.0, %v1262_v62  ;;  %v1270_v45 = vadd.f32 1.0, %v1269_v1  ;;  %v1588_v40 = vsel %vm1586_vm15, %v13836_v14, %v12407_v49  ;;  %v1744_v1 = vsel %vm1734_vm3, nan, %v1743_v39  ;;  %v7637_v49 = vld [vmem:[%s13010_s3 + $0x20] sm:$0xff] }
 0x444   :  { %8209 = vmatmul.msk.f32.gmra.mxu0 %vm13828_vm12, %v7622_v27  ;;  %vm1278_vm4 = vcmp.eq.s32.totalorder %v1273_v10, 2  ;;  %vm1274_vm3 = vcmp.lt.s32.totalorder %v1273_v10, 2  ;;  %vm13839_vm12 = vmmov %vm13829_vm2  ;;  %v7780_v32 = vpop.f32.mrf.mxu3 }
 0x445   :  { %v12900_v30 = vmul.f32 %v1270_v45, %v1255_v2  ;;  %v1279_v28 = vxor.u32 2147483648, %v12896_v17 }
 0x447   :  { %v1276_v0 = vxor.u32 2147483648, %v12900_v30  ;;  %v4983_v53 = vsel %vm4981_vm6, %v1279_v28, %v12900_v30  ;;  %vm1582_vm6 = vcmp.lt.s32.totalorder %v1581_v12, 2 }
 0x448   :  { %v1589_v25 = vsel %vm1582_vm6, %v1585_v58, %v1588_v40  ;;  %v7971_v12 = vpop.permute.xlu0 %7970 }
 0x449   :  { %v4980_v26 = vsel %vm4978_vm11, %v12896_v17, %v1276_v0  ;;  %vm13835_vm11 = vweird.f32 %v13834_v47  ;;  %v1277_v59 = vsel %vm1275_vm8, %v12896_v17, %v1276_v0  ;;  %v1590_v36 = vsel %vm1580_vm7, nan, %v1589_v25  ;;  %vm13840_vm7 = vmmov %vm13829_vm2  ;;  %v7624_v17 = vld [vmem:[%s13009_s2 + $0x18] sm:$0xff]  ;;  %s8272_s2 = smov [#allocation2]  }
 0x44a   :  { %v4984_v24 = vsel %vm4977_vm1, %v4980_v26, %v4983_v53  ;;  %vm1429_vm1 = vcmp.eq.s32.totalorder %v1427_v20, 0  ;;  %v1898_v38 = vsel %vm13835_vm11, nan, %v1897_v19  ;;  %v12999_v53 = vpop.permute.xlu2 %7965  ;;  %s8038_s3 = sshll.u32 %s8272_s2, 4  ;;  %s8039_s3 = int_to_ptr.vmem [resolvable:$true] %s8038_s3 }
 0x44b   :  { %v4985_v2 = vsel %vm1272_vm0, nan, %v4984_v24  ;;  %v1431_v44 = vsel %vm1429_vm1, %v12782_v52, %v1430_v60  ;;  %v1280_v52 = vsel %vm1278_vm4, %v1279_v28, %v12900_v30  ;;  %v7742_v30 = vpop.f32.mrf.mxu2  ;;  %v7946_v28 = vpop.permute.xlu1 %7945 }
 0x44c   :  { %7705 = vmatpush.msra.mxu1 %v4985_v2  ;;  %v1435_v60 = vsel %vm1428_vm5, %v1431_v44, %v1434_v43  ;;  %v1281_v11 = vsel %vm1274_vm3, %v1277_v59, %v1280_v52  ;;  %8210 = vmatmul.msk.f32.gmra.mxu0 %vm13839_vm12, %v7623_v42  ;;  %v7783_v54 = vpop.f32.mrf.mxu3 }
 0x44d   :  { %8199 = vmatmul.msk.f32.vlgmr.msra.gmra.mxu1 %vm13829_vm2, %v7636_v51  ;;  %v1436_v37 = vsel %vm1426_vm10, nan, %v1435_v60  ;;  %v1282_v45 = vsel %vm1272_vm0, nan, %v1281_v11  ;;  %vm13842_vm10 = vmmov %vm13829_vm2 }
 0x44e   :  { %7840 = vmatpush.msrb.mxu1 %v2052_v22  ;;  %vm13843_vm0 = vmmov %vm13829_vm2 }
 0x450   :  { %7841 = vmatpush.msrb.mxu1 %v1898_v38  ;;  %v7986_v61 = vpop.permute.xlu0 %7985 }
 0x452   :  { %7842 = vmatpush.msrb.mxu1 %v1744_v1  ;;  %v7981_v20 = vpop.permute.xlu2 %7980 }
 0x453   :  { %v7745_v0 = vpop.f32.mrf.mxu2  ;;  %v12997_v31 = vpop.permute.xlu1 %7960 }
 0x454   :  { %7843 = vmatpush.msrb.mxu1 %v1590_v36 }
 0x455   :  { %8200 = vmatmul.msk.f32.gmra.mxu1 %vm13829_vm2, %v7637_v49 }
 0x456   :  { %7844 = vmatpush.msrb.mxu1 %v1436_v37 }
 0x458   :  { %7845 = vmatpush.msrb.mxu1 %v1282_v45 }
 0x45a   :  { %v7996_v58 = vpop.permute.xlu2 %7995 }
 0x45b   :  { %v7976_v8 = vpop.permute.xlu1 %7975 }
 0x45d   :  { %8201 = vmatmul.msk.f32.gmra.mxu1 %vm13840_vm7, %v7638_v29 }
 0x463   :  { %v7991_v41 = vpop.permute.xlu1 %7990 }
 0x465   :  { %8211 = vmatmul.msk.f32.vlgmr.msrb.gmra.mxu1 %vm13841_vm13, %v7624_v17 }
 0x46d   :  { %8212 = vmatmul.msk.f32.gmra.mxu1 %vm13842_vm10, %v7625_v46 }
 0x475   :  { %8213 = vmatmul.msk.f32.gmra.mxu1 %vm13843_vm0, %v7626_v18 }
 0x48d   :  { %v7672_v56 = vpop.f32.mrf.mxu0 }
 0x48f   :  { %v7748_v26 = vpop.f32.mrf.mxu2 }
 0x4a9   :  { %v7675_v35 = vpop.f32.mrf.mxu0 }
 0x4ae   :  { %v7917_v57 = vpop.f32.mrf.mxu3 }
 0x4af   :  { %v7918_v55 = vadd.f32 %v7917_v57, %v7777_v9 }
 0x4b1   :  { %v8007_v50 = vadd.f32 %v7986_v61, %v7918_v55  ;;  %v7678_v6 = vpop.f32.mrf.mxu0 }
 0x4b3   :  { %v8019_v27 = vmax.f32 %v8007_v50, 0.0  ;;  %v7882_v24 = vpop.f32.mrf.mxu2 }
 0x4b4   :  { %v7883_v51 = vadd.f32 %v7882_v24, %v7742_v30 }
 0x4b5   :  { %8031 = vst [vmem:[#allocation2 + $0x48] sm:$0xff] %v8019_v27 }
 0x4b6   :  { %v7920_v2 = vpop.f32.mrf.mxu3  ;;  %v8004_v48 = vadd.f32 %v7971_v12, %v7883_v51 }
 0x4b7   :  { %v7921_v5 = vadd.f32 %v7920_v2, %v7780_v32 }
 0x4b8   :  { %v8016_v21 = vmax.f32 %v8004_v48, 0.0 }
 0x4b9   :  { %v8008_v4 = vadd.f32 %v7991_v41, %v7921_v5  ;;  %v7812_v7 = vpop.f32.mrf.mxu0 }
 0x4ba   :  { %8028 = vst [vmem:[#allocation2 + $0x30] sm:$0xff] %v8016_v21  ;;  %v7813_v22 = vadd.f32 %v7812_v7, %v7672_v56 }
 0x4bb   :  { %v8020_v3 = vmax.f32 %v8008_v4, 0.0  ;;  %v7885_v19 = vpop.f32.mrf.mxu2 }
 0x4bc   :  { %v7886_v10 = vadd.f32 %v7885_v19, %v7745_v0  ;;  %v7998_v39 = vadd.f32 %v7941_v23, %v7813_v22 }
 0x4bd   :  { %8032 = vst [vmem:[#allocation2 + $0x50] sm:$0xff] %v8020_v3 }
 0x4be   :  { %v7923_v33 = vpop.f32.mrf.mxu3  ;;  %v8005_v34 = vadd.f32 %v7976_v8, %v7886_v10  ;;  %v8010_v14 = vmax.f32 %v7998_v39, 0.0 }
 0x4bf   :  { %v7924_v16 = vadd.f32 %v7923_v33, %v7783_v54 }
 0x4c0   :  { %v8017_v47 = vmax.f32 %v8005_v34, 0.0  ;;  %8022 = vst [vmem:[#allocation2] sm:$0xff] %v8010_v14 }
 0x4c1   :  { %v8009_v38 = vadd.f32 %v7996_v58, %v7924_v16  ;;  %v7815_v25 = vpop.f32.mrf.mxu0 }
 0x4c2   :  { %8029 = vst [vmem:[#allocation2 + $0x38] sm:$0xff] %v8017_v47  ;;  %v7816_v43 = vadd.f32 %v7815_v25, %v7675_v35 }
 0x4c3   :  { %v8021_v40 = vmax.f32 %v8009_v38, 0.0  ;;  %v7888_v44 = vpop.f32.mrf.mxu2 }
 0x4c4   :  { %v7889_v1 = vadd.f32 %v7888_v44, %v7748_v26  ;;  %v7999_v42 = vadd.f32 %v7946_v28, %v7816_v43 }
 0x4c5   :  { %8033 = vst [vmem:[#allocation2 + $0x58] sm:$0xff] %v8021_v40 }
 0x4c6   :  { %v8006_v59 = vadd.f32 %v7981_v20, %v7889_v1  ;;  %v8011_v60 = vmax.f32 %v7999_v42, 0.0 }
 0x4c8   :  { %v8018_v49 = vmax.f32 %v8006_v59, 0.0  ;;  %8023 = vst [vmem:[#allocation2 + $0x8] sm:$0xff] %v8011_v60 }
 0x4c9   :  { %v7818_v13 = vpop.f32.mrf.mxu0 }
 0x4ca   :  { %v7707_v62 = vpop.f32.mrf.mxu1  ;;  %8030 = vst [vmem:[#allocation2 + $0x40] sm:$0xff] %v8018_v49  ;;  %v7819_v52 = vadd.f32 %v7818_v13, %v7678_v6 }
 0x4cc   :  { %v8000_v11 = vadd.f32 %v7951_v15, %v7819_v52 }
 0x4ce   :  { %v8012_v37 = vmax.f32 %v8000_v11, 0.0 }
 0x4d0   :  { %8024 = vst [vmem:[#allocation2 + $0x10] sm:$0xff] %v8012_v37 }
 0x4d2   :  { %v7710_v36 = vpop.f32.mrf.mxu1 }
 0x4da   :  { %v7713_v45 = vpop.f32.mrf.mxu1 }
 0x4e2   :  { %v7847_v29 = vpop.f32.mrf.mxu1 }
 0x4e3   :  { %v7848_v17 = vadd.f32 %v7847_v29, %v7707_v62 }
 0x4e5   :  { %v8001_v46 = vadd.f32 %v12995_v63, %v7848_v17 }
 0x4e7   :  { %v8013_v18 = vmax.f32 %v8001_v46, 0.0 }
 0x4e9   :  { %8025 = vst [vmem:[#allocation2 + $0x18] sm:$0xff] %v8013_v18 }
 0x4ea   :  { %v7850_v9 = vpop.f32.mrf.mxu1 }
 0x4eb   :  { %v7851_v23 = vadd.f32 %v7850_v9, %v7710_v36 }
 0x4ed   :  { %v8002_v30 = vadd.f32 %v12997_v31, %v7851_v23 }
 0x4ef   :  { %v8014_v28 = vmax.f32 %v8002_v30, 0.0 }
 0x4f1   :  { %8026 = vst [vmem:[#allocation2 + $0x20] sm:$0xff] %v8014_v28 }
 0x4f2   :  { %v7853_v32 = vpop.f32.mrf.mxu1 }
 0x4f3   :  { %v7854_v0 = vadd.f32 %v7853_v32, %v7713_v45 }
 0x4f5   :  { %v8003_v15 = vadd.f32 %v12999_v53, %v7854_v0 }
 0x4f7   :  { %v8015_v63 = vmax.f32 %v8003_v15, 0.0 }
 0x4f9   :  { %8027 = vst [vmem:[#allocation2 + $0x28] sm:$0xff] %v8015_v63 }
 0x4fa   :  { %8046 = dma.vmem_to_hbm [thread:$0]  %s8039_s3, 1536, %s8041_s19, [#allocation3], %s8273_s20, %s8273_s20, %s8274_s21  }
 0x4fb   :  { %8263 = dma.done.wait [#allocation3], 1536  }
 0x4fc   :  { %8264 = vsyncadd [#allocation3], 4294965760 }
 0x4fd   :  { %8051 = vsyncpa [#allocation3], 1 }

</bundles_post_ra>
